<compile_context>
chip_gen: v7x
topology: tpu7x:2x2x1
jax: 0.10.0
libtpu: 0.0.40
codegen_flags: <defaults>
</compile_context>

<pallas_src>
import functools
import math

import jax
import jax.numpy as jnp
from jax.experimental import pallas as pl
from jax.experimental.pallas import tpu as pltpu


def _msb_kernel(x_ref, w3_ref, w11_ref, w33b_ref, b13a_ref, bias_ref, o_ref,
                xpad_ref, tpad_ref, *, H, W, Cin):
    """Fused MSB forward for one batch element.

    x_ref:    (1, H, W, Cin)   f32   input tile
    w3_ref:   (9*Cin, 256)     bf16  conv3x3 weights, (kh, kw, cin) flattened
    w11_ref:  (Cin, 768)       bf16  merged [conv1_3[0] | conv1x1] weights
    w33b_ref: (9*256, 256)     bf16  conv1_3[1] weights, (kh, kw, cin) flat
    b13a_ref: (1, 256)         f32   conv1_3[0] bias (applied to t)
    bias_ref: (1, 1024)        f32   [b3x3 | b13b | b1x1] fused output bias
    o_ref:    (1, H, W, 1024)  f32   relu(concat(x1, x2, x3))
    xpad_ref: (H+2, W+2, Cin)  bf16  VMEM scratch: zero-padded x
    tpad_ref: (H+2, W+2, 256)  bf16  VMEM scratch: zero-padded t
    """
    f32 = jnp.float32
    bf16 = jnp.bfloat16
    HW = H * W

    x = x_ref[0]                                            # (H, W, Cin) f32

    # ---- merged 1x1 convs: one K=Cin matmul -> [t_pre (256) | x3_pre (512)].
    x_flat = x.reshape(HW, Cin).astype(bf16)
    y11 = jnp.dot(x_flat, w11_ref[...],
                  preferred_element_type=f32)               # (HW, 768)

    # ---- stage zero-padded x and t in VMEM (padding done in-kernel). -------
    xpad_ref[...] = jnp.zeros_like(xpad_ref)
    xpad_ref[1:H + 1, 1:W + 1, :] = x.astype(bf16)

    t = (y11[:, 0:256] + b13a_ref[...]).astype(bf16)        # conv1_3[0] output
    tpad_ref[...] = jnp.zeros_like(tpad_ref)
    tpad_ref[1:H + 1, 1:W + 1, :] = t.reshape(H, W, 256)

    # ---- channel-wise im2col of the 9 shifted windows, one matmul per conv.
    xcols = jnp.concatenate(
        [xpad_ref[kh:kh + H, kw:kw + W, :].reshape(HW, Cin)
         for kh in range(3) for kw in range(3)], axis=-1)   # (HW, 9*Cin)
    tcols = jnp.concatenate(
        [tpad_ref[kh:kh + H, kw:kw + W, :].reshape(HW, 256)
         for kh in range(3) for kw in range(3)], axis=-1)   # (HW, 2304)

    x1 = jnp.dot(xcols, w3_ref[...], preferred_element_type=f32)    # (HW, 256)
    x2 = jnp.dot(tcols, w33b_ref[...], preferred_element_type=f32)  # (HW, 256)

    # ---- concat (aligned channel slices), bias, fused ReLU, 1024-lane store.
    out = jnp.concatenate([x1, x2, y11[:, 256:768]], axis=-1) + bias_ref[...]
    o_ref[...] = jnp.maximum(out, 0.0).reshape(1, H, W, 1024)


@jax.jit
def msb_forward(x_nchw, params):
    """MSB.forward. Input NCHW (PyTorch convention), output NCHW (N,1024,H,W)."""
    x = jnp.transpose(x_nchw, (0, 2, 3, 1)).astype(jnp.float32)     # -> NHWC
    N, H, W, Cin = x.shape

    # Weight prep (tiny, folded into this jit): bf16 MXU operands, merged 1x1
    # weights, (kh, kw, cin)-flattened im2col layouts, fused output bias.
    w3 = params["w3x3"].reshape(9 * Cin, 256).astype(jnp.bfloat16)
    w33b = params["w13b"].reshape(9 * 256, 256).astype(jnp.bfloat16)
    w11 = jnp.concatenate(
        [params["w13a"][0, 0], params["w1x1"][0, 0]], axis=-1
    ).astype(jnp.bfloat16)                                          # (Cin, 768)
    b13a = params["b13a"].reshape(1, 256).astype(jnp.float32)
    bias = jnp.concatenate(
        [params["b3x3"], params["b13b"], params["b1x1"]]
    ).reshape(1, 1024).astype(jnp.float32)

    kernel = functools.partial(_msb_kernel, H=H, W=W, Cin=Cin)
    out_nhwc = pl.pallas_call(
        kernel,
        out_shape=jax.ShapeDtypeStruct((N, H, W, 1024), jnp.float32),
        grid_spec=pltpu.PrefetchScalarGridSpec(
            num_scalar_prefetch=0,
            grid=(N,),
            in_specs=[
                pl.BlockSpec((1, H, W, Cin), lambda n: (n, 0, 0, 0)),
                pl.BlockSpec((9 * Cin, 256), lambda n: (0, 0)),
                pl.BlockSpec((Cin, 768), lambda n: (0, 0)),
                pl.BlockSpec((9 * 256, 256), lambda n: (0, 0)),
                pl.BlockSpec((1, 256), lambda n: (0, 0)),
                pl.BlockSpec((1, 1024), lambda n: (0, 0)),
            ],
            out_specs=pl.BlockSpec((1, H, W, 1024), lambda n: (n, 0, 0, 0)),
            scratch_shapes=[
                pltpu.VMEM((H + 2, W + 2, Cin), jnp.bfloat16),
                pltpu.VMEM((H + 2, W + 2, 256), jnp.bfloat16),
            ],
        ),
        compiler_params=pltpu.CompilerParams(
            dimension_semantics=("parallel",),
            vmem_limit_bytes=32 * 1024 * 1024,
        ),
    )(x, w3, w11, w33b, b13a, bias)
    # TODO(synk): for large H/W, add halo'd row-band spatial tiling (second
    # "parallel" grid axis) so per-block VMEM stays within v7x's 64 MiB.
    return jnp.transpose(out_nhwc, (0, 3, 1, 2))                    # -> NCHW


def init_msb_params(key, inchannel):
    """Deterministic init mirroring MSB.__init__ shapes.

    Weights ~ N(0, sqrt(2 / (k*k*out_channels))) (as in the module),
    biases ~ U(-1/sqrt(fan_in), 1/sqrt(fan_in)) (PyTorch Conv2d default).
    Weight layout is HWIO: (KH, KW, Cin, Cout).
    """
    def mk(key, kh, kw, cin, cout):
        kw_key, kb_key = jax.random.split(key)
        n = kh * kw * cout
        w = jax.random.normal(kw_key, (kh, kw, cin, cout),
                              jnp.float32) * math.sqrt(2.0 / n)
        fan_in = kh * kw * cin
        bound = 1.0 / math.sqrt(fan_in)
        b = jax.random.uniform(kb_key, (cout,), jnp.float32, -bound, bound)
        return w, b

    k0, k1, k2, k3 = jax.random.split(key, 4)
    p = {}
    p["w3x3"], p["b3x3"] = mk(k0, 3, 3, inchannel, 256)      # conv3x3
    p["w1x1"], p["b1x1"] = mk(k1, 1, 1, inchannel, 512)      # conv1x1
    p["w13a"], p["b13a"] = mk(k2, 1, 1, inchannel, 256)      # conv1_3[0]
    p["w13b"], p["b13b"] = mk(k3, 3, 3, 256, 256)            # conv1_3[1]
    return p


def msb_reference(x_nchw, params):
    """Pure-JAX f32 reference (XLA convs), matching the torch module."""
    x = jnp.transpose(x_nchw, (0, 2, 3, 1)).astype(jnp.float32)

    def conv(inp, w, b, pad):
        y = jax.lax.conv_general_dilated(
            inp, w, window_strides=(1, 1),
            padding=((pad, pad), (pad, pad)),
            dimension_numbers=("NHWC", "HWIO", "NHWC"))
        return y + b.reshape(1, 1, 1, -1)

    x1 = conv(x, params["w3x3"], params["b3x3"], 1)
    x2 = conv(conv(x, params["w13a"], params["b13a"], 0),
              params["w13b"], params["b13b"], 1)
    x3 = conv(x, params["w1x1"], params["b1x1"], 0)
    out = jnp.maximum(jnp.concatenate([x1, x2, x3], axis=-1), 0.0)
    return jnp.transpose(out, (0, 3, 1, 2))


if __name__ == "__main__":
    key = jax.random.PRNGKey(0)
    pkey, xkey = jax.random.split(key)

    batch, inchannel, spatial = 2, 4, 16
    params = init_msb_params(pkey, inchannel)
    x = jax.random.normal(xkey, (batch, inchannel, spatial, spatial),
                          jnp.float32)

    out = jax.block_until_ready(msb_forward(x, params))

    assert out.shape == (batch, 256 + 256 + 512, spatial, spatial), out.shape
    assert out.dtype == jnp.float32
    assert bool(jnp.all(out >= 0.0))  # ReLU applied

    ref = jax.block_until_ready(msb_reference(x, params))
    max_err = float(jnp.max(jnp.abs(out - ref)))
    assert bool(jnp.allclose(out, ref, rtol=5e-2, atol=5e-2)), max_err

    print("KERNEL_OK")
</pallas_src>

<mosaic_0001>
module attributes {stable_mosaic.version = 11 : i64} {
  func.func @_msb_kernel(%arg0: i32, %arg1: memref<1x16x16x4xf32, #tpu.memory_space<vmem>>, %arg2: memref<36x256xbf16, #tpu.memory_space<vmem>>, %arg3: memref<4x768xbf16, #tpu.memory_space<vmem>>, %arg4: memref<2304x256xbf16, #tpu.memory_space<vmem>>, %arg5: memref<1x256xf32, #tpu.memory_space<vmem>>, %arg6: memref<1x1024xf32, #tpu.memory_space<vmem>>, %arg7: memref<1x16x16x1024xf32, #tpu.memory_space<vmem>>, %arg8: memref<18x18x4xbf16, #tpu.memory_space<vmem>>, %arg9: memref<18x18x256xbf16, #tpu.memory_space<vmem>>) attributes {dimension_semantics = [#tpu.dimension_semantics<parallel>], iteration_bounds = array<i64: 2>, scalar_prefetch = 0 : i64, scratch_operands = 2 : i64, tpu.core_type = #tpu.core_type<tc>, window_params = [{transform_indices = @transform_0, window_bounds = array<i64: 1, 16, 16, 4>}, {pipeline_mode = #tpu.pipeline_mode<synchronous>, transform_indices = @transform_1, window_bounds = array<i64: 36, 256>}, {pipeline_mode = #tpu.pipeline_mode<synchronous>, transform_indices = @transform_2, window_bounds = array<i64: 4, 768>}, {pipeline_mode = #tpu.pipeline_mode<synchronous>, transform_indices = @transform_3, window_bounds = array<i64: 2304, 256>}, {pipeline_mode = #tpu.pipeline_mode<synchronous>, transform_indices = @transform_4, window_bounds = array<i64: 1, 256>}, {pipeline_mode = #tpu.pipeline_mode<synchronous>, transform_indices = @transform_5, window_bounds = array<i64: 1, 1024>}, {transform_indices = @transform_6, window_bounds = array<i64: 1, 16, 16, 1024>}]} {
    %c0 = arith.constant 0 : index
    %c0_0 = arith.constant 0 : index
    %c0_1 = arith.constant 0 : index
    %c0_2 = arith.constant 0 : index
    %0 = vector.load %arg1[%c0, %c0_0, %c0_1, %c0_2] : memref<1x16x16x4xf32, #tpu.memory_space<vmem>>, vector<1x16x16x4xf32>
    %1 = vector.shape_cast %0 : vector<1x16x16x4xf32> to vector<16x16x4xf32>
    %2 = vector.shape_cast %1 : vector<16x16x4xf32> to vector<256x4xf32>
    %3 = arith.truncf %2 : vector<256x4xf32> to vector<256x4xbf16>
    %c0_3 = arith.constant 0 : index
    %c0_4 = arith.constant 0 : index
    %4 = vector.load %arg3[%c0_3, %c0_4] : memref<4x768xbf16, #tpu.memory_space<vmem>>, vector<4x768xbf16>
    %cst = arith.constant dense<0.000000e+00> : vector<256x768xf32>
    %5 = tpu.matmul %3, %4, %cst {dimension_numbers = #tpu.dot_dimension_numbers<[1], [0], [0], [1], [0, 0, 1, 1], [], []>} : vector<256x4xbf16>, vector<4x768xbf16>, vector<256x768xf32> -> vector<256x768xf32>
    %cst_5 = arith.constant 0.000000e+00 : bf16
    %6 = vector.broadcast %cst_5 : bf16 to vector<18x18x4xbf16>
    %c0_6 = arith.constant 0 : index
    %c0_7 = arith.constant 0 : index
    %c0_8 = arith.constant 0 : index
    %7 = vector.load %arg8[%c0_6, %c0_7, %c0_8] : memref<18x18x4xbf16, #tpu.memory_space<vmem>>, vector<18x18x4xbf16>
    tpu.vector_store %arg8[%c0_6, %c0_7, %c0_8], %6 {strides = array<i32>} : memref<18x18x4xbf16, #tpu.memory_space<vmem>>, vector<18x18x4xbf16>,
    %8 = arith.truncf %1 : vector<16x16x4xf32> to vector<16x16x4xbf16>
    %c1 = arith.constant 1 : index
    %c1_9 = arith.constant 1 : index
    %c0_10 = arith.constant 0 : index
    %9 = vector.load %arg8[%c1, %c1_9, %c0_10] : memref<18x18x4xbf16, #tpu.memory_space<vmem>>, vector<16x16x4xbf16>
    tpu.vector_store %arg8[%c1, %c1_9, %c0_10], %8 {strides = array<i32>} : memref<18x18x4xbf16, #tpu.memory_space<vmem>>, vector<16x16x4xbf16>,
    %10 = vector.extract_strided_slice %5 {offsets = [0, 0], sizes = [256, 256], strides = [1, 1]} : vector<256x768xf32> to vector<256x256xf32>
    %c0_11 = arith.constant 0 : index
    %c0_12 = arith.constant 0 : index
    %11 = vector.load %arg5[%c0_11, %c0_12] : memref<1x256xf32, #tpu.memory_space<vmem>>, vector<1x256xf32>
    %12 = vector.broadcast %11 : vector<1x256xf32> to vector<256x256xf32>
    %13 = arith.addf %10, %12 : vector<256x256xf32>
    %14 = arith.truncf %13 : vector<256x256xf32> to vector<256x256xbf16>
    %cst_13 = arith.constant 0.000000e+00 : bf16
    %15 = vector.broadcast %cst_13 : bf16 to vector<18x18x256xbf16>
    %c0_14 = arith.constant 0 : index
    %c0_15 = arith.constant 0 : index
    %c0_16 = arith.constant 0 : index
    %16 = vector.load %arg9[%c0_14, %c0_15, %c0_16] : memref<18x18x256xbf16, #tpu.memory_space<vmem>>, vector<18x18x256xbf16>
    tpu.vector_store %arg9[%c0_14, %c0_15, %c0_16], %15 {strides = array<i32>} : memref<18x18x256xbf16, #tpu.memory_space<vmem>>, vector<18x18x256xbf16>,
    %17 = vector.shape_cast %14 : vector<256x256xbf16> to vector<16x16x256xbf16>
    %c1_17 = arith.constant 1 : index
    %c1_18 = arith.constant 1 : index
    %c0_19 = arith.constant 0 : index
    %18 = vector.load %arg9[%c1_17, %c1_18, %c0_19] : memref<18x18x256xbf16, #tpu.memory_space<vmem>>, vector<16x16x256xbf16>
    tpu.vector_store %arg9[%c1_17, %c1_18, %c0_19], %17 {strides = array<i32>} : memref<18x18x256xbf16, #tpu.memory_space<vmem>>, vector<16x16x256xbf16>,
    %c0_20 = arith.constant 0 : index
    %c0_21 = arith.constant 0 : index
    %c0_22 = arith.constant 0 : index
    %19 = vector.load %arg8[%c0_20, %c0_21, %c0_22] : memref<18x18x4xbf16, #tpu.memory_space<vmem>>, vector<16x16x4xbf16>
    %20 = vector.shape_cast %19 : vector<16x16x4xbf16> to vector<256x4xbf16>
    %c0_23 = arith.constant 0 : index
    %c1_24 = arith.constant 1 : index
    %c0_25 = arith.constant 0 : index
    %21 = vector.load %arg8[%c0_23, %c1_24, %c0_25] : memref<18x18x4xbf16, #tpu.memory_space<vmem>>, vector<16x16x4xbf16>
    %22 = vector.shape_cast %21 : vector<16x16x4xbf16> to vector<256x4xbf16>
    %c0_26 = arith.constant 0 : index
    %c2 = arith.constant 2 : index
    %c0_27 = arith.constant 0 : index
    %23 = vector.load %arg8[%c0_26, %c2, %c0_27] : memref<18x18x4xbf16, #tpu.memory_space<vmem>>, vector<16x16x4xbf16>
    %24 = vector.shape_cast %23 : vector<16x16x4xbf16> to vector<256x4xbf16>
    %c1_28 = arith.constant 1 : index
    %c0_29 = arith.constant 0 : index
    %c0_30 = arith.constant 0 : index
    %25 = vector.load %arg8[%c1_28, %c0_29, %c0_30] : memref<18x18x4xbf16, #tpu.memory_space<vmem>>, vector<16x16x4xbf16>
    %26 = vector.shape_cast %25 : vector<16x16x4xbf16> to vector<256x4xbf16>
    %c1_31 = arith.constant 1 : index
    %c1_32 = arith.constant 1 : index
    %c0_33 = arith.constant 0 : index
    %27 = vector.load %arg8[%c1_31, %c1_32, %c0_33] : memref<18x18x4xbf16, #tpu.memory_space<vmem>>, vector<16x16x4xbf16>
    %28 = vector.shape_cast %27 : vector<16x16x4xbf16> to vector<256x4xbf16>
    %c1_34 = arith.constant 1 : index
    %c2_35 = arith.constant 2 : index
    %c0_36 = arith.constant 0 : index
    %29 = vector.load %arg8[%c1_34, %c2_35, %c0_36] : memref<18x18x4xbf16, #tpu.memory_space<vmem>>, vector<16x16x4xbf16>
    %30 = vector.shape_cast %29 : vector<16x16x4xbf16> to vector<256x4xbf16>
    %c2_37 = arith.constant 2 : index
    %c0_38 = arith.constant 0 : index
    %c0_39 = arith.constant 0 : index
    %31 = vector.load %arg8[%c2_37, %c0_38, %c0_39] : memref<18x18x4xbf16, #tpu.memory_space<vmem>>, vector<16x16x4xbf16>
    %32 = vector.shape_cast %31 : vector<16x16x4xbf16> to vector<256x4xbf16>
    %c2_40 = arith.constant 2 : index
    %c1_41 = arith.constant 1 : index
    %c0_42 = arith.constant 0 : index
    %33 = vector.load %arg8[%c2_40, %c1_41, %c0_42] : memref<18x18x4xbf16, #tpu.memory_space<vmem>>, vector<16x16x4xbf16>
    %34 = vector.shape_cast %33 : vector<16x16x4xbf16> to vector<256x4xbf16>
    %c2_43 = arith.constant 2 : index
    %c2_44 = arith.constant 2 : index
    %c0_45 = arith.constant 0 : index
    %35 = vector.load %arg8[%c2_43, %c2_44, %c0_45] : memref<18x18x4xbf16, #tpu.memory_space<vmem>>, vector<16x16x4xbf16>
    %36 = vector.shape_cast %35 : vector<16x16x4xbf16> to vector<256x4xbf16>
    %37 = tpu.concatenate %20, %22, %24, %26, %28, %30, %32, %34, %36 in 1 : vector<256x4xbf16>, vector<256x4xbf16>, vector<256x4xbf16>, vector<256x4xbf16>, vector<256x4xbf16>, vector<256x4xbf16>, vector<256x4xbf16>, vector<256x4xbf16>, vector<256x4xbf16> -> vector<256x36xbf16>
    %c0_46 = arith.constant 0 : index
    %c0_47 = arith.constant 0 : index
    %c0_48 = arith.constant 0 : index
    %38 = vector.load %arg9[%c0_46, %c0_47, %c0_48] : memref<18x18x256xbf16, #tpu.memory_space<vmem>>, vector<16x16x256xbf16>
    %39 = vector.shape_cast %38 : vector<16x16x256xbf16> to vector<256x256xbf16>
    %c0_49 = arith.constant 0 : index
    %c1_50 = arith.constant 1 : index
    %c0_51 = arith.constant 0 : index
    %40 = vector.load %arg9[%c0_49, %c1_50, %c0_51] : memref<18x18x256xbf16, #tpu.memory_space<vmem>>, vector<16x16x256xbf16>
    %41 = vector.shape_cast %40 : vector<16x16x256xbf16> to vector<256x256xbf16>
    %c0_52 = arith.constant 0 : index
    %c2_53 = arith.constant 2 : index
    %c0_54 = arith.constant 0 : index
    %42 = vector.load %arg9[%c0_52, %c2_53, %c0_54] : memref<18x18x256xbf16, #tpu.memory_space<vmem>>, vector<16x16x256xbf16>
    %43 = vector.shape_cast %42 : vector<16x16x256xbf16> to vector<256x256xbf16>
    %c1_55 = arith.constant 1 : index
    %c0_56 = arith.constant 0 : index
    %c0_57 = arith.constant 0 : index
    %44 = vector.load %arg9[%c1_55, %c0_56, %c0_57] : memref<18x18x256xbf16, #tpu.memory_space<vmem>>, vector<16x16x256xbf16>
    %45 = vector.shape_cast %44 : vector<16x16x256xbf16> to vector<256x256xbf16>
    %c1_58 = arith.constant 1 : index
    %c1_59 = arith.constant 1 : index
    %c0_60 = arith.constant 0 : index
    %46 = vector.load %arg9[%c1_58, %c1_59, %c0_60] : memref<18x18x256xbf16, #tpu.memory_space<vmem>>, vector<16x16x256xbf16>
    %47 = vector.shape_cast %46 : vector<16x16x256xbf16> to vector<256x256xbf16>
    %c1_61 = arith.constant 1 : index
    %c2_62 = arith.constant 2 : index
    %c0_63 = arith.constant 0 : index
    %48 = vector.load %arg9[%c1_61, %c2_62, %c0_63] : memref<18x18x256xbf16, #tpu.memory_space<vmem>>, vector<16x16x256xbf16>
    %49 = vector.shape_cast %48 : vector<16x16x256xbf16> to vector<256x256xbf16>
    %c2_64 = arith.constant 2 : index
    %c0_65 = arith.constant 0 : index
    %c0_66 = arith.constant 0 : index
    %50 = vector.load %arg9[%c2_64, %c0_65, %c0_66] : memref<18x18x256xbf16, #tpu.memory_space<vmem>>, vector<16x16x256xbf16>
    %51 = vector.shape_cast %50 : vector<16x16x256xbf16> to vector<256x256xbf16>
    %c2_67 = arith.constant 2 : index
    %c1_68 = arith.constant 1 : index
    %c0_69 = arith.constant 0 : index
    %52 = vector.load %arg9[%c2_67, %c1_68, %c0_69] : memref<18x18x256xbf16, #tpu.memory_space<vmem>>, vector<16x16x256xbf16>
    %53 = vector.shape_cast %52 : vector<16x16x256xbf16> to vector<256x256xbf16>
    %c2_70 = arith.constant 2 : index
    %c2_71 = arith.constant 2 : index
    %c0_72 = arith.constant 0 : index
    %54 = vector.load %arg9[%c2_70, %c2_71, %c0_72] : memref<18x18x256xbf16, #tpu.memory_space<vmem>>, vector<16x16x256xbf16>
    %55 = vector.shape_cast %54 : vector<16x16x256xbf16> to vector<256x256xbf16>
    %56 = tpu.concatenate %39, %41, %43, %45, %47, %49, %51, %53, %55 in 1 : vector<256x256xbf16>, vector<256x256xbf16>, vector<256x256xbf16>, vector<256x256xbf16>, vector<256x256xbf16>, vector<256x256xbf16>, vector<256x256xbf16>, vector<256x256xbf16>, vector<256x256xbf16> -> vector<256x2304xbf16>
    %c0_73 = arith.constant 0 : index
    %c0_74 = arith.constant 0 : index
    %57 = vector.load %arg2[%c0_73, %c0_74] : memref<36x256xbf16, #tpu.memory_space<vmem>>, vector<36x256xbf16>
    %cst_75 = arith.constant dense<0.000000e+00> : vector<256x256xf32>
    %58 = tpu.matmul %37, %57, %cst_75 {dimension_numbers = #tpu.dot_dimension_numbers<[1], [0], [0], [1], [0, 0, 1, 1], [], []>} : vector<256x36xbf16>, vector<36x256xbf16>, vector<256x256xf32> -> vector<256x256xf32>
    %c0_76 = arith.constant 0 : index
    %c0_77 = arith.constant 0 : index
    %59 = vector.load %arg4[%c0_76, %c0_77] : memref<2304x256xbf16, #tpu.memory_space<vmem>>, vector<2304x256xbf16>
    %cst_78 = arith.constant dense<0.000000e+00> : vector<256x256xf32>
    %60 = tpu.matmul %56, %59, %cst_78 {dimension_numbers = #tpu.dot_dimension_numbers<[1], [0], [0], [1], [0, 0, 1, 1], [], []>} : vector<256x2304xbf16>, vector<2304x256xbf16>, vector<256x256xf32> -> vector<256x256xf32>
    %61 = vector.extract_strided_slice %5 {offsets = [0, 256], sizes = [256, 512], strides = [1, 1]} : vector<256x768xf32> to vector<256x512xf32>
    %62 = tpu.concatenate %58, %60, %61 in 1 : vector<256x256xf32>, vector<256x256xf32>, vector<256x512xf32> -> vector<256x1024xf32>
    %c0_79 = arith.constant 0 : index
    %c0_80 = arith.constant 0 : index
    %63 = vector.load %arg6[%c0_79, %c0_80] : memref<1x1024xf32, #tpu.memory_space<vmem>>, vector<1x1024xf32>
    %64 = vector.broadcast %63 : vector<1x1024xf32> to vector<256x1024xf32>
    %65 = arith.addf %62, %64 : vector<256x1024xf32>
    %cst_81 = arith.constant 0.000000e+00 : f32
    %66 = vector.broadcast %cst_81 : f32 to vector<256x1024xf32>
    %67 = arith.maximumf %65, %66 : vector<256x1024xf32>
    %68 = vector.shape_cast %67 : vector<256x1024xf32> to vector<1x16x16x1024xf32>
    %c0_82 = arith.constant 0 : index
    %c0_83 = arith.constant 0 : index
    %c0_84 = arith.constant 0 : index
    %c0_85 = arith.constant 0 : index
    %69 = vector.load %arg7[%c0_82, %c0_83, %c0_84, %c0_85] : memref<1x16x16x1024xf32, #tpu.memory_space<vmem>>, vector<1x16x16x1024xf32>
    tpu.vector_store %arg7[%c0_82, %c0_83, %c0_84, %c0_85], %68 {strides = array<i32>} : memref<1x16x16x1024xf32, #tpu.memory_space<vmem>>, vector<1x16x16x1024xf32>,
    return
  }
  func.func @transform_0(%arg0: i32) -> (i32, i32, i32, i32) {
    %c0_i32 = arith.constant 0 : i32
    %c0_i32_0 = arith.constant 0 : i32
    %c0_i32_1 = arith.constant 0 : i32
    %c0_i32_2 = arith.constant 0 : i32
    return %arg0, %c0_i32, %c0_i32_0, %c0_i32_1 : i32, i32, i32, i32
  }
  func.func @transform_1(%arg0: i32) -> (i32, i32) {
    %c0_i32 = arith.constant 0 : i32
    %c0_i32_0 = arith.constant 0 : i32
    %c0_i32_1 = arith.constant 0 : i32
    return %c0_i32, %c0_i32_0 : i32, i32
  }
  func.func @transform_2(%arg0: i32) -> (i32, i32) {
    %c0_i32 = arith.constant 0 : i32
    %c0_i32_0 = arith.constant 0 : i32
    %c0_i32_1 = arith.constant 0 : i32
    return %c0_i32, %c0_i32_0 : i32, i32
  }
  func.func @transform_3(%arg0: i32) -> (i32, i32) {
    %c0_i32 = arith.constant 0 : i32
    %c0_i32_0 = arith.constant 0 : i32
    %c0_i32_1 = arith.constant 0 : i32
    return %c0_i32, %c0_i32_0 : i32, i32
  }
  func.func @transform_4(%arg0: i32) -> (i32, i32) {
    %c0_i32 = arith.constant 0 : i32
    %c0_i32_0 = arith.constant 0 : i32
    %c0_i32_1 = arith.constant 0 : i32
    return %c0_i32, %c0_i32_0 : i32, i32
  }
  func.func @transform_5(%arg0: i32) -> (i32, i32) {
    %c0_i32 = arith.constant 0 : i32
    %c0_i32_0 = arith.constant 0 : i32
    %c0_i32_1 = arith.constant 0 : i32
    return %c0_i32, %c0_i32_0 : i32, i32
  }
  func.func @transform_6(%arg0: i32) -> (i32, i32, i32, i32) {
    %c0_i32 = arith.constant 0 : i32
    %c0_i32_0 = arith.constant 0 : i32
    %c0_i32_1 = arith.constant 0 : i32
    %c0_i32_2 = arith.constant 0 : i32
    return %arg0, %c0_i32, %c0_i32_0, %c0_i32_1 : i32, i32, i32, i32
  }
}

</mosaic_0001>

<bundles_post_ra>
// kernel: msb_forward.1
= control target key start
LH: loop header
LB: loop body
LE: loop exit
PB: predicated region body
PF: predicated region fallthrough
CT: control target
= control target key end

     0   :  { %11 = vsyncpa [#allocation5], 0  ;;  %s21545_s0 = inlined_call_operand.vmem [shape: f32[2,16,16,4], index: 0, kind: input, shape index: {}]   ;;  %s21546_s1 = inlined_call_operand.vmem [shape: bf16[36,256], index: 1, kind: input, shape index: {}]   ;;  %s21547_s2 = inlined_call_operand.vmem [shape: bf16[4,768], index: 2, kind: input, shape index: {}]   ;;  %s21548_s3 = inlined_call_operand.vmem [shape: bf16[2304,256], index: 3, kind: input, shape index: {}]   ;;  %s21549_s4 = inlined_call_operand.vmem [shape: f32[1,256], index: 4, kind: input, shape index: {}]   ;;  %s21550_s5 = inlined_call_operand.vmem [shape: f32[1,1024], index: 5, kind: input, shape index: {}]   ;;  %s21551_s6 = inlined_call_operand.hbm [shape: f32[2,16,16,1024], index: 6, kind: output, shape index: {}]  }
   0x1   :  { %13 = vsyncpa [#allocation5 + $0x1], 0  ;;  %s15214_s21 = smov 0   ;;  %s15216_s22 = smov 0  }
   0x2   :  { %s15218_s23 = smov 0   ;;  %s15220_s24 = smov 0  }
   0x3 LB: > { %s15235_s25 = sadd.s32 4294967295, %s15164_s24   ;;  %s12771_s26 = sadd.s32 4294967294, %s15164_s24   ;;  %s15164_s24 = sphi %s15220_s24, %s21973_s24   ;;  %s15160_s23 = sphi %s15218_s23, %s21972_s23   ;;  %s15156_s22 = sphi %s15216_s22, %s21971_s22   ;;  %s15152_s21 = sphi %s15214_s21, %s21970_s21  }
   0x4   : > { %s15239_s27 = sadd.s32 1, %s15164_s24   ;;  %s157_s28 = sadd.s32 1, %s15160_s23 }
   0x5   : > { %s154_s29 = ssub.s32 %s15164_s24, %s15239_s27  ;;  %p167_p0 = scmp.ne.s32.totalorder %s15160_s23, %s15156_s22 }
   0x6   : > { %p155_p1 = scmp.eq.s32.totalorder %s154_s29, 0  ;;  %p168_p2 = scmp.eq.s32.totalorder %s15235_s25, 1 }
   0x7   : > { %p173_p3 = scmp.ne.s32.totalorder %s15156_s22, %s15152_s21  ;;  %p174_p4 = scmp.eq.s32.totalorder %s12771_s26, 1 }
   0x8   : > { %s15250_s30 = scalar_select %p155_p1, %s15160_s23, %s157_s28  }
   0x9   : > { %p15252_p5 = por %p168_p2, %p167_p0  ;;  %p15256_p6 = por %p174_p4, %p173_p3 }
   0xa   : > { %p12774_p7 = scmp.ge.s32.totalorder %s15164_s24, 1  ;;  %p215_p8 = scmp.lt.s32.totalorder %s15164_s24, 3 }
   0xc   : > { %p216_p9 = pnand %p12774_p7, %p215_p8 }
   0xe   : > { %219 = sbr.rel (%p216_p9) target bundleno = 1427 (0x593), region = 44 }
  0x15   : > { %v307_v0 = vlaneseq  ;;  %v15166_v1 = vmov 1983009808   ;;  %p245_p10 = scmp.lt.s32.totalorder %s15235_s25, 1  ;;  %v15268_v3 = vld [vmem:[%s21547_s2] sm:$0xff]  ;;  %v21554_v5 = vmov 0   ;;  %vm975_vm0 = vcmask 27648  }
  0x16   : > { %v15262_v2 = vunpack.c.l.s4 %v15166_v1  ;;  %428 = vmatprep.mubr.bf16.mxu1 %v21554_v5  ;;  %1660 = vst [vmem:[#allocation3] sm:$0xff] %v21554_v5  ;;  %1662 = vst [vmem:[#allocation3 + $0x10] sm:$0x11] %v21554_v5  ;;  %vm978_vm1 = vcmask 24576   ;;  %814 = vmatprep.mubr.bf16.mxu0 %v21554_v5  ;;  %v303_v6 = vcombine.high %v15268_v3, %v15268_v3  ;;  %v11885_v13 = vld [vmem:[%s21550_s5] sm:$0xff]  ;;  %vm377_vm2 = vcmask 1041408  }
  0x17   : > { %v15270_v4 = vshrl.u32 %v307_v0, 7  ;;  %1665 = vst [vmem:[#allocation3 + $0x28] sm:$0x11] %v21554_v5  ;;  %1668 = vst [vmem:[#allocation3 + $0x40] sm:$0x11] %v21554_v5  ;;  %s15300_s11 = scalar_select %p245_p10, %s15235_s25, 1 }
  0x18   : > { %1671 = vst [vmem:[#allocation3 + $0x58] sm:$0x11] %v21554_v5  ;;  %1674 = vst [vmem:[#allocation3 + $0x70] sm:$0x11] %v21554_v5  ;;  %v306_v7 = vunpack.c.0.s8 %v15262_v2  ;;  %vm1111_vm3 = vsmask.f32 256 }
  0x19   : > { %21571 = vst [vmem:[#allocation7_spill] sm:$0xff] %v15270_v4  ;;  %1677 = vst [vmem:[#allocation3 + $0x88] sm:$0x11] %v21554_v5  ;;  %v21553_v8 = vsub.s32 0, %v15270_v4  ;;  %v21552_v9 = vsub.s32 1, %v15270_v4  ;;  %v11897_v10 = vsub.s32 2, %v15270_v4 }
  0x1a   : > { %1680 = vst [vmem:[#allocation3 + $0xa0] sm:$0x11] %v21554_v5  ;;  %1683 = vst [vmem:[#allocation3 + $0xb8] sm:$0x11] %v21554_v5  ;;  %v11901_v11 = vsub.s32 3, %v15270_v4  ;;  %v309_v12 = vsub.s32 %v306_v7, %v15270_v4  ;;  %v11905_v14 = vsub.s32 4, %v15270_v4 }
  0x1b   : > { %1686 = vst [vmem:[#allocation3 + $0xd0] sm:$0x11] %v21554_v5  ;;  %1689 = vst [vmem:[#allocation3 + $0xe8] sm:$0x11] %v21554_v5  ;;  %v11909_v15 = vsub.s32 5, %v15270_v4  ;;  %s13738_s14 = sshll.u32 %s15300_s11, 8  ;;  %v15423_v16 = vrot.slane %v11885_v13, %v21553_v8  ;;  %v15427_v17 = vrot.slane %v11885_v13, %v21552_v9  ;;  %v15440_v20 = vrot.slane %v11885_v13, %v11897_v10 }
  0x1c   : > { %1692 = vst [vmem:[#allocation3 + $0x100] sm:$0x11] %v21554_v5  ;;  %1695 = vst [vmem:[#allocation3 + $0x118] sm:$0x11] %v21554_v5  ;;  %s15432_s17 = scalar_lea.vmem %s21545_s0, %s13738_s14  ;;  %v310_v18 = vrot.slane %v15268_v3, %v309_v12  ;;  %v15438_v19 = vrot.slane %v303_v6, %v309_v12  ;;  %v15442_v21 = vrot.slane %v11885_v13, %v11901_v11  ;;  %vm328_vm4 = vcmask 31744   ;;  %s15168_s18 = smov 12  }
  0x1d   : > { %1698 = vst [vmem:[#allocation3 + $0x130] sm:$0x11] %v21554_v5  ;;  %1701 = vst [vmem:[#allocation3 + $0x148] sm:$0x11] %v21554_v5  ;;  %v251_v22 = vld [vmem:[%s15432_s17] sm:$0xff]  ;;  %v252_v23 = vld [vmem:[%s15432_s17 + $0x8] sm:$0xff]  ;;  %v15447_v25 = vrot.slane %v11885_v13, %v11905_v14  ;;  %v15449_v26 = vrot.slane %v11885_v13, %v11909_v15 }
  0x1e   : > { %1704 = vst [vmem:[#allocation3 + $0x160] sm:$0x11] %v21554_v5  ;;  %1707 = vst [vmem:[#allocation3 + $0x178] sm:$0x11] %v21554_v5  ;;  %v253_v24 = vld [vmem:[%s15432_s17 + $0x10] sm:$0xff]  ;;  %v254_v27 = vld [vmem:[%s15432_s17 + $0x18] sm:$0xff]  ;;  %v318_v30 = vcombine.high %v310_v18, %v310_v18  ;;  %v13739_v32 = vpack.c.bf16 %v251_v22, %v251_v22  ;;  %v15455_v33 = vpack.c.bf16 %v252_v23, %v251_v22 }
  0x1f   : > { %1710 = vst [vmem:[#allocation3 + $0x190] sm:$0x11] %v21554_v5  ;;  %1711 = vst [vmem:[#allocation3 + $0x198] sm:$0xff] %v21554_v5  ;;  %vm1112_vm5 = vsmask.f32 4368  ;;  %v255_v28 = vld [vmem:[%s15432_s17 + $0x20] sm:$0xff]  ;;  %v13740_v34 = vpack.c.bf16 %v252_v23, %v252_v23  ;;  %v15457_v35 = vpack.c.bf16 %v254_v27, %v253_v24  ;;  %v13741_v36 = vpack.c.bf16 %v253_v24, %v253_v24 }
  0x20   : > { %1713 = vst [vmem:[#allocation3 + $0x1a8] sm:$0x11] %v21554_v5  ;;  %980 = vst.msk [vmem:[#allocation2 + $0xc] sm:$0xf] %vm975_vm0, %v21554_v5  ;;  %v256_v29 = vld [vmem:[%s15432_s17 + $0x28] sm:$0xff]  ;;  %v379_v31 = vsel %vm377_vm2, %v310_v18, 0  ;;  %12779 = vmatprep.subr.msk.bf16.mxu1 %vm377_vm2, %v318_v30  ;;  %v13742_v39 = vpack.c.bf16 %v254_v27, %v254_v27  ;;  %v13743_v51 = vpack.c.bf16 %v255_v28, %v255_v28 }
  0x21   : > { %981 = vst.msk [vmem:[#allocation2 + $0x10] sm:$0xf] %vm975_vm0, %v21554_v5  ;;  %976 = vst.msk [vmem:[#allocation2] sm:$0xf] %vm975_vm0, %v21554_v5  ;;  %vm1436_vm6 = vsmask.f32 7938  ;;  %v15460_v40 = vpack.c.bf16 %v256_v29, %v255_v28  ;;  %397 = vmatpush1.bf16.msra.mxu1 %v379_v31  ;;  %v13744_v57 = vpack.c.bf16 %v256_v29, %v256_v29 }
  0x22   : > { %982 = vst.msk [vmem:[#allocation2 + $0x14] sm:$0x1] %vm978_vm1, %v21554_v5  ;;  %979 = vst.msk [vmem:[#allocation2 + $0x8] sm:$0x1] %vm978_vm1, %v21554_v5  ;;  %v1115_v37 = vshrl.u32 %v13739_v32, 16  ;;  %v1118_v38 = vshll.u32 %v13739_v32, 16 }
  0x23   : > { %977 = vst.msk [vmem:[#allocation2 + $0x4] sm:$0xf] %vm975_vm0, %v21554_v5  ;;  %983 = vst.msk [vmem:[#allocation2 + $0x18] sm:$0xf] %vm975_vm0, %v21554_v5  ;;  %v257_v41 = vld [vmem:[%s15432_s17 + $0x30] sm:$0xff]  ;;  %v258_v42 = vld [vmem:[%s15432_s17 + $0x38] sm:$0xff] }
  0x24   : > { %984 = vst.msk [vmem:[#allocation2 + $0x1c] sm:$0xf] %vm975_vm0, %v21554_v5  ;;  %986 = vst.msk [vmem:[#allocation2 + $0x24] sm:$0xf] %vm975_vm0, %v21554_v5  ;;  %v1123_v43 = vshrl.u32 %v13740_v34, 16  ;;  %v1126_v44 = vshll.u32 %v13740_v34, 16  ;;  %v15476_v58 = vpack.c.bf16 %v258_v42, %v257_v41  ;;  %12780 = vmatmul.mubr.msk.bf16.vlgmr.msra.gmra.mrb[0].mxu1 %vm328_vm4, %v15455_v33 }
  0x25   : > { %985 = vst.msk [vmem:[#allocation2 + $0x20] sm:$0x1] %vm978_vm1, %v21554_v5  ;;  %988 = vst.msk [vmem:[#allocation2 + $0x2c] sm:$0x1] %vm978_vm1, %v21554_v5  ;;  %v1132_v45 = vshrl.u32 %v13741_v36, 16  ;;  %v1135_v46 = vshll.u32 %v13741_v36, 16  ;;  %438 = vmatprep.mubr.bf16.mxu1 %v21554_v5  ;;  %v13745_v36 = vpack.c.bf16 %v257_v41, %v257_v41 }
  0x26   : > { %987 = vst.msk [vmem:[#allocation2 + $0x28] sm:$0xf] %vm975_vm0, %v21554_v5  ;;  %989 = vst.msk [vmem:[#allocation2 + $0x30] sm:$0xf] %vm975_vm0, %v21554_v5  ;;  %v1117_v47 = vrot.slane %v1115_v37, 7  ;;  %v1140_v49 = vshrl.u32 %v13742_v39, 16  ;;  %v13746_v37 = vpack.c.bf16 %v258_v42, %v258_v42 }
  0x27   : > { %990 = vst.msk [vmem:[#allocation2 + $0x34] sm:$0xf] %vm975_vm0, %v21554_v5  ;;  %992 = vst.msk [vmem:[#allocation2 + $0x3c] sm:$0xf] %vm975_vm0, %v21554_v5  ;;  %v1143_v50 = vshll.u32 %v13742_v39, 16  ;;  %v1125_v52 = vrot.slane %v1123_v43, 7 }
  0x28   : > { %991 = vst.msk [vmem:[#allocation2 + $0x38] sm:$0x1] %vm978_vm1, %v21554_v5  ;;  %994 = vst.msk [vmem:[#allocation2 + $0x44] sm:$0x1] %vm978_vm1, %v21554_v5  ;;  %v1438_v54 = vld [vmem:[#allocation2 + $0xc] sm:$0xf]  ;;  %v1120_v60 = vor.u32 %v1118_v38, %v1117_v47 }
  0x29   : > { %993 = vst.msk [vmem:[#allocation2 + $0x40] sm:$0xf] %vm975_vm0, %v21554_v5  ;;  %995 = vst.msk [vmem:[#allocation2 + $0x48] sm:$0xf] %vm975_vm0, %v21554_v5  ;;  %v1444_v55 = vld [vmem:[#allocation2 + $0x14] sm:$0x1]  ;;  %v1128_v1 = vor.u32 %v1126_v44, %v1125_v52 }
  0x2a   : > { %996 = vst.msk [vmem:[#allocation2 + $0x4c] sm:$0xf] %vm975_vm0, %v21554_v5  ;;  %998 = vst.msk [vmem:[#allocation2 + $0x54] sm:$0xf] %vm975_vm0, %v21554_v5  ;;  %v1134_v56 = vrot.slane %v1132_v45, 7  ;;  %v1121_v61 = vrot.slane %v1117_v47, 4 }
  0x2b   : > { %997 = vst.msk [vmem:[#allocation2 + $0x50] sm:$0x1] %vm978_vm1, %v21554_v5  ;;  %1000 = vst.msk [vmem:[#allocation2 + $0x5c] sm:$0x1] %vm978_vm1, %v21554_v5  ;;  %v1142_v62 = vrot.slane %v1140_v49, 7  ;;  %v1149_v0 = vshrl.u32 %v13743_v51, 16 }
  0x2c   : > { %999 = vst.msk [vmem:[#allocation2 + $0x58] sm:$0xf] %vm975_vm0, %v21554_v5  ;;  %1001 = vst.msk [vmem:[#allocation2 + $0x60] sm:$0xf] %vm975_vm0, %v21554_v5  ;;  %v1447_v63 = vld [vmem:[#allocation2 + $0x18] sm:$0xf]  ;;  %v1137_v3 = vor.u32 %v1135_v46, %v1134_v56  ;;  %12781 = vmatmul.mubr.msk.bf16.gmra.mrb[4].mxu1 %vm328_vm4, %v15457_v35 }
  0x2d   : > { %1002 = vst.msk [vmem:[#allocation2 + $0x64] sm:$0xf] %vm975_vm0, %v21554_v5  ;;  %1004 = vst.msk [vmem:[#allocation2 + $0x6c] sm:$0xf] %vm975_vm0, %v21554_v5  ;;  %v1130_v2 = vrot.slane %v1125_v52, 4  ;;  %v1138_v6 = vrot.slane %v1134_v56, 4  ;;  %v1145_v11 = vor.u32 %v1143_v50, %v1142_v62  ;;  %448 = vmatprep.mubr.bf16.mxu1 %v21554_v5 }
  0x2e   : > { %1003 = vst.msk [vmem:[#allocation2 + $0x68] sm:$0x1] %vm978_vm1, %v21554_v5  ;;  %1006 = vst.msk [vmem:[#allocation2 + $0x74] sm:$0x1] %vm978_vm1, %v21554_v5  ;;  %v1451_v7 = vld [vmem:[#allocation2 + $0x20] sm:$0x1] }
  0x2f   : > { %1005 = vst.msk [vmem:[#allocation2 + $0x70] sm:$0xf] %vm975_vm0, %v21554_v5  ;;  %1007 = vst.msk [vmem:[#allocation2 + $0x78] sm:$0xf] %vm975_vm0, %v21554_v5  ;;  %v1147_v12 = vrot.slane %v1142_v62, 4  ;;  %v1151_v13 = vrot.slane %v1149_v0, 7 }
  0x30   : > { %1008 = vst.msk [vmem:[#allocation2 + $0x7c] sm:$0xf] %vm975_vm0, %v21554_v5  ;;  %1010 = vst.msk [vmem:[#allocation2 + $0x84] sm:$0xf] %vm975_vm0, %v21554_v5  ;;  %v1152_v22 = vshll.u32 %v13743_v51, 16  ;;  %v259_v23 = vld [vmem:[%s15432_s17 + $0x40] sm:$0xff] }
  0x31   : > { %1009 = vst.msk [vmem:[#allocation2 + $0x80] sm:$0x1] %vm978_vm1, %v21554_v5  ;;  %1012 = vst.msk [vmem:[#allocation2 + $0x8c] sm:$0x1] %vm978_vm1, %v21554_v5  ;;  %v260_v24 = vld [vmem:[%s15432_s17 + $0x48] sm:$0xff]  ;;  %v1155_v29 = vrot.slane %v1151_v13, 4  ;;  %v13747_v43 = vpack.c.bf16 %v259_v23, %v259_v23 }
  0x32   : > { %1011 = vst.msk [vmem:[#allocation2 + $0x88] sm:$0xf] %vm975_vm0, %v21554_v5  ;;  %1013 = vst.msk [vmem:[#allocation2 + $0x90] sm:$0xf] %vm975_vm0, %v21554_v5  ;;  %v1157_v30 = vshrl.u32 %v13744_v57, 16  ;;  %v1154_v32 = vor.u32 %v1152_v22, %v1151_v13  ;;  %v1160_v34 = vshll.u32 %v13744_v57, 16  ;;  %v15503_v39 = vpack.c.bf16 %v260_v24, %v259_v23 }
  0x33   : > { %1014 = vst.msk [vmem:[#allocation2 + $0x94] sm:$0xf] %vm975_vm0, %v21554_v5  ;;  %1016 = vst.msk [vmem:[#allocation2 + $0x9c] sm:$0xf] %vm975_vm0, %v21554_v5  ;;  %v1454_v31 = vld [vmem:[#allocation2 + $0x24] sm:$0xf]  ;;  %v13748_v44 = vpack.c.bf16 %v260_v24, %v260_v24 }
  0x34   : > { %1015 = vst.msk [vmem:[#allocation2 + $0x98] sm:$0x1] %vm978_vm1, %v21554_v5  ;;  %1018 = vst.msk [vmem:[#allocation2 + $0xa4] sm:$0x1] %vm978_vm1, %v21554_v5  ;;  %v1159_v38 = vrot.slane %v1157_v30, 7  ;;  %v1166_v47 = vshrl.u32 %v13745_v36, 16  ;;  %12782 = vmatmul.mubr.msk.bf16.gmra.mrb[8].mxu1 %vm328_vm4, %v15460_v40 }
  0x35   : > { %1017 = vst.msk [vmem:[#allocation2 + $0xa0] sm:$0xf] %vm975_vm0, %v21554_v5  ;;  %1019 = vst.msk [vmem:[#allocation2 + $0xa8] sm:$0xf] %vm975_vm0, %v21554_v5  ;;  %v1458_v46 = vld [vmem:[#allocation2 + $0x2c] sm:$0x1]  ;;  %458 = vmatprep.mubr.bf16.mxu1 %v21554_v5 }
  0x36   : > { %1020 = vst.msk [vmem:[#allocation2 + $0xac] sm:$0xf] %vm975_vm0, %v21554_v5  ;;  %1022 = vst.msk [vmem:[#allocation2 + $0xb4] sm:$0xf] %vm975_vm0, %v21554_v5  ;;  %v1169_v49 = vshll.u32 %v13745_v36, 16  ;;  %v1174_v50 = vshrl.u32 %v13746_v37, 16  ;;  %v1162_v51 = vor.u32 %v1160_v34, %v1159_v38 }
  0x37   : > { %1021 = vst.msk [vmem:[#allocation2 + $0xb0] sm:$0x1] %vm978_vm1, %v21554_v5  ;;  %1024 = vst.msk [vmem:[#allocation2 + $0xbc] sm:$0x1] %vm978_vm1, %v21554_v5  ;;  %v1164_v41 = vrot.slane %v1159_v38, 4  ;;  %v1177_v42 = vshll.u32 %v13746_v37, 16 }
  0x38   : > { %1023 = vst.msk [vmem:[#allocation2 + $0xb8] sm:$0xf] %vm975_vm0, %v21554_v5  ;;  %1025 = vst.msk [vmem:[#allocation2 + $0xc0] sm:$0xf] %vm975_vm0, %v21554_v5  ;;  %v1183_v52 = vshrl.u32 %v13747_v43, 16  ;;  %v1186_v56 = vshll.u32 %v13747_v43, 16 }
  0x39   : > { %1026 = vst.msk [vmem:[#allocation2 + $0xc4] sm:$0xf] %vm975_vm0, %v21554_v5  ;;  %1028 = vst.msk [vmem:[#allocation2 + $0xcc] sm:$0xf] %vm975_vm0, %v21554_v5  ;;  %v1191_v57 = vshrl.u32 %v13748_v44, 16  ;;  %v263_v22 = vld [vmem:[%s15432_s17 + $0x60] sm:$0xff] }
  0x3a   : > { %1027 = vst.msk [vmem:[#allocation2 + $0xc8] sm:$0x1] %vm978_vm1, %v21554_v5  ;;  %1030 = vst.msk [vmem:[#allocation2 + $0xd4] sm:$0x1] %vm978_vm1, %v21554_v5  ;;  %v1461_v0 = vld [vmem:[#allocation2 + $0x30] sm:$0xf] }
  0x3b   : > { %1029 = vst.msk [vmem:[#allocation2 + $0xd0] sm:$0xf] %vm975_vm0, %v21554_v5  ;;  %21572 = vst [vmem:[#allocation8_spill] sm:$0xff] %v15423_v16  ;;  %v264_v23 = vld [vmem:[%s15432_s17 + $0x68] sm:$0xff]  ;;  %vm2786_vm10 = vcmask 1042432   ;;  %vm2787_vm11 = vcmask 1046532  }
  0x3c   : > { %21573 = vst [vmem:[#allocation9_spill] sm:$0xff] %v15427_v17  ;;  %21574 = vst [vmem:[#allocation10_spill] sm:$0xff] %v15440_v20  ;;  %v15530_v43 = vpack.c.bf16 %v264_v23, %v263_v22  ;;  %12783 = vmatmul.mubr.msk.bf16.gmra.mrb[12].mxu1 %vm328_vm4, %v15476_v58  ;;  %s15169_s19 = smov 8   ;;  %vm2335_vm13 = vsmask.f32 3328  ;;  %s15170_s20 = smov 24  }
  0x3d   : > { %21575 = vst [vmem:[#allocation11_spill] sm:$0xff] %v15442_v21  ;;  %21576 = vst [vmem:[#allocation12_spill] sm:$0xff] %v15447_v25  ;;  %468 = vmatprep.mubr.bf16.mxu1 %v21554_v5  ;;  %vm2336_vm14 = vsmask.f32 7440  ;;  %s15171_s26 = smov 4   ;;  %v273_v21 = vld [vmem:[%s15432_s17 + $0xb0] sm:$0xff] }
  0x3e   : > { %21577 = vst [vmem:[#allocation13_spill] sm:$0xff] %v15449_v26  ;;  %vm15466_vm7 = vmand %vm978_vm1, %vm1111_vm3  ;;  %v274_v20 = vld [vmem:[%s15432_s17 + $0xb8] sm:$0xff]  ;;  %s15172_s28 = smov 32   ;;  %s15173_s29 = smov 20   ;;  %vm2165_vm1 = vcmask 1047556  }
  0x3f   : > { %vm15472_vm8 = vmand %vm975_vm0, %vm1436_vm6  ;;  %v1445_v15 = vsel %vm15466_vm7, %v1130_v2, %v1444_v55  ;;  %v1452_v28 = vsel %vm15466_vm7, %v1147_v12, %v1451_v7  ;;  %v1176_v55 = vrot.slane %v1174_v50, 7  ;;  %v1185_v2 = vrot.slane %v1183_v52, 7  ;;  %v1468_v12 = vld [vmem:[#allocation2 + $0x3c] sm:$0xf]  ;;  %s15174_s9 = smov 28   ;;  %s15175_s10 = smov 16  }
  0x40   : > { %vm15482_vm9 = vmor %vm1111_vm3, %vm1112_vm5  ;;  %v1439_v10 = vsel %vm15472_vm8, %v1120_v60, %v1438_v54  ;;  %v1448_v18 = vsel %vm15472_vm8, %v1137_v3, %v1447_v63  ;;  %1446 = vst [vmem:[#allocation2 + $0x14] sm:$0x1] %v1445_v15  ;;  %v1455_v45 = vsel %vm15472_vm8, %v1154_v32, %v1454_v31  ;;  %v1168_v54 = vrot.slane %v1166_v47, 7  ;;  %v261_v60 = vld [vmem:[%s15432_s17 + $0x50] sm:$0xff]  ;;  %s15176_s12 = smov [#allocation4]  }
  0x41   : > { %v1129_v14 = vsel %vm15482_vm9, %v1121_v61, %v1128_v1  ;;  %1440 = vst [vmem:[#allocation2 + $0xc] sm:$0xf] %v1439_v10  ;;  %v1146_v27 = vsel %vm15482_vm9, %v1138_v6, %v1145_v11  ;;  %1449 = vst [vmem:[#allocation2 + $0x18] sm:$0xf] %v1448_v18  ;;  %v262_v61 = vld [vmem:[%s15432_s17 + $0x58] sm:$0xff]  ;;  %v1163_v62 = vsel %vm15482_vm9, %v1155_v29, %v1162_v51  ;;  %v1194_v3 = vshll.u32 %v13748_v44, 16 }
  0x42   : > { %1441 = vst.msk [vmem:[#allocation2 + $0x10] sm:$0xf] %vm975_vm0, %v1129_v14  ;;  %1450 = vst.msk [vmem:[#allocation2 + $0x1c] sm:$0xf] %vm975_vm0, %v1146_v27  ;;  %v1459_v63 = vsel %vm15466_vm7, %v1164_v41, %v1458_v46  ;;  %v1465_v1 = vld [vmem:[#allocation2 + $0x38] sm:$0x1]  ;;  %v1171_v6 = vor.u32 %v1169_v49, %v1168_v54  ;;  %v1179_v10 = vor.u32 %v1177_v42, %v1176_v55 }
  0x43   : > { %1453 = vst [vmem:[#allocation2 + $0x20] sm:$0x1] %v1452_v28  ;;  %1456 = vst [vmem:[#allocation2 + $0x24] sm:$0xf] %v1455_v45  ;;  %v1172_v7 = vrot.slane %v1168_v54, 4  ;;  %v1181_v11 = vrot.slane %v1176_v55, 4  ;;  %v1188_v13 = vor.u32 %v1186_v56, %v1185_v2  ;;  %v15517_v18 = vpack.c.bf16 %v262_v61, %v261_v60 }
  0x44   : > { %1457 = vst.msk [vmem:[#allocation2 + $0x28] sm:$0xf] %vm975_vm0, %v1163_v62  ;;  %1460 = vst [vmem:[#allocation2 + $0x2c] sm:$0x1] %v1459_v63  ;;  %v1189_v14 = vrot.slane %v1185_v2, 4  ;;  %v1193_v15 = vrot.slane %v1191_v57, 7  ;;  %v1462_v27 = vsel %vm15472_vm8, %v1171_v6, %v1461_v0  ;;  %v13749_v30 = vpack.c.bf16 %v261_v60, %v261_v60  ;;  %12784 = vmatmul.mubr.msk.bf16.gmra.mrb[16].mxu1 %vm328_vm4, %v15503_v39 }
  0x45   : > { %v1180_v24 = vsel %vm15482_vm9, %v1172_v7, %v1179_v10  ;;  %v1466_v28 = vsel %vm15466_vm7, %v1181_v11, %v1465_v1  ;;  %v1472_v29 = vld [vmem:[#allocation2 + $0x44] sm:$0x1]  ;;  %1463 = vst [vmem:[#allocation2 + $0x30] sm:$0xf] %v1462_v27  ;;  %v1469_v34 = vsel %vm15472_vm8, %v1188_v13, %v1468_v12  ;;  %v13750_v36 = vpack.c.bf16 %v262_v61, %v262_v61  ;;  %v265_v45 = vld [vmem:[%s15432_s17 + $0x70] sm:$0xff]  ;;  %v266_v46 = vld [vmem:[%s15432_s17 + $0x78] sm:$0xff] }
  0x46   : > { %1464 = vst.msk [vmem:[#allocation2 + $0x34] sm:$0xf] %vm975_vm0, %v1180_v24  ;;  %1467 = vst [vmem:[#allocation2 + $0x38] sm:$0x1] %v1466_v28  ;;  %v1196_v31 = vor.u32 %v1194_v3, %v1193_v15  ;;  %v1198_v32 = vrot.slane %v1193_v15, 4  ;;  %v1200_v37 = vshrl.u32 %v13749_v30, 16  ;;  %v13751_v44 = vpack.c.bf16 %v263_v22, %v263_v22  ;;  %478 = vmatprep.mubr.bf16.mxu1 %v21554_v5 }
  0x47   : > { %1470 = vst [vmem:[#allocation2 + $0x3c] sm:$0xf] %v1469_v34  ;;  %v1203_v38 = vshll.u32 %v13749_v30, 16  ;;  %v1208_v50 = vshrl.u32 %v13750_v36, 16  ;;  %v1211_v51 = vshll.u32 %v13750_v36, 16  ;;  %v13752_v42 = vpack.c.bf16 %v264_v23, %v264_v23  ;;  %v267_v22 = vld [vmem:[%s15432_s17 + $0x80] sm:$0xff]  ;;  %vm15573_vm12 = vmor %vm2786_vm10, %vm2787_vm11 }
  0x48   : > { %v1197_v47 = vsel %vm15482_vm9, %v1189_v14, %v1196_v31  ;;  %v1473_v49 = vsel %vm15466_vm7, %v1198_v32, %v1472_v29  ;;  %v1202_v41 = vrot.slane %v1200_v37, 7  ;;  %v1217_v52 = vshrl.u32 %v13751_v44, 16  ;;  %v1475_v56 = vld [vmem:[#allocation2 + $0x48] sm:$0xf]  ;;  %v1479_v0 = vld [vmem:[#allocation2 + $0x50] sm:$0x1]  ;;  %vm15624_vm15 = vmor %vm2335_vm13, %vm2336_vm14 }
  0x49   : > { %1471 = vst.msk [vmem:[#allocation2 + $0x40] sm:$0xf] %vm975_vm0, %v1197_v47  ;;  %1474 = vst [vmem:[#allocation2 + $0x44] sm:$0x1] %v1473_v49  ;;  %v1220_v54 = vshll.u32 %v13751_v44, 16  ;;  %v1210_v55 = vrot.slane %v1208_v50, 7  ;;  %v15542_v57 = vpack.c.bf16 %v266_v46, %v265_v45  ;;  %v13753_v60 = vpack.c.bf16 %v265_v45, %v265_v45 }
  0x4a   : > { %v13754_v61 = vpack.c.bf16 %v266_v46, %v266_v46  ;;  %v1205_v62 = vor.u32 %v1203_v38, %v1202_v41  ;;  %v1206_v63 = vrot.slane %v1202_v41, 4  ;;  %v1219_v1 = vrot.slane %v1217_v52, 7  ;;  %v1482_v10 = vld [vmem:[#allocation2 + $0x54] sm:$0xf]  ;;  %v268_v23 = vld [vmem:[%s15432_s17 + $0x88] sm:$0xff] }
  0x4b   : > { %v1225_v2 = vshrl.u32 %v13752_v42, 16  ;;  %v1213_v3 = vor.u32 %v1211_v51, %v1210_v55  ;;  %v1215_v6 = vrot.slane %v1210_v55, 4  ;;  %v1228_v7 = vshll.u32 %v13752_v42, 16  ;;  %v1486_v28 = vld [vmem:[#allocation2 + $0x5c] sm:$0x1] }
  0x4c   : > { %v1234_v11 = vshrl.u32 %v13753_v60, 16  ;;  %v1476_v12 = vsel %vm15472_vm8, %v1205_v62, %v1475_v56  ;;  %v1222_v13 = vor.u32 %v1220_v54, %v1219_v1  ;;  %v1223_v14 = vrot.slane %v1219_v1, 4  ;;  %v1489_v37 = vld [vmem:[#allocation2 + $0x60] sm:$0xf]  ;;  %v15559_v47 = vld [vmem:[#allocation2 + $0x4] sm:$0xf]  ;;  %12785 = vmatmul.mubr.msk.bf16.gmra.mrb[20].mxu1 %vm328_vm4, %v15517_v18 }
  0x4d   : > { %v1227_v15 = vrot.slane %v1225_v2, 7  ;;  %v1214_v24 = vsel %vm15482_vm9, %v1206_v63, %v1213_v3  ;;  %1477 = vst [vmem:[#allocation2 + $0x48] sm:$0xf] %v1476_v12  ;;  %v1480_v27 = vsel %vm15466_vm7, %v1215_v6, %v1479_v0  ;;  %v1237_v30 = vshll.u32 %v13753_v60, 16  ;;  %v15566_v42 = vld [vmem:[#allocation2 + $0x8] sm:$0x1]  ;;  %488 = vmatprep.mubr.bf16.mxu1 %v21554_v5 }
  0x4e   : > { %v1236_v29 = vrot.slane %v1234_v11, 7  ;;  %1478 = vst.msk [vmem:[#allocation2 + $0x4c] sm:$0xf] %vm975_vm0, %v1214_v24  ;;  %1481 = vst [vmem:[#allocation2 + $0x50] sm:$0x1] %v1480_v27  ;;  %v1483_v34 = vsel %vm15472_vm8, %v1222_v13, %v1482_v10  ;;  %v1242_v36 = vshrl.u32 %v13754_v61, 16  ;;  %v15557_v46 = vpack.c.bf16 %v268_v23, %v267_v22 }
  0x4f   : > { %v1230_v31 = vor.u32 %v1228_v7, %v1227_v15  ;;  %v1232_v32 = vrot.slane %v1227_v15, 4  ;;  %1484 = vst [vmem:[#allocation2 + $0x54] sm:$0xf] %v1483_v34  ;;  %v1245_v45 = vshll.u32 %v13754_v61, 16  ;;  %v13755_v41 = vpack.c.bf16 %v267_v22, %v267_v22  ;;  %v2722_v52 = vld [vmem:[#allocation2] sm:$0xe] }
  0x50   : > { %v1239_v38 = vor.u32 %v1237_v30, %v1236_v29  ;;  %v1240_v44 = vrot.slane %v1236_v29, 4  ;;  %v1244_v51 = vrot.slane %v1242_v36, 7  ;;  %v1493_v55 = vld [vmem:[#allocation2 + $0x68] sm:$0x1]  ;;  %v13756_v56 = vpack.c.bf16 %v268_v23, %v268_v23  ;;  %v2901_v2 = vld [vmem:[#allocation2 + $0xc] sm:$0xf] }
  0x51   : > { %v1231_v49 = vsel %vm15482_vm9, %v1223_v14, %v1230_v31  ;;  %v1487_v50 = vsel %vm15466_vm7, %v1232_v32, %v1486_v28  ;;  %v2358_v60 = vshll.u32 %v15566_v42, 16  ;;  %v1251_v63 = vshrl.u32 %v13755_v41, 16  ;;  %v15578_v11 = vld [vmem:[#allocation2 + $0x10] sm:$0xf]  ;;  %v1496_v23 = vld [vmem:[#allocation2 + $0x6c] sm:$0xf] }
  0x52   : > { %1485 = vst.msk [vmem:[#allocation2 + $0x58] sm:$0xf] %vm975_vm0, %v1231_v49  ;;  %1488 = vst [vmem:[#allocation2 + $0x5c] sm:$0x1] %v1487_v50  ;;  %v1490_v54 = vsel %vm15472_vm8, %v1239_v38, %v1489_v37  ;;  %v1247_v61 = vor.u32 %v1245_v45, %v1244_v51  ;;  %v1249_v62 = vrot.slane %v1244_v51, 4  ;;  %v1254_v0 = vshll.u32 %v13755_v41, 16 }
  0x53   : > { %1491 = vst [vmem:[#allocation2 + $0x60] sm:$0xf] %v1490_v54  ;;  %v21584_v1 = vmov 0  ;;  %v1259_v3 = vshrl.u32 %v13756_v56, 16  ;;  %v1262_v6 = vshll.u32 %v13756_v56, 16  ;;  %v12894_v7 = vrot.slane %v2722_v52, 9 }
  0x54   : > { %v21585_v1 = vsel %vm15573_vm12, 4294967295, %v21584_v1  ;;  %v2791_v10 = vrot.slane %v15559_v47, 5  ;;  %v1248_v12 = vsel %vm15482_vm9, %v1240_v44, %v1247_v61  ;;  %v1494_v13 = vsel %vm15466_vm7, %v1249_v62, %v1493_v55  ;;  %v1500_v31 = vld [vmem:[#allocation2 + $0x74] sm:$0x1]  ;;  %v270_v37 = vld [vmem:[%s15432_s17 + $0x98] sm:$0xff]  ;;  %12786 = vmatmul.mubr.msk.bf16.gmra.mrb[24].mxu1 %vm328_vm4, %v15530_v43 }
  0x55   : > { %21586 = vst [vmem:[#allocation14_spill] sm:$0xff] %v21585_v1  ;;  %v1253_v14 = vrot.slane %v1251_v63, 7  ;;  %v2794_v15 = vrot.slane %v15566_v42, 5  ;;  %1492 = vst.msk [vmem:[#allocation2 + $0x64] sm:$0xf] %vm975_vm0, %v1248_v12  ;;  %v1261_v22 = vrot.slane %v1259_v3, 7  ;;  %v12990_v34 = vcombine.low %v2901_v2, %v15578_v11  ;;  %498 = vmatprep.mubr.bf16.mxu1 %v21554_v5 }
  0x56   : > { %1495 = vst [vmem:[#allocation2 + $0x68] sm:$0x1] %v1494_v13  ;;  %v2792_v24 = vsel %vm15573_vm12, %v12894_v7, %v2791_v10  ;;  %v2793_v27 = vrot.slane %v2791_v10, 4  ;;  %v2963_v32 = vshrl.u32 %v15578_v11, 16  ;;  %v269_v36 = vld [vmem:[%s15432_s17 + $0x90] sm:$0xff]  ;;  %v2950_v49 = vshrl.u32 %v2901_v2, 16 }
  0x57   : > { %v1256_v29 = vor.u32 %v1254_v0, %v1253_v14  ;;  %v1257_v30 = vrot.slane %v1253_v14, 4  ;;  %v1264_v38 = vor.u32 %v1262_v6, %v1261_v22  ;;  %v1266_v44 = vrot.slane %v1261_v22, 4  ;;  %4406 = vrot.lane.b32.xlu1 %v12990_v34, %s15168_s18  ;;  %v2287_v54 = vld [vmem:[#allocation2] sm:$0xf]  ;;  %v1503_v22 = vld [vmem:[#allocation2 + $0x78] sm:$0xf] }
  0x58   : > { %v2795_v45 = vsel %vm15573_vm12, %v2793_v27, %v2794_v15  ;;  %v15600_v41 = vrot.slane %v2963_v32, 4  ;;  %v2953_v52 = vshll.u32 %v2901_v2, 16  ;;  %v2952_v61 = vrot.slane %v2950_v49, 4  ;;  %v3510_v34 = vld [vmem:[#allocation2 + $0x18] sm:$0xf] }
  0x59   : > { %v1497_v50 = vsel %vm15472_vm8, %v1256_v29, %v1496_v23  ;;  %v12974_v51 = vcombine.low %v2792_v24, %v2795_v45  ;;  %v1265_v55 = vsel %vm15482_vm9, %v1257_v30, %v1264_v38  ;;  %v1501_v56 = vsel %vm15466_vm7, %v1266_v44, %v1500_v31  ;;  %v2723_v5 = vld [vmem:[#allocation2 + $0xc] sm:$0xe] }
  0x5a   : > { %1498 = vst [vmem:[#allocation2 + $0x6c] sm:$0xf] %v1497_v50  ;;  %v15607_v62 = vpack.c.bf16 %v270_v37, %v269_v36  ;;  %1499 = vst.msk [vmem:[#allocation2 + $0x70] sm:$0xf] %vm975_vm0, %v1265_v55  ;;  %v2955_v63 = vrot.slane %v2953_v52, 5  ;;  %v13757_v0 = vpack.c.bf16 %v269_v36, %v269_v36  ;;  %v13758_v2 = vpack.c.bf16 %v270_v37, %v270_v37 }
  0x5b   : > { %1502 = vst [vmem:[#allocation2 + $0x74] sm:$0x1] %v1501_v56  ;;  %4310 = vrot.lane.b32.xlu0 %v12974_v51, %s15169_s19  ;;  %v2339_v3 = vshrl.u32 %v2287_v54, 16  ;;  %v2342_v6 = vshll.u32 %v2287_v54, 16  ;;  %v2348_v7 = vshll.u32 %v15559_v47, 16  ;;  %v2352_v32 = vshrl.u32 %v15559_v47, 16 }
  0x5c   : > { %v2956_v10 = vor.u32 %v2955_v63, %v2952_v61  ;;  %v1268_v12 = vshrl.u32 %v13757_v0, 16  ;;  %v1271_v13 = vshll.u32 %v13757_v0, 16  ;;  %v1276_v14 = vshrl.u32 %v13758_v2, 16  ;;  %v1507_v36 = vld [vmem:[#allocation2 + $0x80] sm:$0x1]  ;;  %12787 = vmatmul.mubr.msk.bf16.gmra.mrb[28].mxu1 %vm328_vm4, %v15542_v57 }
  0x5d   : > { %v1279_v15 = vshll.u32 %v13758_v2, 16  ;;  %v2341_v23 = vrot.slane %v2339_v3, 4  ;;  %v2344_v24 = vrot.slane %v2342_v6, 5  ;;  %v15612_v27 = vrot.slane %v2348_v7, 5  ;;  %v15628_v54 = vld [vmem:[#allocation2 + $0x1c] sm:$0xf] }
  0x5e   : > { %v15614_v29 = vrot.slane %v2956_v10, 4  ;;  %v1270_v30 = vrot.slane %v1268_v12, 7  ;;  %v1278_v31 = vrot.slane %v1276_v14, 7  ;;  %v2360_v38 = vrot.slane %v2358_v60, 5  ;;  %v15630_v55 = vld [vmem:[#allocation2 + $0x18] sm:$0xf] }
  0x5f   : > { %v2345_v37 = vor.u32 %v2344_v24, %v2341_v23  ;;  %v3559_v44 = vshrl.u32 %v3510_v34, 16  ;;  %v3562_v45 = vshll.u32 %v3510_v34, 16  ;;  %v2354_v60 = vrot.slane %v2352_v32, 4  ;;  %v15636_v63 = vld [vmem:[#allocation2 + $0x1c] sm:$0xf]  ;;  %v272_v23 = vld [vmem:[%s15432_s17 + $0xa8] sm:$0xff] }
  0x60   : > { %v1273_v49 = vor.u32 %v1271_v13, %v1270_v30  ;;  %v1274_v50 = vrot.slane %v1270_v30, 4  ;;  %v1281_v51 = vor.u32 %v1279_v15, %v1278_v31  ;;  %v1283_v52 = vrot.slane %v1278_v31, 4  ;;  %v3512_v7 = vld [vmem:[#allocation2 + $0x24] sm:$0xf]  ;;  %v15645_v10 = vld [vmem:[#allocation2 + $0x28] sm:$0xf] }
  0x61   : > { %v2346_v42 = vrot.slane %v2345_v37, 4  ;;  %v15632_v56 = vrot.slane %v3559_v44, 4  ;;  %v15634_v61 = vrot.slane %v3562_v45, 5  ;;  %v2355_v13 = vor.u32 %v2354_v60, %v15612_v27  ;;  %v3333_v45 = vld [vmem:[#allocation2 + $0xc] sm:$0xe] }
  0x62   : > { %v1282_v0 = vsel %vm15482_vm9, %v1274_v50, %v1281_v51  ;;  %v1504_v2 = vsel %vm15472_vm8, %v1273_v49, %v1503_v22  ;;  %v1508_v3 = vsel %vm15466_vm7, %v1283_v52, %v1507_v36  ;;  %v13038_v14 = vcombine.low %v3510_v34, %v15628_v54  ;;  %v271_v22 = vld [vmem:[%s15432_s17 + $0xa0] sm:$0xff]  ;;  %v15660_v36 = vld [vmem:[#allocation2 + $0x14] sm:$0x1]  ;;  %v1514_v15 = vld [vmem:[#allocation2 + $0x8c] sm:$0x1] }
  0x63   : > { %1505 = vst [vmem:[#allocation2 + $0x78] sm:$0xf] %v1504_v2  ;;  %1506 = vst.msk [vmem:[#allocation2 + $0x7c] sm:$0xf] %vm975_vm0, %v1282_v0  ;;  %v2351_v12 = vsel %vm15624_vm15, %v2346_v42, %v15612_v27  ;;  %v12991_v24 = vcombine.low %v15630_v55, %v15636_v63  ;;  %v2974_v30 = vshrl.u32 %v15630_v55, 16  ;;  %v2977_v31 = vshll.u32 %v15630_v55, 16 }
  0x64   : > { %1509 = vst [vmem:[#allocation2 + $0x80] sm:$0x1] %v1508_v3  ;;  %v3583_v32 = vshrl.u32 %v3512_v7, 16  ;;  %v2356_v37 = vrot.slane %v2355_v13, 4  ;;  %4662 = vrot.lane.b32.xlu1 %v13038_v14, %s15170_s20  ;;  %v3586_v27 = vshll.u32 %v3512_v7, 16  ;;  %v13039_v44 = vcombine.low %v3512_v7, %v15645_v10 }
  0x65   : > { %v15665_v49 = vrot.slane %v2974_v30, 4  ;;  %v15667_v50 = vrot.slane %v2977_v31, 5  ;;  %v15671_v52 = vpack.c.bf16 %v272_v23, %v271_v22  ;;  %v13759_v60 = vpack.c.bf16 %v271_v22, %v271_v22  ;;  %v15679_v2 = vld [vmem:[#allocation2 + $0x20] sm:$0x1]  ;;  %v3942_v3 = vld [vmem:[#allocation2 + $0x18] sm:$0xe] }
  0x66   : > { %v15669_v51 = vrot.slane %v3583_v32, 4  ;;  %v2361_v55 = vsel %vm15624_vm15, %v2356_v37, %v2360_v38  ;;  %v15677_v42 = vrot.slane %v3586_v27, 5  ;;  %v13760_v0 = vpack.c.bf16 %v272_v23, %v272_v23  ;;  %v3334_v31 = vld [vmem:[#allocation2 + $0x18] sm:$0xe]  ;;  %v1510_v22 = vld [vmem:[#allocation2 + $0x84] sm:$0xf] }
  0x67   : > { %v12958_v7 = vcombine.low %v2351_v12, %v2361_v55  ;;  %v12910_v13 = vrot.slane %v3333_v45, 9  ;;  %v3399_v14 = vrot.slane %v15578_v11, 5  ;;  %v3402_v30 = vrot.slane %v15660_v36, 5 }
  0x68   : > { %4664 = vrot.lane.b32.xlu1 %v13039_v44, %s15170_s20  ;;  %v1285_v32 = vshrl.u32 %v13759_v60, 16  ;;  %v1288_v38 = vshll.u32 %v13759_v60, 16  ;;  %v1293_v37 = vshrl.u32 %v13760_v0, 16  ;;  %v1296_v27 = vshll.u32 %v13760_v0, 16 }
  0x69   : > { %4230 = vrot.lane.b32.xlu0 %v12958_v7, %s15171_s26  ;;  %v3400_v23 = vsel %vm15573_vm12, %v12910_v13, %v3399_v14  ;;  %v3401_v12 = vrot.slane %v3399_v14, 4  ;;  %v12926_v45 = vrot.slane %v3942_v3, 9  ;;  %v4008_v55 = vrot.slane %v15628_v54, 5  ;;  %v15694_v13 = vld [vmem:[#allocation2 + $0x20] sm:$0x1] }
  0x6a   : > { %v1287_v9 = vrot.slane %v1285_v32, 7  ;;  %v1295_v8 = vrot.slane %v1293_v37, 7  ;;  %v4011_v44 = vrot.slane %v15679_v2, 5  ;;  %v12911_v28 = vrot.slane %v3334_v31, 9  ;;  %v15697_v14 = vld [vmem:[#allocation2 + $0x10] sm:$0xf] }
  0x6b   : > { %v3403_v60 = vsel %vm15573_vm12, %v3401_v12, %v3402_v30  ;;  %v4009_v0 = vsel %vm15573_vm12, %v12926_v45, %v4008_v55  ;;  %v4010_v7 = vrot.slane %v4008_v55, 4  ;;  %v3406_v3 = vrot.slane %v15636_v63, 5  ;;  %v15699_v31 = vld [vmem:[#allocation2 + $0x14] sm:$0x1] }
  0x6c   : > { %v1290_v32 = vor.u32 %v1288_v38, %v1287_v9  ;;  %v1291_v37 = vrot.slane %v1287_v9, 4  ;;  %v1298_v34 = vor.u32 %v1296_v27, %v1295_v8  ;;  %v1300_v6 = vrot.slane %v1295_v8, 4 }
  0x6d   : > { %4408 = vrot.lane.b32.xlu0 %v12991_v24, %s15168_s18  ;;  %v13022_v30 = vcombine.low %v3400_v23, %v3403_v60  ;;  %v4012_v12 = vsel %vm15573_vm12, %v4010_v7, %v4011_v44  ;;  %v3407_v45 = vsel %vm15573_vm12, %v12911_v28, %v3406_v3  ;;  %v3408_v55 = vrot.slane %v3406_v3, 4 }
  0x6e   : > { %v1299_v8 = vsel %vm15482_vm9, %v1291_v37, %v1298_v34  ;;  %v1511_v9 = vsel %vm15472_vm8, %v1290_v32, %v1510_v22  ;;  %v1515_v24 = vsel %vm15466_vm7, %v1300_v6, %v1514_v15  ;;  %v13070_v38 = vcombine.low %v4009_v0, %v4012_v12 }
  0x6f   : > { %v21589_v27 = vmov 0   ;;  %1512 = vst [vmem:[#allocation2 + $0x84] sm:$0xf] %v1511_v9  ;;  %1513 = vst.msk [vmem:[#allocation2 + $0x88] sm:$0xf] %vm975_vm0, %v1299_v8  ;;  %v3409_v28 = vrot.slane %v15694_v13, 5  ;;  %v15722_v22 = vpack.c.bf16 %v274_v20, %v273_v21  ;;  %v13761_v6 = vpack.c.bf16 %v273_v21, %v273_v21 }
  0x70   : > { %508 = vmatprep.mubr.bf16.mxu1 %v21589_v27  ;;  %1516 = vst [vmem:[#allocation2 + $0x8c] sm:$0x1] %v1515_v24  ;;  %v12895_v23 = vrot.slane %v2723_v5, 9  ;;  %v2798_v44 = vrot.slane %v15697_v14, 5  ;;  %v2801_v34 = vrot.slane %v15699_v31, 5  ;;  %4822 = vrot.lane.b32.xlu1 %v13070_v38, %s15172_s28  ;;  %v13762_v15 = vpack.c.bf16 %v274_v20, %v274_v20 }
  0x71   : > { %v3565_v60 = vor.u32 %v15634_v61, %v15632_v56  ;;  %4566 = vrot.lane.b32.xlu0 %v13022_v30, %s15173_s29  ;;  %v3410_v5 = vsel %vm15573_vm12, %v3408_v55, %v3409_v28  ;;  %v3568_v3 = vshll.u32 %v15628_v54, 16  ;;  %v1302_v37 = vshrl.u32 %v13761_v6, 16  ;;  %v3943_v20 = vld [vmem:[#allocation2 + $0x24] sm:$0xe]  ;;  %v1517_v8 = vld [vmem:[#allocation2 + $0x90] sm:$0xf]  ;;  %12788 = vmatmul.mubr.msk.bf16.gmra.mrb[32].mxu1 %vm328_vm4, %v15557_v46 }
  0x72   : > { %v2799_v0 = vsel %vm15573_vm12, %v12895_v23, %v2798_v44  ;;  %v2800_v7 = vrot.slane %v2798_v44, 4  ;;  %v13023_v32 = vcombine.low %v3407_v45, %v3410_v5  ;;  %v1305_v12 = vshll.u32 %v13761_v6, 16  ;;  %v1521_v27 = vld [vmem:[#allocation2 + $0x98] sm:$0x1]  ;;  %v15740_v6 = vld [vmem:[#allocation2 + $0x2c] sm:$0x1] }
  0x73   : > { %v1310_v21 = vshrl.u32 %v13762_v15, 16  ;;  %v1313_v61 = vshll.u32 %v13762_v15, 16  ;;  %v3566_v30 = vrot.slane %v3565_v60, 4  ;;  %v3570_v9 = vrot.slane %v3568_v3, 5  ;;  %v15746_v3 = vld [vmem:[#allocation3] sm:$0xff] }
  0x74   : > { %v2802_v56 = vsel %vm15573_vm12, %v2800_v7, %v2801_v34  ;;  %v1304_v55 = vrot.slane %v1302_v37, 7  ;;  %v21590_v28 = vshrl.u32 %v15628_v54, 16  ;;  %v3578_v44 = vshll.u32 %v15679_v2, 16  ;;  %v2289_v7 = vld [vmem:[#allocation2 + $0xc] sm:$0xf]  ;;  %518 = vmatprep.mubr.bf16.mxu1 %v15746_v3 }
  0x75   : > { %v12975_v24 = vcombine.low %v2799_v0, %v2802_v56  ;;  %v1312_v38 = vrot.slane %v1310_v21, 7  ;;  %4568 = vrot.lane.b32.xlu0 %v13023_v32, %s15173_s29  ;;  %v3571_v45 = vsel %vm15624_vm15, %v3566_v30, %v3570_v9  ;;  %v12927_v34 = vrot.slane %v3943_v20, 9  ;;  %v2724_v20 = vld [vmem:[#allocation2 + $0x18] sm:$0xe] }
  0x76   : > { %v3574_v23 = vrot.slane %v21590_v28, 4  ;;  %v4015_v15 = vrot.slane %v15645_v10, 5  ;;  %v1307_v60 = vor.u32 %v1305_v12, %v1304_v55  ;;  %v1308_v54 = vrot.slane %v1304_v55, 4  ;;  %v276_v55 = vld [vmem:[%s15432_s17 + $0xc8] sm:$0xff] }
  0x77   : > { %4312 = vrot.lane.b32.xlu1 %v12975_v24, %s15169_s19  ;;  %v1315_v5 = vor.u32 %v1313_v61, %v1312_v38  ;;  %v1317_v0 = vrot.slane %v1312_v38, 4  ;;  %v3580_v32 = vrot.slane %v3578_v44, 5  ;;  %v4018_v30 = vrot.slane %v15740_v6, 5  ;;  %v275_v24 = vld [vmem:[%s15432_s17 + $0xc0] sm:$0xff]  ;;  %v15762_v44 = vld [vmem:[#allocation2 + $0x1c] sm:$0xf] }
  0x78   : > { %v3575_v2 = vor.u32 %v3574_v23, %v3570_v9  ;;  %v4016_v37 = vsel %vm15573_vm12, %v12927_v34, %v4015_v15  ;;  %v4017_v21 = vrot.slane %v4015_v15, 4  ;;  %v1518_v56 = vsel %vm15472_vm8, %v1307_v60, %v1517_v8  ;;  %v15768_v15 = vld [vmem:[#allocation2 + $0x20] sm:$0x1] }
  0x79   : > { %v1316_v12 = vsel %vm15482_vm9, %v1308_v54, %v1315_v5  ;;  %v1522_v61 = vsel %vm15466_vm7, %v1317_v0, %v1521_v27  ;;  %1519 = vst [vmem:[#allocation2 + $0x90] sm:$0xf] %v1518_v56  ;;  %v2363_v38 = vshrl.u32 %v2289_v7, 16  ;;  %v2366_v28 = vshll.u32 %v2289_v7, 16  ;;  %12789 = vmatmul.mubr.msk.bf16.gmra.mrb[36].mxu1 %vm328_vm4, %v15607_v62 }
  0x7a   : > { %1520 = vst.msk [vmem:[#allocation2 + $0x94] sm:$0xf] %vm975_vm0, %v1316_v12  ;;  %1523 = vst [vmem:[#allocation2 + $0x98] sm:$0x1] %v1522_v61  ;;  %v3576_v9 = vrot.slane %v3575_v2, 4  ;;  %v2372_v23 = vshll.u32 %v15697_v14, 16  ;;  %v4019_v8 = vsel %vm15573_vm12, %v4017_v21, %v4018_v30  ;;  %v15775_v30 = vpack.c.bf16 %v276_v55, %v275_v24  ;;  %528 = vmatprep.mubr.bf16.mxu1 %v15746_v3 }
  0x7b   : > { %v2376_v27 = vshrl.u32 %v15697_v14, 16  ;;  %v2382_v34 = vshll.u32 %v15699_v31, 16  ;;  %v12896_v60 = vrot.slane %v2724_v20, 9  ;;  %v13071_v5 = vcombine.low %v4016_v37, %v4019_v8 }
  0x7c   : > { %v3581_v54 = vsel %vm15624_vm15, %v3576_v9, %v3580_v32  ;;  %v2365_v0 = vrot.slane %v2363_v38, 4  ;;  %v2368_v7 = vrot.slane %v2366_v28, 5  ;;  %v2374_v12 = vrot.slane %v2372_v23, 5 }
  0x7d   : > { %v13054_v2 = vcombine.low %v3571_v45, %v3581_v54  ;;  %v2378_v56 = vrot.slane %v2376_v27, 4  ;;  %v2384_v61 = vrot.slane %v2382_v34, 5  ;;  %4824 = vrot.lane.b32.xlu1 %v13071_v5, %s15172_s28  ;;  %v2805_v14 = vrot.slane %v15762_v44, 5 }
  0x7e   : > { %v2369_v21 = vor.u32 %v2368_v7, %v2365_v0  ;;  %v2808_v31 = vrot.slane %v15768_v15, 5  ;;  %v13763_v45 = vpack.c.bf16 %v275_v24, %v275_v24  ;;  %v13764_v37 = vpack.c.bf16 %v276_v55, %v276_v55 }
  0x7f   : > { %4742 = vrot.lane.b32.xlu0 %v13054_v2, %s15174_s9  ;;  %v2379_v32 = vor.u32 %v2378_v56, %v2374_v12  ;;  %v3592_v20 = vshll.u32 %v15645_v10, 16  ;;  %v2806_v38 = vsel %vm15573_vm12, %v12896_v60, %v2805_v14  ;;  %v2807_v28 = vrot.slane %v2805_v14, 4 }
  0x80   : > { %v2370_v9 = vrot.slane %v2369_v21, 4  ;;  %v3589_v23 = vor.u32 %v15677_v42, %v15669_v51  ;;  %v1319_v27 = vshrl.u32 %v13763_v45, 16  ;;  %v1322_v34 = vshll.u32 %v13763_v45, 16  ;;  %v1524_v21 = vld [vmem:[#allocation2 + $0x9c] sm:$0xf] }
  0x81   : > { %v2380_v8 = vrot.slane %v2379_v32, 4  ;;  %v1327_v54 = vshrl.u32 %v13764_v37, 16  ;;  %v2809_v55 = vsel %vm15573_vm12, %v2807_v28, %v2808_v31  ;;  %v1330_v5 = vshll.u32 %v13764_v37, 16  ;;  %v1528_v42 = vld [vmem:[#allocation2 + $0xa4] sm:$0x1]  ;;  %12790 = vmatmul.mubr.msk.bf16.gmra.mrb[40].mxu1 %vm328_vm4, %v15671_v52 }
  0x82   : > { %v2375_v24 = vsel %vm15624_vm15, %v2370_v9, %v2374_v12  ;;  %v3590_v0 = vrot.slane %v3589_v23, 4  ;;  %v12976_v60 = vcombine.low %v2806_v38, %v2809_v55  ;;  %v1321_v2 = vrot.slane %v1319_v27, 7  ;;  %v2291_v23 = vld [vmem:[#allocation2 + $0x18] sm:$0xf]  ;;  %538 = vmatprep.mubr.bf16.mxu1 %v15746_v3 }
  0x83   : > { %v2385_v7 = vsel %vm15624_vm15, %v2380_v8, %v2384_v61  ;;  %v1329_v56 = vrot.slane %v1327_v54, 7  ;;  %v3594_v14 = vrot.slane %v3592_v20, 5  ;;  %v21591_v32 = vshrl.u32 %v15645_v10, 16 }
  0x84   : > { %v12959_v51 = vcombine.low %v2375_v24, %v2385_v7  ;;  %v3602_v12 = vshll.u32 %v15740_v6, 16  ;;  %4314 = vrot.lane.b32.xlu1 %v12976_v60, %s15169_s19  ;;  %v1324_v31 = vor.u32 %v1322_v34, %v1321_v2  ;;  %v1325_v37 = vrot.slane %v1321_v2, 4 }
  0x85   : > { %v3598_v45 = vrot.slane %v21591_v32, 4  ;;  %v1332_v9 = vor.u32 %v1330_v5, %v1329_v56  ;;  %v1334_v28 = vrot.slane %v1329_v56, 4  ;;  %v3595_v61 = vsel %vm15624_vm15, %v3590_v0, %v3594_v14 }
  0x86   : > { %4232 = vrot.lane.b32.xlu0 %v12959_v51, %s15171_s26  ;;  %v3604_v8 = vrot.slane %v3602_v12, 5  ;;  %v21592_v20 = vshll.u32 %v15578_v11, 16  ;;  %v1525_v27 = vsel %vm15472_vm8, %v1324_v31, %v1524_v21  ;;  %v2969_v54 = vshll.u32 %v15660_v36, 16 }
  0x87   : > { %v3599_v38 = vor.u32 %v3598_v45, %v3594_v14  ;;  %v1333_v6 = vsel %vm15482_vm9, %v1325_v37, %v1332_v9  ;;  %v1529_v34 = vsel %vm15466_vm7, %v1334_v28, %v1528_v42  ;;  %1526 = vst [vmem:[#allocation2 + $0x9c] sm:$0xf] %v1525_v27  ;;  %v2387_v5 = vshrl.u32 %v2291_v23, 16  ;;  %v277_v45 = vld [vmem:[%s15432_s17 + $0xd0] sm:$0xff] }
  0x88   : > { %v2961_v10 = vrot.slane %v21592_v20, 5  ;;  %1527 = vst.msk [vmem:[#allocation2 + $0xa0] sm:$0xf] %vm975_vm0, %v1333_v6  ;;  %1530 = vst [vmem:[#allocation2 + $0xa4] sm:$0x1] %v1529_v34  ;;  %v2971_v0 = vrot.slane %v2969_v54, 5  ;;  %v13765_v27 = vpack.c.bf16 %v277_v45, %v277_v45 }
  0x89   : > { %v3600_v11 = vrot.slane %v3599_v38, 4  ;;  %v2390_v7 = vshll.u32 %v2291_v23, 16  ;;  %v2396_v36 = vshll.u32 %v15762_v44, 16  ;;  %v2400_v60 = vshrl.u32 %v15762_v44, 16  ;;  %v2905_v38 = vld [vmem:[#allocation2 + $0x24] sm:$0xf]  ;;  %12791 = vmatmul.mubr.msk.bf16.gmra.mrb[44].mxu1 %vm328_vm4, %v15722_v22 }
  0x8a   : > { %v2962_v24 = vsel %vm15624_vm15, %v15614_v29, %v2961_v10  ;;  %v2966_v55 = vor.u32 %v15600_v41, %v2961_v10  ;;  %v2389_v21 = vrot.slane %v2387_v5, 4  ;;  %v2406_v51 = vshll.u32 %v15768_v15, 16  ;;  %v278_v41 = vld [vmem:[%s15432_s17 + $0xd8] sm:$0xff]  ;;  %548 = vmatprep.mubr.bf16.mxu1 %v15746_v3 }
  0x8b   : > { %v3605_v2 = vsel %vm15624_vm15, %v3600_v11, %v3604_v8  ;;  %v2392_v14 = vrot.slane %v2390_v7, 5  ;;  %v2398_v29 = vrot.slane %v2396_v36, 5  ;;  %v2402_v32 = vrot.slane %v2400_v60, 4 }
  0x8c   : > { %v2967_v56 = vrot.slane %v2966_v55, 4  ;;  %v13055_v42 = vcombine.low %v3595_v61, %v3605_v2  ;;  %v2408_v31 = vrot.slane %v2406_v51, 5  ;;  %v2980_v44 = vor.u32 %v15667_v50, %v15665_v49  ;;  %v1531_v51 = vld [vmem:[#allocation2 + $0xa8] sm:$0xf] }
  0x8d   : > { %v2983_v37 = vshll.u32 %v15636_v63, 16  ;;  %v2393_v28 = vor.u32 %v2392_v14, %v2389_v21  ;;  %v2403_v15 = vor.u32 %v2402_v32, %v2398_v29  ;;  %v21593_v23 = vshrl.u32 %v15636_v63, 16 }
  0x8e   : > { %v2972_v12 = vsel %vm15624_vm15, %v2967_v56, %v2971_v0  ;;  %4744 = vrot.lane.b32.xlu0 %v13055_v42, %s15174_s9  ;;  %v2981_v8 = vrot.slane %v2980_v44, 4  ;;  %v2993_v10 = vshll.u32 %v15694_v13, 16  ;;  %v15832_v6 = vpack.c.bf16 %v278_v41, %v277_v45  ;;  %v2906_v13 = vld [vmem:[#allocation2 + $0x28] sm:$0xf]  ;;  %v3335_v44 = vld [vmem:[#allocation2 + $0x24] sm:$0xe] }
  0x8f   : > { %v13006_v9 = vcombine.low %v2962_v24, %v2972_v12  ;;  %v2989_v61 = vrot.slane %v21593_v23, 4  ;;  %v2985_v20 = vrot.slane %v2983_v37, 5  ;;  %v2394_v49 = vrot.slane %v2393_v28, 4  ;;  %v2935_v12 = vld [vmem:[#allocation2 + $0x2c] sm:$0x1] }
  0x90   : > { %v2404_v50 = vrot.slane %v2403_v15, 4  ;;  %v13766_v34 = vpack.c.bf16 %v278_v41, %v278_v41  ;;  %v2995_v11 = vrot.slane %v2993_v10, 5  ;;  %v2998_v24 = vshrl.u32 %v2905_v38, 16  ;;  %v1535_v15 = vld [vmem:[#allocation2 + $0xb0] sm:$0x1] }
  0x91   : > { %4486 = vrot.lane.b32.xlu1 %v13006_v9, %s15175_s10  ;;  %v2986_v63 = vsel %vm15624_vm15, %v2981_v8, %v2985_v20  ;;  %v2990_v54 = vor.u32 %v2989_v61, %v2985_v20  ;;  %v2399_v55 = vsel %vm15624_vm15, %v2394_v49, %v2398_v29  ;;  %v1336_v0 = vshrl.u32 %v13765_v27, 16  ;;  %v15847_v49 = vld [vmem:[#allocation2 + $0x30] sm:$0xf]  ;;  %12792 = vmatmul.mubr.msk.bf16.gmra.mrb[48].mxu1 %vm328_vm4, %v15775_v30 }
  0x92   : > { %v2409_v5 = vsel %vm15624_vm15, %v2404_v50, %v2408_v31  ;;  %v1339_v7 = vshll.u32 %v13765_v27, 16  ;;  %v1344_v2 = vshrl.u32 %v13766_v34, 16  ;;  %v1347_v56 = vshll.u32 %v13766_v34, 16  ;;  %558 = vmatprep.mubr.bf16.mxu1 %v15746_v3 }
  0x93   : > { %v12960_v36 = vcombine.low %v2399_v55, %v2409_v5  ;;  %v2991_v60 = vrot.slane %v2990_v54, 4  ;;  %v1338_v21 = vrot.slane %v1336_v0, 7  ;;  %v3000_v42 = vrot.slane %v2998_v24, 4 }
  0x94   : > { %v3001_v14 = vshll.u32 %v2905_v38, 16  ;;  %v3011_v32 = vshrl.u32 %v2906_v13, 16  ;;  %v1346_v29 = vrot.slane %v1344_v2, 7  ;;  %v12992_v41 = vcombine.low %v2905_v38, %v2906_v13  ;;  %v280_v2 = vld [vmem:[%s15432_s17 + $0xe8] sm:$0xff] }
  0x95   : > { %4234 = vrot.lane.b32.xlu0 %v12960_v36, %s15171_s26  ;;  %v2996_v45 = vsel %vm15624_vm15, %v2991_v60, %v2995_v11  ;;  %v3007_v31 = vshll.u32 %v2906_v13, 16  ;;  %v1341_v9 = vor.u32 %v1339_v7, %v1338_v21  ;;  %v1342_v28 = vrot.slane %v1338_v21, 4  ;;  %v279_v60 = vld [vmem:[%s15432_s17 + $0xe0] sm:$0xff] }
  0x96   : > { %v13007_v37 = vcombine.low %v2986_v63, %v2996_v45  ;;  %v3003_v23 = vrot.slane %v3001_v14, 5  ;;  %v1349_v61 = vor.u32 %v1347_v56, %v1346_v29  ;;  %v1351_v8 = vrot.slane %v1346_v29, 4  ;;  %v15854_v63 = vld [vmem:[#allocation2 + $0x34] sm:$0xf]  ;;  %v3544_v29 = vld [vmem:[#allocation2 + $0x38] sm:$0x1] }
  0x97   : > { %v3009_v20 = vrot.slane %v3007_v31, 5  ;;  %v3013_v10 = vrot.slane %v3011_v32, 4  ;;  %v1532_v38 = vsel %vm15472_vm8, %v1341_v9, %v1531_v51  ;;  %v3017_v27 = vshll.u32 %v2935_v12, 16 }
  0x98   : > { %4488 = vrot.lane.b32.xlu1 %v13007_v37, %s15175_s10  ;;  %v3004_v50 = vor.u32 %v3003_v23, %v3000_v42  ;;  %v12912_v34 = vrot.slane %v3335_v44, 9  ;;  %v1350_v54 = vsel %vm15482_vm9, %v1342_v28, %v1349_v61  ;;  %1533 = vst [vmem:[#allocation2 + $0xa8] sm:$0xf] %v1532_v38  ;;  %v1536_v11 = vsel %vm15466_vm7, %v1351_v8, %v1535_v15  ;;  %v3944_v37 = vld [vmem:[#allocation2 + $0x30] sm:$0xe] }
  0x99   : > { %4410 = vrot.lane.b32.xlu0 %v12992_v41, %s15168_s18  ;;  %v3014_v24 = vor.u32 %v3013_v10, %v3009_v20  ;;  %v3413_v55 = vrot.slane %v2906_v13, 5  ;;  %1534 = vst.msk [vmem:[#allocation2 + $0xac] sm:$0xf] %vm975_vm0, %v1350_v54  ;;  %1537 = vst [vmem:[#allocation2 + $0xb0] sm:$0x1] %v1536_v11  ;;  %v3019_v0 = vrot.slane %v3017_v27, 5  ;;  %v13040_v45 = vcombine.low %v15847_v49, %v15854_v63 }
  0x9a   : > { %v3005_v5 = vrot.slane %v3004_v50, 4  ;;  %v3416_v7 = vrot.slane %v2935_v12, 5  ;;  %v3607_v36 = vshrl.u32 %v15847_v49, 16  ;;  %v3610_v42 = vshll.u32 %v15847_v49, 16  ;;  %v2293_v61 = vld [vmem:[#allocation2 + $0x24] sm:$0xf]  ;;  %12793 = vmatmul.mubr.msk.bf16.gmra.mrb[52].mxu1 %vm328_vm4, %v15832_v6 }
  0x9b   : > { %v3015_v56 = vrot.slane %v3014_v24, 4  ;;  %v3414_v21 = vsel %vm15573_vm12, %v12912_v34, %v3413_v55  ;;  %v3415_v51 = vrot.slane %v3413_v55, 4  ;;  %v3620_v32 = vshrl.u32 %v15854_v63, 16  ;;  %568 = vmatprep.mubr.bf16.mxu1 %v15746_v3  ;;  %v1538_v54 = vld [vmem:[#allocation2 + $0xb4] sm:$0xf] }
  0x9c   : > { %v3010_v13 = vsel %vm15624_vm15, %v3005_v5, %v3009_v20  ;;  %v3609_v14 = vrot.slane %v3607_v36, 4  ;;  %v3612_v31 = vrot.slane %v3610_v42, 5  ;;  %v15878_v44 = vpack.c.bf16 %v280_v2, %v279_v60  ;;  %v1542_v11 = vld [vmem:[#allocation2 + $0xbc] sm:$0x1]  ;;  %v2322_v42 = vld [vmem:[#allocation2 + $0x2c] sm:$0x1] }
  0x9d   : > { %v3020_v41 = vsel %vm15624_vm15, %v3015_v56, %v3019_v0  ;;  %v3417_v12 = vsel %vm15573_vm12, %v3415_v51, %v3416_v7  ;;  %v13767_v15 = vpack.c.bf16 %v279_v60, %v279_v60  ;;  %v13768_v23 = vpack.c.bf16 %v280_v2, %v280_v2  ;;  %v2294_v56 = vld [vmem:[#allocation2 + $0x28] sm:$0xf] }
  0x9e   : > { %v13008_v9 = vcombine.low %v3010_v13, %v3020_v41  ;;  %v13024_v28 = vcombine.low %v3414_v21, %v3417_v12  ;;  %v3613_v8 = vor.u32 %v3612_v31, %v3609_v14  ;;  %v3616_v20 = vshll.u32 %v15854_v63, 16 }
  0x9f   : > { %v3622_v10 = vrot.slane %v3620_v32, 4  ;;  %v3626_v49 = vshll.u32 %v3544_v29, 16  ;;  %v1353_v38 = vshrl.u32 %v13767_v15, 16  ;;  %v1356_v50 = vshll.u32 %v13767_v15, 16  ;;  %v281_v15 = vld [vmem:[%s15432_s17 + $0xf0] sm:$0xff] }
  0xa0   : > { %4490 = vrot.lane.b32.xlu1 %v13008_v9, %s15175_s10  ;;  %v1361_v27 = vshrl.u32 %v13768_v23, 16  ;;  %v1364_v34 = vshll.u32 %v13768_v23, 16  ;;  %4570 = vrot.lane.b32.xlu0 %v13024_v28, %s15173_s29  ;;  %v3614_v24 = vrot.slane %v3613_v8, 4  ;;  %v3618_v55 = vrot.slane %v3616_v20, 5  ;;  %v282_v23 = vld [vmem:[%s15432_s17 + $0xf8] sm:$0xff] }
  0xa1   : > { %v3628_v5 = vrot.slane %v3626_v49, 5  ;;  %v12928_v0 = vrot.slane %v3944_v37, 9  ;;  %v1355_v7 = vrot.slane %v1353_v38, 7  ;;  %v4022_v60 = vrot.slane %v15854_v63, 5  ;;  %v2725_v37 = vld [vmem:[#allocation2 + $0x24] sm:$0xe] }
  0xa2   : > { %v1363_v36 = vrot.slane %v1361_v27, 7  ;;  %v4025_v2 = vrot.slane %v3544_v29, 5  ;;  %v3619_v21 = vsel %vm15624_vm15, %v3614_v24, %v3618_v55  ;;  %v3623_v51 = vor.u32 %v3622_v10, %v3618_v55  ;;  %12794 = vmatmul.mubr.msk.bf16.gmra.mrb[56].mxu1 %vm328_vm4, %v15878_v44 }
  0xa3   : > { %v2411_v13 = vshrl.u32 %v2293_v61, 16  ;;  %v2414_v14 = vshll.u32 %v2293_v61, 16  ;;  %v1358_v32 = vor.u32 %v1356_v50, %v1355_v7  ;;  %v1359_v41 = vrot.slane %v1355_v7, 4  ;;  %578 = vmatprep.mubr.bf16.mxu1 %v15746_v3 }
  0xa4   : > { %4666 = vrot.lane.b32.xlu1 %v13040_v45, %s15170_s20  ;;  %v1366_v12 = vor.u32 %v1364_v34, %v1363_v36  ;;  %v1368_v31 = vrot.slane %v1363_v36, 4  ;;  %v3624_v9 = vrot.slane %v3623_v51, 4  ;;  %v4023_v63 = vsel %vm15573_vm12, %v12928_v0, %v4022_v60  ;;  %v15908_v36 = vld [vmem:[#allocation2 + $0x30] sm:$0xf] }
  0xa5   : > { %v4024_v29 = vrot.slane %v4022_v60, 4  ;;  %v2413_v28 = vrot.slane %v2411_v13, 4  ;;  %v1539_v61 = vsel %vm15472_vm8, %v1358_v32, %v1538_v54  ;;  %v2416_v20 = vrot.slane %v2414_v14, 5 }
  0xa6   : > { %v1367_v8 = vsel %vm15482_vm9, %v1359_v41, %v1366_v12  ;;  %v1543_v45 = vsel %vm15466_vm7, %v1368_v31, %v1542_v11  ;;  %1540 = vst [vmem:[#allocation2 + $0xb4] sm:$0xf] %v1539_v61  ;;  %v3629_v10 = vsel %vm15624_vm15, %v3624_v9, %v3628_v5  ;;  %v2420_v38 = vshll.u32 %v2294_v56, 16  ;;  %v15918_v12 = vld [vmem:[#allocation2 + $0x34] sm:$0xf] }
  0xa7   : > { %1541 = vst.msk [vmem:[#allocation2 + $0xb8] sm:$0xf] %vm975_vm0, %v1367_v8  ;;  %1544 = vst [vmem:[#allocation2 + $0xbc] sm:$0x1] %v1543_v45  ;;  %v4026_v49 = vsel %vm15573_vm12, %v4024_v29, %v4025_v2  ;;  %v2424_v50 = vshrl.u32 %v2294_v56, 16  ;;  %v13056_v27 = vcombine.low %v3619_v21, %v3629_v10  ;;  %v2417_v54 = vor.u32 %v2416_v20, %v2413_v28 }
  0xa8   : > { %v13072_v34 = vcombine.low %v4023_v63, %v4026_v49  ;;  %v2430_v11 = vshll.u32 %v2322_v42, 16  ;;  %v2422_v24 = vrot.slane %v2420_v38, 5  ;;  %v12897_v0 = vrot.slane %v2725_v37, 9  ;;  %v1549_v10 = vld [vmem:[#allocation2 + $0xc8] sm:$0x1] }
  0xa9   : > { %v2426_v55 = vrot.slane %v2424_v50, 4  ;;  %v2812_v7 = vrot.slane %v2294_v56, 5  ;;  %4746 = vrot.lane.b32.xlu0 %v13056_v27, %s15174_s9  ;;  %v2418_v5 = vrot.slane %v2417_v54, 4  ;;  %v2815_v2 = vrot.slane %v2322_v42, 5  ;;  %v2936_v50 = vld [vmem:[#allocation2 + $0x38] sm:$0x1] }
  0xaa   : > { %4826 = vrot.lane.b32.xlu1 %v13072_v34, %s15172_s28  ;;  %v2432_v60 = vrot.slane %v2430_v11, 5  ;;  %v15912_v51 = vpack.c.bf16 %v282_v23, %v281_v15  ;;  %v13769_v32 = vpack.c.bf16 %v281_v15, %v281_v15  ;;  %v13770_v41 = vpack.c.bf16 %v282_v23, %v282_v23  ;;  %v1545_v15 = vld [vmem:[#allocation2 + $0xc0] sm:$0xf] }
  0xab   : > { %v2427_v21 = vor.u32 %v2426_v55, %v2422_v24  ;;  %v2813_v13 = vsel %vm15573_vm12, %v12897_v0, %v2812_v7  ;;  %v2814_v14 = vrot.slane %v2812_v7, 4  ;;  %v2423_v56 = vsel %vm15624_vm15, %v2418_v5, %v2422_v24  ;;  %v3336_v24 = vld [vmem:[#allocation2 + $0x30] sm:$0xe] }
  0xac   : > { %v3022_v31 = vshrl.u32 %v15908_v36, 16  ;;  %v3025_v37 = vshll.u32 %v15908_v36, 16  ;;  %v1370_v63 = vshrl.u32 %v13769_v32, 16  ;;  %v1373_v29 = vshll.u32 %v13769_v32, 16  ;;  %12795 = vmatmul.mubr.msk.bf16.gmra.mrb[60].mxu1 %vm328_vm4, %v15912_v51 }
  0xad   : > { %v2428_v9 = vrot.slane %v2427_v21, 4  ;;  %v2816_v42 = vsel %vm15573_vm12, %v2814_v14, %v2815_v2  ;;  %v1378_v8 = vshrl.u32 %v13770_v41, 16  ;;  %v1381_v61 = vshll.u32 %v13770_v41, 16  ;;  %621 = vmatprep.mubr.bf16.mxu1 %v15746_v3  ;;  %v15938_v2 = vld [vmem:[#allocation2 + $0x40] sm:$0xf] }
  0xae   : > { %v12977_v28 = vcombine.low %v2813_v13, %v2816_v42  ;;  %v3024_v45 = vrot.slane %v3022_v31, 4  ;;  %v1372_v20 = vrot.slane %v1370_v63, 7  ;;  %v3027_v49 = vrot.slane %v3025_v37, 5 }
  0xaf   : > { %v2433_v23 = vsel %vm15624_vm15, %v2428_v9, %v2432_v60  ;;  %v3035_v38 = vshrl.u32 %v15918_v12, 16  ;;  %v1380_v34 = vrot.slane %v1378_v8, 7  ;;  %v12993_v54 = vcombine.low %v15908_v36, %v15918_v12  ;;  %v15936_v60 = vld [vmem:[#allocation2 + $0x3c] sm:$0xf]  ;;  %v3545_v8 = vld [vmem:[#allocation2 + $0x44] sm:$0x1] }
  0xb0   : > { %v12961_v27 = vcombine.low %v2423_v56, %v2433_v23  ;;  %4316 = vrot.lane.b32.xlu1 %v12977_v28, %s15169_s19  ;;  %v319_v11 = vcombine.high %v15438_v19, %v15438_v19  ;;  %v1375_v55 = vor.u32 %v1373_v29, %v1372_v20  ;;  %v1376_v0 = vrot.slane %v1372_v20, 4  ;;  %v3945_v23 = vld [vmem:[#allocation2 + $0x3c] sm:$0xe] }
  0xb1   : > { %v3028_v7 = vor.u32 %v3027_v49, %v3024_v45  ;;  %v3031_v5 = vshll.u32 %v15918_v12, 16  ;;  %v1383_v21 = vor.u32 %v1381_v61, %v1380_v34  ;;  %v1385_v13 = vrot.slane %v1380_v34, 4 }
  0xb2   : > { %4236 = vrot.lane.b32.xlu0 %v12961_v27, %s15171_s26  ;;  %12796 = vmatprep.subr.msk.bf16.mxu1 %vm377_vm2, %v319_v11  ;;  %v3037_v36 = vrot.slane %v3035_v38, 4  ;;  %v3041_v14 = vshll.u32 %v2936_v50, 16  ;;  %v1546_v32 = vsel %vm15472_vm8, %v1375_v55, %v1545_v15  ;;  %v385_v31 = vsel %vm377_vm2, %v15438_v19, 0  ;;  %v2295_v38 = vld [vmem:[#allocation2 + $0x30] sm:$0xf] }
  0xb3   : > { %v3029_v56 = vrot.slane %v3028_v7, 4  ;;  %v3033_v41 = vrot.slane %v3031_v5, 5  ;;  %v1384_v37 = vsel %vm15482_vm9, %v1376_v0, %v1383_v21  ;;  %1547 = vst [vmem:[#allocation2 + $0xc0] sm:$0xf] %v1546_v32  ;;  %v1550_v9 = vsel %vm15466_vm7, %v1385_v13, %v1549_v10  ;;  %590 = vmatpush1.bf16.msra.mxu1 %v385_v31  ;;  %v2296_v7 = vld [vmem:[#allocation2 + $0x34] sm:$0xf] }
  0xb4   : > { %v3043_v42 = vrot.slane %v3041_v14, 5  ;;  %v12913_v63 = vrot.slane %v3336_v24, 9  ;;  %1548 = vst.msk [vmem:[#allocation2 + $0xc4] sm:$0xf] %vm975_vm0, %v1384_v37  ;;  %1551 = vst [vmem:[#allocation2 + $0xc8] sm:$0x1] %v1550_v9  ;;  %v13041_v45 = vcombine.low %v15936_v60, %v15938_v2 }
  0xb5   : > { %v3034_v53 = vsel %vm15624_vm15, %v3029_v56, %v3033_v41  ;;  %v3038_v29 = vor.u32 %v3037_v36, %v3033_v41  ;;  %v3420_v28 = vrot.slane %v15918_v12, 5  ;;  %v3423_v19 = vrot.slane %v2936_v50, 5  ;;  %v2323_v36 = vld [vmem:[#allocation2 + $0x38] sm:$0x1] }
  0xb6   : > { %4412 = vrot.lane.b32.xlu0 %v12993_v54, %s15168_s18  ;;  %v3631_v61 = vshrl.u32 %v15936_v60, 16  ;;  %v3634_v48 = vshll.u32 %v15936_v60, 16  ;;  %v3644_v15 = vshrl.u32 %v15938_v2, 16  ;;  %v3640_v12 = vshll.u32 %v15938_v2, 16  ;;  %12797 = vmatmul.mubr.msk.bf16.vlgmr.msra.gmra.mrb[64].mxu1 %vm328_vm4, %v15455_v33 }
  0xb7   : > { %v3039_v20 = vrot.slane %v3038_v29, 4  ;;  %v3421_v10 = vsel %vm15573_vm12, %v12913_v63, %v3420_v28  ;;  %v3422_v49 = vrot.slane %v3420_v28, 4  ;;  %v3650_v54 = vshll.u32 %v3545_v8, 16  ;;  %631 = vmatprep.mubr.bf16.mxu1 %v15746_v3  ;;  %v2726_v63 = vld [vmem:[#allocation2 + $0x30] sm:$0xe] }
  0xb8   : > { %v3633_v50 = vrot.slane %v3631_v61, 4  ;;  %v3636_v27 = vrot.slane %v3634_v48, 5  ;;  %v3646_v34 = vrot.slane %v3644_v15, 4  ;;  %v3642_v55 = vrot.slane %v3640_v12, 5  ;;  %v15977_v15 = vld [vmem:[#allocation2 + $0x3c] sm:$0xf] }
  0xb9   : > { %v3044_v11 = vsel %vm15624_vm15, %v3039_v20, %v3043_v42  ;;  %v3424_v24 = vsel %vm15573_vm12, %v3422_v49, %v3423_v19  ;;  %v12929_v0 = vrot.slane %v3945_v23, 9  ;;  %v3652_v13 = vrot.slane %v3650_v54, 5  ;;  %v2910_v12 = vld [vmem:[#allocation2 + $0x40] sm:$0xf]  ;;  %v2937_v54 = vld [vmem:[#allocation2 + $0x44] sm:$0x1] }
  0xba   : > { %v13009_v5 = vcombine.low %v3034_v53, %v3044_v11  ;;  %v13025_v60 = vcombine.low %v3421_v10, %v3424_v24  ;;  %v3637_v21 = vor.u32 %v3636_v27, %v3633_v50  ;;  %v3647_v14 = vor.u32 %v3646_v34, %v3642_v55 }
  0xbb   : > { %v4029_v32 = vrot.slane %v15938_v2, 5  ;;  %v4032_v56 = vrot.slane %v3545_v8, 5  ;;  %v2435_v41 = vshrl.u32 %v2295_v38, 16  ;;  %v2438_v37 = vshll.u32 %v2295_v38, 16 }
  0xbc   : > { %4492 = vrot.lane.b32.xlu1 %v13009_v5, %s15175_s10  ;;  %4572 = vrot.lane.b32.xlu0 %v13025_v60, %s15173_s29  ;;  %v3638_v31 = vrot.slane %v3637_v21, 4  ;;  %v2444_v9 = vshll.u32 %v2296_v7, 16  ;;  %v2448_v42 = vshrl.u32 %v2296_v7, 16  ;;  %v3648_v29 = vrot.slane %v3647_v14, 4  ;;  %v3337_v5 = vld [vmem:[#allocation2 + $0x3c] sm:$0xe] }
  0xbd   : > { %v4030_v53 = vsel %vm15573_vm12, %v12929_v0, %v4029_v32  ;;  %v4031_v28 = vrot.slane %v4029_v32, 4  ;;  %v2437_v19 = vrot.slane %v2435_v41, 4  ;;  %v2440_v8 = vrot.slane %v2438_v37, 5  ;;  %v15990_v14 = vld [vmem:[#allocation2 + $0x48] sm:$0xf] }
  0xbe   : > { %v3643_v2 = vsel %vm15624_vm15, %v3638_v31, %v3642_v55  ;;  %v2446_v61 = vrot.slane %v2444_v9, 5  ;;  %v2450_v48 = vrot.slane %v2448_v42, 4  ;;  %v3653_v23 = vsel %vm15624_vm15, %v3648_v29, %v3652_v13  ;;  %12798 = vmatmul.mubr.msk.bf16.gmra.mrb[68].mxu1 %vm328_vm4, %v15457_v35  ;;  %v15995_v41 = vld [vmem:[#allocation2 + $0x4c] sm:$0xf] }
  0xbf   : > { %v4033_v20 = vsel %vm15573_vm12, %v4031_v28, %v4032_v56  ;;  %v2454_v10 = vshll.u32 %v2323_v36, 16  ;;  %v12898_v49 = vrot.slane %v2726_v63, 9  ;;  %v13057_v38 = vcombine.low %v3643_v2, %v3653_v23  ;;  %641 = vmatprep.mubr.bf16.mxu1 %v15746_v3 }
  0xc0   : > { %4668 = vrot.lane.b32.xlu1 %v13041_v45, %s15170_s20  ;;  %v13073_v50 = vcombine.low %v4030_v53, %v4033_v20  ;;  %v2441_v27 = vor.u32 %v2440_v8, %v2437_v19  ;;  %v2451_v34 = vor.u32 %v2450_v48, %v2446_v61  ;;  %v2819_v24 = vrot.slane %v2296_v7, 5  ;;  %v3546_v20 = vld [vmem:[#allocation2 + $0x50] sm:$0x1] }
  0xc1   : > { %v2456_v11 = vrot.slane %v2454_v10, 5  ;;  %v2822_v55 = vrot.slane %v2323_v36, 5  ;;  %v3046_v0 = vshrl.u32 %v15977_v15, 16  ;;  %4748 = vrot.lane.b32.xlu0 %v13057_v38, %s15174_s9  ;;  %v3049_v45 = vshll.u32 %v15977_v15, 16 }
  0xc2   : > { %v2442_v60 = vrot.slane %v2441_v27, 4  ;;  %v2452_v21 = vrot.slane %v2451_v34, 4  ;;  %v3059_v13 = vshrl.u32 %v2910_v12, 16  ;;  %v2820_v7 = vsel %vm15573_vm12, %v12898_v49, %v2819_v24  ;;  %v3946_v27 = vld [vmem:[#allocation2 + $0x48] sm:$0xe] }
  0xc3   : > { %v2821_v36 = vrot.slane %v2819_v24, 4  ;;  %v3048_v32 = vrot.slane %v3046_v0, 4  ;;  %v12994_v56 = vcombine.low %v15977_v15, %v2910_v12  ;;  %v3051_v3 = vrot.slane %v3049_v45, 5 }
  0xc4   : > { %4828 = vrot.lane.b32.xlu1 %v13073_v50, %s15172_s28  ;;  %v2447_v31 = vsel %vm15624_vm15, %v2442_v60, %v2446_v61  ;;  %v2457_v37 = vsel %vm15624_vm15, %v2452_v21, %v2456_v11  ;;  %v3055_v9 = vshll.u32 %v2910_v12, 16  ;;  %v3061_v29 = vrot.slane %v3059_v13, 4  ;;  %v2297_v60 = vld [vmem:[#allocation2 + $0x3c] sm:$0xf] }
  0xc5   : > { %v12962_v42 = vcombine.low %v2447_v31, %v2457_v37  ;;  %v2823_v63 = vsel %vm15573_vm12, %v2821_v36, %v2822_v55  ;;  %v3065_v53 = vshll.u32 %v2937_v54, 16  ;;  %v3052_v19 = vor.u32 %v3051_v3, %v3048_v32  ;;  %v16018_v21 = vld [vmem:[#allocation3] sm:$0xff]  ;;  %v2298_v36 = vld [vmem:[#allocation2 + $0x40] sm:$0xf] }
  0xc6   : > { %v12978_v28 = vcombine.low %v2820_v7, %v2823_v63  ;;  %v3057_v2 = vrot.slane %v3055_v9, 5  ;;  %v12914_v8 = vrot.slane %v3337_v5, 9  ;;  %v3427_v15 = vrot.slane %v2910_v12, 5  ;;  %12799 = vmatmul.mubr.msk.bf16.gmra.mrb[72].mxu1 %vm328_vm4, %v15460_v40  ;;  %v2324_v9 = vld [vmem:[#allocation2 + $0x44] sm:$0x1] }
  0xc7   : > { %4238 = vrot.lane.b32.xlu0 %v12962_v42, %s15171_s26  ;;  %v3067_v48 = vrot.slane %v3065_v53, 5  ;;  %v3430_v61 = vrot.slane %v2937_v54, 5  ;;  %v3655_v23 = vshrl.u32 %v15990_v14, 16  ;;  %v3053_v10 = vrot.slane %v3052_v19, 4  ;;  %651 = vmatprep.mubr.bf16.mxu1 %v16018_v21 }
  0xc8   : > { %4318 = vrot.lane.b32.xlu1 %v12978_v28, %s15169_s19  ;;  %v3062_v49 = vor.u32 %v3061_v29, %v3057_v2  ;;  %v3658_v38 = vshll.u32 %v15990_v14, 16  ;;  %v3668_v50 = vshrl.u32 %v15995_v41, 16  ;;  %v3428_v34 = vsel %vm15573_vm12, %v12914_v8, %v3427_v15  ;;  %v2727_v8 = vld [vmem:[#allocation2 + $0x3c] sm:$0xe] }
  0xc9   : > { %v3429_v11 = vrot.slane %v3427_v15, 4  ;;  %v3657_v24 = vrot.slane %v3655_v23, 4  ;;  %v13042_v12 = vcombine.low %v15990_v14, %v15995_v41  ;;  %v3058_v54 = vsel %vm15624_vm15, %v3053_v10, %v3057_v2  ;;  %v16031_v10 = vld [vmem:[#allocation2 + $0x48] sm:$0xf] }
  0xca   : > { %v3063_v55 = vrot.slane %v3062_v49, 4  ;;  %v3660_v0 = vrot.slane %v3658_v38, 5  ;;  %v3664_v5 = vshll.u32 %v15995_v41, 16  ;;  %v3670_v13 = vrot.slane %v3668_v50, 4  ;;  %v16035_v50 = vld [vmem:[#allocation2 + $0x4c] sm:$0xf] }
  0xcb   : > { %4414 = vrot.lane.b32.xlu0 %v12994_v56, %s15168_s18  ;;  %v3431_v45 = vsel %vm15573_vm12, %v3429_v11, %v3430_v61  ;;  %v3674_v14 = vshll.u32 %v3546_v20, 16  ;;  %v12930_v7 = vrot.slane %v3946_v27, 9  ;;  %v4036_v29 = vrot.slane %v15995_v41, 5 }
  0xcc   : > { %v3068_v32 = vsel %vm15624_vm15, %v3063_v55, %v3067_v48  ;;  %v13026_v31 = vcombine.low %v3428_v34, %v3431_v45  ;;  %v3661_v37 = vor.u32 %v3660_v0, %v3657_v24  ;;  %v3666_v3 = vrot.slane %v3664_v5, 5 }
  0xcd   : > { %v13010_v42 = vcombine.low %v3058_v54, %v3068_v32  ;;  %v3676_v63 = vrot.slane %v3674_v14, 5  ;;  %v4039_v53 = vrot.slane %v3546_v20, 5  ;;  %v2459_v19 = vshrl.u32 %v2297_v60, 16 }
  0xce   : > { %v3662_v56 = vrot.slane %v3661_v37, 4  ;;  %v3671_v28 = vor.u32 %v3670_v13, %v3666_v3  ;;  %v2462_v2 = vshll.u32 %v2297_v60, 16  ;;  %v4037_v48 = vsel %vm15573_vm12, %v12930_v7, %v4036_v29  ;;  %12800 = vmatmul.mubr.msk.bf16.gmra.mrb[76].mxu1 %vm328_vm4, %v15476_v58  ;;  %v2938_v7 = vld [vmem:[#allocation2 + $0x50] sm:$0x1] }
  0xcf   : > { %4494 = vrot.lane.b32.xlu1 %v13010_v42, %s15175_s10  ;;  %4574 = vrot.lane.b32.xlu0 %v13026_v31, %s15173_s29  ;;  %v4038_v15 = vrot.slane %v4036_v29, 4  ;;  %v2468_v61 = vshll.u32 %v2298_v36, 16  ;;  %v2472_v23 = vshrl.u32 %v2298_v36, 16  ;;  %v2461_v49 = vrot.slane %v2459_v19, 4  ;;  %v16055_v19 = vld [vmem:[#allocation2 + $0x54] sm:$0xf] }
  0xd0   : > { %v3667_v41 = vsel %vm15624_vm15, %v3662_v56, %v3666_v3  ;;  %v3672_v20 = vrot.slane %v3671_v28, 4  ;;  %v2464_v38 = vrot.slane %v2462_v2, 5  ;;  %v2478_v24 = vshll.u32 %v2324_v9, 16  ;;  %661 = vmatprep.mubr.bf16.mxu1 %v16018_v21  ;;  %v3338_v28 = vld [vmem:[#allocation2 + $0x48] sm:$0xe] }
  0xd1   : > { %v4040_v27 = vsel %vm15573_vm12, %v4038_v15, %v4039_v53  ;;  %v2470_v34 = vrot.slane %v2468_v61, 5  ;;  %v2474_v11 = vrot.slane %v2472_v23, 4  ;;  %v12899_v5 = vrot.slane %v2727_v8, 9 }
  0xd2   : > { %v3677_v54 = vsel %vm15624_vm15, %v3672_v20, %v3676_v63  ;;  %v13074_v55 = vcombine.low %v4037_v48, %v4040_v27  ;;  %v2465_v0 = vor.u32 %v2464_v38, %v2461_v49  ;;  %v2480_v13 = vrot.slane %v2478_v24, 5  ;;  %v16063_v49 = vld [vmem:[#allocation2 + $0x58] sm:$0xf] }
  0xd3   : > { %4670 = vrot.lane.b32.xlu1 %v13042_v12, %s15170_s20  ;;  %v13058_v60 = vcombine.low %v3667_v41, %v3677_v54  ;;  %v2475_v45 = vor.u32 %v2474_v11, %v2470_v34  ;;  %v2826_v14 = vrot.slane %v2298_v36, 5  ;;  %v2829_v31 = vrot.slane %v2324_v9, 5 }
  0xd4   : > { %v2466_v32 = vrot.slane %v2465_v0, 4  ;;  %v3070_v37 = vshrl.u32 %v16031_v10, 16  ;;  %v3073_v3 = vshll.u32 %v16031_v10, 16  ;;  %v3083_v12 = vshrl.u32 %v16035_v50, 16  ;;  %v3547_v0 = vld [vmem:[#allocation2 + $0x5c] sm:$0x1] }
  0xd5   : > { %4750 = vrot.lane.b32.xlu0 %v13058_v60, %s15174_s9  ;;  %v2476_v42 = vrot.slane %v2475_v45, 4  ;;  %v2827_v63 = vsel %vm15573_vm12, %v12899_v5, %v2826_v14  ;;  %v2828_v29 = vrot.slane %v2826_v14, 4  ;;  %v12995_v9 = vcombine.low %v16031_v10, %v16035_v50  ;;  %v12778_v14 = vld.sshfl [vmem:[%s21547_s2 + $0x8] sm:$0x33 pattern:$0x76325410] }
  0xd6   : > { %v2471_v53 = vsel %vm15624_vm15, %v2466_v32, %v2470_v34  ;;  %v3072_v36 = vrot.slane %v3070_v37, 4  ;;  %v3075_v56 = vrot.slane %v3073_v3, 5  ;;  %v3079_v48 = vshll.u32 %v16035_v50, 16  ;;  %12801 = vmatmul.mubr.msk.bf16.gmra.mrb[80].mxu1 %vm328_vm4, %v15503_v39 }
  0xd7   : > { %4830 = vrot.lane.b32.xlu1 %v13074_v55, %s15172_s28  ;;  %v2481_v2 = vsel %vm15624_vm15, %v2476_v42, %v2480_v13  ;;  %v2830_v8 = vsel %vm15573_vm12, %v2828_v29, %v2829_v31  ;;  %v3085_v15 = vrot.slane %v3083_v12, 4  ;;  %v3089_v20 = vshll.u32 %v2938_v7, 16  ;;  %671 = vmatprep.mubr.bf16.mxu1 %v16018_v21  ;;  %v3947_v13 = vld [vmem:[#allocation2 + $0x54] sm:$0xe]  ;;  %v2299_v12 = vld [vmem:[#allocation2 + $0x48] sm:$0xf] }
  0xd8   : > { %v12963_v61 = vcombine.low %v2471_v53, %v2481_v2  ;;  %v12979_v23 = vcombine.low %v2827_v63, %v2830_v8  ;;  %v3076_v41 = vor.u32 %v3075_v56, %v3072_v36  ;;  %v3081_v10 = vrot.slane %v3079_v48, 5  ;;  %v16086_v53 = vld [vmem:[#allocation2 + $0x4c] sm:$0xf]  ;;  %v16089_v8 = vld [vmem:[#allocation2 + $0x50] sm:$0x1] }
  0xd9   : > { %v12915_v38 = vrot.slane %v3338_v28, 9  ;;  %v3434_v27 = vrot.slane %v16035_v50, 5  ;;  %v3437_v34 = vrot.slane %v2938_v7, 5  ;;  %v3091_v24 = vrot.slane %v3089_v20, 5 }
  0xda   : > { %4240 = vrot.lane.b32.xlu0 %v12963_v61, %s15171_s26  ;;  %v3077_v11 = vrot.slane %v3076_v41, 4  ;;  %v3679_v54 = vshrl.u32 %v16055_v19, 16  ;;  %v3682_v55 = vshll.u32 %v16055_v19, 16  ;;  %v3086_v5 = vor.u32 %v3085_v15, %v3081_v10 }
  0xdb   : > { %4320 = vrot.lane.b32.xlu1 %v12979_v23, %s15169_s19  ;;  %v3435_v50 = vsel %vm15573_vm12, %v12915_v38, %v3434_v27  ;;  %v3436_v60 = vrot.slane %v3434_v27, 4  ;;  %v3692_v45 = vshrl.u32 %v16063_v49, 16  ;;  %v13043_v37 = vcombine.low %v16055_v19, %v16063_v49 }
  0xdc   : > { %v3082_v7 = vsel %vm15624_vm15, %v3077_v11, %v3081_v10  ;;  %v3681_v32 = vrot.slane %v3679_v54, 4  ;;  %v3684_v31 = vrot.slane %v3682_v55, 5  ;;  %v3087_v3 = vrot.slane %v3086_v5, 4  ;;  %v2728_v11 = vld [vmem:[#allocation2 + $0x48] sm:$0xe] }
  0xdd   : > { %v3438_v42 = vsel %vm15573_vm12, %v3436_v60, %v3437_v34  ;;  %v3688_v63 = vshll.u32 %v16063_v49, 16  ;;  %v3694_v29 = vrot.slane %v3692_v45, 4  ;;  %v3698_v28 = vshll.u32 %v3547_v0, 16  ;;  %v16107_v5 = vld [vmem:[#allocation2 + $0x54] sm:$0xf] }
  0xde   : > { %4416 = vrot.lane.b32.xlu0 %v12995_v9, %s15168_s18  ;;  %v13027_v36 = vcombine.low %v3435_v50, %v3438_v42  ;;  %v3685_v56 = vor.u32 %v3684_v31, %v3681_v32  ;;  %v12931_v2 = vrot.slane %v3947_v13, 9  ;;  %v3092_v19 = vsel %vm15624_vm15, %v3087_v3, %v3091_v24  ;;  %12802 = vmatmul.mubr.msk.bf16.gmra.mrb[84].mxu1 %vm328_vm4, %v15517_v18  ;;  %v16109_v50 = vld [vmem:[#allocation2 + $0x58] sm:$0xf]  ;;  %v14383_v60 = vld [vmem:[%s21548_s3 + $0x300] ss:$8 sps:$4 sm:$0xff]  }
  0xdf   : > { %v3690_v48 = vrot.slane %v3688_v63, 5  ;;  %v4043_v15 = vrot.slane %v16063_v49, 5  ;;  %v4046_v61 = vrot.slane %v3547_v0, 5  ;;  %v13011_v23 = vcombine.low %v3082_v7, %v3092_v19  ;;  %v14385_v49 = vld [vmem:[%s21548_s3 + $0x304] ss:$8 sps:$4 sm:$0xff]   ;;  %681 = vmatprep.mubr.bf16.mxu1 %v16018_v21 }
  0xe0   : > { %v3686_v41 = vrot.slane %v3685_v56, 4  ;;  %v3700_v20 = vrot.slane %v3698_v28, 5  ;;  %v327_v10 = vcombine.high %v12778_v14, %v12778_v14  ;;  %v391_v34 = vsel %vm377_vm2, %v12778_v14, 0  ;;  %v16123_v56 = vld [vmem:[#allocation2 + $0x5c] sm:$0x1] }
  0xe1   : > { %v3695_v38 = vor.u32 %v3694_v29, %v3690_v48  ;;  %v4044_v9 = vsel %vm15573_vm12, %v12931_v2, %v4043_v15  ;;  %v4045_v27 = vrot.slane %v4043_v15, 4  ;;  %4496 = vrot.lane.b32.xlu1 %v13011_v23, %s15175_s10  ;;  %v2483_v54 = vshrl.u32 %v2299_v12, 16  ;;  %v14389_v28 = vld [vmem:[%s21548_s3 + $0x314] ss:$8 sps:$4 sm:$0xff]  }
  0xe2   : > { %4576 = vrot.lane.b32.xlu0 %v13027_v36, %s15173_s29  ;;  %v3691_v24 = vsel %vm15624_vm15, %v3686_v41, %v3690_v48  ;;  %v2486_v55 = vshll.u32 %v2299_v12, 16  ;;  %v2492_v0 = vshll.u32 %v16086_v53, 16  ;;  %12813 = vmatprep.subr.msk.bf16.mxu0 %vm377_vm2, %v327_v10  ;;  %v2496_v14 = vshrl.u32 %v16086_v53, 16 }
  0xe3   : > { %v3696_v45 = vrot.slane %v3695_v38, 4  ;;  %v4047_v13 = vsel %vm15573_vm12, %v4045_v27, %v4046_v61  ;;  %v2502_v7 = vshll.u32 %v16089_v8, 16  ;;  %783 = vmatpush1.bf16.msra.mxu0 %v391_v34  ;;  %v2485_v31 = vrot.slane %v2483_v54, 4  ;;  %13804 = vmatprep.subr.msk.bf16.mxu1 %vm377_vm2, %v327_v10  ;;  %v3339_v10 = vld [vmem:[#allocation2 + $0x54] sm:$0xe] }
  0xe4   : > { %v13075_v32 = vcombine.low %v4044_v9, %v4047_v13  ;;  %v2488_v3 = vrot.slane %v2486_v55, 5  ;;  %v2494_v42 = vrot.slane %v2492_v0, 5  ;;  %v2498_v29 = vrot.slane %v2496_v14, 4  ;;  %10727 = vmatprep.subr.bf16.mxu0 %v14385_v49  ;;  %13805 = vmatpush1.bf16.msra.mxu1 %v391_v34  ;;  %v16141_v9 = vld [vmem:[#allocation2 + $0x60] sm:$0xf] }
  0xe5   : > { %v3701_v63 = vsel %vm15624_vm15, %v3696_v45, %v3700_v20  ;;  %v2504_v12 = vrot.slane %v2502_v7, 5  ;;  %v12900_v36 = vrot.slane %v2728_v11, 9  ;;  %4672 = vrot.lane.b32.xlu1 %v13043_v37, %s15170_s20  ;;  %v2833_v48 = vrot.slane %v16086_v53, 5  ;;  %v14392_v54 = vld [vmem:[%s21548_s3 + $0x324] ss:$8 sps:$4 sm:$0xff]  }
  0xe6   : > { %v13059_v2 = vcombine.low %v3691_v24, %v3701_v63  ;;  %v2489_v19 = vor.u32 %v2488_v3, %v2485_v31  ;;  %v2836_v15 = vrot.slane %v16089_v8, 5  ;;  %v2499_v61 = vor.u32 %v2498_v29, %v2494_v42  ;;  %12814 = vmatmul.mubr.msk.bf16.vlgmr.msra.gmra.mrb[0].mxu0 %vm328_vm4, %v15455_v33  ;;  %v14387_v33 = vld [vmem:[%s21548_s3 + $0x310] ss:$8 sps:$4 sm:$0xff]   ;;  %v16147_v24 = vld [vmem:[#allocation2 + $0x64] sm:$0xf]  ;;  %12803 = vmatmul.mubr.msk.bf16.gmra.mrb[88].mxu1 %vm328_vm4, %v15530_v43 }
  0xe7   : > { %v3094_v23 = vshrl.u32 %v16107_v5, 16  ;;  %v3097_v41 = vshll.u32 %v16107_v5, 16  ;;  %v3107_v20 = vshrl.u32 %v16109_v50, 16  ;;  %v2834_v38 = vsel %vm15573_vm12, %v12900_v36, %v2833_v48  ;;  %10728 = vmatpush1.bf16.msra.mxu0 %v14383_v60  ;;  %824 = vmatprep.mubr.bf16.mxu0 %v16018_v21  ;;  %v14390_v13 = vld [vmem:[%s21548_s3 + $0x320] ss:$8 sps:$4 sm:$0xff]  }
  0xe8   : > { %4752 = vrot.lane.b32.xlu0 %v13059_v2, %s15174_s9  ;;  %v2490_v37 = vrot.slane %v2489_v19, 4  ;;  %v2835_v53 = vrot.slane %v2833_v48, 4  ;;  %v12996_v8 = vcombine.low %v16107_v5, %v16109_v50  ;;  %v2500_v27 = vrot.slane %v2499_v61, 4  ;;  %10729 = vmatprep.subr.bf16.mxu0 %v14389_v28  ;;  %v16168_v36 = vld [vmem:[#allocation2 + $0x68] sm:$0x1] }
  0xe9   : > { %v3096_v34 = vrot.slane %v3094_v23, 4  ;;  %v3099_v11 = vrot.slane %v3097_v41, 5  ;;  %v3103_v49 = vshll.u32 %v16109_v50, 16  ;;  %4832 = vrot.lane.b32.xlu1 %v13075_v32, %s15172_s28  ;;  %v3109_v60 = vrot.slane %v3107_v20, 4  ;;  %691 = vmatprep.mubr.bf16.mxu1 %v16018_v21  ;;  %v3948_v28 = vld [vmem:[#allocation2 + $0x60] sm:$0xe] }
  0xea   : > { %v2495_v55 = vsel %vm15624_vm15, %v2490_v37, %v2494_v42  ;;  %v2837_v0 = vsel %vm15573_vm12, %v2835_v53, %v2836_v15  ;;  %v3113_v45 = vshll.u32 %v16123_v56, 16  ;;  %v2505_v14 = vsel %vm15624_vm15, %v2500_v27, %v2504_v12  ;;  %v14395_v15 = vld [vmem:[%s21548_s3 + $0x334] ss:$8 sps:$4 sm:$0xff]  }
  0xeb   : > { %v12980_v7 = vcombine.low %v2834_v38, %v2837_v0  ;;  %v3100_v32 = vor.u32 %v3099_v11, %v3096_v34  ;;  %v3105_v31 = vrot.slane %v3103_v49, 5  ;;  %v12964_v3 = vcombine.low %v2495_v55, %v2505_v14  ;;  %10730 = vmatpush1.bf16.msra.mxu0 %v14387_v33  ;;  %v14399_v55 = vld [vmem:[%s21548_s3 + $0x344] ss:$8 sps:$4 sm:$0xff]   ;;  %v14403_v5 = vld [vmem:[%s21548_s3 + $0x354] ss:$8 sps:$4 sm:$0xff]  }
  0xec   : > { %v3115_v42 = vrot.slane %v3113_v45, 5  ;;  %v12916_v63 = vrot.slane %v3339_v10, 9  ;;  %v3441_v29 = vrot.slane %v16109_v50, 5  ;;  %v3444_v48 = vrot.slane %v16123_v56, 5  ;;  %10731 = vmatprep.subr.bf16.mxu0 %v14392_v54  ;;  %v2301_v56 = vld [vmem:[#allocation2 + $0x54] sm:$0xf] }
  0xed   : > { %v3101_v2 = vrot.slane %v3100_v32, 4  ;;  %v3110_v19 = vor.u32 %v3109_v60, %v3105_v31  ;;  %v3703_v12 = vshrl.u32 %v16141_v9, 16  ;;  %4242 = vrot.lane.b32.xlu0 %v12964_v3, %s15171_s26  ;;  %4322 = vrot.lane.b32.xlu1 %v12980_v7, %s15169_s19  ;;  %v3706_v41 = vshll.u32 %v16141_v9, 16  ;;  %v14393_v10 = vld [vmem:[%s21548_s3 + $0x330] ss:$8 sps:$4 sm:$0xff]  }
  0xee   : > { %v3442_v61 = vsel %vm15573_vm12, %v12916_v63, %v3441_v29  ;;  %v3443_v23 = vrot.slane %v3441_v29, 4  ;;  %v3716_v20 = vshrl.u32 %v16147_v24, 16  ;;  %v13044_v33 = vcombine.low %v16141_v9, %v16147_v24  ;;  %12815 = vmatmul.mubr.msk.bf16.gmra.mrb[4].mxu0 %vm328_vm4, %v15457_v35  ;;  %v16193_v54 = vld [vmem:[#allocation2 + $0x58] sm:$0xf]  ;;  %v16202_v45 = vld [vmem:[#allocation2 + $0x5c] sm:$0x1]  ;;  %12804 = vmatmul.mubr.msk.bf16.gmra.mrb[92].mxu1 %vm328_vm4, %v15542_v57 }
  0xef   : > { %v3106_v37 = vsel %vm15624_vm15, %v3101_v2, %v3105_v31  ;;  %v3111_v38 = vrot.slane %v3110_v19, 4  ;;  %v3705_v53 = vrot.slane %v3703_v12, 4  ;;  %v3708_v34 = vrot.slane %v3706_v41, 5  ;;  %10732 = vmatpush1.bf16.msra.mxu0 %v14390_v13  ;;  %834 = vmatprep.mubr.bf16.mxu0 %v16018_v21  ;;  %v14397_v31 = vld [vmem:[%s21548_s3 + $0x340] ss:$8 sps:$4 sm:$0xff]  }
  0xf0   : > { %v3445_v27 = vsel %vm15573_vm12, %v3443_v23, %v3444_v48  ;;  %v3712_v11 = vshll.u32 %v16147_v24, 16  ;;  %v3718_v49 = vrot.slane %v3716_v20, 4  ;;  %v3722_v0 = vshll.u32 %v16168_v36, 16  ;;  %10733 = vmatprep.subr.bf16.mxu0 %v14395_v15  ;;  %701 = vmatprep.mubr.bf16.mxu1 %v16018_v21  ;;  %v16230_v20 = vld [vmem:[#allocation2 + $0x60] sm:$0xf] }
  0xf1   : > { %v3116_v9 = vsel %vm15624_vm15, %v3111_v38, %v3115_v42  ;;  %v13028_v35 = vcombine.low %v3442_v61, %v3445_v27  ;;  %v12932_v60 = vrot.slane %v3948_v28, 9  ;;  %4418 = vrot.lane.b32.xlu0 %v12996_v8, %s15168_s18  ;;  %v3709_v14 = vor.u32 %v3708_v34, %v3705_v53  ;;  %v2729_v28 = vld [vmem:[#allocation2 + $0x54] sm:$0xe] }
  0xf2   : > { %v13012_v13 = vcombine.low %v3106_v37, %v3116_v9  ;;  %v3714_v7 = vrot.slane %v3712_v11, 5  ;;  %v4050_v32 = vrot.slane %v16147_v24, 5  ;;  %v3724_v3 = vrot.slane %v3722_v0, 5 }
  0xf3   : > { %v4053_v42 = vrot.slane %v16168_v36, 5  ;;  %v2507_v63 = vshrl.u32 %v2301_v56, 16  ;;  %v2510_v29 = vshll.u32 %v2301_v56, 16  ;;  %v3710_v50 = vrot.slane %v3709_v14, 4  ;;  %10734 = vmatpush1.bf16.msra.mxu0 %v14393_v10  ;;  %v16232_v56 = vld [vmem:[#allocation2 + $0x64] sm:$0xf] }
  0xf4   : > { %4498 = vrot.lane.b32.xlu1 %v13012_v13, %s15175_s10  ;;  %v3719_v8 = vor.u32 %v3718_v49, %v3714_v7  ;;  %v4051_v24 = vsel %vm15573_vm12, %v12932_v60, %v4050_v32  ;;  %v4052_v2 = vrot.slane %v4050_v32, 4  ;;  %v2516_v36 = vshll.u32 %v16193_v54, 16  ;;  %10735 = vmatprep.subr.bf16.mxu0 %v14399_v55  ;;  %v14401_v55 = vld [vmem:[%s21548_s3 + $0x350] ss:$8 sps:$4 sm:$0xff]   ;;  %v3340_v32 = vld [vmem:[#allocation2 + $0x60] sm:$0xe] }
  0xf5   : > { %v2509_v19 = vrot.slane %v2507_v63, 4  ;;  %v2512_v48 = vrot.slane %v2510_v29, 5  ;;  %v2520_v12 = vshrl.u32 %v16193_v54, 16  ;;  %4578 = vrot.lane.b32.xlu0 %v13028_v35, %s15173_s29  ;;  %v3715_v15 = vsel %vm15624_vm15, %v3710_v50, %v3714_v7  ;;  %v16268_v50 = vld [vmem:[#allocation2 + $0x6c] sm:$0xf] }
  0xf6   : > { %v3720_v61 = vrot.slane %v3719_v8, 4  ;;  %v4054_v23 = vsel %vm15573_vm12, %v4052_v2, %v4053_v42  ;;  %v2526_v41 = vshll.u32 %v16202_v45, 16  ;;  %v2518_v38 = vrot.slane %v2516_v36, 5  ;;  %12816 = vmatmul.mubr.msk.bf16.gmra.mrb[8].mxu0 %vm328_vm4, %v15460_v40  ;;  %v16244_v40 = vld [vmem:[#allocation2 + $0x68] sm:$0x1]  ;;  %12805 = vmatmul.mubr.msk.bf16.gmra.mrb[96].mxu1 %vm328_vm4, %v15557_v46  ;;  %v16272_v2 = vpop.permute.xlu1 %4406 }
  0xf7   : > { %v13076_v10 = vcombine.low %v4051_v24, %v4054_v23  ;;  %v2513_v37 = vor.u32 %v2512_v48, %v2509_v19  ;;  %v2522_v53 = vrot.slane %v2520_v12, 4  ;;  %v12901_v11 = vrot.slane %v2729_v28, 9  ;;  %10736 = vmatpush1.bf16.msra.mxu0 %v14397_v31  ;;  %844 = vmatprep.mubr.bf16.mxu0 %v16018_v21  ;;  %v14404_v42 = vld [vmem:[%s21548_s3 + $0x360] ss:$8 sps:$4 sm:$0xff]   ;;  %21594 = vst [vmem:[#allocation15_spill] sm:$0xff] %v16272_v2 }
  0xf8   : > { %4674 = vrot.lane.b32.xlu1 %v13044_v33, %s15170_s20  ;;  %v3725_v27 = vsel %vm15624_vm15, %v3720_v61, %v3724_v3  ;;  %v2528_v34 = vrot.slane %v2526_v41, 5  ;;  %v2840_v49 = vrot.slane %v16193_v54, 5  ;;  %v2843_v60 = vrot.slane %v16202_v45, 5  ;;  %10737 = vmatprep.subr.bf16.mxu0 %v14403_v5  ;;  %v14406_v33 = vld [vmem:[%s21548_s3 + $0x364] ss:$8 sps:$4 sm:$0xff]  }
  0xf9   : > { %v13060_v9 = vcombine.low %v3715_v15, %v3725_v27  ;;  %v2514_v35 = vrot.slane %v2513_v37, 4  ;;  %v2523_v0 = vor.u32 %v2522_v53, %v2518_v38  ;;  %v3118_v14 = vshrl.u32 %v16230_v20, 16  ;;  %711 = vmatprep.mubr.bf16.mxu1 %v16018_v21  ;;  %v14409_v36 = vld [vmem:[%s21548_s3 + $0x374] ss:$8 sps:$4 sm:$0xff]   ;;  %v16278_v15 = vpop.permute.xlu0 %4310  ;;  %v2732_v2 = vld [vmem:[#allocation2 + $0x78] sm:$0xe] }
  0xfa   : > { %v2841_v54 = vsel %vm15573_vm12, %v12901_v11, %v2840_v49  ;;  %v2842_v13 = vrot.slane %v2840_v49, 4  ;;  %v3121_v7 = vshll.u32 %v16230_v20, 16  ;;  %v3131_v3 = vshrl.u32 %v16232_v56, 16  ;;  %21595 = vst [vmem:[#allocation16_spill] sm:$0xff] %v16278_v15  ;;  %v16290_v49 = vld [vmem:[#allocation2 + $0x74] sm:$0x1] }
  0xfb   : > { %4754 = vrot.lane.b32.xlu0 %v13060_v9, %s15174_s9  ;;  %v2519_v45 = vsel %vm15624_vm15, %v2514_v35, %v2518_v38  ;;  %v2524_v31 = vrot.slane %v2523_v0, 4  ;;  %v3120_v29 = vrot.slane %v3118_v14, 4  ;;  %v3127_v5 = vshll.u32 %v16232_v56, 16  ;;  %10738 = vmatpush1.bf16.msra.mxu0 %v14401_v55  ;;  %v16283_v38 = vld [vmem:[#allocation2 + $0x70] sm:$0xf]  ;;  %v16310_v14 = vpop.permute.xlu1 %4662 }
  0xfc   : > { %4834 = vrot.lane.b32.xlu1 %v13076_v10, %s15172_s28  ;;  %v2844_v63 = vsel %vm15573_vm12, %v2842_v13, %v2843_v60  ;;  %v3123_v28 = vrot.slane %v3121_v7, 5  ;;  %v3133_v19 = vrot.slane %v3131_v3, 4  ;;  %v3137_v48 = vshll.u32 %v16244_v40, 16  ;;  %10739 = vmatprep.subr.bf16.mxu0 %v14406_v33  ;;  %v14407_v35 = vld [vmem:[%s21548_s3 + $0x370] ss:$8 sps:$4 sm:$0xff]   ;;  %21596 = vst [vmem:[#allocation17_spill] sm:$0xff] %v16310_v14 }
  0xfd   : > { %v2529_v8 = vsel %vm15624_vm15, %v2524_v31, %v2528_v34  ;;  %v12981_v24 = vcombine.low %v2841_v54, %v2844_v63  ;;  %v3129_v23 = vrot.slane %v3127_v5, 5  ;;  %v12997_v41 = vcombine.low %v16230_v20, %v16232_v56  ;;  %v3949_v20 = vld [vmem:[#allocation2 + $0x6c] sm:$0xe]  ;;  %v16307_v13 = vld [vmem:[#allocation2 + $0x64] sm:$0xf]  ;;  %v16324_v63 = vpop.permute.xlu0 %4230 }
  0xfe   : > { %v12965_v12 = vcombine.low %v2519_v45, %v2529_v8  ;;  %v3124_v61 = vor.u32 %v3123_v28, %v3120_v29  ;;  %v12917_v10 = vrot.slane %v3340_v32, 9  ;;  %v3448_v37 = vrot.slane %v16232_v56, 5  ;;  %12817 = vmatmul.mubr.msk.bf16.gmra.mrb[12].mxu0 %vm328_vm4, %v15476_v58  ;;  %v2303_v58 = vld [vmem:[#allocation2 + $0x60] sm:$0xf]  ;;  %12806 = vmatmul.mubr.msk.bf16.gmra.mrb[100].mxu1 %vm328_vm4, %v15607_v62  ;;  %v14413_v0 = vld [vmem:[%s21548_s3 + $0x384] ss:$8 sps:$4 sm:$0xff]  }
  0xff   : > { %v3134_v27 = vor.u32 %v3133_v19, %v3129_v23  ;;  %v3139_v34 = vrot.slane %v3137_v48, 5  ;;  %v3451_v11 = vrot.slane %v16244_v40, 5  ;;  %v3727_v9 = vshrl.u32 %v16268_v50, 16  ;;  %10740 = vmatpush1.bf16.msra.mxu0 %v14404_v42  ;;  %854 = vmatprep.mubr.bf16.mxu0 %v16018_v21  ;;  %v14411_v3 = vld [vmem:[%s21548_s3 + $0x380] ss:$8 sps:$4 sm:$0xff]   ;;  %21597 = vst [vmem:[#allocation18_spill] sm:$0xff] %v16324_v63 }
 0x100   : > { %4244 = vrot.lane.b32.xlu0 %v12965_v12, %s15171_s26  ;;  %4324 = vrot.lane.b32.xlu1 %v12981_v24, %s15169_s19  ;;  %v3125_v53 = vrot.slane %v3124_v61, 4  ;;  %v3449_v56 = vsel %vm15573_vm12, %v12917_v10, %v3448_v37  ;;  %v3450_v55 = vrot.slane %v3448_v37, 4  ;;  %v3730_v33 = vshll.u32 %v16268_v50, 16  ;;  %v16327_v48 = vld [vmem:[#allocation2 + $0x68] sm:$0x1] }
 0x101   : > { %v3135_v40 = vrot.slane %v3134_v27, 4  ;;  %v3740_v54 = vshrl.u32 %v16283_v38, 16  ;;  %10741 = vmatprep.subr.bf16.mxu0 %v14409_v36  ;;  %v3729_v32 = vrot.slane %v3727_v9, 4  ;;  %v13045_v45 = vcombine.low %v16268_v50, %v16283_v38  ;;  %721 = vmatprep.mubr.bf16.mxu1 %v16018_v21  ;;  %v14417_v36 = vld [vmem:[%s21548_s3 + $0x394] ss:$8 sps:$4 sm:$0xff]  }
 0x102   : > { %v3130_v60 = vsel %vm15624_vm15, %v3125_v53, %v3129_v23  ;;  %v3452_v7 = vsel %vm15573_vm12, %v3450_v55, %v3451_v11  ;;  %v3736_v31 = vshll.u32 %v16283_v38, 16  ;;  %v3732_v28 = vrot.slane %v3730_v33, 5  ;;  %v16344_v55 = vpop.permute.xlu1 %4664 }
 0x103   : > { %v3140_v42 = vsel %vm15624_vm15, %v3135_v40, %v3139_v34  ;;  %v13029_v29 = vcombine.low %v3449_v56, %v3452_v7  ;;  %v3742_v5 = vrot.slane %v3740_v54, 4  ;;  %v3746_v24 = vshll.u32 %v16290_v49, 16  ;;  %10742 = vmatpush1.bf16.msra.mxu0 %v14407_v35  ;;  %v2730_v34 = vld [vmem:[#allocation2 + $0x60] sm:$0xe]  ;;  %v16341_v56 = vld [vmem:[#allocation2 + $0x6c] sm:$0xf] }
 0x104   : > { %4420 = vrot.lane.b32.xlu0 %v12997_v41, %s15168_s18  ;;  %v13013_v8 = vcombine.low %v3130_v60, %v3140_v42  ;;  %v3738_v50 = vrot.slane %v3736_v31, 5  ;;  %v12933_v19 = vrot.slane %v3949_v20, 9  ;;  %v3733_v12 = vor.u32 %v3732_v28, %v3729_v32  ;;  %10743 = vmatprep.subr.bf16.mxu0 %v14413_v0  ;;  %21598 = vst [vmem:[#allocation19_spill] sm:$0xff] %v16344_v55  ;;  %v14415_v0 = vld [vmem:[%s21548_s3 + $0x390] ss:$8 sps:$4 sm:$0xff]   ;;  %v16354_v60 = vpop.permute.xlu0 %4408 }
 0x105   : > { %v4057_v61 = vrot.slane %v16283_v38, 5  ;;  %v4060_v23 = vrot.slane %v16290_v49, 5  ;;  %v2531_v41 = vshrl.u32 %v2303_v58, 16  ;;  %v3748_v37 = vrot.slane %v3746_v24, 5  ;;  %21599 = vst [vmem:[#allocation20_spill] sm:$0xff] %v16354_v60  ;;  %v16366_v31 = vld [vmem:[#allocation3] sm:$0xff] }
 0x106   : > { %4500 = vrot.lane.b32.xlu1 %v13013_v8, %s15175_s10  ;;  %v3743_v10 = vor.u32 %v3742_v5, %v3738_v50  ;;  %v2534_v53 = vshll.u32 %v2303_v58, 16  ;;  %v2540_v27 = vshll.u32 %v16307_v13, 16  ;;  %12818 = vmatmul.mubr.msk.bf16.gmra.mrb[16].mxu0 %vm328_vm4, %v15503_v39  ;;  %v3734_v11 = vrot.slane %v3733_v12, 4  ;;  %v16361_v7 = vld [vmem:[#allocation2 + $0x70] sm:$0xf]  ;;  %v16374_v8 = vpop.f32.mrb[0].mxu1 }
 0x107   : > { %v4058_v38 = vsel %vm15573_vm12, %v12933_v19, %v4057_v61  ;;  %v4059_v49 = vrot.slane %v4057_v61, 4  ;;  %v2533_v20 = vrot.slane %v2531_v41, 4  ;;  %864 = vmatprep.mubr.bf16.mxu0 %v16018_v21  ;;  %v2544_v39 = vshrl.u32 %v16307_v13, 16  ;;  %10744 = vmatpush1.bf16.msra.mxu0 %v14411_v3  ;;  %v14420_v32 = vld [vmem:[%s21548_s3 + $0x3a4] ss:$8 sps:$4 sm:$0xff]   ;;  %v16383_v61 = vpop.f32.mrb[1].mxu1 }
 0x108   : > { %4580 = vrot.lane.b32.xlu0 %v13029_v29, %s15173_s29  ;;  %v3744_v9 = vrot.slane %v3743_v10, 4  ;;  %v2536_v58 = vrot.slane %v2534_v53, 5  ;;  %v16346_v35 = vrot.slane %v2540_v27, 5  ;;  %12807 = vmatmul.mubr.msk.bf16.gmra.mrb[104].mxu1 %vm328_vm4, %v15671_v52  ;;  %v3739_v21 = vsel %vm15624_vm15, %v3734_v11, %v3738_v50  ;;  %v16372_v5 = vld [vmem:[#allocation2 + $0x74] sm:$0x1]  ;;  %v16388_v53 = vpop.f32.mrb[2].mxu1 }
 0x109   : > { %v4061_v40 = vsel %vm15573_vm12, %v4059_v49, %v4060_v23  ;;  %v2550_v33 = vshll.u32 %v16327_v48, 16  ;;  %v12902_v54 = vrot.slane %v2730_v34, 9  ;;  %10745 = vmatprep.subr.bf16.mxu0 %v14417_v36  ;;  %731 = vmatprep.mubr.bf16.mxu1 %v16366_v31  ;;  %v2546_v28 = vrot.slane %v2544_v39, 4  ;;  %v14418_v50 = vld [vmem:[%s21548_s3 + $0x3a0] ss:$8 sps:$4 sm:$0xff]   ;;  %v16402_v49 = vpop.permute.xlu1 %4822 }
 0x10a   : > { %4676 = vrot.lane.b32.xlu1 %v13045_v45, %s15170_s20  ;;  %v3749_v3 = vsel %vm15624_vm15, %v3744_v9, %v3748_v37  ;;  %v13077_v42 = vcombine.low %v4058_v38, %v4061_v40  ;;  %v2537_v29 = vor.u32 %v2536_v58, %v2533_v20  ;;  %v2847_v36 = vrot.slane %v16307_v13, 5  ;;  %v16381_v12 = vld [vmem:[#allocation2 + $0x6c] sm:$0xe]  ;;  %v14423_v13 = vld [vmem:[%s21548_s3 + $0x3b4] ss:$8 sps:$4 sm:$0xff]   ;;  %v16399_v38 = vpop.f32.mrb[3].mxu1 }
 0x10b   : > { %v13061_v24 = vcombine.low %v3739_v21, %v3749_v3  ;;  %v2552_v19 = vrot.slane %v2550_v33, 5  ;;  %v2850_v45 = vrot.slane %v16327_v48, 5  ;;  %v2547_v41 = vor.u32 %v2546_v28, %v16346_v35  ;;  %10746 = vmatpush1.bf16.msra.mxu0 %v14415_v0  ;;  %v16397_v11 = vld [vmem:[#allocation2 + $0x78] sm:$0xf]  ;;  %21600 = vst [vmem:[#allocation21_spill] sm:$0xff] %v16402_v49  ;;  %v16417_v33 = vpop.permute.xlu0 %4566 }
 0x10c   : > { %v2538_v23 = vrot.slane %v2537_v29, 4  ;;  %v3142_v10 = vshrl.u32 %v16341_v56, 16  ;;  %v3145_v37 = vshll.u32 %v16341_v56, 16  ;;  %v2848_v48 = vsel %vm15573_vm12, %v12902_v54, %v2847_v36  ;;  %10747 = vmatprep.subr.bf16.mxu0 %v14420_v32  ;;  %v16407_v0 = vld [vmem:[#allocation2 + $0x7c] sm:$0xf]  ;;  %21601 = vst [vmem:[#allocation22_spill] sm:$0xff] %v16417_v33 }
 0x10d   : > { %4756 = vrot.lane.b32.xlu0 %v13061_v24, %s15174_s9  ;;  %v2849_v27 = vrot.slane %v2847_v36, 4  ;;  %v3155_v34 = vshrl.u32 %v16361_v7, 16  ;;  %v2548_v9 = vrot.slane %v2547_v41, 4  ;;  %v14421_v21 = vld [vmem:[%s21548_s3 + $0x3b0] ss:$8 sps:$4 sm:$0xff]   ;;  %v3151_v54 = vshll.u32 %v16361_v7, 16 }
 0x10e   : > { %4836 = vrot.lane.b32.xlu1 %v13077_v42, %s15172_s28  ;;  %v2543_v20 = vsel %vm15624_vm15, %v2538_v23, %v16346_v35  ;;  %v3144_v58 = vrot.slane %v3142_v10, 4  ;;  %v3147_v39 = vrot.slane %v3145_v37, 5  ;;  %12819 = vmatmul.mubr.msk.bf16.gmra.mrb[20].mxu0 %vm328_vm4, %v15517_v18  ;;  %v1552_v40 = vld [vmem:[%s21549_s4] sm:$0x3]  ;;  %v3161_v3 = vshll.u32 %v16372_v5, 16 }
 0x10f   : > { %v2851_v35 = vsel %vm15573_vm12, %v2849_v27, %v2850_v45  ;;  %v3157_v32 = vrot.slane %v3155_v34, 4  ;;  %874 = vmatprep.mubr.bf16.mxu0 %v16366_v31  ;;  %v14427_v18 = vld [vmem:[%s21548_s3 + $0x3c4] ss:$8 sps:$4 sm:$0xff]   ;;  %v2553_v42 = vsel %vm15624_vm15, %v2548_v9, %v2552_v19  ;;  %v12918_v24 = vrot.slane %v16381_v12, 9  ;;  %10748 = vmatpush1.bf16.msra.mxu0 %v14418_v50  ;;  %v16433_v10 = vld [vmem:[#allocation2 + $0x80] sm:$0x1] }
 0x110   : > { %v12982_v29 = vcombine.low %v2848_v48, %v2851_v35  ;;  %v3148_v28 = vor.u32 %v3147_v39, %v3144_v58  ;;  %12808 = vmatmul.mubr.msk.bf16.gmra.mrb[108].mxu1 %vm328_vm4, %v15722_v22  ;;  %v12966_v36 = vcombine.low %v2543_v20, %v2553_v42  ;;  %v3153_v45 = vrot.slane %v3151_v54, 5  ;;  %10749 = vmatprep.subr.bf16.mxu0 %v14423_v13  ;;  %v16440_v48 = vpop.f32.mrb[4].mxu1  ;;  %v14425_v27 = vld [vmem:[%s21548_s3 + $0x3c0] ss:$8 sps:$4 sm:$0xff]   ;;  %v16455_v35 = vpop.permute.xlu1 %4312  ;;  %v16647_v60 = vld [vmem:[#allocation2 + $0x84] sm:$0xf] }
 0x111   : > { %v3163_v23 = vrot.slane %v3161_v3, 5  ;;  %v3455_v41 = vrot.slane %v16361_v7, 5  ;;  %741 = vmatprep.mubr.bf16.mxu1 %v16366_v31  ;;  %v3458_v37 = vrot.slane %v16372_v5, 5  ;;  %v3751_v50 = vshrl.u32 %v16397_v11, 16  ;;  %v16449_v5 = vpop.f32.mrb[5].mxu1  ;;  %21603 = vst [vmem:[#allocation23_spill] sm:$0xff] %v16455_v35 }
 0x112   : > { %4326 = vrot.lane.b32.xlu1 %v12982_v29, %s15169_s19  ;;  %v3149_v19 = vrot.slane %v3148_v28, 4  ;;  %v3754_v12 = vshll.u32 %v16397_v11, 16  ;;  %4246 = vrot.lane.b32.xlu0 %v12966_v36, %s15171_s26  ;;  %v12998_v13 = vcombine.low %v16341_v56, %v16361_v7  ;;  %v3158_v34 = vor.u32 %v3157_v32, %v3153_v45  ;;  %v16459_v29 = vpop.f32.mrb[6].mxu1  ;;  %v16461_v56 = vpop.permute.xlu0 %4568  ;;  %v2186_v35 = vld [vmem:[#allocation3 + $0x40] sm:$0x11] }
 0x113   : > { %v3457_v20 = vrot.slane %v3455_v41, 4  ;;  %v3764_v9 = vshrl.u32 %v16407_v0, 16  ;;  %v21602_v58 = vsub.s32 0, %v15270_v4  ;;  %v3456_v54 = vsel %vm15573_vm12, %v12918_v24, %v3455_v41  ;;  %10750 = vmatpush1.bf16.msra.mxu0 %v14421_v21  ;;  %21604 = vst [vmem:[#allocation24_spill] sm:$0xff] %v16461_v56  ;;  %v14431_v21 = vld [vmem:[%s21548_s3 + $0x3d4] ss:$8 sps:$4 sm:$0xff]  }
 0x114   : > { %v3753_v3 = vrot.slane %v3751_v50, 4  ;;  %v3756_v42 = vrot.slane %v3754_v12, 5  ;;  %v3154_v7 = vsel %vm15624_vm15, %v3149_v19, %v3153_v45  ;;  %v3159_v32 = vrot.slane %v3158_v34, 4  ;;  %10751 = vmatprep.subr.bf16.mxu0 %v14427_v18  ;;  %v3950_v19 = vld [vmem:[#allocation2 + $0x78] sm:$0xe] }
 0x115   : > { %v16453_v39 = vrot.slane %v1552_v40, %v21602_v58  ;;  %v3459_v28 = vsel %vm15573_vm12, %v3457_v20, %v3458_v37  ;;  %v3760_v36 = vshll.u32 %v16407_v0, 16  ;;  %v16468_v58 = vpop.f32.mrb[7].mxu1  ;;  %v21605_v24 = vsub.s32 1, %v15270_v4  ;;  %v16603_v56 = vld [vmem:[#allocation2 + $0x7c] sm:$0xf] }
 0x116   : > { %v3757_v50 = vor.u32 %v3756_v42, %v3753_v3  ;;  %v3766_v12 = vrot.slane %v3764_v9, 4  ;;  %v3770_v45 = vshll.u32 %v16433_v10, 16  ;;  %12820 = vmatmul.mubr.msk.bf16.gmra.mrb[24].mxu0 %vm328_vm4, %v15530_v43  ;;  %4422 = vrot.lane.b32.xlu0 %v12998_v13, %s15168_s18  ;;  %v3164_v18 = vsel %vm15624_vm15, %v3159_v32, %v3163_v23  ;;  %v14429_v43 = vld [vmem:[%s21548_s3 + $0x3d0] ss:$8 sps:$4 sm:$0xff]  }
 0x117   : > { %v16475_v41 = vrot.slane %v1552_v40, %v21605_v24  ;;  %v13030_v37 = vcombine.low %v3456_v54, %v3459_v28  ;;  %v13046_v34 = vcombine.low %v16397_v11, %v16407_v0  ;;  %v3762_v20 = vrot.slane %v3760_v36, 5  ;;  %884 = vmatprep.mubr.bf16.mxu0 %v16366_v31  ;;  %10752 = vmatpush1.bf16.msra.mxu0 %v14425_v27 }
 0x118   : > { %v13014_v40 = vcombine.low %v3154_v7, %v3164_v18  ;;  %v3758_v9 = vrot.slane %v3757_v50, 4  ;;  %v3772_v3 = vrot.slane %v3770_v45, 5  ;;  %v1564_v42 = vadd.f32 %v16453_v39, %v16374_v8  ;;  %12809 = vmatmul.mubr.msk.bf16.gmra.mrb[112].mxu1 %vm328_vm4, %v15775_v30  ;;  %10753 = vmatprep.subr.bf16.mxu0 %v14431_v21  ;;  %v14434_v7 = vld [vmem:[%s21548_s3 + $0x3e4] ss:$8 sps:$4 sm:$0xff]   ;;  %v16500_v8 = vpop.permute.xlu1 %4824 }
 0x119   : > { %v3767_v23 = vor.u32 %v3766_v12, %v3762_v20  ;;  %v12934_v13 = vrot.slane %v3950_v19, 9  ;;  %v4064_v11 = vrot.slane %v16407_v0, 5  ;;  %v4067_v54 = vrot.slane %v16433_v10, 5  ;;  %751 = vmatprep.mubr.bf16.mxu1 %v16366_v31  ;;  %21606 = vst [vmem:[#allocation25_spill] sm:$0xff] %v16500_v8  ;;  %v16506_v0 = vpop.f32.mrb[8].mxu1  ;;  %v16508_v10 = vpop.permute.xlu0 %4742 }
 0x11a   : > { %4502 = vrot.lane.b32.xlu1 %v13014_v40, %s15175_s10  ;;  %v3763_v27 = vsel %vm15624_vm15, %v3758_v9, %v3762_v20  ;;  %v1565_v32 = vadd.f32 %v16475_v41, %v16383_v61  ;;  %vm2163_vm0 = vcmask 1043456   ;;  %21607 = vst [vmem:[#allocation26_spill] sm:$0xff] %v16508_v10  ;;  %4582 = vrot.lane.b32.xlu0 %v13030_v37, %s15173_s29  ;;  %vm2166_vm5 = vsmask.f32 7954  ;;  %v16513_v24 = vpop.f32.mrb[9].mxu1 }
 0x11b   : > { %v3768_v28 = vrot.slane %v3767_v23, 4  ;;  %v4065_v36 = vsel %vm15573_vm12, %v12934_v13, %v4064_v11  ;;  %v4066_v21 = vrot.slane %v4064_v11, 4  ;;  %v2305_v12 = vld [vmem:[#allocation2 + $0x6c] sm:$0xf]  ;;  %10754 = vmatpush1.bf16.msra.mxu0 %v14429_v43  ;;  %v14432_v61 = vld [vmem:[%s21548_s3 + $0x3e0] ss:$8 sps:$4 sm:$0xff]   ;;  %vm16529_vm7 = vmand %vm2163_vm0, %vm1436_vm6  ;;  %v1566_v40 = vadd.f32 %v16453_v39, %v16388_v53 }
 0x11c   : > { %v13771_v50 = vpack.c.bf16 %v1565_v32, %v1564_v42  ;;  %v16518_v45 = vpop.f32.mrb[10].mxu1  ;;  %v14437_v19 = vld [vmem:[%s21548_s3 + $0x3f4] ss:$8 sps:$4 sm:$0xff]   ;;  %10755 = vmatprep.subr.bf16.mxu0 %v14434_v7  ;;  %vm2167_vm8 = vmand %vm2165_vm1, %vm2166_vm5  ;;  %v2306_v23 = vld [vmem:[#allocation2 + $0x70] sm:$0xf]  ;;  %v1567_v11 = vadd.f32 %v16475_v41, %v16399_v38  ;;  %vm2173_vm6 = vcmask 1040384  }
 0x11d   : > { %v3773_v18 = vsel %vm15624_vm15, %v3768_v28, %v3772_v3  ;;  %v4068_v37 = vsel %vm15573_vm12, %v4066_v21, %v4067_v54  ;;  %v16535_v9 = vpop.f32.mrb[11].mxu1  ;;  %v14435_v13 = vld [vmem:[%s21548_s3 + $0x3f0] ss:$8 sps:$4 sm:$0xff]   ;;  %v2328_v54 = vld [vmem:[#allocation2 + $0x74] sm:$0x1]  ;;  %vm2175_vm10 = vcmask 1044484   ;;  %vm16554_vm11 = vmor %vm2167_vm8, %vm16529_vm7 }
 0x11e   : > { %4678 = vrot.lane.b32.xlu1 %v13046_v34, %s15170_s20  ;;  %v13062_v42 = vcombine.low %v3763_v27, %v3773_v18  ;;  %v13078_v43 = vcombine.low %v4065_v36, %v4068_v37  ;;  %v1843_v3 = vshrl.u32 %v13771_v50, 16  ;;  %12821 = vmatmul.mubr.msk.bf16.gmra.mrb[28].mxu0 %vm328_vm4, %v15542_v57  ;;  %v1846_v53 = vshll.u32 %v13771_v50, 16  ;;  %v16547_v34 = vpop.permute.xlu1 %4314  ;;  %v16550_v27 = vpop.permute.xlu0 %4232  ;;  %v14441_v28 = vld [vmem:[%s21548_s3 + $0x404] ss:$8 sps:$4 sm:$0xff]   ;;  %vm16565_vm14 = vmand %vm2173_vm6, %vm1111_vm3  ;;  %v2919_v20 = vld [vmem:[#allocation2 + $0x78] sm:$0xf] }
 0x11f   : > { %21610 = vst [vmem:[#allocation27_spill] sm:$0xff] %v16547_v34  ;;  %10756 = vmatpush1.bf16.msra.mxu0 %v14432_v61  ;;  %21611 = vst [vmem:[#allocation28_spill] sm:$0xff] %v16550_v27  ;;  %v13772_v32 = vpack.c.bf16 %v1567_v11, %v1566_v40  ;;  %vm2176_vm13 = vsmask.f32 4352  ;;  %v2555_v38 = vshrl.u32 %v2305_v12, 16  ;;  %v2558_v50 = vshll.u32 %v2305_v12, 16 }
 0x120   : > { %4758 = vrot.lane.b32.xlu0 %v13062_v42, %s15174_s9  ;;  %v1845_v7 = vrot.slane %v1843_v3, 7  ;;  %12810 = vmatmul.mubr.msk.bf16.gmra.mrb[116].mxu1 %vm328_vm4, %v15832_v6  ;;  %v2731_v61 = vld [vmem:[#allocation2 + $0x6c] sm:$0xe]  ;;  %v16569_v18 = vpop.f32.mrb[12].mxu1  ;;  %vm16573_vm0 = vmand %vm2175_vm10, %vm2176_vm13  ;;  %v2564_v42 = vshll.u32 %v2306_v23, 16  ;;  %v2574_v11 = vshll.u32 %v2328_v54, 16 }
 0x121   : > { %10757 = vmatprep.subr.bf16.mxu0 %v14437_v19  ;;  %761 = vmatprep.mubr.bf16.mxu1 %v16366_v31  ;;  %v1851_v37 = vshrl.u32 %v13772_v32, 16  ;;  %v1854_v19 = vshll.u32 %v13772_v32, 16  ;;  %v2557_v40 = vrot.slane %v2555_v38, 4  ;;  %v2560_v3 = vrot.slane %v2558_v50, 5  ;;  %vm16595_vm3 = vmor %vm16573_vm0, %vm16565_vm14  ;;  %v14558_v57 = vld [vmem:[%s21548_s3 + $0x74] ss:$8 sps:$4 sm:$0xff]  }
 0x122   : > { %4838 = vrot.lane.b32.xlu1 %v13078_v43, %s15172_s28  ;;  %v1848_v36 = vor.u32 %v1846_v53, %v1845_v7  ;;  %v16577_v43 = vpop.f32.mrb[13].mxu1  ;;  %v2568_v53 = vshrl.u32 %v2306_v23, 16  ;;  %v2566_v16 = vrot.slane %v2564_v42, 5  ;;  %v12903_v26 = vrot.slane %v2731_v61, 9  ;;  %v16589_v8 = vpop.permute.xlu1 %4486 }
 0x123   : > { %10758 = vmatpush1.bf16.msra.mxu0 %v14435_v13  ;;  %v16584_v17 = vpop.f32.mrb[14].mxu1  ;;  %v1853_v32 = vrot.slane %v1851_v37, 7  ;;  %v2854_v38 = vrot.slane %v2306_v23, 5  ;;  %v1849_v4 = vrot.slane %v1845_v7, 4  ;;  %21618 = vst [vmem:[#allocation29_spill] sm:$0xff] %v16589_v8  ;;  %v2561_v50 = vor.u32 %v2560_v3, %v2557_v40  ;;  %v16599_v61 = vpop.permute.xlu0 %4744 }
 0x124   : > { %v16582_v12 = vsel %vm16554_vm11, %v1848_v36, %v16366_v31  ;;  %10920 = vmatprep.subr.bf16.mxu0 %v14441_v28  ;;  %v16587_v25 = vpop.f32.mrb[15].mxu1  ;;  %v2179_v36 = vld [vmem:[#allocation3 + $0x28] sm:$0x11]  ;;  %v2570_v37 = vrot.slane %v2568_v53, 4  ;;  %v2857_v42 = vrot.slane %v2328_v54, 5  ;;  %21621 = vst [vmem:[#allocation30_spill] sm:$0xff] %v16599_v61 }
 0x125   : > { %2171 = vst [vmem:[#allocation3 + $0x18] sm:$0xff] %v16582_v12  ;;  %v1856_v23 = vor.u32 %v1854_v19, %v1853_v32  ;;  %v1858_v28 = vrot.slane %v1853_v32, 4  ;;  %v2855_v7 = vsel %vm15573_vm12, %v12903_v26, %v2854_v38  ;;  %v2856_v55 = vrot.slane %v2854_v38, 4  ;;  %v16618_v53 = vpop.f32.mrb[16].mxu1 }
 0x126   : > { %v2562_v49 = vrot.slane %v2561_v50, 4  ;;  %v2571_v21 = vor.u32 %v2570_v37, %v2566_v16  ;;  %v2576_v34 = vrot.slane %v2574_v11, 5  ;;  %v3169_v11 = vshll.u32 %v2919_v20, 16  ;;  %v16622_v38 = vpop.f32.mrb[17].mxu1  ;;  %v16627_v50 = vpop.permute.xlu1 %4488 }
 0x127   : > { %v16607_v10 = vsel %vm15482_vm9, %v1849_v4, %v1856_v23  ;;  %v2180_v54 = vsel %vm16595_vm3, %v1858_v28, %v2179_v36  ;;  %v2858_v19 = vsel %vm15573_vm12, %v2856_v55, %v2857_v42  ;;  %v3166_v4 = vshrl.u32 %v2919_v20, 16  ;;  %v2942_v55 = vld [vmem:[#allocation2 + $0x80] sm:$0x1]  ;;  %21622 = vst [vmem:[#allocation31_spill] sm:$0xff] %v16627_v50  ;;  %v16633_v42 = vpop.permute.xlu0 %4234 }
 0x128   : > { %12811 = vmatmul.mubr.msk.bf16.gmra.mrb[120].mxu1 %vm328_vm4, %v15878_v44  ;;  %2172 = vst [vmem:[#allocation3 + $0x20] sm:$0xff] %v16607_v10  ;;  %2181 = vst [vmem:[#allocation3 + $0x28] sm:$0x11] %v2180_v54  ;;  %v2567_v26 = vsel %vm15624_vm15, %v2562_v49, %v2566_v16  ;;  %v2572_v40 = vrot.slane %v2571_v21, 4  ;;  %v12983_v3 = vcombine.low %v2855_v7, %v2858_v19  ;;  %v3179_v32 = vshrl.u32 %v16603_v56, 16  ;;  %v16631_v49 = vpop.f32.mrb[18].mxu1 }
 0x129   : > { %771 = vmatprep.mubr.bf16.mxu1 %v16366_v31  ;;  %v1568_v16 = vadd.f32 %v16453_v39, %v16440_v48  ;;  %21623 = vst [vmem:[#allocation32_spill] sm:$0xff] %v16633_v42  ;;  %v3168_v23 = vrot.slane %v3166_v4, 4  ;;  %v3171_v28 = vrot.slane %v3169_v11, 5  ;;  %v3175_v7 = vshll.u32 %v16603_v56, 16  ;;  %v3342_v19 = vld [vmem:[#allocation2 + $0x78] sm:$0xe] }
 0x12a   : > { %v2577_v36 = vsel %vm15624_vm15, %v2572_v40, %v2576_v34  ;;  %4328 = vrot.lane.b32.xlu1 %v12983_v3, %s15169_s19  ;;  %v3181_v21 = vrot.slane %v3179_v32, 4  ;;  %v3185_v54 = vshll.u32 %v2942_v55, 16  ;;  %v1569_v34 = vadd.f32 %v16475_v41, %v16449_v5  ;;  %v16638_v40 = vpop.f32.mrb[19].mxu1 }
 0x12b   : > { %v12967_v37 = vcombine.low %v2567_v26, %v2577_v36  ;;  %v12999_v48 = vcombine.low %v2919_v20, %v16603_v56  ;;  %v3172_v3 = vor.u32 %v3171_v28, %v3168_v23  ;;  %v3177_v26 = vrot.slane %v3175_v7, 5  ;;  %v16653_v28 = vld [vmem:[#allocation2 + $0x88] sm:$0xf] }
 0x12c   : > { %v1570_v4 = vadd.f32 %v16453_v39, %v16459_v29  ;;  %v3187_v11 = vrot.slane %v3185_v54, 5  ;;  %v13773_v36 = vpack.c.bf16 %v1569_v34, %v1568_v16  ;;  %v1571_v32 = vadd.f32 %v16475_v41, %v16468_v58  ;;  %v16655_v16 = vpop.f32.mrb[20].mxu1 }
 0x12d   : > { %4248 = vrot.lane.b32.xlu0 %v12967_v37, %s15171_s26  ;;  %v3173_v61 = vrot.slane %v3172_v3, 4  ;;  %v3182_v42 = vor.u32 %v3181_v21, %v3177_v26  ;;  %v12919_v5 = vrot.slane %v3342_v19, 9  ;;  %v3462_v50 = vrot.slane %v16603_v56, 5  ;;  %v16651_v37 = vpop.permute.xlu1 %4490  ;;  %v16661_v21 = vpop.permute.xlu0 %4410 }
 0x12e   : > { %v1860_v20 = vshrl.u32 %v13773_v36, 16  ;;  %21624 = vst [vmem:[#allocation33_spill] sm:$0xff] %v16651_v37  ;;  %v13774_v23 = vpack.c.bf16 %v1571_v32, %v1570_v4  ;;  %v3465_v29 = vrot.slane %v2942_v55, 5  ;;  %v1863_v7 = vshll.u32 %v13773_v36, 16  ;;  %21625 = vst [vmem:[#allocation34_spill] sm:$0xff] %v16661_v21  ;;  %v16663_v34 = vpop.f32.mrb[21].mxu1 }
 0x12f   : > { %v3178_v56 = vsel %vm15624_vm15, %v3173_v61, %v3177_v26  ;;  %v3183_v58 = vrot.slane %v3182_v42, 4  ;;  %v3464_v54 = vrot.slane %v3462_v50, 4  ;;  %v3463_v3 = vsel %vm15573_vm12, %v12919_v5, %v3462_v50  ;;  %v16668_v32 = vpop.f32.mrb[22].mxu1  ;;  %v3551_v5 = vld [vmem:[#allocation2 + $0x8c] sm:$0x1] }
 0x130   : > { %12812 = vmatmul.mubr.msk.bf16.gmra.mrb[124].mxu1 %vm328_vm4, %v15912_v51  ;;  %v1862_v19 = vrot.slane %v1860_v20, 7  ;;  %v1868_v55 = vshrl.u32 %v13774_v23, 16  ;;  %v3775_v4 = vshrl.u32 %v16647_v60, 16  ;;  %v3778_v42 = vshll.u32 %v16647_v60, 16  ;;  %v16676_v36 = vpop.f32.mrb[23].mxu1 }
 0x131   : > { %894 = vmatprep.mubr.bf16.mxu1 %v16366_v31  ;;  %4424 = vrot.lane.b32.xlu0 %v12999_v48, %s15168_s18  ;;  %v3188_v48 = vsel %vm15624_vm15, %v3183_v58, %v3187_v11  ;;  %v3466_v61 = vsel %vm15573_vm12, %v3464_v54, %v3465_v29  ;;  %v3788_v26 = vshrl.u32 %v16653_v28, 16  ;;  %v1871_v50 = vshll.u32 %v13774_v23, 16  ;;  %v3951_v23 = vld [vmem:[#allocation2 + $0x84] sm:$0xe]  ;;  %v16690_v54 = vpop.permute.xlu0 %4570 }
 0x132   : > { %v13015_v20 = vcombine.low %v3178_v56, %v3188_v48  ;;  %v1865_v37 = vor.u32 %v1863_v7, %v1862_v19  ;;  %v1870_v21 = vrot.slane %v1868_v55, 7  ;;  %v1866_v14 = vrot.slane %v1862_v19, 4  ;;  %v16686_v7 = vpop.permute.xlu1 %4666  ;;  %21627 = vst [vmem:[#allocation36_spill] sm:$0xff] %v16690_v54 }
 0x133   : > { %v13031_v33 = vcombine.low %v3463_v3, %v3466_v61  ;;  %v3777_v8 = vrot.slane %v3775_v4, 4  ;;  %v3780_v27 = vrot.slane %v3778_v42, 5  ;;  %v13047_v56 = vcombine.low %v16647_v60, %v16653_v28  ;;  %21626 = vst [vmem:[#allocation35_spill] sm:$0xff] %v16686_v7  ;;  %v16703_v4 = vpop.f32.mrb[24].mxu1  ;;  %v2307_v61 = vld [vmem:[#allocation2 + $0x78] sm:$0xf] }
 0x134   : > { %4504 = vrot.lane.b32.xlu1 %v13015_v20, %s15175_s10  ;;  %v16682_v11 = vsel %vm16554_vm11, %v1865_v37, %v16366_v31  ;;  %v1873_v29 = vor.u32 %v1871_v50, %v1870_v21  ;;  %v1875_v58 = vrot.slane %v1870_v21, 4  ;;  %v3784_v55 = vshll.u32 %v16653_v28, 16  ;;  %v16708_v48 = vpop.f32.mrb[25].mxu1 }
 0x135   : > { %2184 = vst [vmem:[#allocation3 + $0x30] sm:$0xff] %v16682_v11  ;;  %4584 = vrot.lane.b32.xlu0 %v13031_v33, %s15173_s29  ;;  %v3781_v19 = vor.u32 %v3780_v27, %v3777_v8  ;;  %v3790_v3 = vrot.slane %v3788_v26, 4  ;;  %v3794_v21 = vshll.u32 %v3551_v5, 16  ;;  %v1572_v33 = vadd.f32 %v16453_v39, %v16506_v0  ;;  %v16713_v42 = vpop.f32.mrb[26].mxu1 }
 0x136   : > { %v16697_v37 = vsel %vm15482_vm9, %v1866_v14, %v1873_v29  ;;  %v2187_v60 = vsel %vm16595_vm3, %v1875_v58, %v2186_v35  ;;  %v12935_v27 = vrot.slane %v3951_v23, 9  ;;  %v4071_v14 = vrot.slane %v16653_v28, 5  ;;  %v16717_v58 = vpop.f32.mrb[27].mxu1 }
 0x137   : > { %2185 = vst [vmem:[#allocation3 + $0x38] sm:$0xff] %v16697_v37  ;;  %2188 = vst [vmem:[#allocation3 + $0x40] sm:$0x11] %v2187_v60  ;;  %v3782_v8 = vrot.slane %v3781_v19, 4  ;;  %v4074_v35 = vrot.slane %v3551_v5, 5  ;;  %v1573_v0 = vadd.f32 %v16475_v41, %v16513_v24  ;;  %v3796_v20 = vrot.slane %v3794_v21, 5  ;;  %v16729_v60 = vpop.permute.xlu0 %4746 }
 0x138   : > { %12822 = vmatmul.mubr.msk.bf16.vlgmr.msra.gmra.mrb[128].mxu1 %vm328_vm4, %v15557_v46  ;;  %v3786_v46 = vrot.slane %v3784_v55, 5  ;;  %4680 = vrot.lane.b32.xlu1 %v13047_v56, %s15170_s20  ;;  %v4072_v50 = vsel %vm15573_vm12, %v12935_v27, %v4071_v14  ;;  %v4073_v29 = vrot.slane %v4071_v14, 4  ;;  %v1574_v23 = vadd.f32 %v16453_v39, %v16518_v45  ;;  %v16721_v56 = vpop.permute.xlu1 %4826  ;;  %v2308_v5 = vld [vmem:[#allocation2 + $0x7c] sm:$0xf]  ;;  %21629 = vst [vmem:[#allocation38_spill] sm:$0xff] %v16729_v60 }
 0x139   : > { %904 = vmatprep.mubr.bf16.mxu1 %v16366_v31  ;;  %v13775_v28 = vpack.c.bf16 %v1573_v0, %v1572_v33  ;;  %21628 = vst [vmem:[#allocation37_spill] sm:$0xff] %v16721_v56  ;;  %v1575_v24 = vadd.f32 %v16475_v41, %v16535_v9  ;;  %v2579_v21 = vshrl.u32 %v2307_v61, 16  ;;  %v2329_v0 = vld [vmem:[#allocation2 + $0x80] sm:$0x1]  ;;  %v2582_v7 = vshll.u32 %v2307_v61, 16 }
 0x13a   : > { %v3791_v26 = vor.u32 %v3790_v3, %v3786_v46  ;;  %v3787_v19 = vsel %vm15624_vm15, %v3782_v8, %v3786_v46  ;;  %v4075_v3 = vsel %vm15573_vm12, %v4073_v29, %v4074_v35  ;;  %v2588_v54 = vshll.u32 %v2308_v5, 16 }
 0x13b   : > { %v13079_v33 = vcombine.low %v4072_v50, %v4075_v3  ;;  %v1877_v27 = vshrl.u32 %v13775_v28, 16  ;;  %v1880_v14 = vshll.u32 %v13775_v28, 16  ;;  %v13776_v45 = vpack.c.bf16 %v1575_v24, %v1574_v23  ;;  %v16736_v50 = vpop.f32.mrb[28].mxu1  ;;  %v16742_v3 = vld [vmem:[#allocation2 + $0x84] sm:$0xf]  ;;  %v4237_v60 = vpop.permute.xlu0 %4236 }
 0x13c   : > { %v3792_v55 = vrot.slane %v3791_v26, 4  ;;  %v2581_v9 = vrot.slane %v2579_v21, 4  ;;  %vm4902_vm1 = vcmask 64512   ;;  %v2584_v29 = vrot.slane %v2582_v7, 5  ;;  %v16739_v23 = vpop.f32.mrb[29].mxu1 }
 0x13d   : > { %4840 = vrot.lane.b32.xlu1 %v13079_v33, %s15172_s28  ;;  %v1879_v46 = vrot.slane %v1877_v27, 7  ;;  %v1885_v35 = vshrl.u32 %v13776_v45, 16  ;;  %v1888_v26 = vshll.u32 %v13776_v45, 16  ;;  %v2592_v28 = vshrl.u32 %v2308_v5, 16  ;;  %v16744_v21 = vpop.f32.mrb[30].mxu1 }
 0x13e   : > { %v3797_v56 = vsel %vm15624_vm15, %v3792_v55, %v3796_v20  ;;  %v2590_v20 = vrot.slane %v2588_v54, 5  ;;  %v2598_v61 = vshll.u32 %v2329_v0, 16  ;;  %v4317_v55 = vpop.permute.xlu1 %4316  ;;  %v2193_v33 = vld [vmem:[#allocation3 + $0x58] sm:$0x11]  ;;  %v2585_v27 = vor.u32 %v2584_v29, %v2581_v9  ;;  %v16746_v15 = vpop.f32.mrb[31].mxu1 }
 0x13f   : > { %v13063_v8 = vcombine.low %v3787_v19, %v3797_v56  ;;  %v1883_v24 = vrot.slane %v1879_v46, 4  ;;  %v1887_v56 = vrot.slane %v1885_v35, 7  ;;  %v12904_v19 = vrot.slane %v2732_v2, 9 }
 0x140   : > { %12823 = vmatmul.mubr.msk.bf16.gmra.mrb[132].mxu1 %vm328_vm4, %v15607_v62  ;;  %v1882_v62 = vor.u32 %v1880_v14, %v1879_v46  ;;  %v2594_v45 = vrot.slane %v2592_v28, 4  ;;  %v2600_v7 = vrot.slane %v2598_v61, 5  ;;  %v2861_v54 = vrot.slane %v2308_v5, 5  ;;  %v16756_v5 = vld [vmem:[#allocation2 + $0x88] sm:$0xf] }
 0x141   : > { %914 = vmatprep.mubr.bf16.mxu1 %v16366_v31  ;;  %4760 = vrot.lane.b32.xlu0 %v13063_v8, %s15174_s9  ;;  %v1890_v8 = vor.u32 %v1888_v26, %v1887_v56  ;;  %v1892_v2 = vrot.slane %v1887_v56, 4  ;;  %v2864_v46 = vrot.slane %v2329_v0, 5  ;;  %v2586_v35 = vrot.slane %v2585_v27, 4  ;;  %v14917_v26 = vld [vmem:[#allocation2 + $0x24] sm:$0xf] }
 0x142   : > { %v16751_v14 = vsel %vm16554_vm11, %v1882_v62, %v16366_v31  ;;  %v2595_v63 = vor.u32 %v2594_v45, %v2590_v20  ;;  %v2862_v9 = vsel %vm15573_vm12, %v12904_v19, %v2861_v54  ;;  %v2863_v29 = vrot.slane %v2861_v54, 4  ;;  %v14918_v62 = vld [vmem:[#allocation2 + $0x28] sm:$0xf] }
 0x143   : > { %2191 = vst [vmem:[#allocation3 + $0x48] sm:$0xff] %v16751_v14  ;;  %v16760_v28 = vsel %vm15482_vm9, %v1883_v24, %v1890_v8  ;;  %v2194_v61 = vsel %vm16595_vm3, %v1892_v2, %v2193_v33  ;;  %v12945_v0 = vcombine.low %v14917_v26, %v14918_v62  ;;  %v3190_v56 = vshrl.u32 %v16742_v3, 16  ;;  %v16775_v26 = vld [vmem:[#allocation2 + $0x8c] sm:$0x1] }
 0x144   : > { %2192 = vst [vmem:[#allocation3 + $0x50] sm:$0xff] %v16760_v28  ;;  %2195 = vst [vmem:[#allocation3 + $0x58] sm:$0x11] %v2194_v61  ;;  %v2591_v19 = vsel %vm15624_vm15, %v2586_v35, %v2590_v20  ;;  %v2596_v27 = vrot.slane %v2595_v63, 4  ;;  %v2865_v45 = vsel %vm15573_vm12, %v2863_v29, %v2864_v46  ;;  %v3193_v24 = vshll.u32 %v16742_v3, 16  ;;  %v4493_v61 = vpop.permute.xlu1 %4492  ;;  %v16777_v62 = vpop.f32.mrb[32].mxu1 }
 0x145   : > { %v12984_v33 = vcombine.low %v2862_v9, %v2865_v45  ;;  %v4865_v54 = vsel %vm328_vm4, %v12945_v0, %v4237_v60  ;;  %v3192_v8 = vrot.slane %v3190_v56, 4  ;;  %v3203_v2 = vshrl.u32 %v16756_v5, 16  ;;  %21630 = vst [vmem:[#allocation39_spill] sm:$0xff] %v16777_v62  ;;  %v4413_v46 = vpop.permute.xlu0 %4412  ;;  %v16783_v35 = vpop.f32.mrb[33].mxu1 }
 0x146   : > { %vm4935_vm5 = vcmask 97280   ;;  %v2601_v63 = vsel %vm15624_vm15, %v2596_v27, %v2600_v7  ;;  %v4910_v20 = vsel %vm4902_vm1, %v4865_v54, %v4317_v55  ;;  %21631 = vst [vmem:[#allocation40_spill] sm:$0xff] %v16783_v35  ;;  %v1576_v9 = vadd.f32 %v16453_v39, %v16569_v18  ;;  %v16789_v56 = vpop.f32.mrb[34].mxu1  ;;  %v3343_v54 = vld [vmem:[#allocation2 + $0x84] sm:$0xe] }
 0x147   : > { %v12968_v60 = vcombine.low %v2591_v19, %v2601_v63  ;;  %4330 = vrot.lane.b32.xlu1 %v12984_v33, %s15169_s19  ;;  %v3199_v29 = vshll.u32 %v16756_v5, 16  ;;  %v3205_v0 = vrot.slane %v3203_v2, 4  ;;  %21632 = vst [vmem:[#allocation41_spill] sm:$0xff] %v16789_v56  ;;  %vm4968_vm7 = vcmask 130048   ;;  %v16794_v27 = vpop.f32.mrb[35].mxu1 }
 0x148   : > { %12824 = vmatmul.mubr.msk.bf16.gmra.mrb[136].mxu1 %vm328_vm4, %v15671_v52  ;;  %v3195_v52 = vrot.slane %v3193_v24, 5  ;;  %v3209_v7 = vshll.u32 %v16775_v26, 16  ;;  %v1577_v55 = vadd.f32 %v16475_v41, %v16577_v43  ;;  %21633 = vst [vmem:[#allocation42_spill] sm:$0xff] %v16794_v27  ;;  %vm5001_vm8 = vcmask 162816   ;;  %v14439_v43 = vld [vmem:[%s21548_s3 + $0x400] ss:$8 sps:$4 sm:$0xff]  }
 0x149   : > { %924 = vmatprep.mubr.bf16.mxu1 %v16366_v31  ;;  %4250 = vrot.lane.b32.xlu0 %v12968_v60, %s15171_s26  ;;  %v13000_v18 = vcombine.low %v16742_v3, %v16756_v5  ;;  %v3201_v19 = vrot.slane %v3199_v29, 5  ;;  %v13231_v24 = vcombine.high %v16582_v12, %v16607_v10  ;;  %v4943_v33 = vsel %vm4935_vm5, %v4910_v20, %v4413_v46  ;;  %v16812_v46 = vld [vmem:[#allocation2 + $0x90] sm:$0xf] }
 0x14a   : > { %v3196_v45 = vor.u32 %v3195_v52, %v3192_v8  ;;  %vm5034_vm6 = vcmask 195584   ;;  %v3211_v2 = vrot.slane %v3209_v7, 5  ;;  %v13777_v63 = vpack.c.bf16 %v1577_v55, %v1576_v9  ;;  %v16814_v9 = vld [vmem:[#allocation2 + $0x94] sm:$0xf] }
 0x14b   : > { %v1578_v52 = vadd.f32 %v16453_v39, %v16584_v17  ;;  %v3206_v60 = vor.u32 %v3205_v0, %v3201_v19  ;;  %10759 = vmatprep.mubr.bf16.mxu0 %v13231_v24  ;;  %v13230_v3 = vcombine.low %v16582_v12, %v16607_v10  ;;  %v4976_v29 = vsel %vm4968_vm7, %v4943_v33, %v4493_v61  ;;  %v14445_v7 = vld [vmem:[%s21548_s3 + $0x414] ss:$8 sps:$4 sm:$0xff]   ;;  %v4573_v12 = vpop.permute.xlu0 %4572 }
 0x14c   : > { %v3197_v8 = vrot.slane %v3196_v45, 4  ;;  %v1579_v20 = vadd.f32 %v16475_v41, %v16587_v25  ;;  %v4669_v45 = vpop.permute.xlu1 %4668  ;;  %v1894_v0 = vshrl.u32 %v13777_v63, 16  ;;  %v1897_v55 = vshll.u32 %v13777_v63, 16  ;;  %v16826_v27 = vpop.f32.mrb[36].mxu1 }
 0x14d   : > { %v12920_v10 = vrot.slane %v3343_v54, 9  ;;  %4426 = vrot.lane.b32.xlu0 %v13000_v18, %s15168_s18  ;;  %v3207_v25 = vrot.slane %v3206_v60, 4  ;;  %10760 = vmatmul.mubr.bf16.vlgmr.msra.gmra.mrb[32].mxu0 %v13230_v3  ;;  %v3469_v24 = vrot.slane %v16756_v5, 5  ;;  %v3472_v33 = vrot.slane %v16775_v26, 5  ;;  %21634 = vst [vmem:[#allocation43_spill] sm:$0xff] %v16826_v27 }
 0x14e   : > { %v3202_v17 = vsel %vm15624_vm15, %v3197_v8, %v3201_v19  ;;  %v13778_v61 = vpack.c.bf16 %v1579_v20, %v1578_v52  ;;  %v1896_v56 = vrot.slane %v1894_v0, 7  ;;  %10921 = vmatpush1.bf16.msra.mxu0 %v14439_v43  ;;  %v3799_v19 = vshrl.u32 %v16812_v46, 16  ;;  %v14450_v43 = vld [vmem:[%s21548_s3 + $0x424] ss:$8 sps:$4 sm:$0xff]   ;;  %v16842_v52 = vpop.f32.mrb[37].mxu1 }
 0x14f   : > { %v3802_v54 = vshll.u32 %v16812_v46, 16  ;;  %v3812_v8 = vshrl.u32 %v16814_v9, 16  ;;  %v3212_v5 = vsel %vm15624_vm15, %v3207_v25, %v3211_v2  ;;  %v3470_v63 = vsel %vm15573_vm12, %v12920_v10, %v3469_v24  ;;  %10922 = vmatprep.subr.bf16.mxu0 %v14445_v7  ;;  %v16846_v27 = vpop.f32.mrb[38].mxu1  ;;  %v2200_v25 = vld [vmem:[#allocation3 + $0x70] sm:$0x11] }
 0x150   : > { %12825 = vmatmul.mubr.msk.bf16.gmra.mrb[140].mxu1 %vm328_vm4, %v15722_v22  ;;  %v14443_v22 = vld [vmem:[%s21548_s3 + $0x410] ss:$8 sps:$4 sm:$0xff]   ;;  %v1902_v26 = vshrl.u32 %v13778_v61, 16  ;;  %v1905_v18 = vshll.u32 %v13778_v61, 16  ;;  %v13016_v60 = vcombine.low %v3202_v17, %v3212_v5  ;;  %v1899_v3 = vor.u32 %v1897_v55, %v1896_v56  ;;  %v16850_v10 = vpop.permute.xlu1 %4828  ;;  %v16852_v62 = vpop.f32.mrb[39].mxu1 }
 0x151   : > { %934 = vmatprep.mubr.bf16.mxu1 %v16366_v31  ;;  %v1900_v20 = vrot.slane %v1896_v56, 4  ;;  %v3471_v0 = vrot.slane %v3469_v24, 4  ;;  %v16844_v31 = vld [vmem:[#allocation2 + $0x98] sm:$0x1]  ;;  %v3801_v61 = vrot.slane %v3799_v19, 4  ;;  %v3804_v35 = vrot.slane %v3802_v54, 5  ;;  %v4749_v54 = vpop.permute.xlu0 %4748 }
 0x152   : > { %v1904_v2 = vrot.slane %v1902_v26, 7  ;;  %v13048_v7 = vcombine.low %v16812_v46, %v16814_v9  ;;  %21635 = vst [vmem:[#allocation44_spill] sm:$0xff] %v16852_v62  ;;  %4506 = vrot.lane.b32.xlu1 %v13016_v60, %s15175_s10  ;;  %v16855_v17 = vld [vmem:[#allocation3] sm:$0xff]  ;;  %v5009_v24 = vsel %vm5001_vm8, %v4976_v29, %v4573_v12  ;;  %v3808_v46 = vshll.u32 %v16814_v9, 16  ;;  %v3952_v19 = vld [vmem:[#allocation2 + $0x90] sm:$0xe]  ;;  %10923 = vmatpush1.bf16.msra.mxu0 %v14443_v22 }
 0x153   : > { %v16860_v56 = vsel %vm16554_vm11, %v1899_v3, %v16855_v17  ;;  %v3473_v55 = vsel %vm15573_vm12, %v3471_v0, %v3472_v33  ;;  %v14448_v5 = vld [vmem:[%s21548_s3 + $0x420] ss:$8 sps:$4 sm:$0xff]   ;;  %v5042_v62 = vsel %vm5034_vm6, %v5009_v24, %v4669_v45  ;;  %10924 = vmatprep.subr.bf16.mxu0 %v14450_v43  ;;  %v14454_v29 = vld [vmem:[%s21548_s3 + $0x434] ss:$8 sps:$4 sm:$0xff]   ;;  %v3805_v12 = vor.u32 %v3804_v35, %v3801_v61 }
 0x154   : > { %2198 = vst [vmem:[#allocation3 + $0x60] sm:$0xff] %v16860_v56  ;;  %v1907_v26 = vor.u32 %v1905_v18, %v1904_v2  ;;  %v1909_v60 = vrot.slane %v1904_v2, 4  ;;  %v13032_v3 = vcombine.low %v3470_v63, %v3473_v55  ;;  %v3810_v33 = vrot.slane %v3808_v46, 5  ;;  %v16886_v43 = vpop.f32.mrb[40].mxu1 }
 0x155   : > { %v3814_v0 = vrot.slane %v3812_v8, 4  ;;  %v3818_v22 = vshll.u32 %v16844_v31, 16  ;;  %v1580_v63 = vadd.f32 %v16453_v39, %v16618_v53  ;;  %v12936_v35 = vrot.slane %v3952_v19, 9  ;;  %v14452_v53 = vld [vmem:[%s21548_s3 + $0x430] ss:$8 sps:$4 sm:$0xff]  }
 0x156   : > { %v16879_v18 = vsel %vm15482_vm9, %v1900_v20, %v1907_v26  ;;  %v2201_v45 = vsel %vm16595_vm3, %v1909_v60, %v2200_v25  ;;  %4586 = vrot.lane.b32.xlu0 %v13032_v3, %s15173_s29  ;;  %4682 = vrot.lane.b32.xlu1 %v13048_v7, %s15170_s20  ;;  %v4078_v2 = vrot.slane %v16814_v9, 5  ;;  %v16895_v25 = vpop.f32.mrb[41].mxu1  ;;  %vm5067_vm10 = vcmask 228352   ;;  %v16900_v7 = vpop.permute.xlu1 %4318  ;;  %v14459_v9 = vld [vmem:[%s21548_s3 + $0x444] ss:$8 sps:$4 sm:$0xff]  }
 0x157   : > { %2199 = vst [vmem:[#allocation3 + $0x68] sm:$0xff] %v16879_v18  ;;  %2202 = vst [vmem:[#allocation3 + $0x70] sm:$0x11] %v2201_v45  ;;  %v3815_v8 = vor.u32 %v3814_v0, %v3810_v33  ;;  %v3820_v20 = vrot.slane %v3818_v22, 5  ;;  %10925 = vmatpush1.bf16.msra.mxu0 %v14448_v5  ;;  %vm5100_vm13 = vcmask 261120   ;;  %v4081_v61 = vrot.slane %v16844_v31, 5  ;;  %v16911_v26 = vpop.permute.xlu0 %4238 }
 0x158   : > { %12826 = vmatmul.mubr.msk.bf16.gmra.mrb[144].mxu1 %vm328_vm4, %v15775_v30  ;;  %v3806_v30 = vrot.slane %v3805_v12, 4  ;;  %v1581_v55 = vadd.f32 %v16475_v41, %v16622_v38  ;;  %10926 = vmatprep.subr.bf16.mxu0 %v14454_v29  ;;  %v16905_v24 = vpop.f32.mrb[42].mxu1  ;;  %v4079_v5 = vsel %vm15573_vm12, %v12936_v35, %v4078_v2  ;;  %v4080_v31 = vrot.slane %v4078_v2, 4  ;;  %v2309_v0 = vld [vmem:[#allocation2 + $0x84] sm:$0xf] }
 0x159   : > { %944 = vmatprep.mubr.bf16.mxu1 %v16855_v17  ;;  %v3816_v19 = vrot.slane %v3815_v8, 4  ;;  %v16913_v38 = vpop.f32.mrb[43].mxu1  ;;  %v13233_v3 = vcombine.high %v16682_v11, %v16697_v37  ;;  %v5075_v29 = vsel %vm5067_vm10, %v5042_v62, %v4749_v54  ;;  %v1582_v12 = vadd.f32 %v16453_v39, %v16631_v49  ;;  %v16932_v62 = vld [vmem:[#allocation2 + $0x8c] sm:$0x1]  ;;  %v2733_v54 = vld [vmem:[#allocation2 + $0x84] sm:$0xe] }
 0x15a   : > { %v3811_v46 = vsel %vm15624_vm15, %v3806_v30, %v3810_v33  ;;  %v13779_v60 = vpack.c.bf16 %v1581_v55, %v1580_v63  ;;  %v16920_v33 = vld [vmem:[#allocation2 + $0x88] sm:$0xf]  ;;  %v4082_v45 = vsel %vm15573_vm12, %v4080_v31, %v4081_v61  ;;  %v13232_v63 = vcombine.low %v16682_v11, %v16697_v37  ;;  %v14463_v11 = vld [vmem:[%s21548_s3 + $0x454] ss:$8 sps:$4 sm:$0xff]   ;;  %v14461_v55 = vld [vmem:[%s21548_s3 + $0x450] ss:$8 sps:$4 sm:$0xff]  }
 0x15b   : > { %v3821_v22 = vsel %vm15624_vm15, %v3816_v19, %v3820_v20  ;;  %v16930_v35 = vsel %vm5100_vm13, %v5075_v29, %v16850_v10  ;;  %10927 = vmatpush1.bf16.msra.mxu0 %v14452_v53  ;;  %v14457_v49 = vld [vmem:[%s21548_s3 + $0x440] ss:$8 sps:$4 sm:$0xff]   ;;  %v13080_v8 = vcombine.low %v4079_v5, %v4082_v45  ;;  %10769 = vmatprep.mubr.bf16.mxu0 %v13233_v3  ;;  %v2603_v10 = vshrl.u32 %v2309_v0, 16  ;;  %v16954_v5 = vpop.permute.xlu1 %4494  ;;  %v14468_v31 = vld [vmem:[%s21548_s3 + $0x464] ss:$8 sps:$4 sm:$0xff]   ;;  %v18037_v13 = vld [vmem:[#allocation3 + $0x60] sm:$0xff] }
 0x15c   : > { %21636 = vst [vmem:[#allocation45_spill] sm:$0xff] %v16930_v35  ;;  %v13064_v30 = vcombine.low %v3811_v46, %v3821_v22  ;;  %v1911_v20 = vshrl.u32 %v13779_v60, 16  ;;  %v1914_v2 = vshll.u32 %v13779_v60, 16  ;;  %10928 = vmatprep.subr.bf16.mxu0 %v14459_v9  ;;  %10770 = vmatmul.mubr.bf16.gmra.mrb[36].mxu0 %v13232_v63  ;;  %v1583_v37 = vadd.f32 %v16475_v41, %v16638_v40  ;;  %v16959_v60 = vpop.f32.mrb[44].mxu1  ;;  %v16961_v22 = vpop.permute.xlu0 %4414  ;;  %v14479_v63 = vld [vmem:[%s21546_s1] ss:$8 sps:$4 sm:$0xff]  }
 0x15d   : > { %v2606_v53 = vshll.u32 %v2309_v0, 16  ;;  %v2612_v61 = vshll.u32 %v16920_v33, 16  ;;  %4842 = vrot.lane.b32.xlu1 %v13080_v8, %s15172_s28  ;;  %v2616_v46 = vshrl.u32 %v16920_v33, 16  ;;  %v2622_v40 = vshll.u32 %v16932_v62, 16  ;;  %21637 = vst [vmem:[#allocation46_spill] sm:$0xff] %v16959_v60  ;;  %v16963_v45 = vpop.f32.mrb[45].mxu1 }
 0x15e   : > { %4762 = vrot.lane.b32.xlu0 %v13064_v30, %s15174_s9  ;;  %v16950_v9 = vrot.slane %v1911_v20, 7  ;;  %v12905_v19 = vrot.slane %v2733_v54, 9  ;;  %v2605_v3 = vrot.slane %v2603_v10, 4  ;;  %21638 = vst [vmem:[#allocation47_spill] sm:$0xff] %v16963_v45  ;;  %v16971_v20 = vpop.f32.mrb[46].mxu1 }
 0x15f   : > { %v2608_v29 = vrot.slane %v2606_v53, 5  ;;  %v2614_v0 = vrot.slane %v2612_v61, 5  ;;  %10929 = vmatpush1.bf16.msra.mxu0 %v14457_v49  ;;  %v2618_v8 = vrot.slane %v2616_v46, 4  ;;  %21639 = vst [vmem:[#allocation48_spill] sm:$0xff] %v16971_v20  ;;  %v14481_v49 = vld [vmem:[%s21546_s1 + $0x4] ss:$8 sps:$4 sm:$0xff]  }
 0x160   : > { %12827 = vmatmul.mubr.msk.bf16.gmra.mrb[148].mxu1 %vm328_vm4, %v15832_v6  ;;  %v13780_v6 = vpack.c.bf16 %v1583_v37, %v1582_v12  ;;  %v1916_v54 = vor.u32 %v1914_v2, %v16950_v9  ;;  %v1917_v30 = vrot.slane %v16950_v9, 4  ;;  %v2624_v12 = vrot.slane %v2622_v40, 5  ;;  %10930 = vmatprep.subr.bf16.mxu0 %v14463_v11  ;;  %v16977_v35 = vld [vmem:[#allocation2 + $0x90] sm:$0xf]  ;;  %v16979_v45 = vpop.f32.mrb[47].mxu1 }
 0x161   : > { %954 = vmatprep.mubr.bf16.mxu1 %v16855_v17  ;;  %v2609_v53 = vor.u32 %v2608_v29, %v2605_v3  ;;  %v2868_v61 = vrot.slane %v16920_v33, 5  ;;  %v2207_v11 = vld [vmem:[#allocation3 + $0x88] sm:$0x11]  ;;  %v2619_v9 = vor.u32 %v2618_v8, %v2614_v0  ;;  %v2871_v46 = vrot.slane %v16932_v62, 5  ;;  %v14920_v40 = vld [vmem:[#allocation2 + $0x30] sm:$0xf]  ;;  %8227 = vmatprep.subr.bf16.mxu1 %v14481_v49 }
 0x162   : > { %v1919_v37 = vshrl.u32 %v13780_v6, 16  ;;  %v1922_v10 = vshll.u32 %v13780_v6, 16  ;;  %v16984_v2 = vsel %vm16554_vm11, %v1916_v54, %v16855_v17  ;;  %v14921_v20 = vld [vmem:[#allocation2 + $0x34] sm:$0xf]  ;;  %v14466_v54 = vld [vmem:[%s21548_s3 + $0x460] ss:$8 sps:$4 sm:$0xff]   ;;  %8228 = vmatpush1.bf16.msra.mxu1 %v14479_v63 }
 0x163   : > { %v12946_v60 = vcombine.low %v14920_v40, %v14921_v20  ;;  %2205 = vst [vmem:[#allocation3 + $0x78] sm:$0xff] %v16984_v2  ;;  %v2610_v6 = vrot.slane %v2609_v53, 4  ;;  %v2869_v3 = vsel %vm15573_vm12, %v12905_v19, %v2868_v61  ;;  %v2870_v29 = vrot.slane %v2868_v61, 4  ;;  %10931 = vmatpush1.bf16.msra.mxu0 %v14461_v55  ;;  %v14472_v55 = vld [vmem:[%s21548_s3 + $0x474] ss:$8 sps:$4 sm:$0xff]  }
 0x164   : > { %v1921_v33 = vrot.slane %v1919_v37, 7  ;;  %v2620_v8 = vrot.slane %v2619_v9, 4  ;;  %v3214_v20 = vshrl.u32 %v16977_v35, 16  ;;  %v3217_v49 = vshll.u32 %v16977_v35, 16  ;;  %v16997_v37 = vpop.permute.xlu1 %4670  ;;  %10932 = vmatprep.subr.bf16.mxu0 %v14468_v31 }
 0x165   : > { %v4868_v62 = vsel %vm328_vm4, %v12946_v60, %v16911_v26  ;;  %v2615_v63 = vsel %vm15624_vm15, %v2610_v6, %v2614_v0  ;;  %v2872_v61 = vsel %vm15573_vm12, %v2870_v29, %v2871_v46  ;;  %v17006_v26 = vld [vmem:[#allocation2 + $0x94] sm:$0xf]  ;;  %v17008_v60 = vpop.permute.xlu0 %4574  ;;  %v17018_v0 = vpop.f32.mrb[48].mxu1  ;;  %v1584_v29 = vadd.f32 %v16453_v39, %v16655_v16  ;;  %v14477_v16 = vld [vmem:[%s21548_s3 + $0x484] ss:$8 sps:$4 sm:$0xff]  }
 0x166   : > { %v1924_v19 = vor.u32 %v1922_v10, %v1921_v33  ;;  %v1926_v53 = vrot.slane %v1921_v33, 4  ;;  %v2625_v31 = vsel %vm15624_vm15, %v2620_v8, %v2624_v12  ;;  %v12985_v9 = vcombine.low %v2869_v3, %v2872_v61  ;;  %v17016_v33 = vld [vmem:[#allocation2 + $0x98] sm:$0x1]  ;;  %v17030_v3 = vpop.f32.mrb[49].mxu1  ;;  %v3344_v61 = vld [vmem:[#allocation2 + $0x90] sm:$0xe] }
 0x167   : > { %v4912_v10 = vsel %vm4902_vm1, %v4868_v62, %v16900_v7  ;;  %v3216_v40 = vrot.slane %v3214_v20, 4  ;;  %v12969_v6 = vcombine.low %v2615_v63, %v2625_v31  ;;  %v3219_v12 = vrot.slane %v3217_v49, 5  ;;  %10933 = vmatpush1.bf16.msra.mxu0 %v14466_v54  ;;  %v14470_v7 = vld [vmem:[%s21548_s3 + $0x470] ss:$8 sps:$4 sm:$0xff]   ;;  %v17038_v54 = vpop.f32.mrb[50].mxu1 }
 0x168   : > { %12828 = vmatmul.mubr.msk.bf16.gmra.mrb[152].mxu1 %vm328_vm4, %v15878_v44  ;;  %v17023_v46 = vsel %vm15482_vm9, %v1917_v30, %v1924_v19  ;;  %v2208_v44 = vsel %vm16595_vm3, %v1926_v53, %v2207_v11  ;;  %4332 = vrot.lane.b32.xlu1 %v12985_v9, %s15169_s19  ;;  %v3227_v30 = vshrl.u32 %v17006_v26, 16  ;;  %v3223_v11 = vshll.u32 %v17006_v26, 16  ;;  %v17049_v19 = vpop.f32.mrb[51].mxu1  ;;  %v17053_v31 = vpop.permute.xlu1 %4830 }
 0x169   : > { %964 = vmatprep.mubr.bf16.mxu1 %v16855_v17  ;;  %2206 = vst [vmem:[#allocation3 + $0x80] sm:$0xff] %v17023_v46  ;;  %2209 = vst [vmem:[#allocation3 + $0x88] sm:$0x11] %v2208_v44  ;;  %10934 = vmatprep.subr.bf16.mxu0 %v14472_v55  ;;  %v13001_v8 = vcombine.low %v16977_v35, %v17006_v26  ;;  %v3220_v62 = vor.u32 %v3219_v12, %v3216_v40  ;;  %v3233_v20 = vshll.u32 %v17016_v33, 16  ;;  %v17057_v44 = vpop.permute.xlu0 %4750  ;;  %v14487_v12 = vld [vmem:[%s21546_s1 + $0x14] ss:$8 sps:$4 sm:$0xff]  }
 0x16a   : > { %4252 = vrot.lane.b32.xlu0 %v12969_v6, %s15171_s26  ;;  %v1585_v49 = vadd.f32 %v16475_v41, %v16663_v34  ;;  %v3225_v55 = vrot.slane %v3223_v11, 5  ;;  %v3229_v53 = vrot.slane %v3227_v30, 4  ;;  %v13235_v63 = vcombine.high %v16751_v14, %v16760_v28  ;;  %v14475_v6 = vld [vmem:[%s21548_s3 + $0x480] ss:$8 sps:$4 sm:$0xff]   ;;  %8229 = vmatprep.subr.bf16.mxu1 %v14487_v12 }
 0x16b   : > { %v3221_v35 = vrot.slane %v3220_v62, 4  ;;  %v3235_v9 = vrot.slane %v3233_v20, 5  ;;  %v4945_v34 = vsel %vm4935_vm5, %v4912_v10, %v16961_v22  ;;  %10935 = vmatpush1.bf16.msra.mxu0 %v14470_v7  ;;  %v1586_v11 = vadd.f32 %v16453_v39, %v16668_v32  ;;  %v17071_v10 = vld [vmem:[#allocation2 + $0x9c] sm:$0xf]  ;;  %v14485_v62 = vld [vmem:[%s21546_s1 + $0x10] ss:$8 sps:$4 sm:$0xff]  }
 0x16c   : > { %v13781_v40 = vpack.c.bf16 %v1585_v49, %v1584_v29  ;;  %v3230_v30 = vor.u32 %v3229_v53, %v3225_v55  ;;  %10779 = vmatprep.mubr.bf16.mxu0 %v13235_v63  ;;  %v13234_v29 = vcombine.low %v16751_v14, %v16760_v28  ;;  %v4978_v22 = vsel %vm4968_vm7, %v4945_v34, %v16954_v5  ;;  %v14484_v7 = vld [vmem:[%s21548_s3 + $0x494] ss:$8 sps:$4 sm:$0xff]   ;;  %v17084_v5 = vld [vmem:[#allocation2 + $0xa0] sm:$0xf] }
 0x16d   : > { %v3226_v32 = vsel %vm15624_vm15, %v3221_v35, %v3225_v55  ;;  %v1587_v28 = vadd.f32 %v16475_v41, %v16676_v36  ;;  %10936 = vmatprep.subr.bf16.mxu0 %v14477_v16  ;;  %v12921_v53 = vrot.slane %v3344_v61, 9  ;;  %v3476_v63 = vrot.slane %v17006_v26, 5  ;;  %v14482_v16 = vld [vmem:[%s21548_s3 + $0x490] ss:$8 sps:$4 sm:$0xff]   ;;  %8230 = vmatpush1.bf16.msra.mxu1 %v14485_v62 }
 0x16e   : > { %4428 = vrot.lane.b32.xlu0 %v13001_v8, %s15168_s18  ;;  %v1928_v20 = vshrl.u32 %v13781_v40, 16  ;;  %v1931_v14 = vshll.u32 %v13781_v40, 16  ;;  %v3231_v49 = vrot.slane %v3230_v30, 4  ;;  %10780 = vmatmul.mubr.bf16.gmra.mrb[40].mxu0 %v13234_v29  ;;  %v3479_v34 = vrot.slane %v17016_v33, 5  ;;  %v17090_v8 = vpop.f32.mrb[52].mxu1  ;;  %v17102_v30 = vpop.permute.xlu1 %4320 }
 0x16f   : > { %v13782_v35 = vpack.c.bf16 %v1587_v28, %v1586_v11  ;;  %v3823_v40 = vshrl.u32 %v17071_v10, 16  ;;  %v3826_v36 = vshll.u32 %v17071_v10, 16  ;;  %10937 = vmatpush1.bf16.msra.mxu0 %v14475_v6  ;;  %v3478_v33 = vrot.slane %v3476_v63, 4  ;;  %v17104_v28 = vpop.permute.xlu0 %4240 }
 0x170   : > { %12829 = vmatmul.mubr.msk.bf16.gmra.mrb[156].mxu1 %vm328_vm4, %v15912_v51  ;;  %v1930_v55 = vrot.slane %v1928_v20, 7  ;;  %v3236_v26 = vsel %vm15624_vm15, %v3231_v49, %v3235_v9  ;;  %v3477_v51 = vsel %vm15573_vm12, %v12921_v53, %v3476_v63  ;;  %v3836_v61 = vshrl.u32 %v17084_v5, 16  ;;  %10938 = vmatprep.subr.bf16.mxu0 %v14484_v7  ;;  %v3553_v63 = vld [vmem:[#allocation2 + $0xa4] sm:$0x1] }
 0x171   : > { %v13017_v11 = vcombine.low %v3226_v32, %v3236_v26  ;;  %v1936_v20 = vshrl.u32 %v13782_v35, 16  ;;  %8259 = vmatprep.mubr.bf16.mxu1 %v16855_v17  ;;  %v1939_v12 = vshll.u32 %v13782_v35, 16  ;;  %v3480_v9 = vsel %vm15573_vm12, %v3478_v33, %v3479_v34  ;;  %v2214_v34 = vld [vmem:[#allocation3 + $0xa0] sm:$0x11]  ;;  %v17121_v33 = vpop.f32.mrb[53].mxu1 }
 0x172   : > { %v1933_v6 = vor.u32 %v1931_v14, %v1930_v55  ;;  %v1934_v29 = vrot.slane %v1930_v55, 4  ;;  %v3825_v49 = vrot.slane %v3823_v40, 4  ;;  %v3828_v53 = vrot.slane %v3826_v36, 5  ;;  %v3953_v55 = vld [vmem:[#allocation2 + $0x9c] sm:$0xe] }
 0x173   : > { %4508 = vrot.lane.b32.xlu1 %v13017_v11, %s15175_s10  ;;  %v1938_v62 = vrot.slane %v1936_v20, 7  ;;  %v13033_v32 = vcombine.low %v3477_v51, %v3480_v9  ;;  %v13049_v14 = vcombine.low %v17071_v10, %v17084_v5  ;;  %10939 = vmatpush1.bf16.msra.mxu0 %v14482_v16  ;;  %v5011_v35 = vsel %vm5001_vm8, %v4978_v22, %v17008_v60  ;;  %v14491_v51 = vld [vmem:[%s21548_s3 + $0x4a0] ss:$8 sps:$4 sm:$0xff]   ;;  %v14493_v60 = vld [vmem:[%s21548_s3 + $0x4a4] ss:$8 sps:$4 sm:$0xff]   ;;  %v17134_v9 = vpop.permute.xlu1 %4496 }
 0x174   : > { %v17113_v7 = vsel %vm16554_vm11, %v1933_v6, %v16855_v17  ;;  %v3829_v40 = vor.u32 %v3828_v53, %v3825_v49  ;;  %v3832_v36 = vshll.u32 %v17084_v5, 16  ;;  %v3838_v26 = vrot.slane %v3836_v61, 4  ;;  %v17136_v49 = vpop.f32.mrb[54].mxu1  ;;  %10940 = vmatprep.subr.bf16.mxu0 %v14493_v60 }
 0x175   : > { %2212 = vst [vmem:[#allocation3 + $0x90] sm:$0xff] %v17113_v7  ;;  %v1941_v11 = vor.u32 %v1939_v12, %v1938_v62  ;;  %v1943_v6 = vrot.slane %v1938_v62, 4  ;;  %4588 = vrot.lane.b32.xlu0 %v13033_v32, %s15173_s29  ;;  %v5044_v10 = vsel %vm5034_vm6, %v5011_v35, %v16997_v37  ;;  %v3842_v16 = vshll.u32 %v3553_v63, 16  ;;  %v17146_v32 = vpop.permute.xlu0 %4416 }
 0x176   : > { %v3830_v22 = vrot.slane %v3829_v40, 4  ;;  %v3834_v61 = vrot.slane %v3832_v36, 5  ;;  %v1588_v20 = vadd.f32 %v16453_v39, %v16703_v4  ;;  %v12937_v12 = vrot.slane %v3953_v55, 9  ;;  %v17148_v4 = vpop.f32.mrb[55].mxu1 }
 0x177   : > { %v17140_v37 = vsel %vm15482_vm9, %v1934_v29, %v1941_v11  ;;  %v2215_v53 = vsel %vm16595_vm3, %v1943_v6, %v2214_v34  ;;  %4684 = vrot.lane.b32.xlu1 %v13049_v14, %s15170_s20  ;;  %v4085_v62 = vrot.slane %v17084_v5, 5  ;;  %21640 = vst [vmem:[#allocation49_spill] sm:$0xff] %v17148_v4  ;;  %v3844_v35 = vrot.slane %v3842_v16, 5  ;;  %10941 = vmatpush1.bf16.msra.mxu0 %v14491_v51  ;;  %v17396_v4 = vld [vmem:[#allocation2 + $0xb0] sm:$0x1] }
 0x178   : > { %2213 = vst [vmem:[#allocation3 + $0x98] sm:$0xff] %v17140_v37  ;;  %2216 = vst [vmem:[#allocation3 + $0xa0] sm:$0x11] %v2215_v53  ;;  %v3839_v55 = vor.u32 %v3838_v26, %v3834_v61  ;;  %v4088_v40 = vrot.slane %v3553_v63, 5  ;;  %v1589_v29 = vadd.f32 %v16475_v41, %v16708_v48  ;;  %v3835_v14 = vsel %vm15624_vm15, %v3830_v22, %v3834_v61  ;;  %v2311_v63 = vld [vmem:[#allocation2 + $0x90] sm:$0xf] }
 0x179   : > { %v4086_v5 = vsel %vm15573_vm12, %v12937_v12, %v4085_v62  ;;  %v4087_v34 = vrot.slane %v4085_v62, 4  ;;  %v13237_v6 = vcombine.high %v16860_v56, %v16879_v18  ;;  %v5077_v26 = vsel %vm5067_vm10, %v5044_v10, %v17057_v44  ;;  %v2312_v22 = vld [vmem:[#allocation2 + $0x94] sm:$0xf]  ;;  %v2331_v61 = vld [vmem:[#allocation2 + $0x98] sm:$0x1]  ;;  %v17173_v62 = vpop.permute.xlu1 %4672 }
 0x17a   : > { %v3840_v36 = vrot.slane %v3839_v55, 4  ;;  %v13783_v11 = vpack.c.bf16 %v1589_v29, %v1588_v20  ;;  %v1590_v16 = vadd.f32 %v16453_v39, %v16713_v42  ;;  %v13236_v51 = vcombine.low %v16860_v56, %v16879_v18  ;;  %v2734_v53 = vld [vmem:[#allocation2 + $0x90] sm:$0xe]  ;;  %v17177_v55 = vpop.permute.xlu0 %4576 }
 0x17b   : > { %v4089_v48 = vsel %vm15573_vm12, %v4087_v34, %v4088_v40  ;;  %v17169_v60 = vsel %vm5100_vm13, %v5077_v26, %v17053_v31  ;;  %10789 = vmatprep.mubr.bf16.mxu0 %v13237_v6  ;;  %v1591_v56 = vadd.f32 %v16475_v41, %v16717_v58  ;;  %v2627_v18 = vshrl.u32 %v2311_v63, 16 }
 0x17c   : > { %21641 = vst [vmem:[#allocation50_spill] sm:$0xff] %v17169_v60  ;;  %v3845_v20 = vsel %vm15624_vm15, %v3840_v36, %v3844_v35  ;;  %v13081_v44 = vcombine.low %v4086_v5, %v4089_v48  ;;  %v1945_v10 = vshrl.u32 %v13783_v11, 16  ;;  %v1948_v12 = vshll.u32 %v13783_v11, 16  ;;  %10790 = vmatmul.mubr.bf16.gmra.mrb[44].mxu0 %v13236_v51  ;;  %v17181_v51 = vld [vmem:[#allocation2 + $0x9c] sm:$0xf] }
 0x17d   : > { %v13065_v42 = vcombine.low %v3835_v14, %v3845_v20  ;;  %v2630_v31 = vshll.u32 %v2311_v63, 16  ;;  %v2636_v35 = vshll.u32 %v2312_v22, 16  ;;  %v2640_v29 = vshrl.u32 %v2312_v22, 16 }
 0x17e   : > { %4844 = vrot.lane.b32.xlu1 %v13081_v44, %s15172_s28  ;;  %v1947_v40 = vrot.slane %v1945_v10, 7  ;;  %v2646_v5 = vshll.u32 %v2331_v61, 16  ;;  %v13784_v34 = vpack.c.bf16 %v1591_v56, %v1590_v16  ;;  %v2629_v36 = vrot.slane %v2627_v18, 4  ;;  %v17183_v10 = vpop.f32.mrb[56].mxu1 }
 0x17f   : > { %4764 = vrot.lane.b32.xlu0 %v13065_v42, %s15174_s9  ;;  %v2632_v11 = vrot.slane %v2630_v31, 5  ;;  %v12906_v14 = vrot.slane %v2734_v53, 9  ;;  %v2638_v48 = vrot.slane %v2636_v35, 5  ;;  %v2642_v58 = vrot.slane %v2640_v29, 4  ;;  %21642 = vst [vmem:[#allocation51_spill] sm:$0xff] %v17183_v10  ;;  %v17192_v18 = vpop.f32.mrb[57].mxu1 }
 0x180   : > { %v1950_v6 = vor.u32 %v1948_v12, %v1947_v40  ;;  %v1951_v26 = vrot.slane %v1947_v40, 4  ;;  %v1953_v63 = vshrl.u32 %v13784_v34, 16  ;;  %v1956_v20 = vshll.u32 %v13784_v34, 16  ;;  %v17190_v12 = vpop.permute.xlu1 %4832  ;;  %21644 = vst [vmem:[#allocation53_spill] sm:$0xff] %v17192_v18  ;;  %v14922_v35 = vld [vmem:[#allocation2 + $0x3c] sm:$0xf] }
 0x181   : > { %v2633_v60 = vor.u32 %v2632_v11, %v2629_v36  ;;  %v2648_v44 = vrot.slane %v2646_v5, 5  ;;  %v2643_v16 = vor.u32 %v2642_v58, %v2638_v48  ;;  %v2875_v56 = vrot.slane %v2312_v22, 5  ;;  %21643 = vst [vmem:[#allocation52_spill] sm:$0xff] %v17190_v12  ;;  %v14923_v29 = vld [vmem:[#allocation2 + $0x40] sm:$0xf]  ;;  %v17196_v36 = vpop.permute.xlu0 %4752 }
 0x182   : > { %v17188_v42 = vsel %vm16554_vm11, %v1950_v6, %v16855_v17  ;;  %v2878_v53 = vrot.slane %v2331_v61, 5  ;;  %v1955_v31 = vrot.slane %v1953_v63, 7  ;;  %v12947_v5 = vcombine.low %v14922_v35, %v14923_v29  ;;  %v2221_v11 = vld [vmem:[#allocation3 + $0xb8] sm:$0x11]  ;;  %v17205_v35 = vld [vmem:[#allocation2 + $0xa0] sm:$0xf] }
 0x183   : > { %2219 = vst [vmem:[#allocation3 + $0xa8] sm:$0xff] %v17188_v42  ;;  %v2634_v40 = vrot.slane %v2633_v60, 4  ;;  %v3238_v34 = vshrl.u32 %v17181_v51, 16  ;;  %v2644_v6 = vrot.slane %v2643_v16, 4  ;;  %v2876_v22 = vsel %vm15573_vm12, %v12906_v14, %v2875_v56  ;;  %v17207_v29 = vld [vmem:[#allocation2 + $0xa4] sm:$0x1] }
 0x184   : > { %v2877_v61 = vrot.slane %v2875_v56, 4  ;;  %v3241_v58 = vshll.u32 %v17181_v51, 16  ;;  %v1958_v12 = vor.u32 %v1956_v20, %v1955_v31  ;;  %v1960_v18 = vrot.slane %v1955_v31, 4  ;;  %v17221_v31 = vpop.f32.mrb[58].mxu1  ;;  %v14926_v10 = vld [vmem:[#allocation2 + $0x4] sm:$0xf] }
 0x185   : > { %v2639_v60 = vsel %vm15624_vm15, %v2634_v40, %v2638_v48  ;;  %v4871_v63 = vsel %vm328_vm4, %v12947_v5, %v17104_v28  ;;  %v2649_v16 = vsel %vm15624_vm15, %v2644_v6, %v2648_v44  ;;  %v3240_v56 = vrot.slane %v3238_v34, 4  ;;  %v14496_v48 = vld [vmem:[%s21548_s3 + $0x4b0] ss:$8 sps:$4 sm:$0xff]   ;;  %v14498_v28 = vld [vmem:[%s21548_s3 + $0x4b4] ss:$8 sps:$4 sm:$0xff]   ;;  %21645 = vst [vmem:[#allocation54_spill] sm:$0xff] %v17221_v31 }
 0x186   : > { %v2879_v14 = vsel %vm15573_vm12, %v2877_v61, %v2878_v53  ;;  %v4914_v20 = vsel %vm4902_vm1, %v4871_v63, %v17102_v30  ;;  %v17225_v44 = vsel %vm15482_vm9, %v1951_v26, %v1958_v12  ;;  %v2222_v53 = vsel %vm16595_vm3, %v1960_v18, %v2221_v11  ;;  %v17229_v5 = vpop.f32.mrb[59].mxu1  ;;  %v17235_v63 = vpop.permute.xlu1 %4322  ;;  %10942 = vmatprep.subr.bf16.mxu0 %v14498_v28 }
 0x187   : > { %v12970_v40 = vcombine.low %v2639_v60, %v2649_v16  ;;  %v12986_v30 = vcombine.low %v2876_v22, %v2879_v14  ;;  %21646 = vst [vmem:[#allocation55_spill] sm:$0xff] %v17229_v5  ;;  %2220 = vst [vmem:[#allocation3 + $0xb0] sm:$0xff] %v17225_v44  ;;  %v3243_v34 = vrot.slane %v3241_v58, 5  ;;  %v3251_v6 = vshrl.u32 %v17205_v35, 16  ;;  %v17245_v22 = vpop.permute.xlu0 %4242  ;;  %10943 = vmatpush1.bf16.msra.mxu0 %v14496_v48 }
 0x188   : > { %2223 = vst [vmem:[#allocation3 + $0xb8] sm:$0x11] %v2222_v53  ;;  %v1592_v61 = vadd.f32 %v16453_v39, %v16736_v50  ;;  %v13002_v26 = vcombine.low %v17181_v51, %v17205_v35  ;;  %v3247_v12 = vshll.u32 %v17205_v35, 16  ;;  %v3257_v18 = vshll.u32 %v17207_v29, 16  ;;  %v17247_v50 = vpop.f32.mrb[60].mxu1 }
 0x189   : > { %4254 = vrot.lane.b32.xlu0 %v12970_v40, %s15171_s26  ;;  %4334 = vrot.lane.b32.xlu1 %v12986_v30, %s15169_s19  ;;  %v1593_v11 = vadd.f32 %v16475_v41, %v16739_v23  ;;  %21647 = vst [vmem:[#allocation56_spill] sm:$0xff] %v17247_v50  ;;  %v3244_v58 = vor.u32 %v3243_v34, %v3240_v56  ;;  %v3253_v60 = vrot.slane %v3251_v6, 4  ;;  %v17251_v14 = vpop.f32.mrb[61].mxu1  ;;  %v3345_v30 = vld [vmem:[#allocation2 + $0x9c] sm:$0xe] }
 0x18a   : > { %v13239_v16 = vcombine.high %v16984_v2, %v17023_v46  ;;  %21648 = vst [vmem:[#allocation57_spill] sm:$0xff] %v17251_v14  ;;  %v3249_v51 = vrot.slane %v3247_v12, 5  ;;  %v3259_v28 = vrot.slane %v3257_v18, 5  ;;  %v4947_v40 = vsel %vm4935_vm5, %v4914_v20, %v17146_v32  ;;  %v17255_v23 = vld [vmem:[#allocation2 + $0xa8] sm:$0xf]  ;;  %v17269_v20 = vpop.f32.mrb[62].mxu1 }
 0x18b   : > { %v13785_v53 = vpack.c.bf16 %v1593_v11, %v1592_v61  ;;  %v3245_v5 = vrot.slane %v3244_v58, 4  ;;  %v1594_v56 = vadd.f32 %v16453_v39, %v16744_v21  ;;  %v13238_v34 = vcombine.low %v16984_v2, %v17023_v46  ;;  %v14500_v6 = vld [vmem:[%s21548_s3 + $0x4c0] ss:$8 sps:$4 sm:$0xff]   ;;  %v14502_v32 = vld [vmem:[%s21548_s3 + $0x4c4] ss:$8 sps:$4 sm:$0xff]   ;;  %21649 = vst [vmem:[#allocation58_spill] sm:$0xff] %v17269_v20  ;;  %v17285_v20 = vpop.permute.xlu0 %4418 }
 0x18c   : > { %10799 = vmatprep.mubr.bf16.mxu0 %v13239_v16  ;;  %v4980_v48 = vsel %vm4968_vm7, %v4947_v40, %v17134_v9  ;;  %v3254_v61 = vor.u32 %v3253_v60, %v3249_v51  ;;  %v1595_v2 = vadd.f32 %v16475_v41, %v16746_v15  ;;  %v17274_v46 = vld [vmem:[#allocation2 + $0xac] sm:$0xf]  ;;  %v17276_v9 = vpop.f32.mrb[63].mxu1  ;;  %v12922_v11 = vrot.slane %v3345_v30, 9  ;;  %10944 = vmatprep.subr.bf16.mxu0 %v14502_v32  ;;  %v3954_v14 = vld [vmem:[#allocation2 + $0xa8] sm:$0xe] }
 0x18d   : > { %4430 = vrot.lane.b32.xlu0 %v13002_v26, %s15168_s18  ;;  %v1962_v21 = vshrl.u32 %v13785_v53, 16  ;;  %v1965_v12 = vshll.u32 %v13785_v53, 16  ;;  %21650 = vst [vmem:[#allocation59_spill] sm:$0xff] %v17276_v9  ;;  %v3250_v18 = vsel %vm15624_vm15, %v3245_v5, %v3249_v51  ;;  %10800 = vmatmul.mubr.bf16.gmra.mrb[48].mxu0 %v13238_v34  ;;  %v3483_v58 = vrot.slane %v17205_v35, 5  ;;  %v17282_v26 = vpop.permute.xlu1 %4498  ;;  %v14505_v9 = vld [vmem:[%s21548_s3 + $0x4d4] ss:$8 sps:$4 sm:$0xff]  }
 0x18e   : > { %v3486_v16 = vrot.slane %v17207_v29, 5  ;;  %v3255_v60 = vrot.slane %v3254_v61, 4  ;;  %v13786_v40 = vpack.c.bf16 %v1595_v2, %v1594_v56  ;;  %v3847_v15 = vshrl.u32 %v17255_v23, 16  ;;  %10945 = vmatpush1.bf16.msra.mxu0 %v14500_v6  ;;  %v14503_v56 = vld [vmem:[%s21548_s3 + $0x4d0] ss:$8 sps:$4 sm:$0xff]  }
 0x18f   : > { %v1964_v53 = vrot.slane %v1962_v21, 7  ;;  %v3484_v5 = vsel %vm15573_vm12, %v12922_v11, %v3483_v58  ;;  %v3485_v51 = vrot.slane %v3483_v58, 4  ;;  %v3850_v30 = vshll.u32 %v17255_v23, 16  ;;  %v3554_v58 = vld [vmem:[#allocation2 + $0xb0] sm:$0x1]  ;;  %10946 = vmatprep.subr.bf16.mxu0 %v14505_v9 }
 0x190   : > { %v3860_v35 = vshrl.u32 %v17274_v46, 16  ;;  %v3260_v29 = vsel %vm15624_vm15, %v3255_v60, %v3259_v28  ;;  %v1970_v61 = vshrl.u32 %v13786_v40, 16  ;;  %v1973_v6 = vshll.u32 %v13786_v40, 16 }
 0x191   : > { %v1967_v34 = vor.u32 %v1965_v12, %v1964_v53  ;;  %v1968_v32 = vrot.slane %v1964_v53, 4  ;;  %v13018_v21 = vcombine.low %v3250_v18, %v3260_v29  ;;  %v3487_v2 = vsel %vm15573_vm12, %v3485_v51, %v3486_v16  ;;  %v14509_v18 = vld [vmem:[%s21548_s3 + $0x4e4] ss:$8 sps:$4 sm:$0xff]  }
 0x192   : > { %v3849_v11 = vrot.slane %v3847_v15, 4  ;;  %v1972_v12 = vrot.slane %v1970_v61, 7  ;;  %v13034_v60 = vcombine.low %v3484_v5, %v3487_v2  ;;  %v3852_v53 = vrot.slane %v3850_v30, 5  ;;  %v2228_v16 = vld [vmem:[#allocation3 + $0xd0] sm:$0x11]  ;;  %v17316_v30 = vpop.permute.xlu1 %4674  ;;  %v17321_v2 = vpop.permute.xlu0 %4578  ;;  %10947 = vmatpush1.bf16.msra.mxu0 %v14503_v56 }
 0x193   : > { %v17304_v28 = vsel %vm16554_vm11, %v1967_v34, %v16855_v17  ;;  %4510 = vrot.lane.b32.xlu1 %v13018_v21, %s15175_s10  ;;  %v13050_v40 = vcombine.low %v17255_v23, %v17274_v46  ;;  %v5013_v15 = vsel %vm5001_vm8, %v4980_v48, %v17177_v55  ;;  %v3856_v51 = vshll.u32 %v17274_v46, 16  ;;  %v14507_v55 = vld [vmem:[%s21548_s3 + $0x4e0] ss:$8 sps:$4 sm:$0xff]   ;;  %10948 = vmatprep.subr.bf16.mxu0 %v14509_v18 }
 0x194   : > { %2226 = vst [vmem:[#allocation3 + $0xc0] sm:$0xff] %v17304_v28  ;;  %v3862_v5 = vrot.slane %v3860_v35, 4  ;;  %v1975_v29 = vor.u32 %v1973_v6, %v1972_v12  ;;  %v1977_v34 = vrot.slane %v1972_v12, 4  ;;  %4590 = vrot.lane.b32.xlu0 %v13034_v60, %s15173_s29  ;;  %v5046_v61 = vsel %vm5034_vm6, %v5013_v15, %v17173_v62  ;;  %v21651_v35 = vld [vmem:[#allocation39_spill] sm:$0xff] }
 0x195   : > { %v3853_v21 = vor.u32 %v3852_v53, %v3849_v11  ;;  %v3858_v23 = vrot.slane %v3856_v51, 5  ;;  %v3866_v48 = vshll.u32 %v3554_v58, 16  ;;  %v1596_v9 = vadd.f32 %v16453_v39, %v21651_v35 }
 0x196   : > { %v12938_v6 = vrot.slane %v3954_v14, 9  ;;  %v17330_v12 = vsel %vm15482_vm9, %v1968_v32, %v1975_v29  ;;  %v2229_v62 = vsel %vm16595_vm3, %v1977_v34, %v2228_v16  ;;  %v4092_v56 = vrot.slane %v17274_v46, 5  ;;  %v21652_v14 = vld [vmem:[#allocation40_spill] sm:$0xff]  ;;  %10949 = vmatpush1.bf16.msra.mxu0 %v14507_v55  ;;  %v17348_v34 = vpop.permute.xlu1 %4834 }
 0x197   : > { %v3854_v11 = vrot.slane %v3853_v21, 4  ;;  %2227 = vst [vmem:[#allocation3 + $0xc8] sm:$0xff] %v17330_v12  ;;  %2230 = vst [vmem:[#allocation3 + $0xd0] sm:$0x11] %v2229_v62  ;;  %4686 = vrot.lane.b32.xlu1 %v13050_v40, %s15170_s20  ;;  %v3863_v60 = vor.u32 %v3862_v5, %v3858_v23  ;;  %v3868_v53 = vrot.slane %v3866_v48, 5  ;;  %v4095_v15 = vrot.slane %v3554_v58, 5  ;;  %v17363_v62 = vpop.permute.xlu0 %4754 }
 0x198   : > { %v1597_v18 = vadd.f32 %v16475_v41, %v21652_v14  ;;  %v4093_v32 = vsel %vm15573_vm12, %v12938_v6, %v4092_v56  ;;  %v4094_v51 = vrot.slane %v4092_v56, 4  ;;  %v14512_v46 = vld [vmem:[%s21548_s3 + $0x4f4] ss:$8 sps:$4 sm:$0xff]   ;;  %v13241_v58 = vcombine.high %v17113_v7, %v17140_v37  ;;  %v14510_v21 = vld [vmem:[%s21548_s3 + $0x4f0] ss:$8 sps:$4 sm:$0xff]  }
 0x199   : > { %v3859_v16 = vsel %vm15624_vm15, %v3854_v11, %v3858_v23  ;;  %v3864_v29 = vrot.slane %v3863_v60, 4  ;;  %v2313_v5 = vld [vmem:[#allocation2 + $0x9c] sm:$0xf]  ;;  %v17357_v48 = vsel %vm5067_vm10, %v5046_v61, %v17196_v36  ;;  %v2314_v6 = vld [vmem:[#allocation2 + $0xa0] sm:$0xf]  ;;  %10950 = vmatprep.subr.bf16.mxu0 %v14512_v46 }
 0x19a   : > { %v13787_v40 = vpack.c.bf16 %v1597_v18, %v1596_v9  ;;  %v4096_v55 = vsel %vm15573_vm12, %v4094_v51, %v4095_v15  ;;  %21653 = vst [vmem:[#allocation39_spill] sm:$0xff] %v17357_v48  ;;  %v21654_v23 = vld [vmem:[#allocation41_spill] sm:$0xff]  ;;  %v13240_v9 = vcombine.low %v17113_v7, %v17140_v37  ;;  %10809 = vmatprep.mubr.bf16.mxu0 %v13241_v58  ;;  %v2332_v15 = vld [vmem:[#allocation2 + $0xa4] sm:$0x1]  ;;  %v2654_v37 = vshll.u32 %v2313_v5, 16 }
 0x19b   : > { %v1598_v35 = vadd.f32 %v16453_v39, %v21654_v23  ;;  %v3869_v11 = vsel %vm15624_vm15, %v3864_v29, %v3868_v53  ;;  %v13082_v56 = vcombine.low %v4093_v32, %v4096_v55  ;;  %v2735_v14 = vld [vmem:[#allocation2 + $0x9c] sm:$0xe]  ;;  %v21655_v18 = vld [vmem:[#allocation42_spill] sm:$0xff]  ;;  %v2651_v23 = vshrl.u32 %v2313_v5, 16  ;;  %10951 = vmatpush1.bf16.msra.mxu0 %v14510_v21  ;;  %v17375_v31 = vpop.permute.xlu0 %4244 }
 0x19c   : > { %v1979_v60 = vshrl.u32 %v13787_v40, 16  ;;  %v13066_v36 = vcombine.low %v3859_v16, %v3869_v11  ;;  %v1982_v61 = vshll.u32 %v13787_v40, 16  ;;  %10810 = vmatmul.mubr.bf16.gmra.mrb[52].mxu0 %v13240_v9  ;;  %v1599_v51 = vadd.f32 %v16475_v41, %v21655_v18  ;;  %v17371_v11 = vld [vmem:[#allocation2 + $0xa8] sm:$0xf]  ;;  %v17373_v18 = vpop.permute.xlu1 %4324 }
 0x19d   : > { %4846 = vrot.lane.b32.xlu1 %v13082_v56, %s15172_s28  ;;  %v2660_v46 = vshll.u32 %v2314_v6, 16  ;;  %v2664_v48 = vshrl.u32 %v2314_v6, 16  ;;  %v2653_v32 = vrot.slane %v2651_v23, 4  ;;  %v2670_v29 = vshll.u32 %v2332_v15, 16 }
 0x19e   : > { %v1981_v7 = vrot.slane %v1979_v60, 7  ;;  %4766 = vrot.lane.b32.xlu0 %v13066_v36, %s15174_s9  ;;  %v13788_v53 = vpack.c.bf16 %v1599_v51, %v1598_v35  ;;  %v12907_v58 = vrot.slane %v2735_v14, 9  ;;  %v2656_v55 = vrot.slane %v2654_v37, 5 }
 0x19f   : > { %v2662_v9 = vrot.slane %v2660_v46, 5  ;;  %v2666_v5 = vrot.slane %v2664_v48, 4  ;;  %v2672_v50 = vrot.slane %v2670_v29, 5  ;;  %v2882_v14 = vrot.slane %v2314_v6, 5  ;;  %v14924_v48 = vld [vmem:[#allocation2 + $0x48] sm:$0xf] }
 0x1a0   : > { %v1984_v16 = vor.u32 %v1982_v61, %v1981_v7  ;;  %v1985_v40 = vrot.slane %v1981_v7, 4  ;;  %v1987_v56 = vshrl.u32 %v13788_v53, 16  ;;  %v1990_v60 = vshll.u32 %v13788_v53, 16  ;;  %v14516_v61 = vld [vmem:[%s21548_s3 + $0x504] ss:$8 sps:$4 sm:$0xff]  }
 0x1a1   : > { %v2657_v35 = vor.u32 %v2656_v55, %v2653_v32  ;;  %v2885_v36 = vrot.slane %v2332_v15, 5  ;;  %v2667_v23 = vor.u32 %v2666_v5, %v2662_v9  ;;  %v14925_v7 = vld [vmem:[#allocation2 + $0x4c] sm:$0xf]  ;;  %v3262_v46 = vshrl.u32 %v17371_v11, 16  ;;  %v2235_v53 = vld [vmem:[#allocation3 + $0xe8] sm:$0x11]  ;;  %11113 = vmatprep.subr.bf16.mxu0 %v14516_v61  ;;  %v17398_v61 = vpop.permute.xlu1 %4500 }
 0x1a2   : > { %v17380_v21 = vsel %vm16554_vm11, %v1984_v16, %v16855_v17  ;;  %v1989_v51 = vrot.slane %v1987_v56, 7  ;;  %v12948_v37 = vcombine.low %v14924_v48, %v14925_v7  ;;  %v2883_v17 = vsel %vm15573_vm12, %v12907_v58, %v2882_v14  ;;  %v2928_v5 = vld [vmem:[#allocation2 + $0xac] sm:$0xf]  ;;  %v14927_v48 = vld [vmem:[#allocation2] sm:$0xf] }
 0x1a3   : > { %2233 = vst [vmem:[#allocation3 + $0xd8] sm:$0xff] %v17380_v21  ;;  %v2658_v29 = vrot.slane %v2657_v35, 4  ;;  %v2884_v6 = vrot.slane %v2882_v14, 4  ;;  %v3265_v15 = vshll.u32 %v17371_v11, 16  ;;  %v2668_v55 = vrot.slane %v2667_v23, 4 }
 0x1a4   : > { %v1992_v32 = vor.u32 %v1990_v60, %v1989_v51  ;;  %v1994_v16 = vrot.slane %v1989_v51, 4  ;;  %v4874_v56 = vsel %vm328_vm4, %v12948_v37, %v17245_v22  ;;  %v12942_v7 = vcombine.low %v14927_v48, %v14926_v10 }
 0x1a5   : > { %v2663_v35 = vsel %vm15624_vm15, %v2658_v29, %v2662_v9  ;;  %v2886_v58 = vsel %vm15573_vm12, %v2884_v6, %v2885_v36  ;;  %v3264_v14 = vrot.slane %v3262_v46, 4  ;;  %v2673_v10 = vsel %vm15624_vm15, %v2668_v55, %v2672_v50  ;;  %v17408_v9 = vpop.permute.xlu0 %4420  ;;  %v21657_v6 = vld [vmem:[#allocation18_spill] sm:$0xff] }
 0x1a6   : > { %v17402_v60 = vsel %vm15482_vm9, %v1985_v40, %v1992_v32  ;;  %v2236_v22 = vsel %vm16595_vm3, %v1994_v16, %v2235_v53  ;;  %v12987_v51 = vcombine.low %v2883_v17, %v2886_v58  ;;  %v12971_v36 = vcombine.low %v2663_v35, %v2673_v10  ;;  %v21656_v40 = vld [vmem:[#allocation43_spill] sm:$0xff] }
 0x1a7   : > { %2234 = vst [vmem:[#allocation3 + $0xe0] sm:$0xff] %v17402_v60  ;;  %2237 = vst [vmem:[#allocation3 + $0xe8] sm:$0x11] %v2236_v22  ;;  %v4916_v23 = vsel %vm4902_vm1, %v4874_v56, %v17235_v63  ;;  %v3267_v37 = vrot.slane %v3265_v15, 5  ;;  %v3275_v46 = vshrl.u32 %v2928_v5, 16  ;;  %v1600_v53 = vadd.f32 %v16453_v39, %v21656_v40 }
 0x1a8   : > { %4336 = vrot.lane.b32.xlu1 %v12987_v51, %s15169_s19  ;;  %v3271_v29 = vshll.u32 %v2928_v5, 16  ;;  %v3281_v50 = vshll.u32 %v17396_v4, 16  ;;  %v1601_v17 = vadd.f32 %v16475_v41, %v16842_v52  ;;  %v17421_v32 = vsel %vm328_vm4, %v12942_v7, %v21657_v6  ;;  %4256 = vrot.lane.b32.xlu0 %v12971_v36, %s15171_s26  ;;  %v3346_v58 = vld [vmem:[#allocation2 + $0xa8] sm:$0xe] }
 0x1a9   : > { %v13003_v63 = vcombine.low %v17371_v11, %v2928_v5  ;;  %v3268_v15 = vor.u32 %v3267_v37, %v3264_v14  ;;  %v3277_v16 = vrot.slane %v3275_v46, 4  ;;  %v13243_v35 = vcombine.high %v17188_v42, %v17225_v44  ;;  %v17433_v11 = vld [vmem:[#allocation2 + $0xb4] sm:$0xf]  ;;  %v17435_v14 = vpop.permute.xlu1 %4676  ;;  %v17439_v40 = vpop.permute.xlu0 %4580 }
 0x1aa   : > { %v3273_v55 = vrot.slane %v3271_v29, 5  ;;  %v3283_v56 = vrot.slane %v3281_v50, 5  ;;  %v13789_v48 = vpack.c.bf16 %v1601_v17, %v1600_v53  ;;  %v4949_v52 = vsel %vm4935_vm5, %v4916_v23, %v17285_v20 }
 0x1ab   : > { %v3269_v22 = vrot.slane %v3268_v15, 4  ;;  %v1602_v7 = vadd.f32 %v16453_v39, %v16846_v27  ;;  %v13242_v10 = vcombine.low %v17188_v42, %v17225_v44  ;;  %10819 = vmatprep.mubr.bf16.mxu0 %v13243_v35  ;;  %v4982_v46 = vsel %vm4968_vm7, %v4949_v52, %v17282_v26  ;;  %v21658_v42 = vld [vmem:[#allocation44_spill] sm:$0xff]  ;;  %v3537_v15 = vld [vmem:[#allocation2 + $0xb8] sm:$0xf] }
 0x1ac   : > { %v3278_v51 = vor.u32 %v3277_v16, %v3273_v55  ;;  %v1996_v36 = vshrl.u32 %v13789_v48, 16  ;;  %v1999_v37 = vshll.u32 %v13789_v48, 16  ;;  %4432 = vrot.lane.b32.xlu0 %v13003_v63, %s15168_s18  ;;  %v1603_v44 = vadd.f32 %v16475_v41, %v21658_v42 }
 0x1ad   : > { %v3274_v27 = vsel %vm15624_vm15, %v3269_v22, %v3273_v55  ;;  %10820 = vmatmul.mubr.bf16.gmra.mrb[56].mxu0 %v13242_v10  ;;  %v12923_v20 = vrot.slane %v3346_v58, 9  ;;  %v3490_v23 = vrot.slane %v2928_v5, 5  ;;  %v3493_v50 = vrot.slane %v17396_v4, 5  ;;  %v17455_v10 = vpop.permute.xlu1 %4836 }
 0x1ae   : > { %v3279_v53 = vrot.slane %v3278_v51, 4  ;;  %v1998_v29 = vrot.slane %v1996_v36, 7  ;;  %v3871_v17 = vshrl.u32 %v17433_v11, 16  ;;  %v13790_v26 = vpack.c.bf16 %v1603_v44, %v1602_v7  ;;  %v3555_v7 = vld [vmem:[#allocation2 + $0xbc] sm:$0x1]  ;;  %21659 = vst [vmem:[#allocation40_spill] sm:$0xff] %v17455_v10  ;;  %v17464_v44 = vpop.permute.xlu0 %4756 }
 0x1af   : > { %v3491_v6 = vsel %vm15573_vm12, %v12923_v20, %v3490_v23  ;;  %v3492_v63 = vrot.slane %v3490_v23, 4  ;;  %v3874_v16 = vshll.u32 %v17433_v11, 16  ;;  %v17457_v51 = vld [vmem:[#allocation3] sm:$0xff]  ;;  %v3884_v42 = vshrl.u32 %v3537_v15, 16  ;;  %21660 = vst [vmem:[#allocation41_spill] sm:$0xff] %v17464_v44  ;;  %v21677_v44 = vld [vmem:[#allocation15_spill] sm:$0xff] }
 0x1b0   : > { %v3284_v55 = vsel %vm15624_vm15, %v3279_v53, %v3283_v56  ;;  %v2001_v48 = vor.u32 %v1999_v37, %v1998_v29  ;;  %v2002_v35 = vrot.slane %v1998_v29, 4  ;;  %v3873_v5 = vrot.slane %v3871_v17, 4  ;;  %v3955_v29 = vld [vmem:[#allocation2 + $0xb4] sm:$0xe] }
 0x1b1   : > { %v13019_v58 = vcombine.low %v3274_v27, %v3284_v55  ;;  %v2004_v22 = vshrl.u32 %v13790_v26, 16  ;;  %v2007_v52 = vshll.u32 %v13790_v26, 16  ;;  %v3494_v4 = vsel %vm15573_vm12, %v3492_v63, %v3493_v50  ;;  %v2242_v50 = vld [vmem:[#allocation3 + $0x100] sm:$0x11] }
 0x1b2   : > { %v17462_v36 = vsel %vm16554_vm11, %v2001_v48, %v17457_v51  ;;  %v13035_v56 = vcombine.low %v3491_v6, %v3494_v4  ;;  %v3876_v37 = vrot.slane %v3874_v16, 5  ;;  %v13051_v20 = vcombine.low %v17433_v11, %v3537_v15 }
 0x1b3   : > { %4512 = vrot.lane.b32.xlu1 %v13019_v58, %s15175_s10  ;;  %2240 = vst [vmem:[#allocation3 + $0xf0] sm:$0xff] %v17462_v36  ;;  %v2006_v27 = vrot.slane %v2004_v22, 7  ;;  %v5015_v23 = vsel %vm5001_vm8, %v4982_v46, %v17321_v2  ;;  %v3880_v53 = vshll.u32 %v3537_v15, 16  ;;  %v3886_v6 = vrot.slane %v3884_v42, 4 }
 0x1b4   : > { %4592 = vrot.lane.b32.xlu0 %v13035_v56, %s15173_s29  ;;  %v5048_v17 = vsel %vm5034_vm6, %v5015_v23, %v17316_v30  ;;  %v3877_v26 = vor.u32 %v3876_v37, %v3873_v5  ;;  %v3890_v63 = vshll.u32 %v3555_v7, 16  ;;  %v1604_v11 = vadd.f32 %v16453_v39, %v16886_v43  ;;  %v17487_v37 = vpop.permute.xlu1 %4326 }
 0x1b5   : > { %v2009_v55 = vor.u32 %v2007_v52, %v2006_v27  ;;  %v2011_v48 = vrot.slane %v2006_v27, 4  ;;  %v3882_v58 = vrot.slane %v3880_v53, 5  ;;  %v12939_v22 = vrot.slane %v3955_v29, 9  ;;  %v17496_v27 = vpop.permute.xlu0 %4246 }
 0x1b6   : > { %v3878_v2 = vrot.slane %v3877_v26, 4  ;;  %v3892_v46 = vrot.slane %v3890_v63, 5  ;;  %v4099_v4 = vrot.slane %v3537_v15, 5  ;;  %v4102_v56 = vrot.slane %v3555_v7, 5 }
 0x1b7   : > { %v17482_v30 = vsel %vm15482_vm9, %v2002_v35, %v2009_v55  ;;  %v2243_v5 = vsel %vm16595_vm3, %v2011_v48, %v2242_v50  ;;  %4688 = vrot.lane.b32.xlu1 %v13051_v20, %s15170_s20  ;;  %v3887_v52 = vor.u32 %v3886_v6, %v3882_v58  ;;  %v1605_v35 = vadd.f32 %v16475_v41, %v16895_v25  ;;  %v21662_v20 = vld [vmem:[#allocation16_spill] sm:$0xff]  ;;  %v2315_v55 = vld [vmem:[#allocation2 + $0xa8] sm:$0xf] }
 0x1b8   : > { %2241 = vst [vmem:[#allocation3 + $0xf8] sm:$0xff] %v17482_v30  ;;  %2244 = vst [vmem:[#allocation3 + $0x100] sm:$0x11] %v2243_v5  ;;  %v4100_v15 = vsel %vm15573_vm12, %v12939_v22, %v4099_v4  ;;  %v4101_v42 = vrot.slane %v4099_v4, 4  ;;  %v17503_v7 = vsel %vm4902_vm1, %v17421_v32, %v21662_v20  ;;  %v3883_v53 = vsel %vm15624_vm15, %v3878_v2, %v3882_v58  ;;  %v2316_v32 = vld [vmem:[#allocation2 + $0xac] sm:$0xf] }
 0x1b9   : > { %v17474_v16 = vpop.f32.mrb[0].mxu0  ;;  %v3888_v29 = vrot.slane %v3887_v52, 4  ;;  %v13245_v50 = vcombine.high %v17304_v28, %v17330_v12  ;;  %v13791_v25 = vpack.c.bf16 %v1605_v35, %v1604_v11  ;;  %v5081_v6 = vsel %vm5067_vm10, %v5048_v17, %v17363_v62  ;;  %v2333_v11 = vld [vmem:[#allocation2 + $0xb0] sm:$0x1]  ;;  %v2736_v4 = vld [vmem:[#allocation2 + $0xa8] sm:$0xe] }
 0x1ba   : > { %v17478_v10 = vpop.f32.mrb[1].mxu0  ;;  %v4103_v26 = vsel %vm15573_vm12, %v4101_v42, %v4102_v56  ;;  %v1606_v63 = vadd.f32 %v16453_v39, %v16905_v24  ;;  %v13244_v2 = vcombine.low %v17304_v28, %v17330_v12  ;;  %v17521_v22 = vsel %vm5100_vm13, %v5081_v6, %v17348_v34 }
 0x1bb   : > { %v17489_v43 = vpop.f32.mrb[2].mxu0  ;;  %v3893_v48 = vsel %vm15624_vm15, %v3888_v29, %v3892_v46  ;;  %v13083_v58 = vcombine.low %v4100_v15, %v4103_v26  ;;  %10829 = vmatprep.mubr.bf16.mxu0 %v13245_v50  ;;  %21663 = vst [vmem:[#allocation43_spill] sm:$0xff] %v17521_v22  ;;  %v2013_v17 = vshrl.u32 %v13791_v25, 16  ;;  %v2016_v5 = vshll.u32 %v13791_v25, 16  ;;  %v17528_v15 = vpop.permute.xlu1 %4502 }
 0x1bc   : > { %v17498_v23 = vpop.f32.mrb[3].mxu0  ;;  %v13067_v62 = vcombine.low %v3883_v53, %v3893_v48  ;;  %v1607_v24 = vadd.f32 %v16475_v41, %v16913_v38  ;;  %10830 = vmatmul.mubr.bf16.gmra.mrb[60].mxu0 %v13244_v2  ;;  %v2675_v46 = vshrl.u32 %v2315_v55, 16  ;;  %v2678_v56 = vshll.u32 %v2315_v55, 16  ;;  %v17531_v53 = vpop.permute.xlu0 %4422 }
 0x1bd   : > { %21661 = vst [vmem:[#allocation42_spill] sm:$0xff] %v17498_v23  ;;  %4848 = vrot.lane.b32.xlu1 %v13083_v58, %s15172_s28  ;;  %v2684_v28 = vshll.u32 %v2316_v32, 16  ;;  %v2688_v12 = vshrl.u32 %v2316_v32, 16  ;;  %v2015_v34 = vrot.slane %v2013_v17, 7  ;;  %v2694_v35 = vshll.u32 %v2333_v11, 16 }
 0x1be   : > { %4768 = vrot.lane.b32.xlu0 %v13067_v62, %s15174_s9  ;;  %v13792_v42 = vpack.c.bf16 %v1607_v24, %v1606_v63  ;;  %v12908_v20 = vrot.slane %v2736_v4, 9  ;;  %v2677_v29 = vrot.slane %v2675_v46, 4  ;;  %v2680_v50 = vrot.slane %v2678_v56, 5  ;;  %v2929_v24 = vld [vmem:[#allocation2 + $0xb4] sm:$0xf] }
 0x1bf   : > { %v2686_v26 = vrot.slane %v2684_v28, 5  ;;  %v2690_v25 = vrot.slane %v2688_v12, 4  ;;  %v2018_v55 = vor.u32 %v2016_v5, %v2015_v34  ;;  %v2019_v48 = vrot.slane %v2015_v34, 4  ;;  %v14929_v12 = vld [vmem:[#allocation2 + $0x54] sm:$0xf] }
 0x1c0   : > { %v2021_v58 = vshrl.u32 %v13792_v42, 16  ;;  %v2024_v2 = vshll.u32 %v13792_v42, 16  ;;  %v2681_v62 = vor.u32 %v2680_v50, %v2677_v29  ;;  %v2696_v17 = vrot.slane %v2694_v35, 5  ;;  %v2249_v34 = vld [vmem:[#allocation3 + $0x118] sm:$0x11]  ;;  %v17547_v29 = vpop.permute.xlu1 %4678 }
 0x1c1   : > { %v17525_v52 = vpop.f32.mrb[4].mxu0  ;;  %v2691_v63 = vor.u32 %v2690_v25, %v2686_v26  ;;  %v2889_v4 = vrot.slane %v2316_v32, 5  ;;  %v17542_v46 = vsel %vm16554_vm11, %v2018_v55, %v17457_v51  ;;  %v2892_v28 = vrot.slane %v2333_v11, 5  ;;  %21668 = vst [vmem:[#allocation61_spill] sm:$0xff] %v17547_v29  ;;  %v17551_v11 = vld [vmem:[#allocation2 + $0xb8] sm:$0xf] }
 0x1c2   : > { %21664 = vst [vmem:[#allocation18_spill] sm:$0xff] %v17525_v52  ;;  %v17533_v38 = vpop.f32.mrb[5].mxu0  ;;  %v2023_v56 = vrot.slane %v2021_v58, 7  ;;  %2247 = vst [vmem:[#allocation3 + $0x108] sm:$0xff] %v17542_v46  ;;  %v2682_v42 = vrot.slane %v2681_v62, 4  ;;  %v3286_v58 = vshrl.u32 %v2929_v24, 16 }
 0x1c3   : > { %21665 = vst [vmem:[#allocation44_spill] sm:$0xff] %v17533_v38  ;;  %v17535_v6 = vpop.f32.mrb[6].mxu0  ;;  %v2890_v35 = vsel %vm15573_vm12, %v12908_v20, %v2889_v4  ;;  %v2891_v32 = vrot.slane %v2889_v4, 4 }
 0x1c4   : > { %21666 = vst [vmem:[#allocation16_spill] sm:$0xff] %v17535_v6  ;;  %v17537_v22 = vpop.f32.mrb[7].mxu0  ;;  %v14930_v6 = vld [vmem:[#allocation2 + $0x58] sm:$0xf]  ;;  %v2026_v50 = vor.u32 %v2024_v2, %v2023_v56  ;;  %v2028_v25 = vrot.slane %v2023_v56, 4  ;;  %v2687_v62 = vsel %vm15624_vm15, %v2682_v42, %v2686_v26 }
 0x1c5   : > { %21667 = vst [vmem:[#allocation60_spill] sm:$0xff] %v17537_v22  ;;  %v12949_v5 = vcombine.low %v14929_v12, %v14930_v6  ;;  %v2692_v22 = vrot.slane %v2691_v63, 4  ;;  %v17553_v6 = vpop.permute.xlu0 %4582  ;;  %v2893_v2 = vsel %vm15573_vm12, %v2891_v32, %v2892_v28  ;;  %v13004_v28 = vcombine.low %v2929_v24, %v17551_v11 }
 0x1c6   : > { %v17571_v4 = vsel %vm15482_vm9, %v2019_v48, %v2026_v50  ;;  %v2250_v56 = vsel %vm16595_vm3, %v2028_v25, %v2249_v34  ;;  %v21672_v48 = vld [vmem:[#allocation46_spill] sm:$0xff]  ;;  %v21673_v25 = vld [vmem:[#allocation47_spill] sm:$0xff] }
 0x1c7   : > { %v4877_v55 = vsel %vm328_vm4, %v12949_v5, %v17375_v31  ;;  %v2697_v20 = vsel %vm15624_vm15, %v2692_v22, %v2696_v17  ;;  %v17567_v31 = vld [vmem:[#allocation2 + $0xbc] sm:$0x1]  ;;  %v12988_v5 = vcombine.low %v2890_v35, %v2893_v2  ;;  %2248 = vst [vmem:[#allocation3 + $0x110] sm:$0xff] %v17571_v4  ;;  %2251 = vst [vmem:[#allocation3 + $0x118] sm:$0x11] %v2250_v56  ;;  %v3288_v22 = vrot.slane %v3286_v58, 4 }
 0x1c8   : > { %v17565_v63 = vsel %vm4902_vm1, %v4877_v55, %v17373_v18  ;;  %v12972_v26 = vcombine.low %v2687_v62, %v2697_v20  ;;  %v3289_v17 = vshll.u32 %v2929_v24, 16  ;;  %v3299_v18 = vshrl.u32 %v17551_v11, 16  ;;  %v17592_v20 = vpop.permute.xlu1 %4838  ;;  %v14931_v2 = vld [vmem:[#allocation2 + $0x10] sm:$0xf]  ;;  %v14932_v56 = vld [vmem:[#allocation2 + $0xc] sm:$0xf] }
 0x1c9   : > { %v17555_v12 = vpop.f32.mrb[8].mxu0  ;;  %4338 = vrot.lane.b32.xlu1 %v12988_v5, %s15169_s19  ;;  %v1608_v34 = vadd.f32 %v16453_v39, %v21672_v48  ;;  %v3295_v35 = vshll.u32 %v17551_v11, 16  ;;  %v3305_v50 = vshll.u32 %v17567_v31, 16  ;;  %v1609_v55 = vadd.f32 %v16475_v41, %v21673_v25  ;;  %21675 = vst [vmem:[#allocation47_spill] sm:$0xff] %v17592_v20 }
 0x1ca   : > { %21669 = vst [vmem:[#allocation62_spill] sm:$0xff] %v17555_v12  ;;  %v17575_v42 = vpop.f32.mrb[9].mxu0  ;;  %4258 = vrot.lane.b32.xlu0 %v12972_v26, %s15171_s26  ;;  %v3291_v62 = vrot.slane %v3289_v17, 5  ;;  %v3301_v24 = vrot.slane %v3299_v18, 4  ;;  %v12943_v26 = vcombine.low %v14932_v56, %v14931_v2  ;;  %v13247_v48 = vcombine.high %v17380_v21, %v17402_v60  ;;  %v17596_v12 = vpop.permute.xlu0 %4758  ;;  %v21678_v17 = vld [vmem:[#allocation48_spill] sm:$0xff] }
 0x1cb   : > { %21670 = vst [vmem:[#allocation63_spill] sm:$0xff] %v17575_v42  ;;  %v17580_v32 = vpop.f32.mrb[10].mxu0  ;;  %v3297_v5 = vrot.slane %v3295_v35, 5  ;;  %v3347_v42 = vld [vmem:[#allocation2 + $0xb4] sm:$0xe]  ;;  %21676 = vst [vmem:[#allocation65_spill] sm:$0xff] %v17596_v12  ;;  %v4937_v25 = vsel %vm4935_vm5, %v17503_v7, %v21677_v44  ;;  %v1610_v18 = vadd.f32 %v16453_v39, %v21678_v17  ;;  %v13246_v20 = vcombine.low %v17380_v21, %v17402_v60 }
 0x1cc   : > { %21671 = vst [vmem:[#allocation64_spill] sm:$0xff] %v17580_v32  ;;  %v17590_v58 = vpop.f32.mrb[11].mxu0  ;;  %v13793_v32 = vpack.c.bf16 %v1609_v55, %v1608_v34  ;;  %v17605_v2 = vld [vmem:[#allocation2 + $0xc0] sm:$0xf]  ;;  %v3307_v35 = vrot.slane %v3305_v50, 5  ;;  %10839 = vmatprep.mubr.bf16.mxu0 %v13247_v48  ;;  %v1611_v44 = vadd.f32 %v16475_v41, %v16979_v45  ;;  %v12924_v7 = vrot.slane %v3347_v42, 9  ;;  %v17621_v42 = vpop.permute.xlu1 %4328 }
 0x1cd   : > { %21674 = vst [vmem:[#allocation46_spill] sm:$0xff] %v17590_v58  ;;  %v3292_v58 = vor.u32 %v3291_v62, %v3288_v22  ;;  %v3302_v34 = vor.u32 %v3301_v24, %v3297_v5  ;;  %10840 = vmatmul.mubr.bf16.gmra.mrb[64].mxu0 %v13246_v20  ;;  %v3497_v22 = vrot.slane %v17551_v11, 5  ;;  %v3500_v62 = vrot.slane %v17567_v31, 5  ;;  %v3539_v45 = vld [vmem:[#allocation2 + $0xc4] sm:$0xf]  ;;  %v21681_v11 = vld [vmem:[#allocation28_spill] sm:$0xff] }
 0x1ce   : > { %4434 = vrot.lane.b32.xlu0 %v13004_v28, %s15168_s18  ;;  %v2030_v55 = vshrl.u32 %v13793_v32, 16  ;;  %v2033_v56 = vshll.u32 %v13793_v32, 16  ;;  %v3895_v28 = vshrl.u32 %v17605_v2, 16  ;;  %v13794_v24 = vpack.c.bf16 %v1611_v44, %v1610_v18  ;;  %v21682_v17 = vld [vmem:[#allocation29_spill] sm:$0xff] }
 0x1cf   : > { %v3293_v38 = vrot.slane %v3292_v58, 4  ;;  %v3303_v21 = vrot.slane %v3302_v34, 4  ;;  %v3498_v58 = vsel %vm15573_vm12, %v12924_v7, %v3497_v22  ;;  %v3499_v20 = vrot.slane %v3497_v22, 4  ;;  %v3556_v22 = vld [vmem:[#allocation2 + $0xc8] sm:$0x1] }
 0x1d0   : > { %v2032_v60 = vrot.slane %v2030_v55, 7  ;;  %v4859_v48 = vsel %vm328_vm4, %v12943_v26, %v21681_v11  ;;  %v4970_v31 = vsel %vm4968_vm7, %v4937_v25, %v21682_v17  ;;  %v2038_v18 = vshrl.u32 %v13794_v24, 16  ;;  %v2256_v25 = vld [vmem:[#allocation3 + $0x130] sm:$0x11]  ;;  %v3956_v11 = vld [vmem:[#allocation2 + $0xc0] sm:$0xe] }
 0x1d1   : > { %v17608_v12 = vpop.f32.mrb[12].mxu0  ;;  %v3298_v32 = vsel %vm15624_vm15, %v3293_v38, %v3297_v5  ;;  %v3308_v34 = vsel %vm15624_vm15, %v3303_v21, %v3307_v35  ;;  %v3501_v44 = vsel %vm15573_vm12, %v3499_v20, %v3500_v62  ;;  %v3897_v7 = vrot.slane %v3895_v28, 4 }
 0x1d2   : > { %21679 = vst [vmem:[#allocation15_spill] sm:$0xff] %v17608_v12  ;;  %v17615_v50 = vpop.f32.mrb[13].mxu0  ;;  %v2035_v55 = vor.u32 %v2033_v56, %v2032_v60  ;;  %v13020_v5 = vcombine.low %v3298_v32, %v3308_v34  ;;  %v13036_v35 = vcombine.low %v3498_v58, %v3501_v44  ;;  %v3898_v56 = vshll.u32 %v17605_v2, 16 }
 0x1d3   : > { %21680 = vst [vmem:[#allocation48_spill] sm:$0xff] %v17615_v50  ;;  %v17629_v50 = vpop.permute.xlu0 %4248  ;;  %v17631_v38 = vpop.f32.mrb[14].mxu0  ;;  %v3908_v21 = vshrl.u32 %v3539_v45, 16  ;;  %v2040_v32 = vrot.slane %v2038_v18, 7  ;;  %v2041_v62 = vshll.u32 %v13794_v24, 16  ;;  %v13052_v28 = vcombine.low %v17605_v2, %v3539_v45 }
 0x1d4   : > { %21683 = vst [vmem:[#allocation28_spill] sm:$0xff] %v17631_v38  ;;  %v17635_v12 = vpop.f32.mrb[15].mxu0  ;;  %v17640_v26 = vsel %vm16554_vm11, %v2035_v55, %v17457_v51  ;;  %4514 = vrot.lane.b32.xlu1 %v13020_v5, %s15175_s10  ;;  %v3904_v20 = vshll.u32 %v3539_v45, 16  ;;  %v2036_v17 = vrot.slane %v2032_v60, 4  ;;  %4594 = vrot.lane.b32.xlu0 %v13036_v35, %s15173_s29  ;;  %v3900_v34 = vrot.slane %v3898_v56, 5  ;;  %v17651_v18 = vpop.permute.xlu1 %4504 }
 0x1d5   : > { %21684 = vst [vmem:[#allocation29_spill] sm:$0xff] %v17635_v12  ;;  %2254 = vst [vmem:[#allocation3 + $0x120] sm:$0xff] %v17640_v26  ;;  %v3910_v55 = vrot.slane %v3908_v21, 4  ;;  %v3914_v12 = vshll.u32 %v3556_v22, 16  ;;  %v2043_v44 = vor.u32 %v2041_v62, %v2040_v32  ;;  %v2045_v38 = vrot.slane %v2040_v32, 4 }
 0x1d6   : > { %v3906_v52 = vrot.slane %v3904_v20, 5  ;;  %v1612_v5 = vadd.f32 %v16453_v39, %v17018_v0  ;;  %v3901_v24 = vor.u32 %v3900_v34, %v3897_v7  ;;  %v12940_v23 = vrot.slane %v3956_v11, 9 }
 0x1d7   : > { %v3916_v2 = vrot.slane %v3914_v12, 5  ;;  %v4106_v29 = vrot.slane %v3539_v45, 5  ;;  %v17653_v60 = vpop.permute.xlu0 %4424  ;;  %v17659_v56 = vsel %vm15482_vm9, %v2036_v17, %v2043_v44  ;;  %v2257_v21 = vsel %vm16595_vm3, %v2045_v38, %v2256_v25  ;;  %v21689_v38 = vld [vmem:[#allocation22_spill] sm:$0xff]  ;;  %v21690_v17 = vld [vmem:[#allocation23_spill] sm:$0xff]  ;;  %v2318_v44 = vld [vmem:[#allocation2 + $0xb8] sm:$0xf] }
 0x1d8   : > { %4690 = vrot.lane.b32.xlu1 %v13052_v28, %s15170_s20  ;;  %v3911_v0 = vor.u32 %v3910_v55, %v3906_v52  ;;  %v4109_v32 = vrot.slane %v3556_v22, 5  ;;  %2255 = vst [vmem:[#allocation3 + $0x128] sm:$0xff] %v17659_v56  ;;  %2258 = vst [vmem:[#allocation3 + $0x130] sm:$0x11] %v2257_v21  ;;  %v3902_v12 = vrot.slane %v3901_v24, 4  ;;  %v1613_v20 = vadd.f32 %v16475_v41, %v17030_v3 }
 0x1d9   : > { %v17647_v58 = vpop.f32.mrb[16].mxu0  ;;  %v4107_v45 = vsel %vm15573_vm12, %v12940_v23, %v4106_v29  ;;  %v4108_v7 = vrot.slane %v4106_v29, 4  ;;  %v5003_v25 = vsel %vm5001_vm8, %v4970_v31, %v21689_v38  ;;  %v13249_v22 = vcombine.high %v17462_v36, %v17482_v30  ;;  %v2317_v3 = vld [vmem:[#allocation2 + $0xb4] sm:$0xf] }
 0x1da   : > { %21685 = vst [vmem:[#allocation66_spill] sm:$0xff] %v17647_v58  ;;  %v17655_v35 = vpop.f32.mrb[17].mxu0  ;;  %v3912_v28 = vrot.slane %v3911_v0, 4  ;;  %v4906_v34 = vsel %vm4902_vm1, %v4859_v48, %v21690_v17  ;;  %v3907_v55 = vsel %vm15624_vm15, %v3902_v12, %v3906_v52  ;;  %v13795_v29 = vpack.c.bf16 %v1613_v20, %v1612_v5  ;;  %v2334_v0 = vld [vmem:[#allocation2 + $0xbc] sm:$0x1]  ;;  %v17689_v52 = vpop.permute.xlu1 %4680 }
 0x1db   : > { %21686 = vst [vmem:[#allocation67_spill] sm:$0xff] %v17655_v35  ;;  %v17664_v62 = vpop.f32.mrb[18].mxu0  ;;  %v4110_v23 = vsel %vm15573_vm12, %v4108_v7, %v4109_v32  ;;  %10849 = vmatprep.mubr.bf16.mxu0 %v13249_v22  ;;  %v1614_v21 = vadd.f32 %v16453_v39, %v17038_v54  ;;  %v13248_v48 = vcombine.low %v17462_v36, %v17482_v30  ;;  %v2737_v38 = vld [vmem:[#allocation2 + $0xb4] sm:$0xe]  ;;  %v21691_v12 = vld [vmem:[#allocation17_spill] sm:$0xff]  ;;  %v2699_v36 = vshrl.u32 %v2317_v3, 16 }
 0x1dc   : > { %21687 = vst [vmem:[#allocation68_spill] sm:$0xff] %v17664_v62  ;;  %v17671_v11 = vpop.f32.mrb[19].mxu0  ;;  %v3917_v24 = vsel %vm15624_vm15, %v3912_v28, %v3916_v2  ;;  %v13084_v31 = vcombine.low %v4107_v45, %v4110_v23  ;;  %v17693_v5 = vsel %vm5034_vm6, %v5003_v25, %v21691_v12  ;;  %v2047_v7 = vshrl.u32 %v13795_v29, 16  ;;  %v17695_v2 = vpop.permute.xlu0 %4584 }
 0x1dd   : > { %21688 = vst [vmem:[#allocation69_spill] sm:$0xff] %v17671_v11  ;;  %v13068_v32 = vcombine.low %v3907_v55, %v3917_v24  ;;  %v2050_v20 = vshll.u32 %v13795_v29, 16  ;;  %10850 = vmatmul.mubr.bf16.gmra.mrb[68].mxu0 %v13248_v48  ;;  %v1615_v54 = vadd.f32 %v16475_v41, %v17049_v19  ;;  %v2702_v30 = vshll.u32 %v2317_v3, 16  ;;  %v17707_v48 = vld [vmem:[#allocation2 + $0x1c] sm:$0xf] }
 0x1de   : > { %4850 = vrot.lane.b32.xlu1 %v13084_v31, %s15172_s28  ;;  %v2708_v28 = vshll.u32 %v2318_v44, 16  ;;  %v2049_v25 = vrot.slane %v2047_v7, 7  ;;  %v2712_v22 = vshrl.u32 %v2318_v44, 16  ;;  %v2718_v17 = vshll.u32 %v2334_v0, 16  ;;  %v17709_v19 = vld [vmem:[#allocation2 + $0x18] sm:$0xf] }
 0x1df   : > { %4770 = vrot.lane.b32.xlu0 %v13068_v32, %s15174_s9  ;;  %v12909_v55 = vrot.slane %v2737_v38, 9  ;;  %v13796_v29 = vpack.c.bf16 %v1615_v54, %v1614_v21  ;;  %v2701_v24 = vrot.slane %v2699_v36, 4  ;;  %v2704_v12 = vrot.slane %v2702_v30, 5  ;;  %v21695_v32 = vld [vmem:[#allocation20_spill] sm:$0xff] }
 0x1e0   : > { %v12944_v3 = vcombine.low %v17709_v19, %v17707_v48  ;;  %v4939_v7 = vsel %vm4935_vm5, %v4906_v34, %v21695_v32  ;;  %v2052_v11 = vor.u32 %v2050_v20, %v2049_v25  ;;  %v2714_v38 = vrot.slane %v2712_v22, 4  ;;  %v17726_v20 = vpop.permute.xlu0 %4760 }
 0x1e1   : > { %v17697_v45 = vpop.f32.mrb[20].mxu0  ;;  %v2055_v21 = vshrl.u32 %v13796_v29, 16  ;;  %v2705_v54 = vor.u32 %v2704_v12, %v2701_v24  ;;  %v2720_v36 = vrot.slane %v2718_v17, 5  ;;  %v2896_v30 = vrot.slane %v2318_v44, 5  ;;  %21698 = vst [vmem:[#allocation71_spill] sm:$0xff] %v17726_v20 }
 0x1e2   : > { %21692 = vst [vmem:[#allocation22_spill] sm:$0xff] %v17697_v45  ;;  %v17703_v23 = vpop.f32.mrb[21].mxu0  ;;  %v2710_v45 = vrot.slane %v2708_v28, 5  ;;  %v17717_v28 = vld [vmem:[#allocation2 + $0xc0] sm:$0xf]  ;;  %v2058_v48 = vshll.u32 %v13796_v29, 16 }
 0x1e3   : > { %21693 = vst [vmem:[#allocation23_spill] sm:$0xff] %v17703_v23  ;;  %v17705_v31 = vpop.f32.mrb[22].mxu0  ;;  %v17724_v23 = vsel %vm16554_vm11, %v2052_v11, %v17457_v51  ;;  %v2899_v34 = vrot.slane %v2334_v0, 5  ;;  %v2057_v22 = vrot.slane %v2055_v21, 7  ;;  %v2263_v24 = vld [vmem:[#allocation3 + $0x148] sm:$0x11]  ;;  %v2897_v44 = vsel %vm15573_vm12, %v12909_v55, %v2896_v30 }
 0x1e4   : > { %21694 = vst [vmem:[#allocation17_spill] sm:$0xff] %v17705_v31  ;;  %v17715_v62 = vpop.f32.mrb[23].mxu0  ;;  %v17719_v31 = vpop.permute.xlu1 %4840  ;;  %v2715_v19 = vor.u32 %v2714_v38, %v2710_v45  ;;  %2261 = vst [vmem:[#allocation3 + $0x138] sm:$0xff] %v17724_v23  ;;  %v2706_v17 = vrot.slane %v2705_v54, 4  ;;  %v2898_v12 = vrot.slane %v2896_v30, 4  ;;  %v2053_v32 = vrot.slane %v2049_v25, 4 }
 0x1e5   : > { %21696 = vst [vmem:[#allocation20_spill] sm:$0xff] %v17715_v62  ;;  %21697 = vst [vmem:[#allocation70_spill] sm:$0xff] %v17719_v31  ;;  %v3310_v35 = vshrl.u32 %v17717_v28, 16  ;;  %v3313_v11 = vshll.u32 %v17717_v28, 16  ;;  %v2060_v0 = vor.u32 %v2058_v48, %v2057_v22  ;;  %v2062_v38 = vrot.slane %v2057_v22, 4  ;;  %v21700_v55 = vld [vmem:[#allocation31_spill] sm:$0xff] }
 0x1e6   : > { %v2716_v62 = vrot.slane %v2715_v19, 4  ;;  %v2711_v58 = vsel %vm15624_vm15, %v2706_v17, %v2710_v45  ;;  %v2900_v21 = vsel %vm15573_vm12, %v2898_v12, %v2899_v34  ;;  %v17739_v54 = vld [vmem:[#allocation2 + $0xc4] sm:$0xf]  ;;  %v4972_v25 = vsel %vm4968_vm7, %v4939_v7, %v21700_v55  ;;  %v17745_v20 = vld [vmem:[#allocation2 + $0xc8] sm:$0x1] }
 0x1e7   : > { %v12989_v19 = vcombine.low %v2897_v44, %v2900_v21  ;;  %v3312_v31 = vrot.slane %v3310_v35, 4  ;;  %v8162_v48 = vld [vmem:[%s21546_s1 + $0x20] sm:$0x33]  ;;  %v17754_v34 = vsel %vm15482_vm9, %v2053_v32, %v2060_v0  ;;  %v2264_v7 = vsel %vm16595_vm3, %v2062_v38, %v2263_v24  ;;  %v17770_v24 = vpop.permute.xlu0 %4250 }
 0x1e8   : > { %v2721_v30 = vsel %vm15624_vm15, %v2716_v62, %v2720_v36  ;;  %v3315_v17 = vrot.slane %v3313_v11, 5  ;;  %v17758_v62 = vpop.permute.xlu1 %4330  ;;  %2262 = vst [vmem:[#allocation3 + $0x140] sm:$0xff] %v17754_v34  ;;  %2265 = vst [vmem:[#allocation3 + $0x148] sm:$0x11] %v2264_v7  ;;  %v3323_v36 = vshrl.u32 %v17739_v54, 16  ;;  %v13005_v44 = vcombine.low %v17717_v28, %v17739_v54  ;;  %v21704_v55 = vld [vmem:[#allocation26_spill] sm:$0xff] }
 0x1e9   : > { %v17733_v29 = vpop.f32.mrb[24].mxu0  ;;  %v12973_v22 = vcombine.low %v2711_v58, %v2721_v30  ;;  %4340 = vrot.lane.b32.xlu1 %v12989_v19, %s15169_s19  ;;  %v1616_v12 = vadd.f32 %v16453_v39, %v17090_v8  ;;  %v3319_v58 = vshll.u32 %v17739_v54, 16  ;;  %v3329_v0 = vshll.u32 %v17745_v20, 16  ;;  %v21705_v8 = vld [vmem:[#allocation32_spill] sm:$0xff] }
 0x1ea   : > { %21699 = vst [vmem:[#allocation72_spill] sm:$0xff] %v17733_v29  ;;  %v17750_v45 = vpop.f32.mrb[25].mxu0  ;;  %v3316_v11 = vor.u32 %v3315_v17, %v3312_v31  ;;  %v1617_v38 = vadd.f32 %v16475_v41, %v17121_v33  ;;  %v13427_v21 = vcombine.high %v8162_v48, %v8162_v48  ;;  %v5069_v28 = vsel %vm5067_vm10, %v17693_v5, %v21704_v55 }
 0x1eb   : > { %21701 = vst [vmem:[#allocation31_spill] sm:$0xff] %v17750_v45  ;;  %v17760_v35 = vpop.f32.mrb[26].mxu0  ;;  %4260 = vrot.lane.b32.xlu0 %v12973_v22, %s15171_s26  ;;  %v4862_v30 = vsel %vm328_vm4, %v12944_v3, %v21705_v8  ;;  %v3321_v19 = vrot.slane %v3319_v58, 5  ;;  %v3325_v7 = vrot.slane %v3323_v36, 4  ;;  %v13251_v33 = vcombine.high %v17542_v46, %v17571_v4  ;;  %v3348_v3 = vld [vmem:[#allocation2 + $0xc0] sm:$0xe] }
 0x1ec   : > { %21702 = vst [vmem:[#allocation73_spill] sm:$0xff] %v17760_v35  ;;  %v17772_v32 = vpop.f32.mrb[27].mxu0  ;;  %v21706_v35 = vld [vmem:[#allocation24_spill] sm:$0xff]  ;;  %v3317_v31 = vrot.slane %v3316_v11, 4  ;;  %v13797_v22 = vpack.c.bf16 %v1617_v38, %v1616_v12  ;;  %13428 = vmatprep.subr.msk.bf16.mxu1 %vm377_vm2, %v13427_v21  ;;  %v3331_v45 = vrot.slane %v3329_v0, 5  ;;  %v1618_v5 = vadd.f32 %v16453_v39, %v17136_v49  ;;  %v21709_v8 = vld [vmem:[#allocation49_spill] sm:$0xff] }
 0x1ed   : > { %21703 = vst [vmem:[#allocation74_spill] sm:$0xff] %v17772_v32  ;;  %v17785_v32 = vsel %vm5001_vm8, %v4972_v25, %v21706_v35  ;;  %v3326_v17 = vor.u32 %v3325_v7, %v3321_v19  ;;  %v13426_v55 = vcombine.low %v8162_v48, %v8162_v48  ;;  %v14526_v36 = vld [vmem:[%s21548_s3 + $0x4] ss:$8 sps:$4 sm:$0xff]   ;;  %10859 = vmatprep.mubr.bf16.mxu0 %v13251_v33  ;;  %v17802_v48 = vpop.permute.xlu1 %4506  ;;  %v17807_v7 = vpop.permute.xlu0 %4426 }
 0x1ee   : > { %v21707_v25 = vld [vmem:[#allocation27_spill] sm:$0xff]  ;;  %v3322_v12 = vsel %vm15624_vm15, %v3317_v31, %v3321_v19  ;;  %v2064_v58 = vshrl.u32 %v13797_v22, 16  ;;  %v13250_v11 = vcombine.low %v17542_v46, %v17571_v4  ;;  %21708 = vst [vmem:[#allocation26_spill] sm:$0xff] %v17802_v48  ;;  %v2067_v38 = vshll.u32 %v13797_v22, 16  ;;  %v17813_v22 = vld [vmem:[#allocation2 + $0xd0] sm:$0xf] }
 0x1ef   : > { %v4908_v35 = vsel %vm4902_vm1, %v4862_v30, %v21707_v25  ;;  %4436 = vrot.lane.b32.xlu0 %v13005_v44, %s15168_s18  ;;  %v3540_v49 = vld [vmem:[#allocation2 + $0xcc] sm:$0xf]  ;;  %v3327_v0 = vrot.slane %v3326_v17, 4  ;;  %v8222_v21 = vsel %vm377_vm2, %v13426_v55, 0  ;;  %v1619_v30 = vadd.f32 %v16475_v41, %v21709_v8  ;;  %v21710_v25 = vld [vmem:[#allocation34_spill] sm:$0xff] }
 0x1f0   : > { %v2066_v44 = vrot.slane %v2064_v58, 7  ;;  %8232 = vmatpush1.bf16.msra.mxu1 %v8222_v21  ;;  %10860 = vmatmul.mubr.bf16.gmra.mrb[72].mxu0 %v13250_v11  ;;  %v12925_v19 = vrot.slane %v3348_v3, 9  ;;  %v3504_v31 = vrot.slane %v17739_v54, 5  ;;  %v3507_v46 = vrot.slane %v17745_v20, 5 }
 0x1f1   : > { %v3332_v4 = vsel %vm15624_vm15, %v3327_v0, %v3331_v45  ;;  %v13798_v33 = vpack.c.bf16 %v1619_v30, %v1618_v5  ;;  %v3919_v17 = vshrl.u32 %v3540_v49, 16  ;;  %v3922_v55 = vshll.u32 %v3540_v49, 16  ;;  %10148 = vmatprep.subr.bf16.mxu1 %v14526_v36  ;;  %v14524_v45 = vld [vmem:[%s21548_s3] ss:$8 sps:$4 sm:$0xff]   ;;  %v3557_v0 = vld [vmem:[#allocation2 + $0xd4] sm:$0x1] }
 0x1f2   : > { %v4941_v8 = vsel %vm4935_vm5, %v4908_v35, %v21710_v25  ;;  %v13021_v58 = vcombine.low %v3322_v12, %v3332_v4  ;;  %v2069_v21 = vor.u32 %v2067_v38, %v2066_v44  ;;  %v3505_v3 = vsel %vm15573_vm12, %v12925_v19, %v3504_v31  ;;  %v17830_v38 = vpop.permute.xlu1 %4682  ;;  %v17832_v30 = vpop.f32.mrb[28].mxu0  ;;  %v21713_v4 = vld [vmem:[#allocation21_spill] sm:$0xff] }
 0x1f3   : > { %v2072_v54 = vshrl.u32 %v13798_v33, 16  ;;  %v2075_v11 = vshll.u32 %v13798_v33, 16  ;;  %v3506_v20 = vrot.slane %v3504_v31, 4  ;;  %v3921_v29 = vrot.slane %v3919_v17, 4  ;;  %21711 = vst [vmem:[#allocation32_spill] sm:$0xff] %v17830_v38  ;;  %21712 = vst [vmem:[#allocation24_spill] sm:$0xff] %v17832_v30  ;;  %v17839_v17 = vpop.permute.xlu0 %4586 }
 0x1f4   : > { %4516 = vrot.lane.b32.xlu1 %v13021_v58, %s15175_s10  ;;  %v17826_v5 = vsel %vm16554_vm11, %v2069_v21, %v17457_v51  ;;  %v3924_v36 = vrot.slane %v3922_v55, 5  ;;  %v3932_v35 = vshrl.u32 %v17813_v22, 16  ;;  %v13053_v12 = vcombine.low %v3540_v49, %v17813_v22  ;;  %21714 = vst [vmem:[#allocation27_spill] sm:$0xff] %v17839_v17  ;;  %v14529_v49 = vld [vmem:[%s21548_s3 + $0x14] ss:$8 sps:$4 sm:$0xff]   ;;  %v17844_v55 = vpop.f32.mrb[29].mxu0 }
 0x1f5   : > { %2268 = vst [vmem:[#allocation3 + $0x150] sm:$0xff] %v17826_v5  ;;  %v2074_v19 = vrot.slane %v2072_v54, 7  ;;  %v3508_v31 = vsel %vm15573_vm12, %v3506_v20, %v3507_v46  ;;  %v5102_v33 = vsel %vm5100_vm13, %v5069_v28, %v21713_v4  ;;  %vm8188_vm2 = vcmask 293888   ;;  %21715 = vst [vmem:[#allocation49_spill] sm:$0xff] %v17844_v55  ;;  %v21716_v25 = vld [vmem:[#allocation33_spill] sm:$0xff]  ;;  %v17850_v4 = vpop.f32.mrb[30].mxu0 }
 0x1f6   : > { %v4974_v58 = vsel %vm4968_vm7, %v4941_v8, %v21716_v25  ;;  %v2270_v21 = vld [vmem:[#allocation3 + $0x160] sm:$0x11]  ;;  %v13037_v54 = vcombine.low %v3505_v3, %v3508_v31  ;;  %13429 = vmatmul.mubr.msk.bf16.vlgmr.msra.gmra.mrb[160].mxu1 %vm8188_vm2, %v5102_v33  ;;  %v3925_v46 = vor.u32 %v3924_v36, %v3921_v29  ;;  %v3928_v20 = vshll.u32 %v17813_v22, 16  ;;  %v3957_v28 = vld [vmem:[#allocation2 + $0xcc] sm:$0xe]  ;;  %21717 = vst [vmem:[#allocation34_spill] sm:$0xff] %v17850_v4 }
 0x1f7   : > { %v2070_v30 = vrot.slane %v2066_v44, 4  ;;  %v2077_v38 = vor.u32 %v2075_v11, %v2074_v19  ;;  %v2079_v17 = vrot.slane %v2074_v19, 4  ;;  %v3934_v48 = vrot.slane %v3932_v35, 4  ;;  %8269 = vmatprep.mubr.bf16.mxu1 %v17457_v51  ;;  %10149 = vmatpush1.bf16.msra.mxu1 %v14524_v45  ;;  %v14527_v8 = vld [vmem:[%s21548_s3 + $0x10] ss:$8 sps:$4 sm:$0xff]   ;;  %v17856_v3 = vpop.f32.mrb[31].mxu0 }
 0x1f8   : > { %21718 = vst [vmem:[#allocation21_spill] sm:$0xff] %v17856_v3  ;;  %4596 = vrot.lane.b32.xlu0 %v13037_v54, %s15173_s29  ;;  %4692 = vrot.lane.b32.xlu1 %v13053_v12, %s15170_s20  ;;  %v3926_v29 = vrot.slane %v3925_v46, 4  ;;  %v3930_v36 = vrot.slane %v3928_v20, 5  ;;  %v3938_v31 = vshll.u32 %v3557_v0, 16  ;;  %v21719_v44 = vld [vmem:[#allocation51_spill] sm:$0xff]  ;;  %v12941_v33 = vrot.slane %v3957_v28, 9  ;;  %v17873_v20 = vpop.permute.xlu1 %4842 }
 0x1f9   : > { %v1620_v11 = vadd.f32 %v16453_v39, %v21719_v44  ;;  %v14535_v45 = vld [vmem:[%s21548_s3 + $0x24] ss:$8 sps:$4 sm:$0xff]   ;;  %v17867_v35 = vsel %vm15482_vm9, %v2070_v30, %v2077_v38  ;;  %v2271_v19 = vsel %vm16595_vm3, %v2079_v17, %v2270_v21  ;;  %v4113_v12 = vrot.slane %v17813_v22, 5  ;;  %10150 = vmatprep.subr.bf16.mxu1 %v14529_v49  ;;  %v21721_v21 = vld [vmem:[#allocation53_spill] sm:$0xff]  ;;  %v17882_v49 = vpop.permute.xlu0 %4762  ;;  %v14944_v3 = vld [vmem:[#allocation2 + $0x70] sm:$0xf] }
 0x1fa   : > { %2269 = vst [vmem:[#allocation3 + $0x158] sm:$0xff] %v17867_v35  ;;  %2272 = vst [vmem:[#allocation3 + $0x160] sm:$0x11] %v2271_v19  ;;  %v3935_v25 = vor.u32 %v3934_v48, %v3930_v36  ;;  %v3940_v54 = vrot.slane %v3938_v31, 5  ;;  %v4116_v46 = vrot.slane %v3557_v0, 5  ;;  %v21720_v44 = vld [vmem:[#allocation19_spill] sm:$0xff]  ;;  %v1621_v22 = vadd.f32 %v16475_v41, %v21721_v21 }
 0x1fb   : > { %v5038_v38 = vsel %vm5034_vm6, %v17785_v32, %v21720_v44  ;;  %v4114_v30 = vsel %vm15573_vm12, %v12941_v33, %v4113_v12  ;;  %v4115_v17 = vrot.slane %v4113_v12, 4  ;;  %10151 = vmatpush1.bf16.msra.mxu1 %v14527_v8  ;;  %v14533_v48 = vld [vmem:[%s21548_s3 + $0x20] ss:$8 sps:$4 sm:$0xff]   ;;  %v21722_v0 = vld [vmem:[#allocation36_spill] sm:$0xff]  ;;  %v3931_v32 = vsel %vm15624_vm15, %v3926_v29, %v3930_v36  ;;  %s242_s20 = sand.u32 1, %s15156_s22   ;;  %s13803_s10 = sshll.u32 %s15235_s25, 15 }
 0x1fc   : > { %v5007_v28 = vsel %vm5001_vm8, %v4974_v58, %v21722_v0  ;;  %v3936_v31 = vrot.slane %v3935_v25, 4  ;;  %v13253_v19 = vcombine.high %v17640_v26, %v17659_v56  ;;  %10152 = vmatprep.subr.bf16.mxu1 %v14535_v45  ;;  %v13799_v12 = vpack.c.bf16 %v1621_v22, %v1620_v11  ;;  %v21723_v8 = vld [vmem:[#allocation54_spill] sm:$0xff]  ;;  %v21724_v29 = vld [vmem:[#allocation55_spill] sm:$0xff]  ;;  %v14539_v45 = vld [vmem:[%s21548_s3 + $0x34] ss:$8 sps:$4 sm:$0xff]   ;;  %s18129_s18 = sshll.u32 %s242_s20, 11  ;;  %s21495_s17 = scalar_lea.hbm %s21551_s6, %s13803_s10 }
 0x1fd   : > { %v4117_v33 = vsel %vm15573_vm12, %v4115_v17, %v4116_v46  ;;  %v1622_v44 = vadd.f32 %v16453_v39, %v21723_v8  ;;  %v13252_v21 = vcombine.low %v17640_v26, %v17659_v56  ;;  %v1623_v36 = vadd.f32 %v16475_v41, %v21724_v29  ;;  %v21725_v25 = vld [vmem:[#allocation35_spill] sm:$0xff]  ;;  %v21726_v22 = vld [vmem:[#allocation30_spill] sm:$0xff]  ;;  %v14537_v56 = vld [vmem:[%s21548_s3 + $0x30] ss:$8 sps:$4 sm:$0xff]   ;;  %s18197_s13 = scalar_lea.vmem [#allocation4], %s18129_s18  ;;  %s21504_s25 = scalar_lea.sflag [#allocation5], %s242_s20 }
 0x1fe   : > { %v3941_v58 = vsel %vm15624_vm15, %v3936_v31, %v3940_v54  ;;  %v13085_v0 = vcombine.low %v4114_v30, %v4117_v33  ;;  %10869 = vmatprep.mubr.bf16.mxu0 %v13253_v19  ;;  %v5040_v11 = vsel %vm5034_vm6, %v5007_v28, %v21725_v25  ;;  %v2081_v17 = vshrl.u32 %v13799_v12, 16  ;;  %v21727_v30 = vld [vmem:[#allocation25_spill] sm:$0xff]  ;;  %v21728_v19 = vld [vmem:[#allocation56_spill] sm:$0xff]  ;;  %s15106_s29 = sshll.u32 %s15176_s12, 4  ;;  %s15107_s29 = int_to_ptr.vmem [resolvable:$false] %s15106_s29 }
 0x1ff   : > { %v13069_v46 = vcombine.low %v3931_v32, %v3941_v58  ;;  %10870 = vmatmul.mubr.bf16.gmra.mrb[76].mxu0 %v13252_v21  ;;  %v5071_v26 = vsel %vm5067_vm10, %v5038_v38, %v21726_v22  ;;  %10153 = vmatpush1.bf16.msra.mxu1 %v14533_v48  ;;  %v13800_v54 = vpack.c.bf16 %v1623_v36, %v1622_v44  ;;  %v17918_v32 = vpop.permute.xlu1 %4332  ;;  %v14545_v38 = vld [vmem:[%s21548_s3 + $0x44] ss:$8 sps:$4 sm:$0xff]   ;;  %v2084_v33 = vshll.u32 %v13799_v12, 16  ;;  %v21729_v8 = vld [vmem:[#allocation57_spill] sm:$0xff]  ;;  %v17927_v21 = vpop.permute.xlu0 %4252  ;;  %v14543_v12 = vld [vmem:[%s21548_s3 + $0x40] ss:$8 sps:$4 sm:$0xff]  }
 0x200   : > { %4852 = vrot.lane.b32.xlu1 %v13085_v0, %s15172_s28  ;;  %v5104_v31 = vsel %vm5100_vm13, %v5071_v26, %v21727_v30  ;;  %v1624_v28 = vadd.f32 %v16453_v39, %v21728_v19  ;;  %v2083_v48 = vrot.slane %v2081_v17, 7  ;;  %v1625_v44 = vadd.f32 %v16475_v41, %v21729_v8  ;;  %v21730_v58 = vld [vmem:[#allocation38_spill] sm:$0xff]  ;;  %10154 = vmatprep.subr.bf16.mxu1 %v14539_v45  ;;  %v14548_v45 = vld [vmem:[%s21548_s3 + $0x54] ss:$8 sps:$4 sm:$0xff]   ;;  %s12709_s28 = sshll.u32 %s18197_s13, 4  ;;  %s15108_s14 = scalar_lea.vmem %s15107_s29, 65536  ;;  %s21497_s28 = int_to_ptr.vmem [resolvable:$true] %s12709_s28 }
 0x201   : > { %4772 = vrot.lane.b32.xlu0 %v13069_v46, %s15174_s9  ;;  %13430 = vmatmul.mubr.msk.bf16.gmra.mrb[164].mxu1 %vm8188_vm2, %v5104_v31  ;;  %v5073_v0 = vsel %vm5067_vm10, %v5040_v11, %v21730_v58  ;;  %v2089_v29 = vshrl.u32 %v13800_v54, 16  ;;  %v13255_v36 = vcombine.high %v17724_v23, %v17754_v34  ;;  %v2092_v22 = vshll.u32 %v13800_v54, 16  ;;  %v21731_v26 = vld [vmem:[#allocation58_spill] sm:$0xff]  ;;  %v21732_v31 = vld [vmem:[#allocation37_spill] sm:$0xff]  ;;  %v2277_v54 = vld [vmem:[#allocation3 + $0x178] sm:$0x11]  ;;  %p15109_p0 = scmp.lt.s32.totalorder %s21497_s28, %s15107_s29 }
 0x202   : > { %8279 = vmatprep.mubr.bf16.mxu1 %v17457_v51  ;;  %v2086_v25 = vor.u32 %v2084_v33, %v2083_v48  ;;  %v13801_v46 = vpack.c.bf16 %v1625_v44, %v1624_v28  ;;  %v1626_v11 = vadd.f32 %v16453_v39, %v21731_v26  ;;  %v13254_v30 = vcombine.low %v17724_v23, %v17754_v34  ;;  %v21733_v34 = vld [vmem:[#allocation59_spill] sm:$0xff]  ;;  %s15102_s11 = scalar_lea.vmem %s21497_s28, 32768 }
 0x203   : > { %10155 = vmatpush1.bf16.msra.mxu1 %v14537_v56  ;;  %v2091_v17 = vrot.slane %v2089_v29, 7  ;;  %10879 = vmatprep.mubr.bf16.mxu0 %v13255_v36  ;;  %v5106_v56 = vsel %vm5100_vm13, %v5073_v0, %v21732_v31  ;;  %v2087_v33 = vrot.slane %v2083_v48, 4  ;;  %v17954_v8 = vpop.permute.xlu1 %4508  ;;  %v17958_v0 = vpop.permute.xlu0 %4428  ;;  %v14546_v48 = vld [vmem:[%s21548_s3 + $0x50] ss:$8 sps:$4 sm:$0xff]   ;;  %p15103_p11 = scmp.ne.s32.totalorder %s21497_s28, %s15102_s11  ;;  %p15110_p1 = scmp.lt.s32.totalorder %s15108_s14, %s15102_s11 }
 0x204   : > { %10156 = vmatprep.subr.bf16.mxu1 %v14545_v38  ;;  %v17949_v19 = vsel %vm16554_vm11, %v2086_v25, %v17457_v51  ;;  %v2098_v28 = vshrl.u32 %v13801_v46, 16  ;;  %v1627_v38 = vadd.f32 %v16475_v41, %v21733_v34  ;;  %v2101_v58 = vshll.u32 %v13801_v46, 16  ;;  %v14554_v46 = vld [vmem:[%s21548_s3 + $0x64] ss:$8 sps:$4 sm:$0xff]  }
 0x205   : > { %2275 = vst [vmem:[#allocation3 + $0x168] sm:$0xff] %v17949_v19  ;;  %v2094_v39 = vor.u32 %v2092_v22, %v2091_v17  ;;  %v2096_v23 = vrot.slane %v2091_v17, 4  ;;  %v13257_v25 = vcombine.high %v17826_v5, %v17867_v35  ;;  %p15104_p12 = pnand %p15103_p11, %p15252_p5  ;;  %p15111_p2 = por %p15110_p1, %p15109_p0 }
 0x206   : > { %v17956_v44 = vrot.slane %v2098_v28, 7  ;;  %v13802_v36 = vpack.c.bf16 %v1627_v38, %v1626_v11 }
 0x207   : > { %10880 = vmatmul.mubr.bf16.gmra.mrb[80].mxu0 %v13254_v30  ;;  %10157 = vmatpush1.bf16.msra.mxu1 %v14543_v12  ;;  %v17965_v29 = vsel %vm15482_vm9, %v2087_v33, %v2094_v39  ;;  %v2278_v41 = vsel %vm16595_vm3, %v2096_v23, %v2277_v54  ;;  %v21734_v12 = vld [vmem:[#allocation7_spill] sm:$0xff]  ;;  %v14935_v30 = vld [vmem:[#allocation2 + $0x60] sm:$0xf]  ;;  %v17980_v54 = vld [vmem:[#allocation3] sm:$0xff]  ;;  %v13256_v33 = vcombine.low %v17826_v5, %v17867_v35  ;;  %v17995_v34 = vpop.permute.xlu1 %4684  ;;  %p15105_p13 = pneg %p15104_p12 }
 0x208   : > { %10158 = vmatprep.subr.bf16.mxu1 %v14548_v45  ;;  %v11913_v17 = vsub.s32 6, %v21734_v12  ;;  %v11917_v22 = vsub.s32 7, %v21734_v12  ;;  %2276 = vst [vmem:[#allocation3 + $0x170] sm:$0xff] %v17965_v29  ;;  %2279 = vst [vmem:[#allocation3 + $0x178] sm:$0x11] %v2278_v41  ;;  %v2103_v26 = vor.u32 %v2101_v58, %v17956_v44  ;;  %v2106_v11 = vshrl.u32 %v13802_v36, 16  ;;  %10889 = vmatprep.mubr.bf16.mxu0 %v13257_v25  ;;  %v18007_v25 = vpop.permute.xlu0 %4588 }
 0x209   : > { %13431 = vmatmul.mubr.msk.bf16.gmra.mrb[168].mxu1 %vm8188_vm2, %v5106_v56  ;;  %v14936_v45 = vld [vmem:[#allocation2 + $0x64] sm:$0xf]  ;;  %v14552_v56 = vld [vmem:[%s21548_s3 + $0x60] ss:$8 sps:$4 sm:$0xff]   ;;  %v2109_v39 = vshll.u32 %v13802_v36, 16  ;;  %v13259_v23 = vcombine.high %v17949_v19, %v17965_v29  ;;  %v14939_v58 = vld [vmem:[#allocation3 + $0x18] sm:$0xff]  ;;  %p15112_p3 = pnand %p15111_p2, %p15105_p13 }
 0x20a   : > { %8289 = vmatprep.mubr.bf16.mxu1 %v17457_v51  ;;  %v12950_v31 = vcombine.low %v14935_v30, %v14936_v45  ;;  %v17985_v28 = vsel %vm16554_vm11, %v2103_v26, %v17980_v54  ;;  %v2108_v51 = vrot.slane %v2106_v11, 7  ;;  %v14938_v5 = vld [vmem:[%s21550_s5] sm:$0xff]  ;;  %v5793_v41 = vshll.u32 %v14939_v58, 16  ;;  %v2284_v36 = vld [vmem:[#allocation3 + $0x190] sm:$0x11]  ;;  %v14940_v11 = vld [vmem:[#allocation3 + $0x20] sm:$0xff] }
 0x20b   : > { %10159 = vmatpush1.bf16.msra.mxu1 %v14546_v48  ;;  %2282 = vst [vmem:[#allocation3 + $0x180] sm:$0xff] %v17985_v28  ;;  %v18003_v35 = vrot.slane %v14938_v5, %v11913_v17  ;;  %v18005_v38 = vrot.slane %v14938_v5, %v11917_v22  ;;  %v5790_v48 = vshrl.u32 %v14939_v58, 16  ;;  %v5799_v30 = vshll.u32 %v14940_v11, 16  ;;  %v18010_v45 = vld [vmem:[#allocation3 + $0x30] sm:$0xff] }
 0x20c   : > { %10160 = vmatprep.subr.bf16.mxu1 %v14554_v46  ;;  %v2104_v46 = vrot.slane %v17956_v44, 4  ;;  %v2111_v12 = vor.u32 %v2109_v39, %v2108_v51  ;;  %v2113_v26 = vrot.slane %v2108_v51, 4  ;;  %v4880_v22 = vsel %vm328_vm4, %v12950_v31, %v17496_v27  ;;  %v14556_v44 = vld [vmem:[%s21548_s3 + $0x70] ss:$8 sps:$4 sm:$0xff]   ;;  %v18019_v39 = vld [vmem:[#allocation3 + $0x48] sm:$0xff] }
 0x20d   : > { %21735 = vst [vmem:[#allocation33_spill] sm:$0xff] %v18003_v35  ;;  %21736 = vst [vmem:[#allocation51_spill] sm:$0xff] %v18005_v38  ;;  %v5803_v5 = vshrl.u32 %v14940_v11, 16  ;;  %v14943_v58 = vld [vmem:[#allocation2 + $0x6c] sm:$0xf]  ;;  %v5792_v59 = vrot.slane %v5790_v48, 4 }
 0x20e   : > { %v12951_v4 = vcombine.low %v14943_v58, %v14944_v3  ;;  %v18024_v17 = vsel %vm15482_vm9, %v2104_v46, %v2111_v12  ;;  %v2285_v27 = vsel %vm16595_vm3, %v2113_v26, %v2284_v36  ;;  %v5773_v31 = vld [vmem:[#allocation3 + $0x28] sm:$0x11]  ;;  %v21737_v3 = vld [vmem:[#allocation45_spill] sm:$0xff]  ;;  %v5795_v46 = vrot.slane %v5793_v41, 5  ;;  %v18041_v36 = vld [vmem:[#allocation3 + $0x78] sm:$0xff]  ;;  %v18045_v58 = vpop.permute.xlu1 %4844 }
 0x20f   : > { %10890 = vmatmul.mubr.bf16.gmra.mrb[84].mxu0 %v13256_v33  ;;  %10161 = vmatpush1.bf16.msra.mxu1 %v14552_v56  ;;  %v14564_v33 = vld [vmem:[%s21548_s3 + $0x84] ss:$8 sps:$4 sm:$0xff]   ;;  %2283 = vst [vmem:[#allocation3 + $0x188] sm:$0xff] %v18024_v17  ;;  %2286 = vst [vmem:[#allocation3 + $0x190] sm:$0x11] %v2285_v27  ;;  %v18035_v12 = vrot.slane %v5799_v30, 5  ;;  %v4920_v41 = vsel %vm4902_vm1, %v4880_v22, %v17487_v37  ;;  %v13258_v30 = vcombine.low %v17949_v19, %v17965_v29 }
 0x210   : > { %10899 = vmatprep.mubr.bf16.mxu0 %v13259_v23  ;;  %10162 = vmatprep.subr.bf16.mxu1 %v14558_v57  ;;  %v5805_v11 = vrot.slane %v5803_v5, 4  ;;  %v5809_v27 = vshll.u32 %v5773_v31, 16  ;;  %v14562_v26 = vld [vmem:[%s21548_s3 + $0x80] ss:$8 sps:$4 sm:$0xff]   ;;  %v4883_v37 = vsel %vm328_vm4, %v12951_v4, %v17629_v50  ;;  %v13261_v19 = vcombine.high %v17985_v28, %v18024_v17  ;;  %v14567_v29 = vld [vmem:[%s21548_s3 + $0x94] ss:$8 sps:$4 sm:$0xff]  }
 0x211   : > { %13432 = vmatmul.mubr.msk.bf16.gmra.mrb[172].mxu1 %vm8188_vm2, %v21737_v3  ;;  %v18052_v3 = vpop.permute.xlu0 %4764  ;;  %v18057_v57 = vld [vmem:[#allocation3 + $0x90] sm:$0xff]  ;;  %v5796_v22 = vor.u32 %v5795_v46, %v5792_v59  ;;  %v14948_v31 = vld [vmem:[#allocation3 + $0x38] sm:$0xff]  ;;  %v18069_v56 = vld [vmem:[#allocation3 + $0xa8] sm:$0xff]  ;;  %v4951_v50 = vsel %vm4935_vm5, %v17565_v63, %v17408_v9  ;;  %v4953_v4 = vsel %vm4935_vm5, %v4920_v41, %v17531_v53  ;;  %v4922_v46 = vsel %vm4902_vm1, %v4883_v37, %v17621_v42  ;;  %v18091_v63 = vpop.f32.mrb[64].mxu1 }
 0x212   : > { %8299 = vmatprep.mubr.bf16.mxu1 %v17980_v54  ;;  %v5823_v23 = vshll.u32 %v14948_v31, 16  ;;  %v5827_v5 = vshrl.u32 %v14948_v31, 16  ;;  %v14951_v51 = vld [vmem:[#allocation2 + $0x7c] sm:$0xf]  ;;  %v21738_v31 = vshrl.u32 %v18010_v45, 16  ;;  %v21739_v55 = vshll.u32 %v18010_v45, 16 }
 0x213   : > { %10163 = vmatpush1.bf16.msra.mxu1 %v14556_v44  ;;  %v5806_v44 = vor.u32 %v5805_v11, %v18035_v12  ;;  %v5774_v59 = vld [vmem:[#allocation3 + $0x40] sm:$0x11]  ;;  %v5811_v11 = vrot.slane %v5809_v27, 5  ;;  %21740 = vst [vmem:[#allocation19_spill] sm:$0xff] %v18091_v63  ;;  %v21742_v41 = vld [vmem:[#allocation39_spill] sm:$0xff]  ;;  %v4986_v63 = vsel %vm4968_vm7, %v4953_v4, %v17528_v15 }
 0x214   : > { %10164 = vmatprep.subr.bf16.mxu1 %v14564_v33  ;;  %v14950_v33 = vld [vmem:[#allocation2 + $0x78] sm:$0xf]  ;;  %v18082_v48 = vrot.slane %v21738_v31, 4  ;;  %v18086_v9 = vrot.slane %v21739_v55, 5  ;;  %v14573_v37 = vld [vmem:[%s21548_s3 + $0xa4] ss:$8 sps:$4 sm:$0xff]  }
 0x215   : > { %v12952_v1 = vcombine.low %v14950_v33, %v14951_v51  ;;  %v14565_v53 = vld [vmem:[%s21548_s3 + $0x90] ss:$8 sps:$4 sm:$0xff]   ;;  %v18108_v33 = vpop.f32.mrb[65].mxu1  ;;  %v21744_v31 = vld [vmem:[#allocation50_spill] sm:$0xff]  ;;  %v5829_v45 = vrot.slane %v5827_v5, 4  ;;  %v18114_v55 = vpop.permute.xlu0 %4254  ;;  %v5833_v5 = vshll.u32 %v5774_v59, 16 }
 0x216   : > { %v21741_v51 = vld [vmem:[#allocation52_spill] sm:$0xff]  ;;  %v18099_v27 = vld [vmem:[#allocation3 + $0xc0] sm:$0xff]  ;;  %21743 = vst [vmem:[#allocation53_spill] sm:$0xff] %v18108_v33  ;;  %v4955_v33 = vsel %vm4935_vm5, %v4922_v46, %v17653_v60  ;;  %v5820_v15 = vor.u32 %v18086_v9, %v18082_v48  ;;  %v14953_v60 = vld [vmem:[#allocation3 + $0x50] sm:$0xff] }
 0x217   : > { %10900 = vmatmul.mubr.bf16.gmra.mrb[88].mxu0 %v13258_v30  ;;  %10165 = vmatpush1.bf16.msra.mxu1 %v14562_v26  ;;  %v18096_v42 = vsel %vm5100_vm13, %v21742_v41, %v21741_v51  ;;  %v18103_v26 = vpop.permute.xlu1 %4334  ;;  %v5797_v51 = vrot.slane %v5796_v22, 4  ;;  %v5807_v41 = vrot.slane %v5806_v44, 4  ;;  %v18112_v30 = vrot.slane %v5823_v23, 5  ;;  %v18149_v48 = vld [vmem:[#allocation3 + $0xd8] sm:$0xff] }
 0x218   : > { %10909 = vmatprep.mubr.bf16.mxu0 %v13261_v19  ;;  %10166 = vmatprep.subr.bf16.mxu1 %v14567_v29  ;;  %v18116_v19 = vpop.f32.mrb[66].mxu1  ;;  %v4984_v29 = vsel %vm4968_vm7, %v4951_v50, %v17398_v61  ;;  %v4886_v22 = vsel %vm328_vm4, %v12952_v1, %v17770_v24  ;;  %v13260_v23 = vcombine.low %v17985_v28, %v18024_v17  ;;  %v14571_v1 = vld [vmem:[%s21548_s3 + $0xa0] ss:$8 sps:$4 sm:$0xff]   ;;  %v5847_v24 = vshll.u32 %v14953_v60, 16  ;;  %v14577_v17 = vld [vmem:[%s21548_s3 + $0xb4] ss:$8 sps:$4 sm:$0xff]  }
 0x219   : > { %13433 = vmatmul.mubr.msk.bf16.gmra.mrb[176].mxu1 %vm8188_vm2, %v21744_v31  ;;  %v18135_v61 = vsel %vm15624_vm15, %v5807_v41, %v5811_v11  ;;  %v5851_v44 = vshrl.u32 %v14953_v60, 16  ;;  %v11933_v50 = vadd.f32 %v18003_v35, %v17474_v16  ;;  %v11934_v28 = vadd.f32 %v18005_v38, %v17478_v10  ;;  %v18164_v9 = vld [vmem:[#allocation3 + $0x58] sm:$0x11]  ;;  %v14583_v60 = vld [vmem:[%s21548_s3 + $0xc4] ss:$8 sps:$4 sm:$0xff]  }
 0x21a   : > { %8309 = vmatprep.mubr.bf16.mxu1 %v17980_v54  ;;  %v5017_v59 = vsel %vm5001_vm8, %v4984_v29, %v17439_v40  ;;  %v18157_v46 = vsel %vm15624_vm15, %v5797_v51, %v18035_v12  ;;  %v5830_v16 = vor.u32 %v5829_v45, %v18112_v30  ;;  %v5019_v10 = vsel %vm5001_vm8, %v4986_v63, %v17553_v6  ;;  %v14575_v40 = vld [vmem:[%s21548_s3 + $0xb0] ss:$8 sps:$4 sm:$0xff]   ;;  %v18171_v12 = vpop.f32.mrb[67].mxu1  ;;  %v18181_v29 = vpop.permute.xlu0 %4430 }
 0x21b   : > { %10167 = vmatpush1.bf16.msra.mxu1 %v14565_v53  ;;  %v13263_v11 = vcombine.high %v18157_v46, %v18135_v61  ;;  %v12189_v53 = vmax.f32 %v11933_v50, 0.0  ;;  %v12190_v31 = vmax.f32 %v11934_v28, 0.0  ;;  %v4988_v45 = vsel %vm4968_vm7, %v4955_v33, %v17651_v18  ;;  %v18186_v50 = vpop.f32.mrb[68].mxu1  ;;  %v21747_v28 = vld [vmem:[#allocation61_spill] sm:$0xff] }
 0x21c   : > { %10168 = vmatprep.subr.bf16.mxu1 %v14573_v37  ;;  %v18166_v37 = vpop.permute.xlu1 %4510  ;;  %v4924_v6 = vsel %vm4902_vm1, %v4886_v22, %v17758_v62  ;;  %v5835_v63 = vrot.slane %v5833_v5, 5  ;;  %v21745_v51 = vshrl.u32 %v18019_v39, 16  ;;  %v5821_v18 = vrot.slane %v5820_v15, 4  ;;  %v18201_v5 = vpop.f32.mrb[69].mxu1 }
 0x21d   : > { %v21746_v33 = vshll.u32 %v18019_v39, 16  ;;  %v18192_v22 = vrot.slane %v5847_v24, 5  ;;  %12445 = vst [vmem:[%s18197_s13 + $0x30] sm:$0xff] %v12189_v53  ;;  %12446 = vst [vmem:[%s18197_s13 + $0x38] sm:$0xff] %v12190_v31  ;;  %v5050_v39 = vsel %vm5034_vm6, %v5017_v59, %v17435_v14  ;;  %v5831_v15 = vrot.slane %v5830_v16, 4  ;;  %v21748_v14 = vld [vmem:[#allocation42_spill] sm:$0xff] }
 0x21e   : > { %v18179_v41 = vrot.slane %v21745_v51, 4  ;;  %v11941_v24 = vadd.f32 %v18003_v35, %v17489_v43  ;;  %v4957_v53 = vsel %vm4935_vm5, %v4924_v6, %v17807_v7  ;;  %v13262_v43 = vcombine.low %v18157_v46, %v18135_v61  ;;  %v14581_v7 = vld [vmem:[%s21548_s3 + $0xc0] ss:$8 sps:$4 sm:$0xff]   ;;  %v14519_v51 = vld [vmem:[%s21548_s3 + $0x514] ss:$8 sps:$4 sm:$0xff]  }
 0x21f   : > { %10910 = vmatmul.mubr.bf16.gmra.mrb[92].mxu0 %v13260_v23  ;;  %10169 = vmatpush1.bf16.msra.mxu1 %v14571_v1  ;;  %v18190_v62 = vrot.slane %v21746_v33, 5  ;;  %v18194_v23 = vrot.slane %v5851_v44, 4  ;;  %v18210_v44 = vpop.f32.mrb[70].mxu1  ;;  %v18227_v16 = vsel %vm15624_vm15, %v5831_v15, %v5835_v63  ;;  %v18241_v61 = vsel %vm15624_vm15, %v5821_v18, %v18112_v30  ;;  %v14955_v33 = vld [vmem:[#allocation3 + $0x68] sm:$0xff]  ;;  %v18255_v15 = vpop.permute.xlu0 %4590 }
 0x220   : > { %10952 = vmatprep.mubr.bf16.mxu0 %v13263_v11  ;;  %10170 = vmatprep.subr.bf16.mxu1 %v14577_v17  ;;  %v5052_v11 = vsel %vm5034_vm6, %v5019_v10, %v21747_v28  ;;  %v5021_v17 = vsel %vm5001_vm8, %v4988_v45, %v17695_v2  ;;  %v18221_v59 = vpop.f32.mrb[71].mxu1  ;;  %v5857_v10 = vshll.u32 %v18164_v9, 16  ;;  %v12197_v2 = vmax.f32 %v11941_v24, 0.0  ;;  %v14514_v45 = vld [vmem:[%s21548_s3 + $0x500] ss:$8 sps:$4 sm:$0xff]   ;;  %v18247_v6 = vpop.permute.xlu1 %4686  ;;  %v21754_v28 = vld [vmem:[#allocation41_spill] sm:$0xff] }
 0x221   : > { %13434 = vmatmul.mubr.msk.bf16.gmra.mrb[180].mxu1 %vm8188_vm2, %v18096_v42  ;;  %v11942_v42 = vadd.f32 %v18005_v38, %v21748_v14  ;;  %v18233_v31 = vpop.f32.mrb[72].mxu1  ;;  %v5844_v46 = vor.u32 %v18190_v62, %v18179_v41  ;;  %v5854_v9 = vor.u32 %v18194_v23, %v18192_v22  ;;  %v5871_v30 = vshll.u32 %v14955_v33, 16  ;;  %v21751_v41 = vld [vmem:[#allocation18_spill] sm:$0xff]  ;;  %v21752_v23 = vld [vmem:[#allocation44_spill] sm:$0xff] }
 0x222   : > { %8319 = vmatprep.mubr.bf16.mxu1 %v17980_v54  ;;  %21749 = vst [vmem:[#allocation36_spill] sm:$0xff] %v18233_v31  ;;  %v18249_v63 = vpop.f32.mrb[73].mxu1  ;;  %v5875_v18 = vshrl.u32 %v14955_v33, 16  ;;  %12453 = vst [vmem:[%s18197_s13 + $0x70] sm:$0xff] %v12197_v2  ;;  %v11949_v62 = vadd.f32 %v18003_v35, %v21751_v41  ;;  %v11950_v24 = vadd.f32 %v18005_v38, %v21752_v23  ;;  %v14956_v33 = vld [vmem:[#allocation2 + $0x84] sm:$0xf] }
 0x223   : > { %10171 = vmatpush1.bf16.msra.mxu1 %v14575_v40  ;;  %v12198_v40 = vmax.f32 %v11942_v42, 0.0  ;;  %21750 = vst [vmem:[#allocation54_spill] sm:$0xff] %v18249_v63  ;;  %v18265_v14 = vsel %vm5067_vm10, %v5050_v39, %v21754_v28  ;;  %v21755_v42 = vld [vmem:[#allocation65_spill] sm:$0xff]  ;;  %v14957_v2 = vld [vmem:[#allocation2 + $0x88] sm:$0xf]  ;;  %v13265_v63 = vcombine.high %v18241_v61, %v18227_v16  ;;  %v21758_v31 = vld [vmem:[#allocation26_spill] sm:$0xff] }
 0x224   : > { %10172 = vmatprep.subr.bf16.mxu1 %v14583_v60  ;;  %v18261_v60 = vpop.f32.mrb[74].mxu1  ;;  %v18269_v1 = vsel %vm5067_vm10, %v5052_v11, %v21755_v42  ;;  %v12953_v4 = vcombine.low %v14956_v33, %v14957_v2  ;;  %v14517_v41 = vld [vmem:[%s21548_s3 + $0x510] ss:$8 sps:$4 sm:$0xff]   ;;  %v18276_v23 = vld [vmem:[#allocation3 + $0x70] sm:$0x11]  ;;  %v18286_v11 = vsel %vm5034_vm6, %v5021_v17, %v17689_v52  ;;  %v5859_v42 = vrot.slane %v5857_v10, 5 }
 0x225   : > { %21753 = vst [vmem:[#allocation55_spill] sm:$0xff] %v18261_v60  ;;  %12454 = vst [vmem:[%s18197_s13 + $0x78] sm:$0xff] %v12198_v40  ;;  %v14586_v39 = vld [vmem:[%s21548_s3 + $0xd4] ss:$8 sps:$4 sm:$0xff]   ;;  %v18282_v28 = vpop.f32.mrb[75].mxu1  ;;  %v12205_v33 = vmax.f32 %v11949_v62, 0.0 }
 0x226   : > { %21756 = vst [vmem:[#allocation35_spill] sm:$0xff] %v18282_v28  ;;  %v12206_v2 = vmax.f32 %v11950_v24, 0.0  ;;  %v14584_v60 = vld [vmem:[%s21548_s3 + $0xd0] ss:$8 sps:$4 sm:$0xff]   ;;  %v18291_v40 = vpop.f32.mrb[76].mxu1  ;;  %v4990_v28 = vsel %vm4968_vm7, %v4957_v53, %v21758_v31  ;;  %v5845_v52 = vrot.slane %v5844_v46, 4 }
 0x227   : > { %10953 = vmatmul.mubr.bf16.vlgmr.msra.gmra.mrb[32].mxu0 %v13262_v43  ;;  %10173 = vmatpush1.bf16.msra.mxu1 %v14581_v7  ;;  %21757 = vst [vmem:[#allocation30_spill] sm:$0xff] %v18291_v40  ;;  %v21759_v17 = vshrl.u32 %v18037_v13, 16  ;;  %v21760_v10 = vshll.u32 %v18037_v13, 16  ;;  %v14592_v62 = vld [vmem:[%s21548_s3 + $0xe4] ss:$8 sps:$4 sm:$0xff]   ;;  %v18306_v24 = vpop.f32.mrb[77].mxu1 }
 0x228   : > { %11114 = vmatpush1.bf16.msra.mxu0 %v14514_v45  ;;  %10962 = vmatprep.mubr.bf16.mxu0 %v13265_v63  ;;  %v21761_v40 = vld [vmem:[#allocation43_spill] sm:$0xff]  ;;  %v5855_v53 = vrot.slane %v5854_v9, 4  ;;  %v18313_v45 = vrot.slane %v5871_v30, 5  ;;  %v18315_v13 = vrot.slane %v5875_v18, 4  ;;  %12461 = vst [vmem:[%s18197_s13 + $0xb0] sm:$0xff] %v12205_v33  ;;  %12462 = vst [vmem:[%s18197_s13 + $0xb8] sm:$0xff] %v12206_v2  ;;  %v13264_v9 = vcombine.low %v18241_v61, %v18227_v16  ;;  %v18329_v30 = vpop.permute.xlu1 %4846 }
 0x229   : > { %v18297_v43 = vrot.slane %v21759_v17, 4  ;;  %v18301_v7 = vrot.slane %v21760_v10, 5  ;;  %13435 = vmatmul.mubr.msk.bf16.gmra.mrb[184].mxu1 %vm8188_vm2, %v21761_v40  ;;  %11115 = vmatprep.subr.bf16.mxu0 %v14519_v51  ;;  %v14523_v31 = vld [vmem:[%s21548_s3 + $0x524] ss:$8 sps:$4 sm:$0xff]   ;;  %v21762_v46 = vld [vmem:[#allocation16_spill] sm:$0xff]  ;;  %v18321_v17 = vpop.f32.mrb[78].mxu1  ;;  %v4889_v40 = vsel %vm328_vm4, %v12953_v4, %v17927_v21  ;;  %v18339_v21 = vpop.permute.xlu0 %4766 }
 0x22a   : > { %v11957_v63 = vadd.f32 %v18003_v35, %v21762_v46  ;;  %8329 = vmatprep.mubr.bf16.mxu1 %v17980_v54  ;;  %v5881_v51 = vshll.u32 %v18276_v23, 16  ;;  %v21763_v18 = vld [vmem:[#allocation60_spill] sm:$0xff]  ;;  %10174 = vmatprep.subr.bf16.mxu1 %v14586_v39  ;;  %v18333_v2 = vpop.f32.mrb[79].mxu1  ;;  %v18337_v10 = vsel %vm15624_vm15, %v5855_v53, %v5859_v42  ;;  %v21765_v16 = vld [vmem:[#allocation62_spill] sm:$0xff]  ;;  %v21766_v46 = vld [vmem:[#allocation63_spill] sm:$0xff]  ;;  %v18353_v42 = vsel %vm15624_vm15, %v5845_v52, %v18192_v22 }
 0x22b   : > { %v11958_v33 = vadd.f32 %v18005_v38, %v21763_v18  ;;  %21764 = vst [vmem:[#allocation25_spill] sm:$0xff] %v18333_v2  ;;  %v11965_v61 = vadd.f32 %v18003_v35, %v21765_v16  ;;  %v11966_v23 = vadd.f32 %v18005_v38, %v21766_v46  ;;  %10175 = vmatpush1.bf16.msra.mxu1 %v14584_v60  ;;  %v14590_v39 = vld [vmem:[%s21548_s3 + $0xe0] ss:$8 sps:$4 sm:$0xff]   ;;  %v18348_v18 = vpop.f32.mrb[80].mxu1  ;;  %v14532_v52 = vld [vmem:[%s21548_s3 + $0x534] ss:$8 sps:$4 sm:$0xff]  }
 0x22c   : > { %v12213_v4 = vmax.f32 %v11957_v63, 0.0  ;;  %21767 = vst [vmem:[#allocation56_spill] sm:$0xff] %v18348_v18  ;;  %11116 = vmatpush1.bf16.msra.mxu0 %v14517_v41  ;;  %v14521_v53 = vld [vmem:[%s21548_s3 + $0x520] ss:$8 sps:$4 sm:$0xff]   ;;  %v14958_v63 = vld [vmem:[#allocation3 + $0x80] sm:$0xff]  ;;  %10176 = vmatprep.subr.bf16.mxu1 %v14592_v62  ;;  %v18358_v2 = vpop.f32.mrb[81].mxu1  ;;  %v5868_v41 = vor.u32 %v18301_v7, %v18297_v43  ;;  %v5878_v22 = vor.u32 %v18315_v13, %v18313_v45 }
 0x22d   : > { %v5895_v16 = vshll.u32 %v14958_v63, 16  ;;  %v5899_v60 = vshrl.u32 %v14958_v63, 16  ;;  %v12214_v46 = vmax.f32 %v11958_v33, 0.0  ;;  %21768 = vst [vmem:[#allocation57_spill] sm:$0xff] %v18358_v2  ;;  %11117 = vmatprep.subr.bf16.mxu0 %v14523_v31  ;;  %v12221_v18 = vmax.f32 %v11965_v61, 0.0  ;;  %v18368_v63 = vpop.f32.mrb[82].mxu1 }
 0x22e   : > { %12469 = vst [vmem:[%s18197_s13 + $0xf0] sm:$0xff] %v12213_v4  ;;  %v12222_v33 = vmax.f32 %v11966_v23, 0.0  ;;  %21769 = vst [vmem:[#allocation38_spill] sm:$0xff] %v18368_v63  ;;  %v21770_v62 = vld [vmem:[#allocation40_spill] sm:$0xff]  ;;  %v21771_v2 = vld [vmem:[#allocation27_spill] sm:$0xff]  ;;  %v4926_v7 = vsel %vm4902_vm1, %v4889_v40, %v17918_v32  ;;  %v13267_v13 = vcombine.high %v18353_v42, %v18337_v10  ;;  %v18385_v23 = vpop.f32.mrb[83].mxu1 }
 0x22f   : > { %v5116_v31 = vsel %vm5100_vm13, %v18265_v14, %v21770_v62  ;;  %v5023_v43 = vsel %vm5001_vm8, %v4990_v28, %v21771_v2  ;;  %v18379_v4 = vld [vmem:[#allocation3 + $0x88] sm:$0x11]  ;;  %12470 = vst [vmem:[%s18197_s13 + $0xf8] sm:$0xff] %v12214_v46  ;;  %v14595_v61 = vld [vmem:[%s21548_s3 + $0xf4] ss:$8 sps:$4 sm:$0xff]   ;;  %21772 = vst [vmem:[#allocation58_spill] sm:$0xff] %v18385_v23  ;;  %10963 = vmatmul.mubr.bf16.gmra.mrb[36].mxu0 %v13264_v9  ;;  %10177 = vmatpush1.bf16.msra.mxu1 %v14590_v39 }
 0x230   : > { %v5883_v14 = vrot.slane %v5881_v51, 5  ;;  %v21773_v62 = vshrl.u32 %v18041_v36, 16  ;;  %v21774_v32 = vshll.u32 %v18041_v36, 16  ;;  %12477 = vst [vmem:[%s18197_s13 + $0x130] sm:$0xff] %v12221_v18  ;;  %12478 = vst [vmem:[%s18197_s13 + $0x138] sm:$0xff] %v12222_v33  ;;  %v21775_v2 = vld [vmem:[#allocation64_spill] sm:$0xff]  ;;  %10972 = vmatprep.mubr.bf16.mxu0 %v13267_v13  ;;  %11118 = vmatpush1.bf16.msra.mxu0 %v14521_v53 }
 0x231   : > { %v11973_v46 = vadd.f32 %v18003_v35, %v21775_v2  ;;  %v14593_v23 = vld [vmem:[%s21548_s3 + $0xf0] ss:$8 sps:$4 sm:$0xff]   ;;  %v18402_v9 = vpop.f32.mrb[84].mxu1  ;;  %v21777_v51 = vld [vmem:[#allocation47_spill] sm:$0xff]  ;;  %v18417_v33 = vrot.slane %v5895_v16, 5  ;;  %v18419_v2 = vpop.permute.xlu1 %4336  ;;  %13436 = vmatmul.mubr.msk.bf16.gmra.mrb[188].mxu1 %vm8188_vm2, %v5116_v31  ;;  %v5869_v53 = vrot.slane %v5868_v41, 4  ;;  %11119 = vmatprep.subr.bf16.mxu0 %v14532_v52 }
 0x232   : > { %v18389_v28 = vrot.slane %v21773_v62, 4  ;;  %v18393_v40 = vrot.slane %v21774_v32, 5  ;;  %21776 = vst [vmem:[#allocation37_spill] sm:$0xff] %v18402_v9  ;;  %v18407_v62 = vsel %vm5100_vm13, %v18269_v1, %v21777_v51  ;;  %v21778_v36 = vld [vmem:[#allocation71_spill] sm:$0xff]  ;;  %v14530_v39 = vld [vmem:[%s21548_s3 + $0x530] ss:$8 sps:$4 sm:$0xff]   ;;  %8339 = vmatprep.mubr.bf16.mxu1 %v17980_v54  ;;  %10178 = vmatprep.subr.bf16.mxu1 %v14595_v61 }
 0x233   : > { %v18412_v18 = vsel %vm5067_vm10, %v18286_v11, %v21778_v36  ;;  %v5901_v32 = vrot.slane %v5899_v60, 4  ;;  %v18421_v9 = vpop.f32.mrb[85].mxu1  ;;  %v21780_v1 = vld [vmem:[#allocation32_spill] sm:$0xff]  ;;  %v4959_v11 = vsel %vm4935_vm5, %v4926_v7, %v17958_v0  ;;  %v5879_v13 = vrot.slane %v5878_v22, 4  ;;  %v18430_v36 = vpop.permute.xlu0 %4256  ;;  %v14542_v16 = vld [vmem:[%s21548_s3 + $0x544] ss:$8 sps:$4 sm:$0xff]   ;;  %10179 = vmatpush1.bf16.msra.mxu1 %v14593_v23 }
 0x234   : > { %21779 = vst [vmem:[#allocation59_spill] sm:$0xff] %v18421_v9  ;;  %v18425_v51 = vsel %vm5034_vm6, %v5023_v43, %v21780_v1  ;;  %v18435_v60 = vpop.f32.mrb[86].mxu1  ;;  %v14959_v9 = vld [vmem:[#allocation2 + $0x90] sm:$0xf]  ;;  %v14960_v63 = vld [vmem:[#allocation2 + $0x94] sm:$0xf]  ;;  %v5892_v1 = vor.u32 %v18393_v40, %v18389_v28  ;;  %11120 = vmatpush1.bf16.msra.mxu0 %v14530_v39  ;;  %v13266_v23 = vcombine.low %v18353_v42, %v18337_v10 }
 0x235   : > { %21781 = vst [vmem:[#allocation7_spill] sm:$0xff] %v18435_v60  ;;  %v12954_v43 = vcombine.low %v14959_v9, %v14960_v63  ;;  %v5905_v0 = vshll.u32 %v18379_v4, 16  ;;  %v12229_v7 = vmax.f32 %v11973_v46, 0.0  ;;  %v21782_v31 = vld [vmem:[#allocation46_spill] sm:$0xff]  ;;  %v18441_v22 = vpop.f32.mrb[87].mxu1  ;;  %v18445_v52 = vsel %vm15624_vm15, %v5879_v13, %v5883_v14  ;;  %v21784_v63 = vld [vmem:[#allocation15_spill] sm:$0xff]  ;;  %11121 = vmatprep.subr.bf16.mxu0 %v14542_v16 }
 0x236   : > { %v11974_v41 = vadd.f32 %v18005_v38, %v21782_v31  ;;  %21783 = vst [vmem:[#allocation45_spill] sm:$0xff] %v18441_v22  ;;  %v11981_v9 = vadd.f32 %v18003_v35, %v21784_v63  ;;  %v21785_v60 = vld [vmem:[#allocation48_spill] sm:$0xff]  ;;  %v18453_v46 = vpop.f32.mrb[88].mxu1  ;;  %v5902_v61 = vor.u32 %v5901_v32, %v18417_v33  ;;  %v14540_v14 = vld [vmem:[%s21548_s3 + $0x540] ss:$8 sps:$4 sm:$0xff]   ;;  %v18467_v39 = vsel %vm15624_vm15, %v5869_v53, %v18313_v45  ;;  %v18480_v53 = vpop.permute.xlu1 %4512 }
 0x237   : > { %v11982_v4 = vadd.f32 %v18005_v38, %v21785_v60  ;;  %v14961_v13 = vld [vmem:[#allocation3 + $0x98] sm:$0xff]  ;;  %12485 = vst [vmem:[%s18197_s13 + $0x170] sm:$0xff] %v12229_v7  ;;  %v18460_v40 = vpop.f32.mrb[89].mxu1  ;;  %v4892_v10 = vsel %vm328_vm4, %v12954_v43, %v18114_v55  ;;  %v13269_v45 = vcombine.high %v18467_v39, %v18445_v52  ;;  %v5907_v42 = vrot.slane %v5905_v0, 5  ;;  %10973 = vmatmul.mubr.bf16.gmra.mrb[40].mxu0 %v13266_v23 }
 0x238   : > { %v5919_v31 = vshll.u32 %v14961_v13, 16  ;;  %v5923_v22 = vshrl.u32 %v14961_v13, 16  ;;  %v12230_v28 = vmax.f32 %v11974_v41, 0.0  ;;  %v14551_v32 = vld [vmem:[%s21548_s3 + $0x554] ss:$8 sps:$4 sm:$0xff]   ;;  %v12237_v60 = vmax.f32 %v11981_v9, 0.0  ;;  %11122 = vmatpush1.bf16.msra.mxu0 %v14540_v14 }
 0x239   : > { %v12238_v63 = vmax.f32 %v11982_v4, 0.0  ;;  %v18472_v7 = vpop.f32.mrb[90].mxu1  ;;  %v4992_v41 = vsel %vm4968_vm7, %v4959_v11, %v17954_v8  ;;  %v5893_v9 = vrot.slane %v5892_v1, 4  ;;  %v18485_v4 = vpop.permute.xlu0 %4432  ;;  %v18487_v13 = vld [vmem:[#allocation3 + $0xa0] sm:$0x11]  ;;  %v21788_v8 = vshrl.u32 %v18057_v57, 16  ;;  %10982 = vmatprep.mubr.bf16.mxu0 %v13269_v45  ;;  %13437 = vmatmul.mubr.msk.bf16.gmra.mrb[192].mxu1 %vm8188_vm2, %v18407_v62 }
 0x23a   : > { %21786 = vst [vmem:[#allocation52_spill] sm:$0xff] %v18472_v7  ;;  %12486 = vst [vmem:[%s18197_s13 + $0x178] sm:$0xff] %v12230_v28  ;;  %v18483_v16 = vpop.f32.mrb[91].mxu1  ;;  %v21789_v55 = vshll.u32 %v18057_v57, 16  ;;  %v21790_v0 = vld [vmem:[#allocation28_spill] sm:$0xff]  ;;  %v5903_v1 = vrot.slane %v5902_v61, 4  ;;  %v18518_v61 = vsel %vm5067_vm10, %v18425_v51, %v17882_v49  ;;  %11123 = vmatprep.subr.bf16.mxu0 %v14551_v32  ;;  %8349 = vmatprep.mubr.bf16.mxu1 %v17980_v54 }
 0x23b   : > { %21787 = vst [vmem:[#allocation39_spill] sm:$0xff] %v18483_v16  ;;  %v18491_v11 = vrot.slane %v21788_v8, 4  ;;  %12493 = vst [vmem:[%s18197_s13 + $0x1b0] sm:$0xff] %v12237_v60  ;;  %v11989_v28 = vadd.f32 %v18003_v35, %v21790_v0  ;;  %v18501_v16 = vpop.f32.mrb[92].mxu1  ;;  %v18503_v23 = vrot.slane %v5919_v31, 5  ;;  %v5925_v7 = vrot.slane %v5923_v22, 4 }
 0x23c   : > { %v18495_v43 = vrot.slane %v21789_v55, 5  ;;  %12494 = vst [vmem:[%s18197_s13 + $0x1b8] sm:$0xff] %v12238_v63  ;;  %v14549_v8 = vld [vmem:[%s21548_s3 + $0x550] ss:$8 sps:$4 sm:$0xff]   ;;  %v18510_v60 = vpop.f32.mrb[93].mxu1  ;;  %v21793_v63 = vld [vmem:[#allocation70_spill] sm:$0xff]  ;;  %v18533_v49 = vsel %vm15624_vm15, %v5903_v1, %v5907_v42  ;;  %v18547_v42 = vsel %vm15624_vm15, %v5893_v9, %v18417_v33  ;;  %v13268_v33 = vcombine.low %v18467_v39, %v18445_v52 }
 0x23d   : > { %v21791_v57 = vld [vmem:[#allocation29_spill] sm:$0xff]  ;;  %21792 = vst [vmem:[#allocation50_spill] sm:$0xff] %v18510_v60  ;;  %v5120_v0 = vsel %vm5100_vm13, %v18412_v18, %v21793_v63  ;;  %v12245_v22 = vmax.f32 %v11989_v28, 0.0  ;;  %v14561_v14 = vld [vmem:[%s21548_s3 + $0x564] ss:$8 sps:$4 sm:$0xff]   ;;  %v5025_v18 = vsel %vm5001_vm8, %v4992_v41, %v18007_v25  ;;  %v4928_v63 = vsel %vm4902_vm1, %v4892_v10, %v18103_v26  ;;  %11124 = vmatpush1.bf16.msra.mxu0 %v14549_v8 }
 0x23e   : > { %v11990_v55 = vadd.f32 %v18005_v38, %v21791_v57  ;;  %v21794_v31 = vld [vmem:[#allocation66_spill] sm:$0xff]  ;;  %v18527_v57 = vpop.f32.mrb[94].mxu1  ;;  %v21796_v51 = vld [vmem:[#allocation67_spill] sm:$0xff]  ;;  %v5929_v25 = vshll.u32 %v18487_v13, 16  ;;  %v5916_v1 = vor.u32 %v18495_v43, %v18491_v11  ;;  %v13271_v9 = vcombine.high %v18547_v42, %v18533_v49  ;;  %v18564_v11 = vpop.permute.xlu0 %4592  ;;  %11125 = vmatprep.subr.bf16.mxu0 %v14561_v14  ;;  %v21803_v14 = vld [vmem:[#allocation69_spill] sm:$0xff] }
 0x23f   : > { %v11997_v45 = vadd.f32 %v18003_v35, %v21794_v31  ;;  %21795 = vst [vmem:[#allocation61_spill] sm:$0xff] %v18527_v57  ;;  %v11998_v32 = vadd.f32 %v18005_v38, %v21796_v51  ;;  %v18538_v28 = vpop.f32.mrb[95].mxu1  ;;  %v14962_v31 = vld [vmem:[#allocation2 + $0x9c] sm:$0xf]  ;;  %v14963_v57 = vld [vmem:[#allocation2 + $0xa0] sm:$0xf]  ;;  %v18552_v51 = vpop.permute.xlu1 %4688  ;;  %10983 = vmatmul.mubr.bf16.gmra.mrb[44].mxu0 %v13268_v33 }
 0x240   : > { %v12246_v62 = vmax.f32 %v11990_v55, 0.0  ;;  %21797 = vst [vmem:[#allocation42_spill] sm:$0xff] %v18538_v28  ;;  %v12955_v60 = vcombine.low %v14962_v31, %v14963_v57  ;;  %12501 = vst [vmem:[%s18197_s13 + $0x1f0] sm:$0xff] %v12245_v22  ;;  %v5926_v55 = vor.u32 %v5925_v7, %v18503_v23  ;;  %v14559_v26 = vld [vmem:[%s21548_s3 + $0x560] ss:$8 sps:$4 sm:$0xff]   ;;  %v18558_v13 = vpop.f32.mrb[96].mxu1  ;;  %10992 = vmatprep.mubr.bf16.mxu0 %v13271_v9 }
 0x241   : > { %v12253_v41 = vmax.f32 %v11997_v45, 0.0  ;;  %v12254_v10 = vmax.f32 %v11998_v32, 0.0  ;;  %21798 = vst [vmem:[#allocation18_spill] sm:$0xff] %v18558_v13  ;;  %v14964_v7 = vld [vmem:[#allocation3 + $0xb0] sm:$0xff]  ;;  %v14570_v22 = vld [vmem:[%s21548_s3 + $0x574] ss:$8 sps:$4 sm:$0xff]   ;;  %11126 = vmatpush1.bf16.msra.mxu0 %v14559_v26  ;;  %13438 = vmatmul.mubr.msk.bf16.gmra.mrb[196].mxu1 %vm8188_vm2, %v5120_v0  ;;  %v5122_v0 = vsel %vm5100_vm13, %v18518_v61, %v17873_v20 }
 0x242   : > { %12502 = vst [vmem:[%s18197_s13 + $0x1f8] sm:$0xff] %v12246_v62  ;;  %v5943_v43 = vshll.u32 %v14964_v7, 16  ;;  %v5947_v8 = vshrl.u32 %v14964_v7, 16  ;;  %v18570_v45 = vpop.f32.mrb[97].mxu1  ;;  %v21800_v57 = vshrl.u32 %v18069_v56, 16  ;;  %v21801_v52 = vshll.u32 %v18069_v56, 16  ;;  %11127 = vmatprep.subr.bf16.mxu0 %v14570_v22  ;;  %8359 = vmatprep.mubr.bf16.mxu1 %v17980_v54  ;;  %v18635_v20 = vpop.permute.xlu0 %4768 }
 0x243   : > { %12509 = vst [vmem:[%s18197_s13 + $0x230] sm:$0xff] %v12253_v41  ;;  %21799 = vst [vmem:[#allocation44_spill] sm:$0xff] %v18570_v45  ;;  %v21802_v32 = vld [vmem:[#allocation68_spill] sm:$0xff]  ;;  %v12006_v41 = vadd.f32 %v18005_v38, %v21803_v14  ;;  %v18585_v7 = vpop.f32.mrb[98].mxu1  ;;  %v14641_v45 = vld [vmem:[%s21548_s3 + $0x104] ss:$8 sps:$4 sm:$0xff]   ;;  %v4961_v56 = vsel %vm4935_vm5, %v4928_v63, %v18181_v29 }
 0x244   : > { %v18574_v62 = vrot.slane %v21800_v57, 4  ;;  %v18578_v39 = vrot.slane %v21801_v52, 5  ;;  %12510 = vst [vmem:[%s18197_s13 + $0x238] sm:$0xff] %v12254_v10  ;;  %v12005_v31 = vadd.f32 %v18003_v35, %v21802_v32  ;;  %21804 = vst [vmem:[#allocation41_spill] sm:$0xff] %v18585_v7  ;;  %v5058_v57 = vsel %vm5034_vm6, %v5025_v18, %v17995_v34  ;;  %v5779_v32 = vld [vmem:[#allocation3 + $0xb8] sm:$0x11]  ;;  %10341 = vmatprep.subr.bf16.mxu1 %v14641_v45 }
 0x245   : > { %v4895_v10 = vsel %vm328_vm4, %v12955_v60, %v18430_v36  ;;  %v5931_v52 = vrot.slane %v5929_v25, 5  ;;  %v14568_v14 = vld [vmem:[%s21548_s3 + $0x570] ss:$8 sps:$4 sm:$0xff]   ;;  %v18599_v7 = vpop.f32.mrb[99].mxu1  ;;  %v5917_v13 = vrot.slane %v5916_v1, 4  ;;  %v5927_v28 = vrot.slane %v5926_v55, 4 }
 0x246   : > { %v12261_v34 = vmax.f32 %v12005_v31, 0.0  ;;  %v12262_v18 = vmax.f32 %v12006_v41, 0.0  ;;  %v18601_v29 = vpop.f32.mrb[100].mxu1  ;;  %v18604_v36 = vrot.slane %v5943_v43, 5  ;;  %v18606_v60 = vrot.slane %v5947_v8, 4  ;;  %v21805_v63 = vld [vmem:[#allocation22_spill] sm:$0xff]  ;;  %v18623_v43 = vpop.permute.xlu1 %4848  ;;  %11128 = vmatpush1.bf16.msra.mxu0 %v14568_v14 }
 0x247   : > { %v12013_v25 = vadd.f32 %v18003_v35, %v21805_v63  ;;  %v21806_v33 = vld [vmem:[#allocation23_spill] sm:$0xff]  ;;  %v18615_v26 = vpop.f32.mrb[101].mxu1  ;;  %v5091_v9 = vsel %vm5067_vm10, %v5058_v57, %v18052_v3  ;;  %v5940_v8 = vor.u32 %v18578_v39, %v18574_v62  ;;  %v5953_v22 = vshll.u32 %v5779_v32, 16  ;;  %v21808_v57 = vld [vmem:[#allocation17_spill] sm:$0xff]  ;;  %v14965_v32 = vld [vmem:[#allocation3 + $0xc8] sm:$0xff] }
 0x248   : > { %v12014_v1 = vadd.f32 %v18005_v38, %v21806_v33  ;;  %v14580_v55 = vld [vmem:[%s21548_s3 + $0x584] ss:$8 sps:$4 sm:$0xff]   ;;  %12517 = vst [vmem:[%s18197_s13 + $0x270] sm:$0xff] %v12261_v34  ;;  %12518 = vst [vmem:[%s18197_s13 + $0x278] sm:$0xff] %v12262_v18  ;;  %v18629_v31 = vpop.f32.mrb[102].mxu1  ;;  %v18633_v41 = vsel %vm15624_vm15, %v5927_v28, %v5931_v52  ;;  %v12021_v63 = vadd.f32 %v18003_v35, %v21808_v57  ;;  %v5967_v28 = vshll.u32 %v14965_v32, 16 }
 0x249   : > { %21807 = vst [vmem:[#allocation65_spill] sm:$0xff] %v18629_v31  ;;  %v12269_v3 = vmax.f32 %v12013_v25, 0.0  ;;  %v18639_v62 = vpop.f32.mrb[103].mxu1  ;;  %v4994_v45 = vsel %vm4968_vm7, %v4961_v56, %v18166_v37  ;;  %v4930_v39 = vsel %vm4902_vm1, %v4895_v10, %v18419_v2  ;;  %v5971_v52 = vshrl.u32 %v14965_v32, 16  ;;  %v14578_v34 = vld [vmem:[%s21548_s3 + $0x580] ss:$8 sps:$4 sm:$0xff]   ;;  %11129 = vmatprep.subr.bf16.mxu0 %v14580_v55  ;;  %13439 = vmatmul.mubr.msk.bf16.gmra.mrb[200].mxu1 %vm8188_vm2, %v5122_v0 }
 0x24a   : > { %v12270_v61 = vmax.f32 %v12014_v1, 0.0  ;;  %21809 = vst [vmem:[#allocation26_spill] sm:$0xff] %v18639_v62  ;;  %v18648_v18 = vpop.f32.mrb[104].mxu1  ;;  %v13270_v25 = vcombine.low %v18547_v42, %v18533_v49  ;;  %v18655_v37 = vsel %vm15624_vm15, %v5917_v13, %v18503_v23  ;;  %v5950_v2 = vor.u32 %v18606_v60, %v18604_v36  ;;  %v14589_v10 = vld [vmem:[%s21548_s3 + $0x594] ss:$8 sps:$4 sm:$0xff]   ;;  %11130 = vmatpush1.bf16.msra.mxu0 %v14578_v34 }
 0x24b   : > { %21810 = vst [vmem:[#allocation43_spill] sm:$0xff] %v18648_v18  ;;  %12525 = vst [vmem:[%s18197_s13 + $0x2b0] sm:$0xff] %v12269_v3  ;;  %v12277_v56 = vmax.f32 %v12021_v63, 0.0  ;;  %v18664_v14 = vpop.f32.mrb[105].mxu1  ;;  %v13273_v49 = vcombine.high %v18655_v37, %v18633_v41  ;;  %v5941_v42 = vrot.slane %v5940_v8, 4  ;;  %v5955_v23 = vrot.slane %v5953_v22, 5  ;;  %11131 = vmatprep.subr.bf16.mxu0 %v14589_v10  ;;  %8369 = vmatprep.mubr.bf16.mxu1 %v17980_v54 }
 0x24c   : > { %12526 = vst [vmem:[%s18197_s13 + $0x2b8] sm:$0xff] %v12270_v61  ;;  %21811 = vst [vmem:[#allocation16_spill] sm:$0xff] %v18664_v14  ;;  %v21812_v13 = vld [vmem:[#allocation20_spill] sm:$0xff]  ;;  %v18670_v60 = vpop.f32.mrb[106].mxu1  ;;  %10993 = vmatmul.mubr.bf16.gmra.mrb[48].mxu0 %v13270_v25  ;;  %v14966_v1 = vld [vmem:[#allocation2 + $0xa8] sm:$0xf]  ;;  %v13272_v0 = vcombine.low %v18655_v37, %v18633_v41 }
 0x24d   : > { %v12022_v33 = vadd.f32 %v18005_v38, %v21812_v13  ;;  %21813 = vst [vmem:[#allocation60_spill] sm:$0xff] %v18670_v60  ;;  %v14967_v3 = vld [vmem:[#allocation2 + $0xac] sm:$0xf]  ;;  %v21814_v57 = vshrl.u32 %v18099_v27, 16  ;;  %12533 = vst [vmem:[%s18197_s13 + $0x2f0] sm:$0xff] %v12277_v56  ;;  %v21815_v32 = vld [vmem:[#allocation72_spill] sm:$0xff]  ;;  %11002 = vmatprep.mubr.bf16.mxu0 %v13273_v49  ;;  %v18717_v10 = vsel %vm15624_vm15, %v5941_v42, %v18604_v36 }
 0x24e   : > { %v12956_v55 = vcombine.low %v14966_v1, %v14967_v3  ;;  %v18672_v61 = vld [vmem:[#allocation3 + $0xd0] sm:$0x11]  ;;  %v12029_v8 = vadd.f32 %v18003_v35, %v21815_v32  ;;  %v14587_v25 = vld [vmem:[%s21548_s3 + $0x590] ss:$8 sps:$4 sm:$0xff]   ;;  %v18686_v13 = vpop.f32.mrb[107].mxu1  ;;  %v4339_v1 = vpop.permute.xlu1 %4338  ;;  %v21818_v3 = vshll.u32 %v18099_v27, 16 }
 0x24f   : > { %v18676_v63 = vrot.slane %v21814_v57, 4  ;;  %v21816_v22 = vld [vmem:[#allocation31_spill] sm:$0xff]  ;;  %21817 = vst [vmem:[#allocation62_spill] sm:$0xff] %v18686_v13  ;;  %v18690_v57 = vrot.slane %v5967_v28, 5  ;;  %v5973_v56 = vrot.slane %v5971_v52, 4  ;;  %v12278_v18 = vmax.f32 %v12022_v33, 0.0  ;;  %v4259_v13 = vpop.permute.xlu0 %4258  ;;  %11132 = vmatpush1.bf16.msra.mxu0 %v14587_v25 }
 0x250   : > { %v12030_v14 = vadd.f32 %v18005_v38, %v21816_v22  ;;  %v5963_v60 = vrot.slane %v21818_v3, 5  ;;  %v18692_v32 = vpop.f32.mrb[108].mxu1  ;;  %v5124_v22 = vsel %vm5100_vm13, %v5091_v9, %v18045_v58  ;;  %v5951_v62 = vrot.slane %v5950_v2, 4  ;;  %v14598_v27 = vld [vmem:[%s21548_s3 + $0x5a4] ss:$8 sps:$4 sm:$0xff]   ;;  %v21819_v9 = vld [vmem:[#allocation73_spill] sm:$0xff] }
 0x251   : > { %v12285_v49 = vmax.f32 %v12029_v8, 0.0  ;;  %v18700_v28 = vpop.f32.mrb[109].mxu1  ;;  %v5027_v52 = vsel %vm5001_vm8, %v4994_v45, %v18255_v15  ;;  %v4963_v58 = vsel %vm4935_vm5, %v4930_v39, %v18485_v4  ;;  %12534 = vst [vmem:[%s18197_s13 + $0x2f8] sm:$0xff] %v12278_v18  ;;  %v12037_v34 = vadd.f32 %v18003_v35, %v21819_v9  ;;  %v14968_v18 = vld [vmem:[#allocation3 + $0xe0] sm:$0xff]  ;;  %v21821_v33 = vld [vmem:[#allocation24_spill] sm:$0xff]  ;;  %11133 = vmatprep.subr.bf16.mxu0 %v14598_v27 }
 0x252   : > { %v12286_v31 = vmax.f32 %v12030_v14, 0.0  ;;  %v18712_v2 = vpop.f32.mrb[110].mxu1  ;;  %v18721_v15 = vsel %vm15624_vm15, %v5951_v62, %v5955_v23  ;;  %v4898_v4 = vsel %vm328_vm4, %v12956_v55, %v4259_v13  ;;  %v5977_v41 = vshll.u32 %v18672_v61, 16  ;;  %v14596_v62 = vld [vmem:[%s21548_s3 + $0x5a0] ss:$8 sps:$4 sm:$0xff]   ;;  %v21822_v55 = vld [vmem:[#allocation49_spill] sm:$0xff]  ;;  %13440 = vmatmul.mubr.msk.bf16.gmra.mrb[204].mxu1 %vm8188_vm2, %v5124_v22 }
 0x253   : > { %12541 = vst [vmem:[%s18197_s13 + $0x330] sm:$0xff] %v12285_v49  ;;  %v18727_v54 = vpop.f32.mrb[111].mxu1  ;;  %v5964_v45 = vor.u32 %v5963_v60, %v18676_v63  ;;  %v5974_v39 = vor.u32 %v5973_v56, %v18690_v57  ;;  %v5991_v37 = vshll.u32 %v14968_v18, 16  ;;  %v12293_v36 = vmax.f32 %v12037_v34, 0.0  ;;  %v21820_v23 = vld [vmem:[#allocation74_spill] sm:$0xff]  ;;  %v18754_v49 = vpop.permute.xlu1 %4514  ;;  %11134 = vmatpush1.bf16.msra.mxu0 %v14596_v62  ;;  %v14969_v22 = vld [vmem:[#allocation3 + $0xf0] sm:$0xff] }
 0x254   : > { %12542 = vst [vmem:[%s18197_s13 + $0x338] sm:$0xff] %v12286_v31  ;;  %v18734_v14 = vpop.f32.mrb[112].mxu1  ;;  %v5995_v42 = vshrl.u32 %v14968_v18, 16  ;;  %v12038_v31 = vadd.f32 %v18005_v38, %v21820_v23  ;;  %v12045_v60 = vadd.f32 %v18003_v35, %v21821_v33  ;;  %v12046_v61 = vadd.f32 %v18005_v38, %v21822_v55  ;;  %v14602_v63 = vld [vmem:[%s21548_s3 + $0x5b4] ss:$8 sps:$4 sm:$0xff]   ;;  %11003 = vmatmul.mubr.bf16.gmra.mrb[52].mxu0 %v13272_v0 }
 0x255   : > { %v18745_v8 = vpop.f32.mrb[113].mxu1  ;;  %v5060_v25 = vsel %vm5034_vm6, %v5027_v52, %v18247_v6  ;;  %v4996_v13 = vsel %vm4968_vm7, %v4963_v58, %v18480_v53  ;;  %v13275_v3 = vcombine.high %v18717_v10, %v18721_v15  ;;  %v4932_v56 = vsel %vm4902_vm1, %v4898_v4, %v4339_v1  ;;  %v18756_v27 = vld [vmem:[#allocation3 + $0xe8] sm:$0x11]  ;;  %12549 = vst [vmem:[%s18197_s13 + $0x370] sm:$0xff] %v12293_v36  ;;  %v14600_v9 = vld [vmem:[%s21548_s3 + $0x5b0] ss:$8 sps:$4 sm:$0xff]   ;;  %v4435_v6 = vpop.permute.xlu0 %4434 }
 0x256   : > { %v18762_v34 = vpop.f32.mrb[114].mxu1  ;;  %v5979_v53 = vrot.slane %v5977_v41, 5  ;;  %v12294_v52 = vmax.f32 %v12038_v31, 0.0  ;;  %v12301_v58 = vmax.f32 %v12045_v60, 0.0  ;;  %v12302_v1 = vmax.f32 %v12046_v61, 0.0  ;;  %v21826_v60 = vld [vmem:[#allocation34_spill] sm:$0xff]  ;;  %11135 = vmatprep.subr.bf16.mxu0 %v14602_v63 }
 0x257   : > { %21823 = vst [vmem:[#allocation63_spill] sm:$0xff] %v18762_v34  ;;  %v18764_v4 = vpop.f32.mrb[115].mxu1  ;;  %11012 = vmatprep.mubr.bf16.mxu0 %v13275_v3  ;;  %v5965_v18 = vrot.slane %v5964_v45, 4  ;;  %v5975_v36 = vrot.slane %v5974_v39, 4  ;;  %v21824_v23 = vshrl.u32 %v18149_v48, 16  ;;  %v21825_v55 = vshll.u32 %v18149_v48, 16  ;;  %11136 = vmatpush1.bf16.msra.mxu0 %v14600_v9 }
 0x258   : > { %v18770_v0 = vpop.f32.mrb[116].mxu1  ;;  %v18773_v41 = vrot.slane %v5991_v37, 5  ;;  %v5997_v31 = vrot.slane %v5995_v42, 4  ;;  %12550 = vst [vmem:[%s18197_s13 + $0x378] sm:$0xff] %v12294_v52  ;;  %12557 = vst [vmem:[%s18197_s13 + $0x3b0] sm:$0xff] %v12301_v58  ;;  %v12053_v45 = vadd.f32 %v18003_v35, %v21826_v60  ;;  %v21827_v39 = vld [vmem:[#allocation21_spill] sm:$0xff]  ;;  %v5093_v42 = vsel %vm5067_vm10, %v5060_v25, %v18339_v21  ;;  %v18806_v25 = vpop.permute.xlu1 %4690 }
 0x259   : > { %v5984_v33 = vrot.slane %v21824_v23, 4  ;;  %v5987_v34 = vrot.slane %v21825_v55, 5  ;;  %12558 = vst [vmem:[%s18197_s13 + $0x3b8] sm:$0xff] %v12302_v1  ;;  %v12054_v61 = vadd.f32 %v18005_v38, %v21827_v39  ;;  %v14607_v48 = vld [vmem:[%s21548_s3 + $0x5c4] ss:$8 sps:$4 sm:$0xff]   ;;  %v18785_v62 = vpop.f32.mrb[117].mxu1  ;;  %v5029_v63 = vsel %vm5001_vm8, %v4996_v13, %v18564_v11  ;;  %v4595_v13 = vpop.permute.xlu0 %4594 }
 0x25a   : > { %v6006_v37 = vshrl.u32 %v14969_v22, 16  ;;  %v6009_v3 = vshll.u32 %v14969_v22, 16  ;;  %v18789_v52 = vld [vmem:[#allocation3] sm:$0xff]  ;;  %v18792_v58 = vpop.f32.mrb[118].mxu1  ;;  %v13274_v1 = vcombine.low %v18717_v10, %v18721_v15  ;;  %v18800_v23 = vsel %vm15624_vm15, %v5975_v36, %v5979_v53  ;;  %v14605_v11 = vld [vmem:[%s21548_s3 + $0x5c0] ss:$8 sps:$4 sm:$0xff]   ;;  %11137 = vmatprep.subr.bf16.mxu0 %v14607_v48 }
 0x25b   : > { %8379 = vmatprep.mubr.bf16.mxu1 %v18789_v52  ;;  %v6001_v55 = vshll.u32 %v18756_v27, 16  ;;  %v18803_v60 = vpop.f32.mrb[119].mxu1  ;;  %v4965_v21 = vsel %vm4935_vm5, %v4932_v56, %v4435_v6  ;;  %v5988_v39 = vor.u32 %v5987_v34, %v5984_v33  ;;  %v12309_v22 = vmax.f32 %v12053_v45, 0.0  ;;  %v14971_v27 = vld [vmem:[#allocation3 + $0xf8] sm:$0xff]  ;;  %11138 = vmatpush1.bf16.msra.mxu0 %v14605_v11 }
 0x25c   : > { %v12310_v38 = vmax.f32 %v12054_v61, 0.0  ;;  %v18811_v10 = vpop.f32.mrb[120].mxu1  ;;  %v18816_v15 = vsel %vm15624_vm15, %v5965_v18, %v18690_v57  ;;  %v5998_v56 = vor.u32 %v5997_v31, %v18773_v41  ;;  %v6015_v34 = vshll.u32 %v14971_v27, 16  ;;  %v14612_v9 = vld [vmem:[%s21548_s3 + $0x5d4] ss:$8 sps:$4 sm:$0xff]   ;;  %v14972_v31 = vld [vmem:[#allocation3 + $0x108] sm:$0xff]  ;;  %11013 = vmatmul.mubr.bf16.gmra.mrb[56].mxu0 %v13274_v1 }
 0x25d   : > { %v6019_v6 = vshrl.u32 %v14971_v27, 16  ;;  %v18822_v53 = vpop.f32.mrb[121].mxu1  ;;  %v5126_v36 = vsel %vm5100_vm13, %v5093_v42, %v18329_v30  ;;  %v13277_v57 = vcombine.high %v18816_v15, %v18800_v23  ;;  %v18828_v18 = vld [vmem:[#allocation3 + $0x100] sm:$0x11]  ;;  %12565 = vst [vmem:[%s18197_s13 + $0x3f0] sm:$0xff] %v12309_v22  ;;  %v6030_v45 = vshrl.u32 %v14972_v31, 16  ;;  %11139 = vmatprep.subr.bf16.mxu0 %v14612_v9 }
 0x25e   : > { %12566 = vst [vmem:[%s18197_s13 + $0x3f8] sm:$0xff] %v12310_v38  ;;  %v18832_v33 = vpop.f32.mrb[122].mxu1  ;;  %v6033_v61 = vshll.u32 %v14972_v31, 16  ;;  %v6003_v48 = vrot.slane %v6001_v55, 5  ;;  %v14610_v27 = vld [vmem:[%s21548_s3 + $0x5d0] ss:$8 sps:$4 sm:$0xff]   ;;  %v5062_v30 = vsel %vm5034_vm6, %v5029_v63, %v18552_v51  ;;  %v4998_v42 = vsel %vm4968_vm7, %v4965_v21, %v18754_v49  ;;  %13441 = vmatmul.mubr.msk.bf16.gmra.mrb[208].mxu1 %vm8188_vm2, %v5126_v36  ;;  %v18853_v49 = vpop.permute.xlu1 %4850 }
 0x25f   : > { %21828 = vst [vmem:[#allocation40_spill] sm:$0xff] %v18832_v33  ;;  %v18837_v35 = vpop.f32.mrb[123].mxu1  ;;  %11022 = vmatprep.mubr.bf16.mxu0 %v13277_v57  ;;  %v5989_v38 = vrot.slane %v5988_v39, 4  ;;  %v6008_v22 = vrot.slane %v6006_v37, 4  ;;  %v14617_v1 = vld [vmem:[%s21548_s3 + $0x5e4] ss:$8 sps:$4 sm:$0xff]   ;;  %8389 = vmatprep.mubr.bf16.mxu1 %v18789_v52  ;;  %v5095_v21 = vsel %vm5067_vm10, %v5062_v30, %v18635_v20  ;;  %v4771_v39 = vpop.permute.xlu0 %4770  ;;  %v13276_v11 = vcombine.low %v18816_v15, %v18800_v23 }
 0x260   : > { %21829 = vst [vmem:[#allocation27_spill] sm:$0xff] %v18837_v35  ;;  %v18846_v55 = vpop.f32.mrb[124].mxu1  ;;  %v5999_v31 = vrot.slane %v5998_v56, 4  ;;  %v6011_v35 = vrot.slane %v6009_v3, 5  ;;  %v18849_v33 = vrot.slane %v6015_v34, 5  ;;  %v6021_v51 = vrot.slane %v6019_v6, 4  ;;  %11140 = vmatpush1.bf16.msra.mxu0 %v14610_v27 }
 0x261   : > { %v18851_v63 = vpop.f32.mrb[125].mxu1  ;;  %v6025_v56 = vshll.u32 %v18828_v18, 16  ;;  %v5031_v6 = vsel %vm5001_vm8, %v4998_v42, %v4595_v13  ;;  %v18873_v9 = vsel %vm15624_vm15, %v5989_v38, %v18773_v41  ;;  %v14973_v20 = vld [vmem:[#allocation3 + $0x110] sm:$0xff]  ;;  %v18881_v30 = vrot.slane %v6030_v45, 4  ;;  %11141 = vmatprep.subr.bf16.mxu0 %v14617_v1  ;;  %v14622_v41 = vld [vmem:[%s21548_s3 + $0x5f4] ss:$8 sps:$4 sm:$0xff]  }
 0x262   : > { %21830 = vst [vmem:[#allocation64_spill] sm:$0xff] %v18851_v63  ;;  %v18856_v37 = vpop.f32.mrb[126].mxu1  ;;  %v18864_v3 = vsel %vm15624_vm15, %v5999_v31, %v6003_v48  ;;  %v6039_v36 = vshll.u32 %v14973_v20, 16  ;;  %v6043_v57 = vshrl.u32 %v14973_v20, 16  ;;  %v14615_v23 = vld [vmem:[%s21548_s3 + $0x5e0] ss:$8 sps:$4 sm:$0xff]   ;;  %v6012_v18 = vor.u32 %v6011_v35, %v6008_v22  ;;  %v4341_v63 = vpop.permute.xlu1 %4340 }
 0x263   : > { %21831 = vst [vmem:[#allocation47_spill] sm:$0xff] %v18856_v37  ;;  %v18867_v34 = vpop.f32.mrb[127].mxu1  ;;  %v6022_v48 = vor.u32 %v6021_v51, %v18849_v33  ;;  %v6035_v13 = vrot.slane %v6033_v61, 5  ;;  %v14974_v27 = vld [vmem:[#allocation3 + $0x120] sm:$0xff]  ;;  %v5128_v31 = vsel %vm5100_vm13, %v5095_v21, %v18623_v43  ;;  %v13279_v35 = vcombine.high %v18873_v9, %v18864_v3  ;;  %v14975_v22 = vld [vmem:[#allocation2 + $0xb4] sm:$0xf] }
 0x264   : > { %21832 = vst [vmem:[#allocation71_spill] sm:$0xff] %v18867_v34  ;;  %v18878_v15 = vpop.f32.mrb[128].mxu1  ;;  %v6054_v38 = vshrl.u32 %v14974_v27, 16  ;;  %v14976_v51 = vld [vmem:[#allocation2 + $0xb8] sm:$0xf]  ;;  %v6057_v1 = vshll.u32 %v14974_v27, 16  ;;  %11023 = vmatmul.mubr.bf16.gmra.mrb[60].mxu0 %v13276_v11 }
 0x265   : > { %21833 = vst [vmem:[#allocation32_spill] sm:$0xff] %v18878_v15  ;;  %v18886_v42 = vpop.f32.mrb[129].mxu1  ;;  %v12957_v45 = vcombine.low %v14975_v22, %v14976_v51  ;;  %v5783_v20 = vld [vmem:[#allocation3 + $0x118] sm:$0x11]  ;;  %v6027_v37 = vrot.slane %v6025_v56, 5  ;;  %11032 = vmatprep.mubr.bf16.mxu0 %v13279_v35  ;;  %v18902_v22 = vrot.slane %v6039_v36, 5  ;;  %11142 = vmatpush1.bf16.msra.mxu0 %v14615_v23 }
 0x266   : > { %21834 = vst [vmem:[#allocation46_spill] sm:$0xff] %v18886_v42  ;;  %v18892_v61 = vpop.f32.mrb[130].mxu1  ;;  %v18894_v15 = vld [vmem:[#allocation3 + $0x138] sm:$0xff]  ;;  %v5064_v42 = vsel %vm5034_vm6, %v5031_v6, %v18806_v25  ;;  %v6045_v51 = vrot.slane %v6043_v57, 4  ;;  %13442 = vmatmul.mubr.msk.bf16.gmra.mrb[212].mxu1 %vm8188_vm2, %v5128_v31  ;;  %v4261_v25 = vpop.permute.xlu0 %4260  ;;  %v6013_v11 = vrot.slane %v6012_v18, 4  ;;  %v6023_v56 = vrot.slane %v6022_v48, 4  ;;  %11143 = vmatprep.subr.bf16.mxu0 %v14622_v41 }
 0x267   : > { %21835 = vst [vmem:[#allocation15_spill] sm:$0xff] %v18892_v61  ;;  %v18899_v43 = vpop.f32.mrb[131].mxu1  ;;  %v6081_v21 = vshll.u32 %v18894_v15, 16  ;;  %v14620_v27 = vld [vmem:[%s21548_s3 + $0x5f0] ss:$8 sps:$4 sm:$0xff]   ;;  %v6036_v6 = vor.u32 %v6035_v13, %v18881_v30  ;;  %v5097_v23 = vsel %vm5067_vm10, %v5064_v42, %v4771_v39  ;;  %v4901_v35 = vsel %vm328_vm4, %v12957_v45, %v4261_v25  ;;  %8399 = vmatprep.mubr.bf16.mxu1 %v18789_v52  ;;  %v14978_v31 = vld [vmem:[#allocation3 + $0x128] sm:$0xff] }
 0x268   : > { %21836 = vst [vmem:[#allocation48_spill] sm:$0xff] %v18899_v43  ;;  %v18907_v34 = vpop.f32.mrb[132].mxu1  ;;  %v6049_v43 = vshll.u32 %v5783_v20, 16  ;;  %v14627_v36 = vld [vmem:[%s21548_s3 + $0x604] ss:$8 sps:$4 sm:$0xff]   ;;  %v6067_v18 = vshrl.u32 %v14978_v31, 16  ;;  %v18926_v41 = vsel %vm15624_vm15, %v6023_v56, %v6027_v37  ;;  %v5130_v37 = vsel %vm5100_vm13, %v5097_v23, %v18853_v49 }
 0x269   : > { %21837 = vst [vmem:[#allocation28_spill] sm:$0xff] %v18907_v34  ;;  %v18914_v57 = vpop.f32.mrb[133].mxu1  ;;  %v6063_v34 = vshll.u32 %v14978_v31, 16  ;;  %v18921_v30 = vld [vmem:[#allocation3 + $0x150] sm:$0xff]  ;;  %v6056_v20 = vrot.slane %v6054_v38, 4  ;;  %v18931_v45 = vld [vmem:[#allocation3 + $0x168] sm:$0xff]  ;;  %v13278_v31 = vcombine.low %v18873_v9, %v18864_v3  ;;  %11144 = vmatpush1.bf16.msra.mxu0 %v14620_v27  ;;  %v4934_v38 = vsel %vm4902_vm1, %v4901_v35, %v4341_v63  ;;  %v4517_v3 = vpop.permute.xlu1 %4516 }
 0x26a   : > { %21838 = vst [vmem:[#allocation29_spill] sm:$0xff] %v18914_v57  ;;  %v18919_v48 = vpop.f32.mrb[134].mxu1  ;;  %v6059_v57 = vrot.slane %v6057_v1, 5  ;;  %v5784_v13 = vld [vmem:[#allocation3 + $0x130] sm:$0x11]  ;;  %v6018_v1 = vsel %vm15624_vm15, %v6013_v11, %v18849_v33  ;;  %v6037_v56 = vrot.slane %v6036_v6, 4  ;;  %11306 = vmatprep.subr.bf16.mxu0 %v14627_v36  ;;  %v4437_v35 = vpop.permute.xlu0 %4436 }
 0x26b   : > { %21839 = vst [vmem:[#allocation70_spill] sm:$0xff] %v18919_v48  ;;  %v18928_v39 = vpop.f32.mrb[135].mxu1  ;;  %v6046_v48 = vor.u32 %v6045_v51, %v18902_v22  ;;  %v13281_v9 = vcombine.high %v6018_v1, %v18926_v41  ;;  %v6051_v51 = vrot.slane %v6049_v43, 5  ;;  %v6065_v27 = vrot.slane %v6063_v34, 5  ;;  %v18951_v23 = vld [vmem:[#allocation3 + $0x180] sm:$0xff] }
 0x26c   : > { %v18937_v61 = vpop.f32.mrb[136].mxu1  ;;  %v6069_v42 = vrot.slane %v6067_v18, 4  ;;  %11033 = vmatmul.mubr.bf16.gmra.mrb[64].mxu0 %v13278_v31  ;;  %v6060_v33 = vor.u32 %v6059_v57, %v6056_v20  ;;  %v6073_v11 = vshll.u32 %v5784_v13, 16  ;;  %v4967_v36 = vsel %vm4935_vm5, %v4934_v38, %v4437_v35  ;;  %v5785_v57 = vld [vmem:[#allocation3 + $0x148] sm:$0x11]  ;;  %v14982_v13 = vld [vmem:[#allocation3 + $0x140] sm:$0xff] }
 0x26d   : > { %21840 = vst [vmem:[#allocation66_spill] sm:$0xff] %v18937_v61  ;;  %v18945_v25 = vpop.f32.mrb[137].mxu1  ;;  %11042 = vmatprep.mubr.bf16.mxu0 %v13281_v9  ;;  %v6047_v43 = vrot.slane %v6046_v48, 4  ;;  %v21844_v34 = vshrl.u32 %v18894_v15, 16  ;;  %v13280_v31 = vcombine.low %v6018_v1, %v18926_v41  ;;  %v6087_v20 = vshll.u32 %v14982_v13, 16  ;;  %v21848_v41 = vld [vmem:[#allocation12_spill] sm:$0xff] }
 0x26e   : > { %21841 = vst [vmem:[#allocation67_spill] sm:$0xff] %v18945_v25  ;;  %v18948_v61 = vpop.f32.mrb[138].mxu1  ;;  %13443 = vmatmul.mubr.msk.bf16.gmra.mrb[216].mxu1 %vm8188_vm2, %v5130_v37  ;;  %v6091_v63 = vshrl.u32 %v14982_v13, 16  ;;  %v18969_v15 = vsel %vm15624_vm15, %v6037_v56, %v18902_v22  ;;  %v6070_v48 = vor.u32 %v6069_v42, %v6065_v27  ;;  %v21847_v37 = vld [vmem:[#allocation19_spill] sm:$0xff]  ;;  %v5000_v1 = vsel %vm4968_vm7, %v4967_v36, %v4517_v3  ;;  %v18981_v13 = vld [vmem:[#allocation3 + $0x20] sm:$0xff]  ;;  %v4693_v56 = vpop.permute.xlu1 %4692 }
 0x26f   : > { %21842 = vst [vmem:[#allocation68_spill] sm:$0xff] %v18948_v61  ;;  %v18954_v6 = vpop.f32.mrb[139].mxu1  ;;  %v6080_v18 = vrot.slane %v21844_v34, 4  ;;  %v6083_v61 = vrot.slane %v6081_v21, 5  ;;  %v18973_v21 = vsel %vm15624_vm15, %v6047_v43, %v6051_v51  ;;  %8409 = vmatprep.mubr.bf16.mxu1 %v18789_v52  ;;  %v11931_v38 = vadd.f32 %v21848_v41, %v21847_v37  ;;  %v4597_v3 = vpop.permute.xlu0 %4596 }
 0x270   : > { %21843 = vst [vmem:[#allocation69_spill] sm:$0xff] %v18954_v6  ;;  %v18959_v25 = vpop.f32.mrb[140].mxu1  ;;  %v6061_v9 = vrot.slane %v6060_v33, 4  ;;  %v6075_v35 = vrot.slane %v6073_v11, 5  ;;  %v6097_v43 = vshll.u32 %v5785_v57, 16  ;;  %v13283_v33 = vcombine.high %v18969_v15, %v18973_v21  ;;  %v18991_v11 = vld [vmem:[#allocation3 + $0x18] sm:$0xff] }
 0x271   : > { %21845 = vst [vmem:[#allocation22_spill] sm:$0xff] %v18959_v25  ;;  %v18964_v6 = vpop.f32.mrb[141].mxu1  ;;  %v6084_v42 = vor.u32 %v6083_v61, %v6080_v18  ;;  %v12187_v49 = vmax.f32 %v11931_v38, 0.0  ;;  %v18993_v36 = vrot.slane %v6087_v20, 5  ;;  %v18995_v34 = vrot.slane %v6091_v63, 4  ;;  %v21858_v38 = vld [vmem:[#allocation36_spill] sm:$0xff] }
 0x272   : > { %21846 = vst [vmem:[#allocation23_spill] sm:$0xff] %v18964_v6  ;;  %v18983_v22 = vpop.f32.mrb[142].mxu1  ;;  %v21851_v6 = vld [vmem:[#allocation13_spill] sm:$0xff]  ;;  %v5033_v61 = vsel %vm5001_vm8, %v5000_v1, %v4597_v3  ;;  %v13282_v18 = vcombine.low %v18969_v15, %v18973_v21  ;;  %v6071_v57 = vrot.slane %v6070_v48, 4  ;;  %v19011_v63 = vsel %vm15624_vm15, %v6061_v9, %v6065_v27 }
 0x273   : > { %21849 = vst [vmem:[#allocation17_spill] sm:$0xff] %v18983_v22  ;;  %v18987_v37 = vpop.f32.mrb[143].mxu1  ;;  %v21850_v22 = vld [vmem:[#allocation53_spill] sm:$0xff]  ;;  %12443 = vst [vmem:[%s18197_s13 + $0x20] sm:$0xff] %v12187_v49  ;;  %v11939_v15 = vadd.f32 %v21848_v41, %v18116_v19  ;;  %v6085_v48 = vrot.slane %v6084_v42, 4  ;;  %v11940_v27 = vadd.f32 %v21851_v6, %v18171_v12  ;;  %v6094_v19 = vor.u32 %v18995_v34, %v18993_v36  ;;  %v4853_v42 = vpop.permute.xlu1 %4852 }
 0x274   : > { %v11932_v25 = vadd.f32 %v21851_v6, %v21850_v22  ;;  %v18999_v51 = vpop.f32.mrb[144].mxu1  ;;  %11043 = vmatmul.mubr.bf16.gmra.mrb[68].mxu0 %v13280_v31  ;;  %v19021_v49 = vsel %vm15624_vm15, %v6071_v57, %v6075_v35  ;;  %v19023_v31 = vrot.slane %v6097_v43, 5  ;;  %v11947_v35 = vadd.f32 %v21848_v41, %v18186_v50 }
 0x275   : > { %v19007_v20 = vpop.f32.mrb[145].mxu1  ;;  %11052 = vmatprep.mubr.bf16.mxu0 %v13283_v33  ;;  %v12195_v3 = vmax.f32 %v11939_v15, 0.0  ;;  %v21855_v43 = vshrl.u32 %v18921_v30, 16  ;;  %v12196_v12 = vmax.f32 %v11940_v27, 0.0  ;;  %v11955_v34 = vadd.f32 %v21848_v41, %v18210_v44  ;;  %v19047_v15 = vld [vmem:[#allocation3 + $0x38] sm:$0xff] }
 0x276   : > { %v12188_v1 = vmax.f32 %v11932_v25, 0.0  ;;  %v19017_v21 = vpop.f32.mrb[146].mxu1  ;;  %v5066_v25 = vsel %vm5034_vm6, %v5033_v61, %v4693_v56  ;;  %v11948_v56 = vadd.f32 %v21851_v6, %v18201_v5  ;;  %v21857_v50 = vshll.u32 %v18921_v30, 16 }
 0x277   : > { %21852 = vst [vmem:[#allocation20_spill] sm:$0xff] %v19017_v21  ;;  %v19027_v9 = vpop.f32.mrb[147].mxu1  ;;  %v19039_v57 = vrot.slane %v21855_v43, 4  ;;  %12451 = vst [vmem:[%s18197_s13 + $0x60] sm:$0xff] %v12195_v3  ;;  %v12203_v43 = vmax.f32 %v11947_v35, 0.0  ;;  %v11956_v27 = vadd.f32 %v21851_v6, %v18221_v59  ;;  %v11963_v5 = vadd.f32 %v21848_v41, %v21858_v38  ;;  %v19067_v38 = vld [vmem:[#allocation3 + $0x30] sm:$0xff] }
 0x278   : > { %21853 = vst [vmem:[#allocation72_spill] sm:$0xff] %v19027_v9  ;;  %12444 = vst [vmem:[%s18197_s13 + $0x28] sm:$0xff] %v12188_v1  ;;  %v19035_v33 = vpop.f32.mrb[148].mxu1  ;;  %v4773_v1 = vpop.permute.xlu0 %4772  ;;  %v19051_v22 = vrot.slane %v21857_v50, 5  ;;  %v14983_v9 = vld [vmem:[#allocation3 + $0x158] sm:$0xff]  ;;  %v12204_v30 = vmax.f32 %v11948_v56, 0.0  ;;  %v13285_v59 = vcombine.high %v19011_v63, %v19021_v49 }
 0x279   : > { %21854 = vst [vmem:[#allocation31_spill] sm:$0xff] %v19035_v33  ;;  %v19045_v61 = vpop.f32.mrb[149].mxu1  ;;  %v5099_v44 = vsel %vm5067_vm10, %v5066_v25, %v4773_v1  ;;  %v6111_v21 = vshll.u32 %v14983_v9, 16  ;;  %12452 = vst [vmem:[%s18197_s13 + $0x68] sm:$0xff] %v12196_v12  ;;  %v12211_v3 = vmax.f32 %v11955_v34, 0.0  ;;  %v12212_v25 = vmax.f32 %v11956_v27, 0.0 }
 0x27a   : > { %21856 = vst [vmem:[#allocation73_spill] sm:$0xff] %v19045_v61  ;;  %v19058_v33 = vpop.f32.mrb[150].mxu1  ;;  %v5786_v61 = vld [vmem:[#allocation3 + $0x160] sm:$0x11]  ;;  %v5132_v50 = vsel %vm5100_vm13, %v5099_v44, %v4853_v42  ;;  %12459 = vst [vmem:[%s18197_s13 + $0xa0] sm:$0xff] %v12203_v43  ;;  %v13284_v12 = vcombine.low %v19011_v63, %v19021_v49  ;;  %v12219_v42 = vmax.f32 %v11963_v5, 0.0  ;;  %v21861_v43 = vcombine.high %v18789_v52, %v18789_v52 }
 0x27b   : > { %21859 = vst [vmem:[#allocation74_spill] sm:$0xff] %v19058_v33  ;;  %v19062_v35 = vpop.f32.mrb[151].mxu1  ;;  %v6115_v33 = vshrl.u32 %v14983_v9, 16  ;;  %13444 = vmatmul.mubr.msk.bf16.gmra.mrb[220].mxu1 %vm8188_vm2, %v5132_v50  ;;  %12460 = vst [vmem:[%s18197_s13 + $0xa8] sm:$0xff] %v12204_v30  ;;  %v21860_v34 = vld [vmem:[#allocation54_spill] sm:$0xff]  ;;  %v19089_v63 = vsel %vm15624_vm15, %v6085_v48, %v18993_v36  ;;  %v6121_v49 = vshll.u32 %v5786_v61, 16 }
 0x27c   : > { %v19070_v1 = vpop.f32.mrb[152].mxu1  ;;  %12467 = vst [vmem:[%s18197_s13 + $0xe0] sm:$0xff] %v12211_v3  ;;  %v11964_v9 = vadd.f32 %v21851_v6, %v21860_v34  ;;  %11053 = vmatmul.mubr.bf16.gmra.mrb[72].mxu0 %v13282_v18  ;;  %10180 = vmatprep.mubr.bf16.mxu1 %v21861_v43  ;;  %12468 = vst [vmem:[%s18197_s13 + $0xe8] sm:$0xff] %v12212_v25  ;;  %v21862_v27 = vld [vmem:[#allocation55_spill] sm:$0xff]  ;;  %v6095_v18 = vrot.slane %v6094_v19, 4  ;;  %v6108_v34 = vor.u32 %v19051_v22, %v19039_v57  ;;  %v21866_v56 = vld [vmem:[#allocation30_spill] sm:$0xff] }
 0x27d   : > { %v19081_v44 = vpop.f32.mrb[153].mxu1  ;;  %v11971_v5 = vadd.f32 %v21848_v41, %v21862_v27  ;;  %v21863_v30 = vld [vmem:[#allocation35_spill] sm:$0xff]  ;;  %11062 = vmatprep.mubr.bf16.mxu0 %v13285_v59  ;;  %v19100_v43 = vrot.slane %v6111_v21, 5  ;;  %12475 = vst [vmem:[%s18197_s13 + $0x120] sm:$0xff] %v12219_v42  ;;  %v6117_v61 = vrot.slane %v6115_v33, 4  ;;  %v11980_v21 = vadd.f32 %v21851_v6, %v18306_v24  ;;  %v21868_v33 = vld [vmem:[#allocation25_spill] sm:$0xff] }
 0x27e   : > { %v11972_v3 = vadd.f32 %v21851_v6, %v21863_v30  ;;  %v19096_v50 = vpop.f32.mrb[154].mxu1  ;;  %v12220_v36 = vmax.f32 %v11964_v9, 0.0  ;;  %v11979_v30 = vadd.f32 %v21848_v41, %v21866_v56  ;;  %v19112_v22 = vsel %vm15624_vm15, %v6095_v18, %v19023_v31  ;;  %v14984_v42 = vld [vmem:[#allocation3 + $0x170] sm:$0xff] }
 0x27f   : > { %21864 = vst [vmem:[#allocation24_spill] sm:$0xff] %v19096_v50  ;;  %v19103_v48 = vpop.f32.mrb[155].mxu1  ;;  %v12227_v25 = vmax.f32 %v11971_v5, 0.0  ;;  %v11987_v19 = vadd.f32 %v21848_v41, %v18321_v17  ;;  %v11988_v57 = vadd.f32 %v21851_v6, %v21868_v33  ;;  %v6123_v56 = vrot.slane %v6121_v49, 5  ;;  %v21870_v5 = vld [vmem:[#allocation56_spill] sm:$0xff] }
 0x280   : > { %21865 = vst [vmem:[#allocation49_spill] sm:$0xff] %v19103_v48  ;;  %v12228_v27 = vmax.f32 %v11972_v3, 0.0  ;;  %v19107_v50 = vpop.f32.mrb[156].mxu1  ;;  %12476 = vst [vmem:[%s18197_s13 + $0x128] sm:$0xff] %v12220_v36  ;;  %v6135_v9 = vshll.u32 %v14984_v42, 16  ;;  %v12235_v31 = vmax.f32 %v11979_v30, 0.0  ;;  %v11995_v3 = vadd.f32 %v21848_v41, %v21870_v5 }
 0x281   : > { %21867 = vst [vmem:[#allocation34_spill] sm:$0xff] %v19107_v50  ;;  %v19121_v59 = vpop.f32.mrb[157].mxu1  ;;  %12483 = vst [vmem:[%s18197_s13 + $0x160] sm:$0xff] %v12227_v25  ;;  %v14639_v24 = vld [vmem:[%s21548_s3 + $0x100] ss:$8 sps:$4 sm:$0xff]   ;;  %v6139_v18 = vshrl.u32 %v14984_v42, 16  ;;  %v13287_v25 = vcombine.high %v19089_v63, %v19112_v22  ;;  %v21879_v48 = vcombine.high %v18991_v11, %v18981_v13 }
 0x282   : > { %21869 = vst [vmem:[#allocation21_spill] sm:$0xff] %v19121_v59  ;;  %12484 = vst [vmem:[%s18197_s13 + $0x168] sm:$0xff] %v12228_v27  ;;  %v19130_v17 = vpop.f32.mrb[158].mxu1  ;;  %v12236_v49 = vmax.f32 %v11980_v21, 0.0  ;;  %v12243_v36 = vmax.f32 %v11987_v19, 0.0  ;;  %v12244_v33 = vmax.f32 %v11988_v57, 0.0  ;;  %v6118_v27 = vor.u32 %v6117_v61, %v19100_v43 }
 0x283   : > { %21871 = vst [vmem:[#allocation19_spill] sm:$0xff] %v19130_v17  ;;  %v19132_v59 = vpop.f32.mrb[159].mxu1  ;;  %12491 = vst [vmem:[%s18197_s13 + $0x1a0] sm:$0xff] %v12235_v31  ;;  %v12251_v30 = vmax.f32 %v11995_v3, 0.0  ;;  %v21873_v5 = vld [vmem:[#allocation57_spill] sm:$0xff]  ;;  %v21874_v21 = vcombine.low %v18789_v52, %v18789_v52  ;;  %v21875_v19 = vshrl.u32 %v18931_v45, 16  ;;  %v13286_v52 = vcombine.low %v19089_v63, %v19112_v22 }
 0x284   : > { %21872 = vst [vmem:[#allocation12_spill] sm:$0xff] %v19132_v59  ;;  %v11996_v50 = vadd.f32 %v21851_v6, %v21873_v5  ;;  %v14646_v42 = vld [vmem:[%s21548_s3 + $0x114] ss:$8 sps:$4 sm:$0xff]   ;;  %v21876_v59 = vshll.u32 %v18931_v45, 16  ;;  %12492 = vst [vmem:[%s18197_s13 + $0x1a8] sm:$0xff] %v12236_v49  ;;  %v21877_v31 = vld [vmem:[#allocation38_spill] sm:$0xff]  ;;  %11063 = vmatmul.mubr.bf16.gmra.mrb[76].mxu0 %v13284_v12 }
 0x285   : > { %10181 = vmatmul.mubr.bf16.vlgmr.msra.gmra.mrb[224].mxu1 %v21874_v21  ;;  %v6128_v57 = vrot.slane %v21875_v19, 4  ;;  %12499 = vst [vmem:[%s18197_s13 + $0x1e0] sm:$0xff] %v12243_v36  ;;  %12500 = vst [vmem:[%s18197_s13 + $0x1e8] sm:$0xff] %v12244_v33  ;;  %v12003_v3 = vadd.f32 %v21848_v41, %v21877_v31  ;;  %v21878_v5 = vld [vmem:[#allocation58_spill] sm:$0xff]  ;;  %v6109_v45 = vrot.slane %v6108_v34, 4  ;;  %v19162_v49 = vrot.slane %v6135_v9, 5  ;;  %11072 = vmatprep.mubr.bf16.mxu0 %v13287_v25 }
 0x286   : > { %v6131_v61 = vrot.slane %v21876_v59, 5  ;;  %v12004_v17 = vadd.f32 %v21851_v6, %v21878_v5  ;;  %10190 = vmatprep.mubr.bf16.mxu1 %v21879_v48  ;;  %v5787_v59 = vld [vmem:[#allocation3 + $0x178] sm:$0x11]  ;;  %12507 = vst [vmem:[%s18197_s13 + $0x220] sm:$0xff] %v12251_v30  ;;  %v12252_v36 = vmax.f32 %v11996_v50, 0.0  ;;  %v6141_v33 = vrot.slane %v6139_v18, 4  ;;  %10342 = vmatpush1.bf16.msra.mxu1 %v14639_v24 }
 0x287   : > { %v12259_v21 = vmax.f32 %v12003_v3, 0.0  ;;  %v21880_v31 = vld [vmem:[#allocation37_spill] sm:$0xff]  ;;  %v6119_v63 = vrot.slane %v6118_v27, 4  ;;  %v21881_v34 = vld [vmem:[#allocation59_spill] sm:$0xff]  ;;  %10343 = vmatprep.subr.bf16.mxu1 %v14646_v42  ;;  %v6145_v30 = vshll.u32 %v5787_v59, 16  ;;  %v12027_v3 = vadd.f32 %v21848_v41, %v18453_v46 }
 0x288   : > { %v12260_v19 = vmax.f32 %v12004_v17, 0.0  ;;  %v12011_v48 = vadd.f32 %v21848_v41, %v21880_v31  ;;  %v14644_v12 = vld [vmem:[%s21548_s3 + $0x110] ss:$8 sps:$4 sm:$0xff]   ;;  %12508 = vst [vmem:[%s18197_s13 + $0x228] sm:$0xff] %v12252_v36  ;;  %v12012_v22 = vadd.f32 %v21851_v6, %v21881_v34  ;;  %v21882_v50 = vld [vmem:[#allocation7_spill] sm:$0xff]  ;;  %v6132_v25 = vor.u32 %v6131_v61, %v6128_v57 }
 0x289   : > { %v12019_v9 = vadd.f32 %v21848_v41, %v21882_v50  ;;  %v21883_v18 = vld [vmem:[#allocation45_spill] sm:$0xff]  ;;  %v14652_v24 = vld [vmem:[%s21548_s3 + $0x124] ss:$8 sps:$4 sm:$0xff]   ;;  %12515 = vst [vmem:[%s18197_s13 + $0x260] sm:$0xff] %v12259_v21  ;;  %v19186_v5 = vsel %vm15624_vm15, %v6119_v63, %v6123_v56  ;;  %v19191_v57 = vsel %vm15624_vm15, %v6109_v45, %v19100_v43  ;;  %v6142_v61 = vor.u32 %v6141_v33, %v19162_v49  ;;  %v14650_v33 = vld [vmem:[%s21548_s3 + $0x120] ss:$8 sps:$4 sm:$0xff]  }
 0x28a   : > { %v12020_v17 = vadd.f32 %v21851_v6, %v21883_v18  ;;  %12516 = vst [vmem:[%s18197_s13 + $0x268] sm:$0xff] %v12260_v19  ;;  %v12267_v27 = vmax.f32 %v12011_v48, 0.0  ;;  %v12268_v42 = vmax.f32 %v12012_v22, 0.0  ;;  %v12283_v59 = vmax.f32 %v12027_v3, 0.0  ;;  %10344 = vmatpush1.bf16.msra.mxu1 %v14644_v12  ;;  %v14985_v21 = vld [vmem:[#allocation3 + $0x188] sm:$0xff]  ;;  %v21884_v48 = vld [vmem:[#allocation52_spill] sm:$0xff] }
 0x28b   : > { %v12275_v36 = vmax.f32 %v12019_v9, 0.0  ;;  %v12028_v46 = vadd.f32 %v21851_v6, %v18460_v40  ;;  %v6159_v56 = vshll.u32 %v14985_v21, 16  ;;  %v6163_v19 = vshrl.u32 %v14985_v21, 16  ;;  %v21885_v43 = vld [vmem:[#allocation39_spill] sm:$0xff]  ;;  %10345 = vmatprep.subr.bf16.mxu1 %v14652_v24  ;;  %v14657_v9 = vld [vmem:[%s21548_s3 + $0x134] ss:$8 sps:$4 sm:$0xff]  }
 0x28c   : > { %v12276_v31 = vmax.f32 %v12020_v17, 0.0  ;;  %12523 = vst [vmem:[%s18197_s13 + $0x2a0] sm:$0xff] %v12267_v27  ;;  %12524 = vst [vmem:[%s18197_s13 + $0x2a8] sm:$0xff] %v12268_v42  ;;  %v12035_v63 = vadd.f32 %v21848_v41, %v21884_v48  ;;  %v12036_v45 = vadd.f32 %v21851_v6, %v21885_v43  ;;  %v21886_v40 = vcombine.low %v18991_v11, %v18981_v13  ;;  %v5788_v3 = vld [vmem:[#allocation3 + $0x190] sm:$0x11] }
 0x28d   : > { %12531 = vst [vmem:[%s18197_s13 + $0x2e0] sm:$0xff] %v12275_v36  ;;  %v13289_v12 = vcombine.high %v19191_v57, %v19186_v5  ;;  %v6133_v34 = vrot.slane %v6132_v25, 4  ;;  %v6147_v22 = vrot.slane %v6145_v30, 5  ;;  %12539 = vst [vmem:[%s18197_s13 + $0x320] sm:$0xff] %v12283_v59  ;;  %v12284_v50 = vmax.f32 %v12028_v46, 0.0  ;;  %11073 = vmatmul.mubr.bf16.gmra.mrb[80].mxu0 %v13286_v52  ;;  %v21890_v36 = vld [vmem:[#allocation50_spill] sm:$0xff] }
 0x28e   : > { %12532 = vst [vmem:[%s18197_s13 + $0x2e8] sm:$0xff] %v12276_v31  ;;  %10191 = vmatmul.mubr.bf16.gmra.mrb[228].mxu1 %v21886_v40  ;;  %v21887_v18 = vcombine.high %v19067_v38, %v19047_v15  ;;  %v21888_v13 = vshrl.u32 %v18951_v23, 16  ;;  %v21889_v17 = vshll.u32 %v18951_v23, 16  ;;  %v12291_v25 = vmax.f32 %v12035_v63, 0.0  ;;  %v21891_v59 = vld [vmem:[#allocation61_spill] sm:$0xff]  ;;  %v21892_v23 = vld [vmem:[#allocation42_spill] sm:$0xff] }
 0x28f   : > { %v12292_v30 = vmax.f32 %v12036_v45, 0.0  ;;  %11082 = vmatprep.mubr.bf16.mxu0 %v13289_v12  ;;  %v6143_v27 = vrot.slane %v6142_v61, 4  ;;  %12540 = vst [vmem:[%s18197_s13 + $0x328] sm:$0xff] %v12284_v50  ;;  %v12043_v42 = vadd.f32 %v21848_v41, %v18501_v16  ;;  %v12044_v31 = vadd.f32 %v21851_v6, %v21890_v36  ;;  %v21893_v61 = vld [vmem:[#allocation18_spill] sm:$0xff]  ;;  %10346 = vmatpush1.bf16.msra.mxu1 %v14650_v33  ;;  %v14655_v16 = vld [vmem:[%s21548_s3 + $0x130] ss:$8 sps:$4 sm:$0xff]  }
 0x290   : > { %10200 = vmatprep.mubr.bf16.mxu1 %v21887_v18  ;;  %v6152_v11 = vrot.slane %v21888_v13, 4  ;;  %v6155_v24 = vrot.slane %v21889_v17, 5  ;;  %v12051_v52 = vadd.f32 %v21848_v41, %v21891_v59  ;;  %v19230_v46 = vrot.slane %v6159_v56, 5  ;;  %12547 = vst [vmem:[%s18197_s13 + $0x360] sm:$0xff] %v12291_v25  ;;  %10347 = vmatprep.subr.bf16.mxu1 %v14657_v9  ;;  %v14663_v12 = vld [vmem:[%s21548_s3 + $0x144] ss:$8 sps:$4 sm:$0xff]  }
 0x291   : > { %v6165_v21 = vrot.slane %v6163_v19, 4  ;;  %12548 = vst [vmem:[%s18197_s13 + $0x368] sm:$0xff] %v12292_v30  ;;  %v12052_v48 = vadd.f32 %v21851_v6, %v21892_v23  ;;  %v12059_v63 = vadd.f32 %v21848_v41, %v21893_v61  ;;  %v13138_v56 = vcombine.low %v19067_v38, %v19047_v15  ;;  %v19243_v19 = vld [vmem:[#allocation3 + $0x50] sm:$0xff]  ;;  %v19252_v15 = vld [vmem:[#allocation3 + $0x48] sm:$0xff]  ;;  %v21894_v9 = vld [vmem:[#allocation44_spill] sm:$0xff] }
 0x292   : > { %v12299_v43 = vmax.f32 %v12043_v42, 0.0  ;;  %v12300_v45 = vmax.f32 %v12044_v31, 0.0  ;;  %v12307_v40 = vmax.f32 %v12051_v52, 0.0  ;;  %v19250_v33 = vsel %vm15624_vm15, %v6143_v27, %v6147_v22  ;;  %v21895_v25 = vld [vmem:[#allocation41_spill] sm:$0xff] }
 0x293   : > { %v6169_v50 = vshll.u32 %v5788_v3, 16  ;;  %v12308_v18 = vmax.f32 %v12052_v48, 0.0  ;;  %v12315_v13 = vmax.f32 %v12059_v63, 0.0  ;;  %v6156_v38 = vor.u32 %v6155_v24, %v6152_v11  ;;  %10348 = vmatpush1.bf16.msra.mxu1 %v14655_v16  ;;  %v21897_v48 = vld [vmem:[#allocation26_spill] sm:$0xff] }
 0x294   : > { %12555 = vst [vmem:[%s18197_s13 + $0x3a0] sm:$0xff] %v12299_v43  ;;  %12556 = vst [vmem:[%s18197_s13 + $0x3a8] sm:$0xff] %v12300_v45  ;;  %v12060_v17 = vadd.f32 %v21851_v6, %v21894_v9  ;;  %v12067_v30 = vadd.f32 %v21848_v41, %v21895_v25  ;;  %v12068_v22 = vadd.f32 %v21851_v6, %v18599_v7  ;;  %v14661_v7 = vld [vmem:[%s21548_s3 + $0x140] ss:$8 sps:$4 sm:$0xff]   ;;  %10349 = vmatprep.subr.bf16.mxu1 %v14663_v12  ;;  %v14666_v45 = vld [vmem:[%s21548_s3 + $0x150] ss:$8 sps:$4 sm:$0xff]  }
 0x295   : > { %12563 = vst [vmem:[%s18197_s13 + $0x3e0] sm:$0xff] %v12307_v40  ;;  %v13141_v27 = vcombine.high %v19252_v15, %v19243_v19  ;;  %v13288_v3 = vcombine.low %v19191_v57, %v19186_v5  ;;  %v19270_v11 = vsel %vm15624_vm15, %v6133_v34, %v19162_v49  ;;  %v6166_v24 = vor.u32 %v6165_v21, %v19230_v46  ;;  %v14668_v34 = vld [vmem:[%s21548_s3 + $0x154] ss:$8 sps:$4 sm:$0xff]   ;;  %v19294_v63 = vld [vmem:[#allocation3 + $0x68] sm:$0xff]  ;;  %v21898_v43 = vld [vmem:[#allocation43_spill] sm:$0xff] }
 0x296   : > { %12564 = vst [vmem:[%s18197_s13 + $0x3e8] sm:$0xff] %v12308_v18  ;;  %12571 = vst [vmem:[%s18197_s13 + $0x420] sm:$0xff] %v12315_v13  ;;  %10201 = vmatmul.mubr.bf16.gmra.mrb[232].mxu1 %v13138_v56  ;;  %v13291_v5 = vcombine.high %v19270_v11, %v19250_v33  ;;  %v12316_v57 = vmax.f32 %v12060_v17, 0.0  ;;  %v12323_v42 = vmax.f32 %v12067_v30, 0.0  ;;  %v12324_v49 = vmax.f32 %v12068_v22, 0.0  ;;  %v21896_v21 = vld [vmem:[#allocation65_spill] sm:$0xff] }
 0x297   : > { %10210 = vmatprep.mubr.bf16.mxu1 %v13141_v27  ;;  %11083 = vmatmul.mubr.bf16.gmra.mrb[84].mxu0 %v13288_v3  ;;  %v6171_v36 = vrot.slane %v6169_v50, 5  ;;  %v12075_v31 = vadd.f32 %v21848_v41, %v18601_v29  ;;  %v12076_v59 = vadd.f32 %v21851_v6, %v18615_v26  ;;  %v6157_v52 = vrot.slane %v6156_v38, 4  ;;  %v21899_v50 = vld [vmem:[#allocation16_spill] sm:$0xff]  ;;  %v14674_v13 = vld [vmem:[%s21548_s3 + $0x164] ss:$8 sps:$4 sm:$0xff]   ;;  %v19306_v38 = vld [vmem:[#allocation3 + $0x60] sm:$0xff] }
 0x298   : > { %11092 = vmatprep.mubr.bf16.mxu0 %v13291_v5  ;;  %12572 = vst [vmem:[%s18197_s13 + $0x428] sm:$0xff] %v12316_v57  ;;  %12579 = vst [vmem:[%s18197_s13 + $0x460] sm:$0xff] %v12323_v42  ;;  %v12083_v23 = vadd.f32 %v21848_v41, %v21896_v21  ;;  %v12084_v61 = vadd.f32 %v21851_v6, %v21897_v48  ;;  %v6167_v16 = vrot.slane %v6166_v24, 4  ;;  %10350 = vmatpush1.bf16.msra.mxu1 %v14661_v7  ;;  %v21900_v25 = vld [vmem:[#allocation60_spill] sm:$0xff]  ;;  %v21901_v24 = vld [vmem:[#allocation62_spill] sm:$0xff] }
 0x299   : > { %12580 = vst [vmem:[%s18197_s13 + $0x468] sm:$0xff] %v12324_v49  ;;  %v12331_v29 = vmax.f32 %v12075_v31, 0.0  ;;  %v12332_v56 = vmax.f32 %v12076_v59, 0.0  ;;  %v12091_v26 = vadd.f32 %v21848_v41, %v21898_v43  ;;  %v12092_v18 = vadd.f32 %v21851_v6, %v21899_v50  ;;  %10351 = vmatprep.subr.bf16.mxu1 %v14668_v34  ;;  %v6173_v42 = vld [vmem:[#allocation3 + $0x18] sm:$0xee] }
 0x29a   : > { %v12339_v40 = vmax.f32 %v12083_v23, 0.0  ;;  %v12340_v12 = vmax.f32 %v12084_v61, 0.0  ;;  %v19310_v9 = vsel %vm15624_vm15, %v6167_v16, %v6171_v36  ;;  %v12099_v30 = vadd.f32 %v21848_v41, %v21900_v25  ;;  %v14672_v34 = vld [vmem:[%s21548_s3 + $0x160] ss:$8 sps:$4 sm:$0xff]   ;;  %v14679_v31 = vld [vmem:[%s21548_s3 + $0x174] ss:$8 sps:$4 sm:$0xff]  }
 0x29b   : > { %12587 = vst [vmem:[%s18197_s13 + $0x4a0] sm:$0xff] %v12331_v29  ;;  %12588 = vst [vmem:[%s18197_s13 + $0x4a8] sm:$0xff] %v12332_v56  ;;  %v12347_v17 = vmax.f32 %v12091_v26, 0.0  ;;  %v13140_v22 = vcombine.low %v19252_v15, %v19243_v19  ;;  %v13143_v27 = vcombine.high %v19306_v38, %v19294_v63  ;;  %v12348_v3 = vmax.f32 %v12092_v18, 0.0  ;;  %v14986_v19 = vld [vmem:[#allocation3 + $0x20] sm:$0xff] }
 0x29c   : > { %12595 = vst [vmem:[%s18197_s13 + $0x4e0] sm:$0xff] %v12339_v40  ;;  %12596 = vst [vmem:[%s18197_s13 + $0x4e8] sm:$0xff] %v12340_v12  ;;  %v12100_v7 = vadd.f32 %v21851_v6, %v21901_v24  ;;  %v13290_v5 = vcombine.low %v19270_v11, %v19250_v33  ;;  %v19329_v57 = vsel %vm15624_vm15, %v6157_v52, %v19230_v46  ;;  %v6239_v15 = vrot.slane %v14986_v19, 5  ;;  %v14987_v59 = vld [vmem:[#allocation3 + $0x28] sm:$0x11]  ;;  %v19353_v16 = vld [vmem:[#allocation3 + $0x80] sm:$0xff] }
 0x29d   : > { %12603 = vst [vmem:[%s18197_s13 + $0x520] sm:$0xff] %v12347_v17  ;;  %v12355_v49 = vmax.f32 %v12099_v30, 0.0  ;;  %10352 = vmatpush1.bf16.msra.mxu1 %v14666_v45  ;;  %v13293_v33 = vcombine.high %v19329_v57, %v19310_v9  ;;  %12604 = vst [vmem:[%s18197_s13 + $0x528] sm:$0xff] %v12348_v3  ;;  %v12107_v46 = vadd.f32 %v21848_v41, %v18692_v32  ;;  %v6242_v52 = vrot.slane %v14987_v59, 5  ;;  %v19366_v12 = vld [vmem:[#allocation3 + $0x78] sm:$0xff] }
 0x29e   : > { %10211 = vmatmul.mubr.bf16.gmra.mrb[236].mxu1 %v13140_v22  ;;  %v12356_v11 = vmax.f32 %v12100_v7, 0.0  ;;  %v12108_v36 = vadd.f32 %v21851_v6, %v18700_v28  ;;  %10353 = vmatprep.subr.bf16.mxu1 %v14674_v13  ;;  %v12115_v21 = vadd.f32 %v21848_v41, %v18712_v2  ;;  %v12116_v32 = vadd.f32 %v21851_v6, %v18727_v54  ;;  %v14677_v54 = vld [vmem:[%s21548_s3 + $0x170] ss:$8 sps:$4 sm:$0xff]   ;;  %v14685_v30 = vld [vmem:[%s21548_s3 + $0x184] ss:$8 sps:$4 sm:$0xff]  }
 0x29f   : > { %10220 = vmatprep.mubr.bf16.mxu1 %v13143_v27  ;;  %11093 = vmatmul.mubr.bf16.gmra.mrb[88].mxu0 %v13290_v5  ;;  %12611 = vst [vmem:[%s18197_s13 + $0x560] sm:$0xff] %v12355_v49  ;;  %v13102_v28 = vrot.slane %v6173_v42, 9  ;;  %v12363_v23 = vmax.f32 %v12107_v46, 0.0  ;;  %v12123_v61 = vadd.f32 %v21848_v41, %v18734_v14  ;;  %v6241_v29 = vrot.slane %v6239_v15, 4  ;;  %v21902_v14 = vld [vmem:[#allocation63_spill] sm:$0xff]  ;;  %v14988_v27 = vld [vmem:[#allocation3 + $0x38] sm:$0xff] }
 0x2a0   : > { %11102 = vmatprep.mubr.bf16.mxu0 %v13293_v33  ;;  %12612 = vst [vmem:[%s18197_s13 + $0x568] sm:$0xff] %v12356_v11  ;;  %v12364_v48 = vmax.f32 %v12108_v36, 0.0  ;;  %v12371_v56 = vmax.f32 %v12115_v21, 0.0  ;;  %v12372_v43 = vmax.f32 %v12116_v32, 0.0  ;;  %v12124_v2 = vadd.f32 %v21851_v6, %v18745_v8  ;;  %v6174_v22 = vld [vmem:[#allocation3 + $0x30] sm:$0xee] }
 0x2a1   : > { %10354 = vmatpush1.bf16.msra.mxu1 %v14672_v34  ;;  %12619 = vst [vmem:[%s18197_s13 + $0x5a0] sm:$0xff] %v12363_v23  ;;  %v12379_v26 = vmax.f32 %v12123_v61, 0.0  ;;  %v12131_v45 = vadd.f32 %v21848_v41, %v21902_v14  ;;  %v13142_v40 = vcombine.low %v19306_v38, %v19294_v63  ;;  %v19370_v50 = vsel %vm15573_vm12, %v6241_v29, %v6242_v52  ;;  %v14683_v7 = vld [vmem:[%s21548_s3 + $0x180] ss:$8 sps:$4 sm:$0xff]   ;;  %v19408_v19 = vld [vmem:[#allocation3 + $0x98] sm:$0xff] }
 0x2a2   : > { %12620 = vst [vmem:[%s18197_s13 + $0x5a8] sm:$0xff] %v12364_v48  ;;  %10355 = vmatprep.subr.bf16.mxu1 %v14679_v31  ;;  %12627 = vst [vmem:[%s18197_s13 + $0x5e0] sm:$0xff] %v12371_v56  ;;  %v12380_v18 = vmax.f32 %v12124_v2, 0.0  ;;  %v12132_v13 = vadd.f32 %v21851_v6, %v18764_v4  ;;  %v13145_v17 = vcombine.high %v19366_v12, %v19353_v16  ;;  %v6246_v4 = vrot.slane %v14988_v27, 5  ;;  %v19411_v46 = vld [vmem:[#allocation3 + $0x90] sm:$0xff]  ;;  %v21904_v59 = vld [vmem:[#allocation40_spill] sm:$0xff] }
 0x2a3   : > { %12628 = vst [vmem:[%s18197_s13 + $0x5e8] sm:$0xff] %v12372_v43  ;;  %v13292_v25 = vcombine.low %v19329_v57, %v19310_v9  ;;  %v19382_v63 = vsel %vm15573_vm12, %v13102_v28, %v6239_v15  ;;  %12635 = vst [vmem:[%s18197_s13 + $0x620] sm:$0xff] %v12379_v26  ;;  %v12387_v38 = vmax.f32 %v12131_v45, 0.0  ;;  %v12139_v24 = vadd.f32 %v21848_v41, %v18770_v0  ;;  %v14989_v15 = vld [vmem:[#allocation3 + $0x40] sm:$0x11]  ;;  %v21905_v23 = vld [vmem:[#allocation27_spill] sm:$0xff] }
 0x2a4   : > { %12636 = vst [vmem:[%s18197_s13 + $0x628] sm:$0xff] %v12380_v18  ;;  %v12388_v3 = vmax.f32 %v12132_v13, 0.0  ;;  %v12140_v9 = vadd.f32 %v21851_v6, %v18785_v62  ;;  %v13295_v5 = vcombine.high %v19382_v63, %v19370_v50  ;;  %v12147_v57 = vadd.f32 %v21848_v41, %v18792_v58  ;;  %v14690_v62 = vld [vmem:[%s21548_s3 + $0x194] ss:$8 sps:$4 sm:$0xff]   ;;  %v14688_v21 = vld [vmem:[%s21548_s3 + $0x190] ss:$8 sps:$4 sm:$0xff]  }
 0x2a5   : > { %10356 = vmatpush1.bf16.msra.mxu1 %v14677_v54  ;;  %12643 = vst [vmem:[%s18197_s13 + $0x660] sm:$0xff] %v12387_v38  ;;  %v12148_v0 = vadd.f32 %v21851_v6, %v18803_v60  ;;  %v12155_v42 = vadd.f32 %v21848_v41, %v18811_v10  ;;  %v6249_v49 = vrot.slane %v14989_v15, 5  ;;  %v12395_v58 = vmax.f32 %v12139_v24, 0.0  ;;  %v14696_v48 = vld [vmem:[%s21548_s3 + $0x1a4] ss:$8 sps:$4 sm:$0xff]   ;;  %v21906_v14 = vld [vmem:[#allocation64_spill] sm:$0xff] }
 0x2a6   : > { %10221 = vmatmul.mubr.bf16.gmra.mrb[240].mxu1 %v13142_v40  ;;  %12644 = vst [vmem:[%s18197_s13 + $0x668] sm:$0xff] %v12388_v3  ;;  %v12396_v34 = vmax.f32 %v12140_v9, 0.0  ;;  %v13103_v60 = vrot.slane %v6174_v22, 9  ;;  %v12403_v10 = vmax.f32 %v12147_v57, 0.0  ;;  %10357 = vmatprep.subr.bf16.mxu1 %v14685_v30  ;;  %v6248_v36 = vrot.slane %v6246_v4, 4  ;;  %v21907_v18 = vld [vmem:[#allocation47_spill] sm:$0xff] }
 0x2a7   : > { %10230 = vmatprep.mubr.bf16.mxu1 %v13145_v17  ;;  %11103 = vmatmul.mubr.bf16.gmra.mrb[92].mxu0 %v13292_v25  ;;  %v12404_v33 = vmax.f32 %v12148_v0, 0.0  ;;  %v12411_v11 = vmax.f32 %v12155_v42, 0.0  ;;  %12651 = vst [vmem:[%s18197_s13 + $0x6a0] sm:$0xff] %v12395_v58  ;;  %v12156_v31 = vadd.f32 %v21851_v6, %v18822_v53  ;;  %v12163_v52 = vadd.f32 %v21848_v41, %v21904_v59  ;;  %v14625_v43 = vld [vmem:[%s21548_s3 + $0x600] ss:$8 sps:$4 sm:$0xff]  }
 0x2a8   : > { %11145 = vmatprep.mubr.bf16.mxu0 %v13295_v5  ;;  %12652 = vst [vmem:[%s18197_s13 + $0x6a8] sm:$0xff] %v12396_v34  ;;  %v13144_v32 = vcombine.low %v19366_v12, %v19353_v16  ;;  %v13147_v28 = vcombine.high %v19411_v46, %v19408_v19  ;;  %12659 = vst [vmem:[%s18197_s13 + $0x6e0] sm:$0xff] %v12403_v10  ;;  %v12164_v53 = vadd.f32 %v21851_v6, %v21905_v23  ;;  %v14632_v40 = vld [vmem:[%s21548_s3 + $0x614] ss:$8 sps:$4 sm:$0xff]   ;;  %v19454_v12 = vld [vmem:[#allocation3 + $0x50] sm:$0xff] }
 0x2a9   : > { %10358 = vmatpush1.bf16.msra.mxu1 %v14683_v7  ;;  %12660 = vst [vmem:[%s18197_s13 + $0x6e8] sm:$0xff] %v12404_v33  ;;  %12667 = vst [vmem:[%s18197_s13 + $0x720] sm:$0xff] %v12411_v11  ;;  %v13294_v61 = vcombine.low %v19382_v63, %v19370_v50  ;;  %v19438_v16 = vsel %vm15573_vm12, %v6248_v36, %v6249_v49  ;;  %v12412_v29 = vmax.f32 %v12156_v31, 0.0  ;;  %v12419_v56 = vmax.f32 %v12163_v52, 0.0  ;;  %v21908_v17 = vld [vmem:[#allocation71_spill] sm:$0xff]  ;;  %v21910_v63 = vld [vmem:[#allocation33_spill] sm:$0xff] }
 0x2aa   : > { %10359 = vmatprep.subr.bf16.mxu1 %v14690_v62  ;;  %v19445_v2 = vsel %vm15573_vm12, %v13103_v60, %v6246_v4  ;;  %v12420_v54 = vmax.f32 %v12164_v53, 0.0  ;;  %v12171_v26 = vadd.f32 %v21848_v41, %v18846_v55  ;;  %v12172_v45 = vadd.f32 %v21851_v6, %v21906_v14  ;;  %v21909_v55 = vld [vmem:[#allocation32_spill] sm:$0xff]  ;;  %v14694_v30 = vld [vmem:[%s21548_s3 + $0x1a0] ss:$8 sps:$4 sm:$0xff]   ;;  %v14638_v33 = vld [vmem:[%s21548_s3 + $0x624] ss:$8 sps:$4 sm:$0xff]  }
 0x2ab   : > { %v6253_v50 = vrot.slane %v19454_v12, 5  ;;  %12668 = vst [vmem:[%s18197_s13 + $0x728] sm:$0xff] %v12412_v29  ;;  %12675 = vst [vmem:[%s18197_s13 + $0x760] sm:$0xff] %v12419_v56  ;;  %v12179_v13 = vadd.f32 %v21848_v41, %v21907_v18  ;;  %v12180_v25 = vadd.f32 %v21851_v6, %v21908_v17  ;;  %v12061_v38 = vadd.f32 %v21910_v63, %v21909_v55  ;;  %v6175_v27 = vld [vmem:[#allocation3 + $0x48] sm:$0xee]  ;;  %v19474_v3 = vld [vmem:[#allocation3 + $0xb0] sm:$0xff] }
 0x2ac   : > { %v13297_v22 = vcombine.high %v19445_v2, %v19438_v16  ;;  %12676 = vst [vmem:[%s18197_s13 + $0x768] sm:$0xff] %v12420_v54  ;;  %v12427_v4 = vmax.f32 %v12171_v26, 0.0  ;;  %v12428_v41 = vmax.f32 %v12172_v45, 0.0  ;;  %v14701_v6 = vld [vmem:[%s21548_s3 + $0x1b4] ss:$8 sps:$4 sm:$0xff]   ;;  %v19476_v0 = vld [vmem:[#allocation3 + $0xa8] sm:$0xff]  ;;  %v13146_v59 = vcombine.low %v19411_v46, %v19408_v19 }
 0x2ad   : > { %10360 = vmatpush1.bf16.msra.mxu1 %v14688_v21  ;;  %v14991_v24 = vld [vmem:[#allocation3 + $0x58] sm:$0x11]  ;;  %v12435_v7 = vmax.f32 %v12179_v13, 0.0  ;;  %v12436_v5 = vmax.f32 %v12180_v25, 0.0  ;;  %v12317_v57 = vmax.f32 %v12061_v38, 0.0  ;;  %v21911_v62 = vld [vmem:[#allocation46_spill] sm:$0xff]  ;;  %v13149_v52 = vcombine.high %v19476_v0, %v19474_v3 }
 0x2ae   : > { %10231 = vmatmul.mubr.bf16.gmra.mrb[244].mxu1 %v13144_v32  ;;  %10361 = vmatprep.subr.bf16.mxu1 %v14696_v48  ;;  %v6256_v9 = vrot.slane %v14991_v24, 5  ;;  %v14630_v42 = vld [vmem:[%s21548_s3 + $0x610] ss:$8 sps:$4 sm:$0xff]   ;;  %12683 = vst [vmem:[%s18197_s13 + $0x7a0] sm:$0xff] %v12427_v4  ;;  %12684 = vst [vmem:[%s18197_s13 + $0x7a8] sm:$0xff] %v12428_v41  ;;  %v21912_v15 = vld [vmem:[#allocation51_spill] sm:$0xff]  ;;  %v13296_v29 = vcombine.low %v19445_v2, %v19438_v16 }
 0x2af   : > { %10240 = vmatprep.mubr.bf16.mxu1 %v13147_v28  ;;  %11146 = vmatmul.mubr.bf16.vlgmr.msra.gmra.mrb[32].mxu0 %v13294_v61  ;;  %v12062_v49 = vadd.f32 %v21912_v15, %v21911_v62  ;;  %v21913_v58 = vld [vmem:[#allocation15_spill] sm:$0xff]  ;;  %v13104_v60 = vrot.slane %v6175_v27, 9  ;;  %v6255_v10 = vrot.slane %v6253_v50, 4  ;;  %12691 = vst [vmem:[%s18197_s13 + $0x7e0] sm:$0xff] %v12435_v7  ;;  %12692 = vst [vmem:[%s18197_s13 + $0x7e8] sm:$0xff] %v12436_v5  ;;  %v21914_v11 = vld [vmem:[#allocation48_spill] sm:$0xff] }
 0x2b0   : > { %11307 = vmatpush1.bf16.msra.mxu0 %v14625_v43  ;;  %11155 = vmatprep.mubr.bf16.mxu0 %v13297_v22  ;;  %v12069_v34 = vadd.f32 %v21910_v63, %v21913_v58  ;;  %12573 = vst [vmem:[%s18197_s13 + $0x430] sm:$0xff] %v12317_v57  ;;  %v12070_v36 = vadd.f32 %v21912_v15, %v21914_v11  ;;  %v14699_v31 = vld [vmem:[%s21548_s3 + $0x1b0] ss:$8 sps:$4 sm:$0xff]   ;;  %v14707_v28 = vld [vmem:[%s21548_s3 + $0x1c4] ss:$8 sps:$4 sm:$0xff]  }
 0x2b1   : > { %11308 = vmatprep.subr.bf16.mxu0 %v14632_v40  ;;  %10362 = vmatpush1.bf16.msra.mxu1 %v14694_v30  ;;  %v12318_v21 = vmax.f32 %v12062_v49, 0.0  ;;  %v19509_v23 = vsel %vm15573_vm12, %v6255_v10, %v6256_v9  ;;  %v21915_v48 = vld [vmem:[#allocation28_spill] sm:$0xff]  ;;  %v21916_v19 = vld [vmem:[#allocation29_spill] sm:$0xff]  ;;  %v14636_v56 = vld [vmem:[%s21548_s3 + $0x620] ss:$8 sps:$4 sm:$0xff]   ;;  %v12086_v45 = vadd.f32 %v21912_v15, %v18928_v39  ;;  %v19537_v40 = vsel %vm15573_vm12, %v13104_v60, %v6253_v50 }
 0x2b2   : > { %v12325_v32 = vmax.f32 %v12069_v34, 0.0  ;;  %10363 = vmatprep.subr.bf16.mxu1 %v14701_v6  ;;  %v12326_v53 = vmax.f32 %v12070_v36, 0.0  ;;  %v12077_v61 = vadd.f32 %v21910_v63, %v21915_v48  ;;  %v12078_v46 = vadd.f32 %v21912_v15, %v21916_v19  ;;  %v19520_v43 = vld [vmem:[#allocation3 + $0x60] sm:$0xee]  ;;  %v21917_v26 = vld [vmem:[#allocation70_spill] sm:$0xff]  ;;  %v21919_v41 = vld [vmem:[#allocation67_spill] sm:$0xff] }
 0x2b3   : > { %v14649_v54 = vld [vmem:[%s21548_s3 + $0x634] ss:$8 sps:$4 sm:$0xff]   ;;  %12574 = vst [vmem:[%s18197_s13 + $0x438] sm:$0xff] %v12318_v21  ;;  %v12085_v14 = vadd.f32 %v21910_v63, %v21917_v26  ;;  %v21918_v16 = vld [vmem:[#allocation66_spill] sm:$0xff]  ;;  %v13299_v12 = vcombine.high %v19537_v40, %v19509_v23  ;;  %v12342_v55 = vmax.f32 %v12086_v45, 0.0  ;;  %v12094_v6 = vadd.f32 %v21912_v15, %v21919_v41 }
 0x2b4   : > { %11309 = vmatpush1.bf16.msra.mxu0 %v14630_v42  ;;  %12581 = vst [vmem:[%s18197_s13 + $0x470] sm:$0xff] %v12325_v32  ;;  %v12093_v2 = vadd.f32 %v21910_v63, %v21918_v16  ;;  %v19539_v18 = vld [vmem:[#allocation3 + $0x68] sm:$0xff]  ;;  %12582 = vst [vmem:[%s18197_s13 + $0x478] sm:$0xff] %v12326_v53  ;;  %v12333_v17 = vmax.f32 %v12077_v61, 0.0  ;;  %v12334_v25 = vmax.f32 %v12078_v46, 0.0  ;;  %v21920_v24 = vld [vmem:[#allocation68_spill] sm:$0xff]  ;;  %v13148_v7 = vcombine.low %v19476_v0, %v19474_v3 }
 0x2b5   : > { %11310 = vmatprep.subr.bf16.mxu0 %v14638_v33  ;;  %v6260_v13 = vrot.slane %v19539_v18, 5  ;;  %10364 = vmatpush1.bf16.msra.mxu1 %v14699_v31  ;;  %v14705_v39 = vld [vmem:[%s21548_s3 + $0x1c0] ss:$8 sps:$4 sm:$0xff]   ;;  %v12341_v50 = vmax.f32 %v12085_v14, 0.0  ;;  %v14712_v30 = vld [vmem:[%s21548_s3 + $0x1d4] ss:$8 sps:$4 sm:$0xff]   ;;  %v12101_v9 = vadd.f32 %v21910_v63, %v21920_v24  ;;  %v12118_v61 = vadd.f32 %v21912_v15, %v18987_v37 }
 0x2b6   : > { %10241 = vmatmul.mubr.bf16.gmra.mrb[248].mxu1 %v13146_v59  ;;  %v12349_v38 = vmax.f32 %v12093_v2, 0.0  ;;  %10365 = vmatprep.subr.bf16.mxu1 %v14707_v28  ;;  %v19551_v22 = vld [vmem:[#allocation3 + $0xc8] sm:$0xff]  ;;  %v14993_v27 = vld [vmem:[#allocation3 + $0x70] sm:$0x11]  ;;  %12589 = vst [vmem:[%s18197_s13 + $0x4b0] sm:$0xff] %v12333_v17  ;;  %12590 = vst [vmem:[%s18197_s13 + $0x4b8] sm:$0xff] %v12334_v25  ;;  %v12125_v19 = vadd.f32 %v21910_v63, %v18999_v51  ;;  %v13298_v46 = vcombine.low %v19537_v40, %v19509_v23 }
 0x2b7   : > { %10250 = vmatprep.mubr.bf16.mxu1 %v13149_v52  ;;  %11156 = vmatmul.mubr.bf16.gmra.mrb[36].mxu0 %v13296_v29  ;;  %v6263_v4 = vrot.slane %v14993_v27, 5  ;;  %v19561_v5 = vld [vmem:[#allocation3 + $0xc0] sm:$0xff]  ;;  %v14660_v42 = vld [vmem:[%s21548_s3 + $0x644] ss:$8 sps:$4 sm:$0xff]   ;;  %12597 = vst [vmem:[%s18197_s13 + $0x4f0] sm:$0xff] %v12341_v50  ;;  %12598 = vst [vmem:[%s18197_s13 + $0x4f8] sm:$0xff] %v12342_v55  ;;  %v12126_v18 = vadd.f32 %v21912_v15, %v19007_v20 }
 0x2b8   : > { %11165 = vmatprep.mubr.bf16.mxu0 %v13299_v12  ;;  %11311 = vmatpush1.bf16.msra.mxu0 %v14636_v56  ;;  %v14647_v57 = vld [vmem:[%s21548_s3 + $0x630] ss:$8 sps:$4 sm:$0xff]   ;;  %12605 = vst [vmem:[%s18197_s13 + $0x530] sm:$0xff] %v12349_v38  ;;  %v13105_v58 = vrot.slane %v19520_v43, 9  ;;  %v6262_v3 = vrot.slane %v6260_v13, 4  ;;  %v12350_v0 = vmax.f32 %v12094_v6, 0.0  ;;  %v13151_v10 = vcombine.high %v19561_v5, %v19551_v22 }
 0x2b9   : > { %v21921_v62 = vld [vmem:[#allocation69_spill] sm:$0xff]  ;;  %11312 = vmatprep.subr.bf16.mxu0 %v14649_v54  ;;  %v12357_v34 = vmax.f32 %v12101_v9, 0.0  ;;  %10366 = vmatpush1.bf16.msra.mxu1 %v14705_v39  ;;  %v21922_v11 = vld [vmem:[#allocation22_spill] sm:$0xff]  ;;  %v21923_v31 = vld [vmem:[#allocation23_spill] sm:$0xff]  ;;  %v12374_v14 = vmax.f32 %v12118_v61, 0.0  ;;  %v12381_v23 = vmax.f32 %v12125_v19, 0.0 }
 0x2ba   : > { %v12102_v49 = vadd.f32 %v21912_v15, %v21921_v62  ;;  %v14710_v60 = vld [vmem:[%s21548_s3 + $0x1d0] ss:$8 sps:$4 sm:$0xff]   ;;  %v12109_v36 = vadd.f32 %v21910_v63, %v21922_v11  ;;  %v12110_v59 = vadd.f32 %v21912_v15, %v21923_v31  ;;  %10367 = vmatprep.subr.bf16.mxu1 %v14712_v30  ;;  %v14718_v52 = vld [vmem:[%s21548_s3 + $0x1e4] ss:$8 sps:$4 sm:$0xff]   ;;  %v19589_v21 = vsel %vm15573_vm12, %v6262_v3, %v6263_v4  ;;  %v14658_v28 = vld [vmem:[%s21548_s3 + $0x640] ss:$8 sps:$4 sm:$0xff]  }
 0x2bb   : > { %v19591_v32 = vld [vmem:[#allocation3 + $0x78] sm:$0xee]  ;;  %12606 = vst [vmem:[%s18197_s13 + $0x538] sm:$0xff] %v12350_v0  ;;  %12613 = vst [vmem:[%s18197_s13 + $0x570] sm:$0xff] %v12357_v34  ;;  %v21924_v53 = vld [vmem:[#allocation17_spill] sm:$0xff]  ;;  %v19612_v37 = vsel %vm15573_vm12, %v13105_v58, %v6260_v13  ;;  %v12382_v30 = vmax.f32 %v12126_v18, 0.0  ;;  %v13150_v4 = vcombine.low %v19561_v5, %v19551_v22  ;;  %v12150_v58 = vadd.f32 %v21912_v15, %v19062_v35 }
 0x2bc   : > { %v12358_v33 = vmax.f32 %v12102_v49, 0.0  ;;  %v12117_v48 = vadd.f32 %v21910_v63, %v21924_v53  ;;  %11313 = vmatpush1.bf16.msra.mxu0 %v14647_v57  ;;  %v14994_v29 = vld [vmem:[#allocation3 + $0x80] sm:$0xff]  ;;  %v12365_v54 = vmax.f32 %v12109_v36, 0.0  ;;  %v12366_v26 = vmax.f32 %v12110_v59, 0.0  ;;  %v14716_v45 = vld [vmem:[%s21548_s3 + $0x1e0] ss:$8 sps:$4 sm:$0xff]  }
 0x2bd   : > { %v6267_v56 = vrot.slane %v14994_v29, 5  ;;  %v14671_v43 = vld [vmem:[%s21548_s3 + $0x654] ss:$8 sps:$4 sm:$0xff]   ;;  %11314 = vmatprep.subr.bf16.mxu0 %v14660_v42  ;;  %10368 = vmatpush1.bf16.msra.mxu1 %v14710_v60  ;;  %v13301_v16 = vcombine.high %v19612_v37, %v19589_v21  ;;  %v14995_v2 = vld [vmem:[#allocation3 + $0x88] sm:$0x11]  ;;  %12630 = vst [vmem:[%s18197_s13 + $0x5f8] sm:$0xff] %v12374_v14  ;;  %v12157_v3 = vadd.f32 %v21910_v63, %v19070_v1 }
 0x2be   : > { %12614 = vst [vmem:[%s18197_s13 + $0x578] sm:$0xff] %v12358_v33  ;;  %v12373_v51 = vmax.f32 %v12117_v48, 0.0  ;;  %10251 = vmatmul.mubr.bf16.gmra.mrb[252].mxu1 %v13148_v7  ;;  %v6270_v40 = vrot.slane %v14995_v2, 5  ;;  %12621 = vst [vmem:[%s18197_s13 + $0x5b0] sm:$0xff] %v12365_v54  ;;  %v21925_v13 = vld [vmem:[#allocation20_spill] sm:$0xff]  ;;  %10369 = vmatprep.subr.bf16.mxu1 %v14718_v52  ;;  %v19628_v39 = vld [vmem:[#allocation3 + $0xe0] sm:$0xff]  ;;  %v13300_v34 = vcombine.low %v19612_v37, %v19589_v21 }
 0x2bf   : > { %12622 = vst [vmem:[%s18197_s13 + $0x5b8] sm:$0xff] %v12366_v26  ;;  %v12133_v17 = vadd.f32 %v21910_v63, %v21925_v13  ;;  %v14721_v25 = vld [vmem:[%s21548_s3 + $0x1f4] ss:$8 sps:$4 sm:$0xff]   ;;  %10260 = vmatprep.mubr.bf16.mxu1 %v13151_v10  ;;  %11166 = vmatmul.mubr.bf16.gmra.mrb[40].mxu0 %v13298_v46  ;;  %12637 = vst [vmem:[%s18197_s13 + $0x630] sm:$0xff] %v12381_v23  ;;  %v13106_v20 = vrot.slane %v19591_v32, 9  ;;  %v6269_v55 = vrot.slane %v6267_v56, 4 }
 0x2c0   : > { %12629 = vst [vmem:[%s18197_s13 + $0x5f0] sm:$0xff] %v12373_v51  ;;  %v21926_v12 = vld [vmem:[#allocation72_spill] sm:$0xff]  ;;  %11175 = vmatprep.mubr.bf16.mxu0 %v13301_v16  ;;  %11315 = vmatpush1.bf16.msra.mxu0 %v14658_v28  ;;  %v14682_v41 = vld [vmem:[%s21548_s3 + $0x664] ss:$8 sps:$4 sm:$0xff]   ;;  %v21928_v7 = vld [vmem:[#allocation73_spill] sm:$0xff]  ;;  %v12406_v11 = vmax.f32 %v12150_v58, 0.0  ;;  %v12158_v32 = vadd.f32 %v21912_v15, %v19081_v44 }
 0x2c1   : > { %v12134_v50 = vadd.f32 %v21912_v15, %v21926_v12  ;;  %v14669_v38 = vld [vmem:[%s21548_s3 + $0x650] ss:$8 sps:$4 sm:$0xff]   ;;  %v12389_v27 = vmax.f32 %v12133_v17, 0.0  ;;  %11316 = vmatprep.subr.bf16.mxu0 %v14671_v43  ;;  %v21927_v24 = vld [vmem:[#allocation31_spill] sm:$0xff]  ;;  %v12142_v57 = vadd.f32 %v21912_v15, %v21928_v7  ;;  %10370 = vmatpush1.bf16.msra.mxu1 %v14716_v45  ;;  %v19655_v22 = vsel %vm15573_vm12, %v6269_v55, %v6270_v40  ;;  %v21929_v5 = vld [vmem:[#allocation74_spill] sm:$0xff] }
 0x2c2   : > { %v12141_v9 = vadd.f32 %v21910_v63, %v21927_v24  ;;  %v14719_v42 = vld [vmem:[%s21548_s3 + $0x1f0] ss:$8 sps:$4 sm:$0xff]   ;;  %12638 = vst [vmem:[%s18197_s13 + $0x638] sm:$0xff] %v12382_v30  ;;  %v12149_v49 = vadd.f32 %v21910_v63, %v21929_v5  ;;  %10371 = vmatprep.subr.bf16.mxu1 %v14721_v25  ;;  %v19672_v33 = vsel %vm15573_vm12, %v13106_v20, %v6267_v56  ;;  %v14680_v35 = vld [vmem:[%s21548_s3 + $0x660] ss:$8 sps:$4 sm:$0xff]   ;;  %v12413_v36 = vmax.f32 %v12157_v3, 0.0 }
 0x2c3   : > { %v12390_v6 = vmax.f32 %v12134_v50, 0.0  ;;  %v19651_v62 = vld [vmem:[#allocation3 + $0xd8] sm:$0xff]  ;;  %12645 = vst [vmem:[%s18197_s13 + $0x670] sm:$0xff] %v12389_v27  ;;  %v12398_v10 = vmax.f32 %v12142_v57, 0.0  ;;  %v13303_v31 = vcombine.high %v19672_v33, %v19655_v22  ;;  %v6178_v48 = vld [vmem:[#allocation3 + $0x90] sm:$0xee] }
 0x2c4   : > { %v13153_v0 = vcombine.high %v19651_v62, %v19628_v39  ;;  %v12397_v60 = vmax.f32 %v12141_v9, 0.0  ;;  %11317 = vmatpush1.bf16.msra.mxu0 %v14669_v38  ;;  %v12405_v1 = vmax.f32 %v12149_v49, 0.0  ;;  %v14996_v59 = vld [vmem:[#allocation3 + $0x98] sm:$0xff]  ;;  %12662 = vst [vmem:[%s18197_s13 + $0x6f8] sm:$0xff] %v12406_v11  ;;  %12669 = vst [vmem:[%s18197_s13 + $0x730] sm:$0xff] %v12413_v36  ;;  %v21931_v61 = vld [vmem:[#allocation49_spill] sm:$0xff]  ;;  %v13152_v55 = vcombine.low %v19651_v62, %v19628_v39 }
 0x2c5   : > { %12646 = vst [vmem:[%s18197_s13 + $0x678] sm:$0xff] %v12390_v6  ;;  %v6274_v52 = vrot.slane %v14996_v59, 5  ;;  %11318 = vmatprep.subr.bf16.mxu0 %v14682_v41  ;;  %v14693_v21 = vld [vmem:[%s21548_s3 + $0x674] ss:$8 sps:$4 sm:$0xff]   ;;  %12654 = vst [vmem:[%s18197_s13 + $0x6b8] sm:$0xff] %v12398_v10  ;;  %10372 = vmatpush1.bf16.msra.mxu1 %v14719_v42  ;;  %v12166_v19 = vadd.f32 %v21912_v15, %v21931_v61  ;;  %v21932_v46 = vld [vmem:[#allocation34_spill] sm:$0xff] }
 0x2c6   : > { %12653 = vst [vmem:[%s18197_s13 + $0x6b0] sm:$0xff] %v12397_v60  ;;  %v21930_v28 = vld [vmem:[#allocation24_spill] sm:$0xff]  ;;  %10261 = vmatmul.mubr.bf16.gmra.mrb[0].mxu1 %v13150_v4  ;;  %12661 = vst [vmem:[%s18197_s13 + $0x6f0] sm:$0xff] %v12405_v1  ;;  %v12173_v29 = vadd.f32 %v21910_v63, %v21932_v46  ;;  %v21933_v56 = vld [vmem:[#allocation21_spill] sm:$0xff]  ;;  %v12414_v14 = vmax.f32 %v12158_v32, 0.0  ;;  %v13107_v13 = vrot.slane %v6178_v48, 9  ;;  %v13302_v4 = vcombine.low %v19672_v33, %v19655_v22 }
 0x2c7   : > { %v12165_v53 = vadd.f32 %v21910_v63, %v21930_v28  ;;  %v12174_v43 = vadd.f32 %v21912_v15, %v21933_v56  ;;  %v21934_v54 = vld [vmem:[#allocation19_spill] sm:$0xff]  ;;  %10270 = vmatprep.mubr.bf16.mxu1 %v13153_v0  ;;  %11176 = vmatmul.mubr.bf16.gmra.mrb[44].mxu0 %v13300_v34  ;;  %v14997_v37 = vld [vmem:[#allocation3 + $0xa0] sm:$0x11]  ;;  %v21935_v45 = vld [vmem:[#allocation12_spill] sm:$0xff]  ;;  %v12422_v2 = vmax.f32 %v12166_v19, 0.0  ;;  %v6276_v17 = vrot.slane %v6274_v52, 4 }
 0x2c8   : > { %v12181_v44 = vadd.f32 %v21910_v63, %v21934_v54  ;;  %v14758_v26 = vld [vmem:[%s21548_s3 + $0x204] ss:$8 sps:$4 sm:$0xff]   ;;  %v6277_v51 = vrot.slane %v14997_v37, 5  ;;  %v12182_v16 = vadd.f32 %v21912_v15, %v21935_v45  ;;  %11185 = vmatprep.mubr.bf16.mxu0 %v13303_v31  ;;  %11319 = vmatpush1.bf16.msra.mxu0 %v14680_v35  ;;  %v14691_v63 = vld [vmem:[%s21548_s3 + $0x670] ss:$8 sps:$4 sm:$0xff]   ;;  %v12429_v40 = vmax.f32 %v12173_v29, 0.0 }
 0x2c9   : > { %v12421_v23 = vmax.f32 %v12165_v53, 0.0  ;;  %v12430_v18 = vmax.f32 %v12174_v43, 0.0  ;;  %11320 = vmatprep.subr.bf16.mxu0 %v14693_v21  ;;  %v14704_v15 = vld [vmem:[%s21548_s3 + $0x684] ss:$8 sps:$4 sm:$0xff]   ;;  %12670 = vst [vmem:[%s18197_s13 + $0x738] sm:$0xff] %v12414_v14  ;;  %10534 = vmatprep.subr.bf16.mxu1 %v14758_v26  ;;  %v5154_v50 = vld [vmem:[#allocation3 + $0xf8] sm:$0xff]  ;;  %v6275_v41 = vsel %vm15573_vm12, %v13107_v13, %v6274_v52 }
 0x2ca   : > { %v12437_v25 = vmax.f32 %v12181_v44, 0.0  ;;  %v12438_v12 = vmax.f32 %v12182_v16, 0.0  ;;  %12678 = vst [vmem:[%s18197_s13 + $0x778] sm:$0xff] %v12422_v2  ;;  %12685 = vst [vmem:[%s18197_s13 + $0x7b0] sm:$0xff] %v12429_v40  ;;  %v6278_v20 = vsel %vm15573_vm12, %v6276_v17, %v6277_v51  ;;  %v5153_v38 = vld [vmem:[#allocation3 + $0xf0] sm:$0xff]  ;;  %v8261_v3 = vpop.f32.mrb[160].mxu1 }
 0x2cb   : > { %12677 = vst [vmem:[%s18197_s13 + $0x770] sm:$0xff] %v12421_v23  ;;  %12686 = vst [vmem:[%s18197_s13 + $0x7b8] sm:$0xff] %v12430_v18  ;;  %v14702_v30 = vld [vmem:[%s21548_s3 + $0x680] ss:$8 sps:$4 sm:$0xff]   ;;  %v13155_v27 = vcombine.high %v5153_v38, %v5154_v50  ;;  %v14715_v39 = vld [vmem:[%s21548_s3 + $0x694] ss:$8 sps:$4 sm:$0xff]   ;;  %v13305_v9 = vcombine.high %v6275_v41, %v6278_v20  ;;  %v13154_v10 = vcombine.low %v5153_v38, %v5154_v50 }
 0x2cc   : > { %12693 = vst [vmem:[%s18197_s13 + $0x7f0] sm:$0xff] %v12437_v25  ;;  %12694 = vst [vmem:[%s18197_s13 + $0x7f8] sm:$0xff] %v12438_v12  ;;  %11321 = vmatpush1.bf16.msra.mxu0 %v14691_v63  ;;  %v14998_v6 = vld [vmem:[#allocation3 + $0xb0] sm:$0xff]  ;;  %v6179_v7 = vld [vmem:[#allocation3 + $0xa8] sm:$0xee]  ;;  %v8263_v60 = vpop.f32.mrb[161].mxu1  ;;  %v13304_v59 = vcombine.low %v6275_v41, %v6278_v20 }
 0x2cd   : > { %v6281_v24 = vrot.slane %v14998_v6, 5  ;;  %11322 = vmatprep.subr.bf16.mxu0 %v14704_v15  ;;  %v14999_v57 = vld [vmem:[#allocation3 + $0xb8] sm:$0x11]  ;;  %v19734_v22 = vld [vmem:[#allocation3 + $0x110] sm:$0xff]  ;;  %v13108_v5 = vrot.slane %v6179_v7, 9  ;;  %v5155_v33 = vld [vmem:[#allocation3 + $0x108] sm:$0xff] }
 0x2ce   : > { %10271 = vmatmul.mubr.bf16.gmra.mrb[4].mxu1 %v13152_v55  ;;  %v6284_v42 = vrot.slane %v14999_v57, 5  ;;  %v14713_v62 = vld [vmem:[%s21548_s3 + $0x690] ss:$8 sps:$4 sm:$0xff]   ;;  %v14724_v58 = vld [vmem:[%s21548_s3 + $0x6a4] ss:$8 sps:$4 sm:$0xff]   ;;  %v8265_v36 = vpop.f32.mrb[162].mxu1  ;;  %v13157_v31 = vcombine.high %v5155_v33, %v19734_v22  ;;  %v13156_v40 = vcombine.low %v5155_v33, %v19734_v22 }
 0x2cf   : > { %10280 = vmatprep.mubr.bf16.mxu1 %v13155_v27  ;;  %11186 = vmatmul.mubr.bf16.gmra.mrb[48].mxu0 %v13302_v4  ;;  %v6283_v49 = vrot.slane %v6281_v24, 4  ;;  %v21936_v0 = vld [vmem:[#allocation8_spill] sm:$0xff]  ;;  %v21937_v1 = vld [vmem:[#allocation9_spill] sm:$0xff]  ;;  %v14722_v52 = vld [vmem:[%s21548_s3 + $0x6a0] ss:$8 sps:$4 sm:$0xff]   ;;  %v8267_v28 = vpop.f32.mrb[163].mxu1  ;;  %v6282_v53 = vsel %vm15573_vm12, %v13108_v5, %v6281_v24 }
 0x2d0   : > { %11195 = vmatprep.mubr.bf16.mxu0 %v13305_v9  ;;  %11323 = vmatpush1.bf16.msra.mxu0 %v14702_v30  ;;  %v11927_v34 = vadd.f32 %v21936_v0, %v8261_v3  ;;  %v11928_v11 = vadd.f32 %v21937_v1, %v8263_v60  ;;  %v11935_v32 = vadd.f32 %v21936_v0, %v8265_v36  ;;  %v15000_v48 = vld [vmem:[#allocation3 + $0xc8] sm:$0xff]  ;;  %v14727_v29 = vld [vmem:[%s21548_s3 + $0x6b4] ss:$8 sps:$4 sm:$0xff]   ;;  %v15001_v44 = vld [vmem:[#allocation3 + $0xd0] sm:$0x11] }
 0x2d1   : > { %11324 = vmatprep.subr.bf16.mxu0 %v14715_v39  ;;  %v6285_v35 = vsel %vm15573_vm12, %v6283_v49, %v6284_v42  ;;  %v6288_v61 = vrot.slane %v15000_v48, 5  ;;  %v11936_v46 = vadd.f32 %v21937_v1, %v8267_v28  ;;  %v6180_v43 = vld [vmem:[#allocation3 + $0xc0] sm:$0xee]  ;;  %v6291_v26 = vrot.slane %v15001_v44, 5  ;;  %v19760_v14 = vld [vmem:[#allocation3 + $0x128] sm:$0xff]  ;;  %v19795_v60 = vld [vmem:[#allocation3 + $0x138] sm:$0xff] }
 0x2d2   : > { %v12183_v21 = vmax.f32 %v11927_v34, 0.0  ;;  %v12184_v19 = vmax.f32 %v11928_v11, 0.0  ;;  %v13307_v56 = vcombine.high %v6282_v53, %v6285_v35  ;;  %v12191_v54 = vmax.f32 %v11935_v32, 0.0  ;;  %v14725_v51 = vld [vmem:[%s21548_s3 + $0x6b0] ss:$8 sps:$4 sm:$0xff]  }
 0x2d3   : > { %v12192_v37 = vmax.f32 %v11936_v46, 0.0  ;;  %v13109_v23 = vrot.slane %v6180_v43, 9  ;;  %v6290_v45 = vrot.slane %v6288_v61, 4  ;;  %v14730_v16 = vld [vmem:[%s21548_s3 + $0x6c4] ss:$8 sps:$4 sm:$0xff]   ;;  %v5157_v63 = vld [vmem:[#allocation3 + $0x120] sm:$0xff]  ;;  %v13306_v15 = vcombine.low %v6282_v53, %v6285_v35 }
 0x2d4   : > { %11325 = vmatpush1.bf16.msra.mxu0 %v14713_v62  ;;  %12439 = vst [vmem:[%s18197_s13] sm:$0xff] %v12183_v21  ;;  %12440 = vst [vmem:[%s18197_s13 + $0x8] sm:$0xff] %v12184_v19  ;;  %v13159_v18 = vcombine.high %v5157_v63, %v19760_v14  ;;  %v8271_v13 = vpop.f32.mrb[164].mxu1  ;;  %v14728_v17 = vld [vmem:[%s21548_s3 + $0x6c0] ss:$8 sps:$4 sm:$0xff]   ;;  %v15002_v12 = vld [vmem:[#allocation3 + $0xe0] sm:$0xff]  ;;  %v13158_v33 = vcombine.low %v5157_v63, %v19760_v14 }
 0x2d5   : > { %11326 = vmatprep.subr.bf16.mxu0 %v14724_v58  ;;  %12447 = vst [vmem:[%s18197_s13 + $0x40] sm:$0xff] %v12191_v54  ;;  %12448 = vst [vmem:[%s18197_s13 + $0x48] sm:$0xff] %v12192_v37  ;;  %v19768_v2 = vsel %vm15573_vm12, %v6290_v45, %v6291_v26  ;;  %v6289_v25 = vsel %vm15573_vm12, %v13109_v23, %v6288_v61  ;;  %v6295_v50 = vrot.slane %v15002_v12, 5  ;;  %v8273_v55 = vpop.f32.mrb[165].mxu1  ;;  %v14733_v38 = vld [vmem:[%s21548_s3 + $0x6d4] ss:$8 sps:$4 sm:$0xff]  }
 0x2d6   : > { %10281 = vmatmul.mubr.bf16.gmra.mrb[8].mxu1 %v13154_v10  ;;  %v11943_v20 = vadd.f32 %v21936_v0, %v8271_v13  ;;  %v13309_v30 = vcombine.high %v6289_v25, %v19768_v2  ;;  %v6181_v27 = vld [vmem:[#allocation3 + $0xd8] sm:$0xee]  ;;  %v11944_v4 = vadd.f32 %v21937_v1, %v8273_v55  ;;  %v8275_v41 = vpop.f32.mrb[166].mxu1  ;;  %v15003_v6 = vld [vmem:[#allocation3 + $0xe8] sm:$0x11]  ;;  %v19788_v22 = vld [vmem:[#allocation3 + $0x140] sm:$0xff] }
 0x2d7   : > { %10290 = vmatprep.mubr.bf16.mxu1 %v13157_v31  ;;  %11196 = vmatmul.mubr.bf16.gmra.mrb[52].mxu0 %v13304_v59  ;;  %v6298_v24 = vrot.slane %v15003_v6, 5  ;;  %v11951_v9 = vadd.f32 %v21936_v0, %v8275_v41  ;;  %v8277_v7 = vpop.f32.mrb[167].mxu1  ;;  %v14731_v62 = vld [vmem:[%s21548_s3 + $0x6d0] ss:$8 sps:$4 sm:$0xff]   ;;  %v13110_v5 = vrot.slane %v6181_v27, 9  ;;  %v6297_v49 = vrot.slane %v6295_v50, 4 }
 0x2d8   : > { %11205 = vmatprep.mubr.bf16.mxu0 %v13307_v56  ;;  %11327 = vmatpush1.bf16.msra.mxu0 %v14722_v52  ;;  %v12199_v39 = vmax.f32 %v11943_v20, 0.0  ;;  %v12200_v57 = vmax.f32 %v11944_v4, 0.0  ;;  %v11952_v42 = vadd.f32 %v21937_v1, %v8277_v7  ;;  %v14736_v3 = vld [vmem:[%s21548_s3 + $0x6e4] ss:$8 sps:$4 sm:$0xff]   ;;  %v13161_v35 = vcombine.high %v19795_v60, %v19788_v22  ;;  %v14734_v36 = vld [vmem:[%s21548_s3 + $0x6e0] ss:$8 sps:$4 sm:$0xff]  }
 0x2d9   : > { %11328 = vmatprep.subr.bf16.mxu0 %v14727_v29  ;;  %v12207_v58 = vmax.f32 %v11951_v9, 0.0  ;;  %v19799_v10 = vsel %vm15573_vm12, %v6297_v49, %v6298_v24  ;;  %v13308_v31 = vcombine.low %v6289_v25, %v19768_v2  ;;  %v6296_v59 = vsel %vm15573_vm12, %v13110_v5, %v6295_v50  ;;  %v15004_v52 = vld [vmem:[#allocation3 + $0xf8] sm:$0xff]  ;;  %v6182_v61 = vld [vmem:[#allocation3 + $0xf0] sm:$0xee]  ;;  %v15005_v29 = vld [vmem:[#allocation3] sm:$0xff] }
 0x2da   : > { %12455 = vst [vmem:[%s18197_s13 + $0x80] sm:$0xff] %v12199_v39  ;;  %12456 = vst [vmem:[%s18197_s13 + $0x88] sm:$0xff] %v12200_v57  ;;  %v12208_v34 = vmax.f32 %v11952_v42, 0.0  ;;  %v6302_v21 = vrot.slane %v15004_v52, 5  ;;  %v14739_v53 = vld [vmem:[%s21548_s3 + $0x6f4] ss:$8 sps:$4 sm:$0xff]   ;;  %v13311_v48 = vcombine.high %v6296_v59, %v19799_v10  ;;  %v13160_v13 = vcombine.low %v19795_v60, %v19788_v22 }
 0x2db   : > { %12463 = vst [vmem:[%s18197_s13 + $0xc0] sm:$0xff] %v12207_v58  ;;  %v5182_v56 = vshrl.u32 %v15005_v29, 16  ;;  %v15006_v43 = vld [vmem:[#allocation3 + $0x100] sm:$0x11]  ;;  %v13111_v45 = vrot.slane %v6182_v61, 9  ;;  %v5161_v12 = vld [vmem:[#allocation3 + $0x150] sm:$0xff] }
 0x2dc   : > { %11329 = vmatpush1.bf16.msra.mxu0 %v14725_v51  ;;  %12464 = vst [vmem:[%s18197_s13 + $0xc8] sm:$0xff] %v12208_v34  ;;  %v8281_v11 = vpop.f32.mrb[168].mxu1  ;;  %v6305_v54 = vrot.slane %v15006_v43, 5  ;;  %v5185_v51 = vshll.u32 %v15005_v29, 16  ;;  %v14737_v23 = vld [vmem:[%s21548_s3 + $0x6f0] ss:$8 sps:$4 sm:$0xff]  }
 0x2dd   : > { %11330 = vmatprep.subr.bf16.mxu0 %v14730_v16  ;;  %v11959_v32 = vadd.f32 %v21936_v0, %v8281_v11  ;;  %v8283_v28 = vpop.f32.mrb[169].mxu1  ;;  %v6304_v16 = vrot.slane %v6302_v21, 4  ;;  %v5184_v50 = vrot.slane %v5182_v56, 4  ;;  %v6303_v27 = vsel %vm15573_vm12, %v13111_v45, %v6302_v21  ;;  %v15007_v4 = vld [vmem:[#allocation3 + $0x110] sm:$0xff]  ;;  %v15008_v42 = vld [vmem:[#allocation3 + $0x118] sm:$0x11] }
 0x2de   : > { %10291 = vmatmul.mubr.bf16.gmra.mrb[12].mxu1 %v13156_v40  ;;  %v11960_v19 = vadd.f32 %v21937_v1, %v8283_v28  ;;  %v8285_v46 = vpop.f32.mrb[170].mxu1  ;;  %v14743_v40 = vld [vmem:[%s21548_s3 + $0x704] ss:$8 sps:$4 sm:$0xff]   ;;  %v19835_v20 = vrot.slane %v5185_v51, 5  ;;  %v6309_v41 = vrot.slane %v15007_v4, 5  ;;  %v15009_v58 = vld [vmem:[#allocation3 + $0x20] sm:$0xff] }
 0x2df   : > { %10300 = vmatprep.mubr.bf16.mxu1 %v13159_v18  ;;  %11206 = vmatmul.mubr.bf16.gmra.mrb[56].mxu0 %v13306_v15  ;;  %v12215_v44 = vmax.f32 %v11959_v32, 0.0  ;;  %v11967_v26 = vadd.f32 %v21936_v0, %v8285_v46  ;;  %v8287_v37 = vpop.f32.mrb[171].mxu1  ;;  %v5162_v18 = vld [vmem:[#allocation3 + $0x158] sm:$0xff]  ;;  %v6183_v15 = vld [vmem:[#allocation3 + $0x108] sm:$0xee]  ;;  %v19842_v7 = vld [vmem:[#allocation3 + $0x170] sm:$0xff] }
 0x2e0   : > { %11215 = vmatprep.mubr.bf16.mxu0 %v13309_v30  ;;  %11331 = vmatpush1.bf16.msra.mxu0 %v14728_v17  ;;  %v12216_v14 = vmax.f32 %v11960_v19, 0.0  ;;  %v11968_v2 = vadd.f32 %v21937_v1, %v8287_v37  ;;  %v19832_v17 = vsel %vm15573_vm12, %v6304_v16, %v6305_v54  ;;  %v13310_v30 = vcombine.low %v6296_v59, %v19799_v10  ;;  %v5165_v6 = vld [vmem:[#allocation3 + $0x10] sm:$0x11]  ;;  %v19845_v34 = vld [vmem:[#allocation3 + $0x168] sm:$0xff]  ;;  %v6184_v32 = vld [vmem:[#allocation3 + $0x120] sm:$0xee] }
 0x2e1   : > { %11332 = vmatprep.subr.bf16.mxu0 %v14733_v38  ;;  %12471 = vst [vmem:[%s18197_s13 + $0x100] sm:$0xff] %v12215_v44  ;;  %v12223_v63 = vmax.f32 %v11967_v26, 0.0  ;;  %v13163_v38 = vcombine.high %v5161_v12, %v5162_v18  ;;  %v13313_v39 = vcombine.high %v6303_v27, %v19832_v17  ;;  %v13112_v57 = vrot.slane %v6183_v15, 9  ;;  %v15011_v28 = vld [vmem:[#allocation3 + $0x128] sm:$0xff]  ;;  %v15012_v51 = vld [vmem:[#allocation3 + $0x130] sm:$0x11] }
 0x2e2   : > { %12472 = vst [vmem:[%s18197_s13 + $0x108] sm:$0xff] %v12216_v14  ;;  %v12224_v25 = vmax.f32 %v11968_v2, 0.0  ;;  %v5188_v5 = vor.u32 %v19835_v20, %v5184_v50  ;;  %v5201_v49 = vshll.u32 %v5165_v6, 16  ;;  %v6311_v60 = vrot.slane %v6309_v41, 4  ;;  %v15013_v50 = vld [vmem:[#allocation3 + $0x38] sm:$0xff] }
 0x2e3   : > { %12479 = vst [vmem:[%s18197_s13 + $0x140] sm:$0xff] %v12223_v63  ;;  %v5219_v10 = vshrl.u32 %v15009_v58, 16  ;;  %v13312_v59 = vcombine.low %v6303_v27, %v19832_v17  ;;  %v19852_v52 = vsel %vm15573_vm12, %v13112_v57, %v6309_v41  ;;  %v13113_v37 = vrot.slane %v6184_v32, 9  ;;  %v5166_v17 = vld [vmem:[#allocation3 + $0x28] sm:$0x11]  ;;  %v15014_v27 = vld [vmem:[#allocation3 + $0x30] sm:$0xff] }
 0x2e4   : > { %11333 = vmatpush1.bf16.msra.mxu0 %v14731_v62  ;;  %v8291_v55 = vpop.f32.mrb[172].mxu1  ;;  %12480 = vst [vmem:[%s18197_s13 + $0x148] sm:$0xff] %v12224_v25  ;;  %v6312_v62 = vrot.slane %v15008_v42, 5  ;;  %v5203_v61 = vrot.slane %v5201_v49, 5  ;;  %v6319_v14 = vrot.slane %v15012_v51, 5  ;;  %v5230_v4 = vshrl.u32 %v15014_v27, 16 }
 0x2e5   : > { %11334 = vmatprep.subr.bf16.mxu0 %v14736_v3  ;;  %v8293_v24 = vpop.f32.mrb[173].mxu1  ;;  %v5215_v3 = vshll.u32 %v15009_v58, 16  ;;  %v5221_v29 = vrot.slane %v5219_v10, 4  ;;  %v11975_v56 = vadd.f32 %v21936_v0, %v8291_v55  ;;  %v5239_v55 = vshll.u32 %v15013_v50, 16  ;;  %v15015_v42 = vld [vmem:[#allocation3 + $0x140] sm:$0xff] }
 0x2e6   : > { %10301 = vmatmul.mubr.bf16.gmra.mrb[16].mxu1 %v13158_v33  ;;  %v8295_v9 = vpop.f32.mrb[174].mxu1  ;;  %v15010_v33 = vld [vmem:[#allocation3 + $0x18] sm:$0xff]  ;;  %v19856_v21 = vsel %vm15573_vm12, %v6311_v60, %v6312_v62  ;;  %v11976_v43 = vadd.f32 %v21937_v1, %v8293_v24  ;;  %v5233_v41 = vshll.u32 %v15014_v27, 16  ;;  %v6323_v62 = vrot.slane %v15015_v42, 5 }
 0x2e7   : > { %10310 = vmatprep.mubr.bf16.mxu1 %v13161_v35  ;;  %11216 = vmatmul.mubr.bf16.gmra.mrb[60].mxu0 %v13308_v31  ;;  %v8297_v22 = vpop.f32.mrb[175].mxu1  ;;  %v5206_v35 = vshrl.u32 %v15010_v33, 16  ;;  %v5209_v11 = vshll.u32 %v15010_v33, 16  ;;  %v13165_v31 = vcombine.high %v19845_v34, %v19842_v7  ;;  %v19858_v19 = vrot.slane %v5215_v3, 5  ;;  %v6185_v58 = vld [vmem:[#allocation3 + $0x138] sm:$0xee] }
 0x2e8   : > { %11225 = vmatprep.mubr.bf16.mxu0 %v13311_v48  ;;  %11335 = vmatpush1.bf16.msra.mxu0 %v14734_v36  ;;  %v13162_v36 = vcombine.low %v5161_v12, %v5162_v18  ;;  %v5189_v48 = vrot.slane %v5188_v5, 4  ;;  %v11983_v54 = vadd.f32 %v21936_v0, %v8295_v9  ;;  %v13315_v26 = vcombine.high %v19852_v52, %v19856_v21 }
 0x2e9   : > { %11336 = vmatprep.subr.bf16.mxu0 %v14739_v53  ;;  %v6316_v53 = vrot.slane %v15011_v28, 5  ;;  %v5208_v16 = vrot.slane %v5206_v35, 4  ;;  %v5211_v63 = vrot.slane %v5209_v11, 5  ;;  %v12231_v2 = vmax.f32 %v11975_v56, 0.0  ;;  %v5167_v56 = vld [vmem:[#allocation3 + $0x40] sm:$0x11] }
 0x2ea   : > { %v19876_v18 = vsel %vm15624_vm15, %v5189_v48, %v19835_v20  ;;  %v12232_v15 = vmax.f32 %v11976_v43, 0.0  ;;  %v12239_v25 = vmax.f32 %v11983_v54, 0.0  ;;  %v5222_v12 = vor.u32 %v5221_v29, %v19858_v19 }
 0x2eb   : > { %v6318_v45 = vrot.slane %v6316_v53, 4  ;;  %12487 = vst [vmem:[%s18197_s13 + $0x180] sm:$0xff] %v12231_v2  ;;  %v13164_v20 = vcombine.low %v19845_v34, %v19842_v7  ;;  %v13314_v9 = vcombine.low %v19852_v52, %v19856_v21  ;;  %v5212_v57 = vor.u32 %v5211_v63, %v5208_v16  ;;  %v15017_v21 = vld [vmem:[#allocation3 + $0x148] sm:$0x11] }
 0x2ec   : > { %11337 = vmatpush1.bf16.msra.mxu0 %v14737_v23  ;;  %v19860_v46 = vpop.f32.mrb[176].mxu1  ;;  %12488 = vst [vmem:[%s18197_s13 + $0x188] sm:$0xff] %v12232_v15  ;;  %12495 = vst [vmem:[%s18197_s13 + $0x1c0] sm:$0xff] %v12239_v25  ;;  %v19901_v7 = vsel %vm15573_vm12, %v13113_v37, %v6316_v53  ;;  %v5223_v49 = vrot.slane %v5222_v12, 4  ;;  %v19903_v3 = vrot.slane %v5239_v55, 5  ;;  %v5232_v33 = vrot.slane %v5230_v4, 4 }
 0x2ed   : > { %11499 = vmatprep.subr.bf16.mxu0 %v14743_v40  ;;  %v19865_v44 = vpop.f32.mrb[177].mxu1  ;;  %v19891_v6 = vsel %vm15573_vm12, %v6318_v45, %v6319_v14  ;;  %v5235_v35 = vrot.slane %v5233_v41, 5  ;;  %v6326_v32 = vrot.slane %v15017_v21, 5  ;;  %v6325_v29 = vrot.slane %v6323_v62, 4  ;;  %v15018_v14 = vld [vmem:[#allocation3 + $0x50] sm:$0xff]  ;;  %v15022_v21 = vld [vmem:[#allocation3 + $0x60] sm:$0xff] }
 0x2ee   : > { %10311 = vmatmul.mubr.bf16.gmra.mrb[20].mxu1 %v13160_v13  ;;  %v19869_v23 = vpop.f32.mrb[178].mxu1  ;;  %v19880_v13 = vsel %vm15624_vm15, %v5189_v48, %v5203_v61  ;;  %v13317_v10 = vcombine.high %v19901_v7, %v19891_v6  ;;  %v5213_v48 = vrot.slane %v5212_v57, 4  ;;  %v13114_v61 = vrot.slane %v6185_v58, 9  ;;  %v6186_v15 = vld [vmem:[#allocation3 + $0x150] sm:$0xee] }
 0x2ef   : > { %10320 = vmatprep.mubr.bf16.mxu1 %v13163_v38  ;;  %11226 = vmatmul.mubr.bf16.gmra.mrb[64].mxu0 %v13310_v30  ;;  %v19871_v40 = vpop.f32.mrb[179].mxu1  ;;  %v5243_v38 = vshrl.u32 %v15013_v50, 16  ;;  %v11984_v30 = vadd.f32 %v21937_v1, %v8297_v22  ;;  %v13167_v24 = vcombine.high %v19876_v18, %v19880_v13  ;;  %v13166_v53 = vcombine.low %v19876_v18, %v19880_v13  ;;  %v14756_v25 = vld [vmem:[%s21548_s3 + $0x200] ss:$8 sps:$4 sm:$0xff]   ;;  %v14761_v4 = vld [vmem:[%s21548_s3 + $0x214] ss:$8 sps:$4 sm:$0xff]  }
 0x2f0   : > { %11235 = vmatprep.mubr.bf16.mxu0 %v13313_v39  ;;  %v5225_v39 = vshll.u32 %v5166_v17, 16  ;;  %v11992_v37 = vadd.f32 %v21937_v1, %v19865_v44  ;;  %v5236_v51 = vor.u32 %v5235_v35, %v5232_v33  ;;  %v5263_v45 = vshll.u32 %v15018_v14, 16  ;;  %v15020_v57 = vld [vmem:[#allocation3 + $0x160] sm:$0x11]  ;;  %v5168_v58 = vld [vmem:[#allocation3 + $0x58] sm:$0x11] }
 0x2f1   : > { %v12240_v22 = vmax.f32 %v11984_v30, 0.0  ;;  %v5245_v34 = vrot.slane %v5243_v38, 4  ;;  %v5267_v16 = vshrl.u32 %v15018_v14, 16  ;;  %v11999_v63 = vadd.f32 %v21936_v0, %v19869_v23  ;;  %v15019_v38 = vld [vmem:[#allocation3 + $0x158] sm:$0xff]  ;;  %v19998_v14 = vld [vmem:[#allocation3 + $0x170] sm:$0xff] }
 0x2f2   : > { %v5227_v52 = vrot.slane %v5225_v39, 5  ;;  %v19929_v2 = vsel %vm15573_vm12, %v6325_v29, %v6326_v32  ;;  %v5249_v18 = vshll.u32 %v5167_v56, 16  ;;  %v12248_v17 = vmax.f32 %v11992_v37, 0.0 }
 0x2f3   : > { %12496 = vst [vmem:[%s18197_s13 + $0x1c8] sm:$0xff] %v12240_v22  ;;  %v5246_v54 = vor.u32 %v5245_v34, %v19903_v3  ;;  %v13316_v44 = vcombine.low %v19901_v7, %v19891_v6  ;;  %v19940_v23 = vsel %vm15573_vm12, %v13114_v61, %v6323_v62  ;;  %v12255_v12 = vmax.f32 %v11999_v63, 0.0 }
 0x2f4   : > { %v19897_v5 = vpop.f32.mrb[180].mxu1  ;;  %v19918_v43 = vsel %vm15624_vm15, %v5223_v49, %v5227_v52  ;;  %v6330_v30 = vrot.slane %v15019_v38, 5  ;;  %12504 = vst [vmem:[%s18197_s13 + $0x208] sm:$0xff] %v12248_v17  ;;  %v12000_v27 = vadd.f32 %v21937_v1, %v19871_v40  ;;  %v5237_v6 = vrot.slane %v5236_v51, 4  ;;  %v14769_v52 = vld [vmem:[%s21548_s3 + $0x224] ss:$8 sps:$4 sm:$0xff]  }
 0x2f5   : > { %v19905_v60 = vpop.f32.mrb[181].mxu1  ;;  %v5247_v55 = vrot.slane %v5246_v54, 4  ;;  %v5269_v39 = vrot.slane %v5267_v16, 4  ;;  %12511 = vst [vmem:[%s18197_s13 + $0x240] sm:$0xff] %v12255_v12  ;;  %v5251_v40 = vrot.slane %v5249_v18, 5  ;;  %v6333_v42 = vrot.slane %v15020_v57, 5 }
 0x2f6   : > { %10321 = vmatmul.mubr.bf16.gmra.mrb[24].mxu1 %v13162_v36  ;;  %v19910_v11 = vpop.f32.mrb[182].mxu1  ;;  %v15016_v36 = vld [vmem:[#allocation3 + $0x48] sm:$0xff]  ;;  %v13115_v49 = vrot.slane %v6186_v15, 9  ;;  %v12256_v34 = vmax.f32 %v12000_v27, 0.0  ;;  %v6332_v35 = vrot.slane %v6330_v30, 4  ;;  %v5278_v32 = vshrl.u32 %v15022_v21, 16 }
 0x2f7   : > { %10330 = vmatprep.mubr.bf16.mxu1 %v13165_v31  ;;  %11236 = vmatmul.mubr.bf16.gmra.mrb[68].mxu0 %v13312_v59  ;;  %v5254_v31 = vshrl.u32 %v15016_v36, 16  ;;  %v5257_v59 = vshll.u32 %v15016_v36, 16  ;;  %v19912_v28 = vpop.f32.mrb[183].mxu1  ;;  %v19972_v33 = vsel %vm15624_vm15, %v5247_v55, %v5251_v40  ;;  %v15021_v36 = vld [vmem:[#allocation3 + $0x68] sm:$0xff]  ;;  %v19984_v29 = vsel %vm15624_vm15, %v5237_v6, %v19903_v3  ;;  %v14772_v18 = vld [vmem:[%s21548_s3 + $0x234] ss:$8 sps:$4 sm:$0xff]  }
 0x2f8   : > { %11245 = vmatprep.mubr.bf16.mxu0 %v13315_v26  ;;  %v11991_v26 = vadd.f32 %v21936_v0, %v19860_v46  ;;  %v19934_v46 = vsel %vm15624_vm15, %v5213_v48, %v19858_v19  ;;  %12512 = vst [vmem:[%s18197_s13 + $0x248] sm:$0xff] %v12256_v34  ;;  %v13318_v56 = vcombine.low %v19940_v23, %v19929_v2  ;;  %v5273_v51 = vshll.u32 %v5168_v58, 16  ;;  %v6187_v15 = vld [vmem:[#allocation3 + $0x168] sm:$0xee]  ;;  %v15024_v55 = vld [vmem:[#allocation3 + $0x178] sm:$0x11] }
 0x2f9   : > { %v13169_v19 = vcombine.high %v19934_v46, %v19918_v43  ;;  %v5256_v62 = vrot.slane %v5254_v31, 4  ;;  %v5259_v22 = vrot.slane %v5257_v59, 5  ;;  %v5287_v31 = vshll.u32 %v15021_v36, 16 }
 0x2fa   : > { %v12247_v13 = vmax.f32 %v11991_v26, 0.0  ;;  %v5291_v59 = vshrl.u32 %v15021_v36, 16  ;;  %v13168_v48 = vcombine.low %v19934_v46, %v19918_v43  ;;  %v19990_v54 = vsel %vm15573_vm12, %v6332_v35, %v6333_v42 }
 0x2fb   : > { %v5260_v26 = vor.u32 %v5259_v22, %v5256_v62  ;;  %v13171_v37 = vcombine.high %v19984_v29, %v19972_v33  ;;  %v19996_v43 = vsel %vm15573_vm12, %v13115_v49, %v6330_v30  ;;  %v6337_v3 = vrot.slane %v19998_v14, 5  ;;  %v14780_v62 = vld [vmem:[%s21548_s3 + $0x244] ss:$8 sps:$4 sm:$0xff]   ;;  %v15025_v49 = vld [vmem:[#allocation3 + $0x78] sm:$0xff] }
 0x2fc   : > { %v19945_v50 = vpop.f32.mrb[184].mxu1  ;;  %12503 = vst [vmem:[%s18197_s13 + $0x200] sm:$0xff] %v12247_v13  ;;  %v20006_v63 = vrot.slane %v5287_v31, 5  ;;  %v12007_v13 = vadd.f32 %v21936_v0, %v19897_v5  ;;  %v12008_v17 = vadd.f32 %v21937_v1, %v19905_v60  ;;  %v12015_v12 = vadd.f32 %v21936_v0, %v19910_v11  ;;  %v14770_v11 = vld [vmem:[%s21548_s3 + $0x230] ss:$8 sps:$4 sm:$0xff]  }
 0x2fd   : > { %v19956_v41 = vpop.f32.mrb[185].mxu1  ;;  %v5261_v5 = vrot.slane %v5260_v26, 4  ;;  %v6340_v60 = vrot.slane %v15024_v55, 5  ;;  %v13116_v40 = vrot.slane %v6187_v15, 9  ;;  %v6339_v57 = vrot.slane %v6337_v3, 4 }
 0x2fe   : > { %10331 = vmatmul.mubr.bf16.gmra.mrb[28].mxu1 %v13164_v20  ;;  %v13319_v20 = vcombine.high %v19940_v23, %v19929_v2  ;;  %v5293_v2 = vrot.slane %v5291_v59, 4  ;;  %v12263_v38 = vmax.f32 %v12007_v13, 0.0  ;;  %v12264_v30 = vmax.f32 %v12008_v17, 0.0  ;;  %v15028_v13 = vld [vmem:[#allocation3 + $0x190] sm:$0x11] }
 0x2ff   : > { %11246 = vmatmul.mubr.bf16.gmra.mrb[72].mxu0 %v13314_v9  ;;  %10373 = vmatprep.mubr.bf16.mxu1 %v13167_v24  ;;  %v19960_v24 = vrot.slane %v5263_v45, 5  ;;  %v19963_v9 = vpop.f32.mrb[186].mxu1  ;;  %v14767_v45 = vld [vmem:[%s21548_s3 + $0x220] ss:$8 sps:$4 sm:$0xff]   ;;  %v12016_v22 = vadd.f32 %v21937_v1, %v19912_v28  ;;  %v5302_v58 = vshrl.u32 %v15025_v49, 16  ;;  %v5305_v31 = vshll.u32 %v15025_v49, 16 }
 0x300   : > { %11255 = vmatprep.mubr.bf16.mxu0 %v13317_v10  ;;  %v19965_v7 = vpop.f32.mrb[187].mxu1  ;;  %v14759_v10 = vld [vmem:[%s21548_s3 + $0x210] ss:$8 sps:$4 sm:$0xff]   ;;  %v5294_v42 = vor.u32 %v5293_v2, %v20006_v63  ;;  %12519 = vst [vmem:[%s18197_s13 + $0x280] sm:$0xff] %v12263_v38  ;;  %12520 = vst [vmem:[%s18197_s13 + $0x288] sm:$0xff] %v12264_v30  ;;  %v13170_v59 = vcombine.low %v19984_v29, %v19972_v33  ;;  %v6347_v17 = vrot.slane %v15028_v13, 5 }
 0x301   : > { %v5270_v61 = vor.u32 %v5269_v39, %v19960_v24  ;;  %v12271_v39 = vmax.f32 %v12015_v12, 0.0  ;;  %v20050_v28 = vsel %vm15624_vm15, %v5261_v5, %v19960_v24  ;;  %v14778_v33 = vld [vmem:[%s21548_s3 + $0x240] ss:$8 sps:$4 sm:$0xff]   ;;  %v20063_v24 = vsel %vm15573_vm12, %v13116_v40, %v6337_v3  ;;  %v14781_v38 = vld [vmem:[%s21548_s3 + $0x250] ss:$8 sps:$4 sm:$0xff]  }
 0x302   : > { %v5295_v26 = vrot.slane %v5294_v42, 4 }
 0x303   : > { %v5271_v23 = vrot.slane %v5270_v61, 4  ;;  %12527 = vst [vmem:[%s18197_s13 + $0x2c0] sm:$0xff] %v12271_v39  ;;  %v12272_v61 = vmax.f32 %v12016_v22, 0.0  ;;  %v12024_v39 = vadd.f32 %v21937_v1, %v19956_v41  ;;  %v12031_v22 = vadd.f32 %v21936_v0, %v19963_v9  ;;  %v14789_v9 = vld [vmem:[%s21548_s3 + $0x260] ss:$8 sps:$4 sm:$0xff]  }
 0x304   : > { %v20004_v16 = vpop.f32.mrb[188].mxu1 }
 0x305   : > { %v20015_v46 = vpop.f32.mrb[189].mxu1  ;;  %12528 = vst [vmem:[%s18197_s13 + $0x2c8] sm:$0xff] %v12272_v61 }
 0x306   : > { %10374 = vmatmul.mubr.bf16.vlgmr.msra.gmra.mrb[224].mxu1 %v13166_v53  ;;  %v5281_v53 = vshll.u32 %v15022_v21, 16 }
 0x307   : > { %10383 = vmatprep.mubr.bf16.mxu1 %v13169_v19  ;;  %11256 = vmatmul.mubr.bf16.gmra.mrb[76].mxu0 %v13316_v44  ;;  %v13321_v44 = vcombine.high %v19996_v43, %v19990_v54  ;;  %v20021_v19 = vpop.f32.mrb[190].mxu1 }
 0x308   : > { %11265 = vmatprep.mubr.bf16.mxu0 %v13319_v20  ;;  %10535 = vmatpush1.bf16.msra.mxu1 %v14756_v25  ;;  %v5169_v25 = vld [vmem:[#allocation3 + $0x70] sm:$0x11]  ;;  %v20023_v27 = vpop.f32.mrb[191].mxu1  ;;  %v5280_v20 = vrot.slane %v5278_v32, 4  ;;  %v5283_v6 = vrot.slane %v5281_v53, 5  ;;  %v13320_v32 = vcombine.low %v19996_v43, %v19990_v54  ;;  %v15027_v54 = vld [vmem:[#allocation3 + $0x188] sm:$0xff] }
 0x309   : > { %10536 = vmatprep.subr.bf16.mxu1 %v14761_v4  ;;  %v5275_v4 = vrot.slane %v5273_v51, 5  ;;  %v5297_v21 = vshll.u32 %v5169_v25, 16  ;;  %v14783_v43 = vld [vmem:[%s21548_s3 + $0x254] ss:$8 sps:$4 sm:$0xff]   ;;  %v15029_v25 = vld [vmem:[#allocation3 + $0x90] sm:$0xff] }
 0x30a   : > { %v5284_v53 = vor.u32 %v5283_v6, %v5280_v20  ;;  %v5326_v12 = vshrl.u32 %v15029_v25, 16  ;;  %v5329_v5 = vshll.u32 %v15029_v25, 16  ;;  %v5170_v20 = vld [vmem:[#allocation3 + $0x88] sm:$0x11] }
 0x30b   : > { %v20038_v34 = vsel %vm15624_vm15, %v5271_v23, %v5275_v4  ;;  %v5307_v23 = vrot.slane %v5305_v31, 5  ;;  %v14791_v6 = vld [vmem:[%s21548_s3 + $0x264] ss:$8 sps:$4 sm:$0xff]   ;;  %v12287_v31 = vmax.f32 %v12031_v22, 0.0 }
 0x30c   : > { %10537 = vmatpush1.bf16.msra.mxu1 %v14759_v10  ;;  %v15026_v10 = vld [vmem:[#allocation3 + $0x80] sm:$0xff]  ;;  %v20057_v29 = vpop.f32.mrb[192].mxu1  ;;  %v5285_v55 = vrot.slane %v5284_v53, 4  ;;  %v13172_v41 = vcombine.low %v20050_v28, %v20038_v34 }
 0x30d   : > { %10538 = vmatprep.subr.bf16.mxu1 %v14769_v52  ;;  %v5311_v35 = vshll.u32 %v15026_v10, 16  ;;  %v5315_v36 = vshrl.u32 %v15026_v10, 16  ;;  %v20045_v52 = vsel %vm15573_vm12, %v6339_v57, %v6340_v60  ;;  %v20068_v51 = vpop.f32.mrb[193].mxu1  ;;  %v15030_v57 = vld [vmem:[#allocation3 + $0x98] sm:$0xff]  ;;  %12543 = vst [vmem:[%s18197_s13 + $0x340] sm:$0xff] %v12287_v31 }
 0x30e   : > { %10384 = vmatmul.mubr.bf16.gmra.mrb[228].mxu1 %v13168_v48  ;;  %v6188_v48 = vld [vmem:[#allocation3 + $0x180] sm:$0xee]  ;;  %v13323_v14 = vcombine.high %v20063_v24, %v20045_v52  ;;  %v20075_v3 = vpop.f32.mrb[194].mxu1  ;;  %v5335_v42 = vshll.u32 %v15030_v57, 16 }
 0x30f   : > { %10393 = vmatprep.mubr.bf16.mxu1 %v13171_v37  ;;  %11266 = vmatmul.mubr.bf16.gmra.mrb[80].mxu0 %v13318_v56  ;;  %v13173_v56 = vcombine.high %v20050_v28, %v20038_v34  ;;  %v6344_v37 = vrot.slane %v15027_v54, 5  ;;  %v5317_v2 = vrot.slane %v5315_v36, 4  ;;  %v20077_v15 = vpop.f32.mrb[195].mxu1  ;;  %v13117_v60 = vrot.slane %v6188_v48, 9  ;;  %v14794_v28 = vld [vmem:[%s21548_s3 + $0x274] ss:$8 sps:$4 sm:$0xff]  }
 0x310   : > { %11275 = vmatprep.mubr.bf16.mxu0 %v13321_v44  ;;  %10539 = vmatpush1.bf16.msra.mxu1 %v14767_v45  ;;  %v20072_v45 = vrot.slane %v5311_v35, 5  ;;  %v5304_v44 = vrot.slane %v5302_v58, 4  ;;  %v20105_v35 = vsel %vm15624_vm15, %v5285_v55, %v20006_v63  ;;  %v5321_v36 = vshll.u32 %v5170_v20, 16  ;;  %v20150_v55 = vld [vmem:[#allocation3 + $0x30] sm:$0xff] }
 0x311   : > { %10540 = vmatprep.subr.bf16.mxu1 %v14772_v18  ;;  %v5299_v18 = vrot.slane %v5297_v21, 5  ;;  %v6346_v4 = vrot.slane %v6344_v37, 4  ;;  %v13322_v34 = vcombine.low %v20063_v24, %v20045_v52  ;;  %v20118_v63 = vsel %vm15573_vm12, %v13117_v60, %v6344_v37  ;;  %v15031_v24 = vld [vmem:[#allocation3 + $0xa8] sm:$0xff]  ;;  %v20136_v37 = vld [vmem:[#allocation3 + $0x38] sm:$0xff] }
 0x312   : > { %v5318_v40 = vor.u32 %v5317_v2, %v20072_v45  ;;  %v5308_v58 = vor.u32 %v5307_v23, %v5304_v44  ;;  %v5331_v2 = vrot.slane %v5329_v5, 5  ;;  %v5171_v44 = vld [vmem:[#allocation3 + $0xa0] sm:$0x11]  ;;  %v14802_v23 = vld [vmem:[%s21548_s3 + $0x284] ss:$8 sps:$4 sm:$0xff]  }
 0x313   : > { %v20084_v30 = vsel %vm15624_vm15, %v5295_v26, %v5299_v18  ;;  %v20098_v49 = vsel %vm15573_vm12, %v6346_v4, %v6347_v17  ;;  %v5350_v26 = vshrl.u32 %v15031_v24, 16  ;;  %v14792_v18 = vld [vmem:[%s21548_s3 + $0x270] ss:$8 sps:$4 sm:$0xff]   ;;  %v5353_v17 = vshll.u32 %v15031_v24, 16  ;;  %v15032_v5 = vld [vmem:[#allocation3 + $0xb0] sm:$0xff] }
 0x314   : > { %10541 = vmatpush1.bf16.msra.mxu1 %v14770_v11  ;;  %v12023_v11 = vadd.f32 %v21936_v0, %v19945_v50  ;;  %v12280_v50 = vmax.f32 %v12024_v39, 0.0  ;;  %v13175_v21 = vcombine.high %v20105_v35, %v20084_v30  ;;  %v13325_v52 = vcombine.high %v20118_v63, %v20098_v49  ;;  %v20200_v24 = vld [vmem:[#allocation3 + $0x50] sm:$0xff] }
 0x315   : > { %10542 = vmatprep.subr.bf16.mxu1 %v14780_v62  ;;  %v5339_v62 = vshrl.u32 %v15030_v57, 16  ;;  %v5319_v48 = vrot.slane %v5318_v40, 4  ;;  %v5309_v54 = vrot.slane %v5308_v58, 4  ;;  %v5359_v60 = vshll.u32 %v15032_v5, 16 }
 0x316   : > { %10394 = vmatmul.mubr.bf16.gmra.mrb[232].mxu1 %v13170_v59  ;;  %v12279_v10 = vmax.f32 %v12023_v11, 0.0  ;;  %v20110_v59 = vpop.f32.mrb[196].mxu1  ;;  %12536 = vst [vmem:[%s18197_s13 + $0x308] sm:$0xff] %v12280_v50  ;;  %v13174_v4 = vcombine.low %v20105_v35, %v20084_v30  ;;  %v13324_v20 = vcombine.low %v20118_v63, %v20098_v49  ;;  %v5345_v40 = vshll.u32 %v5171_v44, 16  ;;  %v14805_v49 = vld [vmem:[%s21548_s3 + $0x294] ss:$8 sps:$4 sm:$0xff]  }
 0x317   : > { %10403 = vmatprep.mubr.bf16.mxu1 %v13173_v56  ;;  %11276 = vmatmul.mubr.bf16.gmra.mrb[84].mxu0 %v13320_v32  ;;  %v12032_v32 = vadd.f32 %v21937_v1, %v19965_v7  ;;  %v20127_v53 = vpop.f32.mrb[197].mxu1  ;;  %v5341_v61 = vrot.slane %v5339_v62, 4  ;;  %v5314_v11 = vsel %vm15624_vm15, %v5309_v54, %v20072_v45  ;;  %v5352_v57 = vrot.slane %v5350_v26, 4  ;;  %v15033_v54 = vld [vmem:[#allocation3 + $0xc8] sm:$0xff] }
 0x318   : > { %11285 = vmatprep.mubr.bf16.mxu0 %v13323_v14  ;;  %10543 = vmatpush1.bf16.msra.mxu1 %v14778_v33  ;;  %12535 = vst [vmem:[%s18197_s13 + $0x300] sm:$0xff] %v12279_v10  ;;  %v20131_v33 = vrot.slane %v5335_v42, 5  ;;  %v20134_v56 = vpop.f32.mrb[198].mxu1  ;;  %v5328_v14 = vrot.slane %v5326_v12, 4  ;;  %v14800_v42 = vld [vmem:[%s21548_s3 + $0x280] ss:$8 sps:$4 sm:$0xff]   ;;  %v12039_v45 = vadd.f32 %v21936_v0, %v20004_v16  ;;  %v12040_v58 = vadd.f32 %v21937_v1, %v20015_v46 }
 0x319   : > { %10544 = vmatprep.subr.bf16.mxu1 %v14783_v43  ;;  %v20138_v7 = vpop.f32.mrb[199].mxu1  ;;  %v5323_v43 = vrot.slane %v5321_v36, 5  ;;  %v12288_v13 = vmax.f32 %v12032_v32, 0.0  ;;  %v5355_v22 = vrot.slane %v5353_v17, 5  ;;  %v12047_v36 = vadd.f32 %v21936_v0, %v20021_v19  ;;  %v5172_v16 = vld [vmem:[#allocation3 + $0xb8] sm:$0x11] }
 0x31a   : > { %v5342_v12 = vor.u32 %v5341_v61, %v20131_v33  ;;  %v5332_v39 = vor.u32 %v5331_v2, %v5328_v14  ;;  %v12295_v31 = vmax.f32 %v12039_v45, 0.0  ;;  %v5347_v63 = vrot.slane %v5345_v40, 5  ;;  %v14803_v19 = vld [vmem:[%s21548_s3 + $0x290] ss:$8 sps:$4 sm:$0xff]  }
 0x31b   : > { %v20148_v25 = vsel %vm15624_vm15, %v5319_v48, %v5323_v43  ;;  %12544 = vst [vmem:[%s18197_s13 + $0x348] sm:$0xff] %v12288_v13  ;;  %v5356_v32 = vor.u32 %v5355_v22, %v5352_v57  ;;  %v12048_v48 = vadd.f32 %v21937_v1, %v20023_v27  ;;  %v5383_v43 = vshll.u32 %v15033_v54, 16  ;;  %v15034_v2 = vld [vmem:[#allocation3 + $0xc0] sm:$0xff]  ;;  %v5173_v57 = vld [vmem:[#allocation3 + $0xd0] sm:$0x11] }
 0x31c   : > { %10545 = vmatpush1.bf16.msra.mxu1 %v14781_v38  ;;  %v5363_v38 = vshrl.u32 %v15032_v5, 16  ;;  %v20166_v62 = vpop.f32.mrb[200].mxu1  ;;  %v13177_v30 = vcombine.high %v5314_v11, %v20148_v25  ;;  %v5343_v50 = vrot.slane %v5342_v12, 4  ;;  %12551 = vst [vmem:[%s18197_s13 + $0x380] sm:$0xff] %v12295_v31  ;;  %v5387_v14 = vshrl.u32 %v15033_v54, 16  ;;  %v20213_v12 = vld [vmem:[#allocation3 + $0x48] sm:$0xff] }
 0x31d   : > { %10546 = vmatprep.subr.bf16.mxu1 %v14791_v6  ;;  %v13327_v6 = vcombine.high %v20150_v55, %v20136_v37  ;;  %v20176_v10 = vpop.f32.mrb[201].mxu1  ;;  %v5377_v13 = vshll.u32 %v15034_v2, 16  ;;  %v5369_v17 = vshll.u32 %v5172_v16, 16  ;;  %v13176_v44 = vcombine.low %v5314_v11, %v20148_v25  ;;  %v15035_v45 = vld [vmem:[#allocation3 + $0xe0] sm:$0xff] }
 0x31e   : > { %10404 = vmatmul.mubr.bf16.gmra.mrb[236].mxu1 %v13172_v41  ;;  %v20178_v41 = vrot.slane %v5359_v60, 5  ;;  %v5365_v35 = vrot.slane %v5363_v38, 4  ;;  %v20198_v61 = vsel %vm15624_vm15, %v5343_v50, %v5347_v63  ;;  %v12304_v5 = vmax.f32 %v12048_v48, 0.0  ;;  %v14814_v16 = vld [vmem:[%s21548_s3 + $0x2b0] ss:$8 sps:$4 sm:$0xff]   ;;  %v20261_v48 = vld [vmem:[#allocation3 + $0x68] sm:$0xff] }
 0x31f   : > { %10413 = vmatprep.mubr.bf16.mxu1 %v13175_v21  ;;  %11286 = vmatmul.mubr.bf16.gmra.mrb[88].mxu0 %v13322_v34  ;;  %v12296_v21 = vmax.f32 %v12040_v58, 0.0  ;;  %v5333_v34 = vrot.slane %v5332_v39, 4  ;;  %v13326_v25 = vcombine.low %v20150_v55, %v20136_v37  ;;  %v13329_v38 = vcombine.high %v20213_v12, %v20200_v24  ;;  %v14816_v37 = vld [vmem:[%s21548_s3 + $0x2b4] ss:$8 sps:$4 sm:$0xff]  }
 0x320   : > { %11295 = vmatprep.mubr.bf16.mxu0 %v13325_v52  ;;  %10547 = vmatpush1.bf16.msra.mxu1 %v14789_v9  ;;  %v20182_v9 = vpop.f32.mrb[202].mxu1  ;;  %v14813_v52 = vld [vmem:[%s21548_s3 + $0x2a4] ss:$8 sps:$4 sm:$0xff]   ;;  %v5366_v26 = vor.u32 %v5365_v35, %v20178_v41  ;;  %v20227_v11 = vrot.slane %v5383_v43, 5  ;;  %v5389_v39 = vrot.slane %v5387_v14, 4  ;;  %12560 = vst [vmem:[%s18197_s13 + $0x3c8] sm:$0xff] %v12304_v5  ;;  %v12055_v55 = vadd.f32 %v21936_v0, %v20057_v29 }
 0x321   : > { %10548 = vmatprep.subr.bf16.mxu1 %v14794_v28  ;;  %v20184_v46 = vpop.f32.mrb[203].mxu1  ;;  %v12303_v28 = vmax.f32 %v12047_v36, 0.0  ;;  %12552 = vst [vmem:[%s18197_s13 + $0x388] sm:$0xff] %v12296_v21  ;;  %v20208_v27 = vsel %vm15624_vm15, %v5333_v34, %v20131_v33  ;;  %v5357_v33 = vrot.slane %v5356_v32, 4  ;;  %v5371_v40 = vrot.slane %v5369_v17, 5  ;;  %v15036_v34 = vld [vmem:[#allocation3 + $0xd8] sm:$0xff] }
 0x322   : > { %v13179_v60 = vcombine.high %v20208_v27, %v20198_v61  ;;  %v12056_v22 = vadd.f32 %v21937_v1, %v20068_v51  ;;  %v5407_v58 = vshll.u32 %v15035_v45, 16  ;;  %v5411_v50 = vshrl.u32 %v15035_v45, 16  ;;  %v14753_v51 = vld [vmem:[%s21548_s3 + $0x724] ss:$8 sps:$4 sm:$0xff]   ;;  %v14825_v45 = vld [vmem:[%s21548_s3 + $0x2d0] ss:$8 sps:$4 sm:$0xff]  }
 0x323   : > { %12559 = vst [vmem:[%s18197_s13 + $0x3c0] sm:$0xff] %v12303_v28  ;;  %v12311_v29 = vmax.f32 %v12055_v55, 0.0  ;;  %v12063_v35 = vadd.f32 %v21936_v0, %v20075_v3  ;;  %v5398_v63 = vshrl.u32 %v15036_v34, 16  ;;  %v14824_v28 = vld [vmem:[%s21548_s3 + $0x2c4] ss:$8 sps:$4 sm:$0xff]   ;;  %v5393_v54 = vshll.u32 %v5173_v57, 16 }
 0x324   : > { %10549 = vmatpush1.bf16.msra.mxu1 %v14792_v18  ;;  %v5374_v18 = vshrl.u32 %v15034_v2, 16  ;;  %v12312_v31 = vmax.f32 %v12056_v22, 0.0  ;;  %v12064_v43 = vadd.f32 %v21937_v1, %v20077_v15  ;;  %v13178_v14 = vcombine.low %v20208_v27, %v20198_v61  ;;  %v14822_v27 = vld [vmem:[%s21548_s3 + $0x2c0] ss:$8 sps:$4 sm:$0xff]  }
 0x325   : > { %10550 = vmatprep.subr.bf16.mxu1 %v14802_v23  ;;  %v14741_v23 = vld [vmem:[%s21548_s3 + $0x700] ss:$8 sps:$4 sm:$0xff]   ;;  %v20242_v36 = vpop.f32.mrb[204].mxu1  ;;  %12567 = vst [vmem:[%s18197_s13 + $0x400] sm:$0xff] %v12311_v29  ;;  %v12319_v32 = vmax.f32 %v12063_v35, 0.0  ;;  %v20271_v2 = vsel %vm15624_vm15, %v5357_v33, %v20178_v41  ;;  %v5413_v17 = vrot.slane %v5411_v50, 4  ;;  %v13328_v61 = vcombine.low %v20213_v12, %v20200_v24 }
 0x326   : > { %10414 = vmatmul.mubr.bf16.gmra.mrb[240].mxu1 %v13174_v4  ;;  %v14748_v4 = vld [vmem:[%s21548_s3 + $0x714] ss:$8 sps:$4 sm:$0xff]   ;;  %v20250_v21 = vpop.f32.mrb[205].mxu1  ;;  %12568 = vst [vmem:[%s18197_s13 + $0x408] sm:$0xff] %v12312_v31  ;;  %v12071_v57 = vadd.f32 %v21936_v0, %v20110_v59  ;;  %v12079_v50 = vadd.f32 %v21936_v0, %v20134_v56  ;;  %v14835_v35 = vld [vmem:[%s21548_s3 + $0x2e4] ss:$8 sps:$4 sm:$0xff]  }
 0x327   : > { %10423 = vmatprep.mubr.bf16.mxu1 %v13177_v30  ;;  %11296 = vmatmul.mubr.bf16.gmra.mrb[92].mxu0 %v13324_v20  ;;  %v14811_v20 = vld [vmem:[%s21548_s3 + $0x2a0] ss:$8 sps:$4 sm:$0xff]   ;;  %v5379_v30 = vrot.slane %v5377_v13, 5  ;;  %v20276_v13 = vrot.slane %v5407_v58, 5  ;;  %12575 = vst [vmem:[%s18197_s13 + $0x440] sm:$0xff] %v12319_v32  ;;  %v20296_v12 = vpop.f32.mrb[206].mxu1  ;;  %v12072_v58 = vadd.f32 %v21937_v1, %v20127_v53 }
 0x328   : > { %11338 = vmatprep.mubr.bf16.mxu0 %v13327_v6  ;;  %10551 = vmatpush1.bf16.msra.mxu1 %v14800_v42  ;;  %v5367_v6 = vrot.slane %v5366_v26, 4  ;;  %v5376_v42 = vrot.slane %v5374_v18, 4  ;;  %v14751_v18 = vld [vmem:[%s21548_s3 + $0x720] ss:$8 sps:$4 sm:$0xff]   ;;  %v14764_v41 = vld [vmem:[%s21548_s3 + $0x734] ss:$8 sps:$4 sm:$0xff]  }
 0x329   : > { %10552 = vmatprep.subr.bf16.mxu1 %v14805_v49  ;;  %v14746_v49 = vld [vmem:[%s21548_s3 + $0x710] ss:$8 sps:$4 sm:$0xff]   ;;  %v14827_v24 = vld [vmem:[%s21548_s3 + $0x2d4] ss:$8 sps:$4 sm:$0xff]   ;;  %v5414_v55 = vor.u32 %v5413_v17, %v20276_v13 }
 0x32a   : > { %v20254_v3 = vsel %vm15624_vm15, %v5367_v6, %v5371_v40  ;;  %v5380_v26 = vor.u32 %v5379_v30, %v5376_v42  ;;  %v5174_v6 = vld [vmem:[#allocation3 + $0xe8] sm:$0x11]  ;;  %v14762_v40 = vld [vmem:[%s21548_s3 + $0x730] ss:$8 sps:$4 sm:$0xff]  }
 0x32b   : > { %v13181_v15 = vcombine.high %v20271_v2, %v20254_v3  ;;  %v15038_v42 = vld [vmem:[#allocation3 + $0xf8] sm:$0xff]  ;;  %v20332_v56 = vld [vmem:[#allocation3 + $0x80] sm:$0xff]  ;;  %v5417_v31 = vshll.u32 %v5174_v6, 16 }
 0x32c   : > { %10553 = vmatpush1.bf16.msra.mxu1 %v14803_v19  ;;  %v5390_v19 = vor.u32 %v5389_v39, %v20227_v11  ;;  %v5381_v33 = vrot.slane %v5380_v26, 4  ;;  %v5400_v39 = vrot.slane %v5398_v63, 4  ;;  %v5431_v30 = vshll.u32 %v15038_v42, 16  ;;  %v20350_v26 = vld [vmem:[#allocation3 + $0x78] sm:$0xff] }
 0x32d   : > { %10554 = vmatprep.subr.bf16.mxu1 %v14813_v52  ;;  %v5401_v52 = vshll.u32 %v15036_v34, 16  ;;  %v5435_v22 = vshrl.u32 %v15038_v42, 16  ;;  %v12328_v34 = vmax.f32 %v12072_v58, 0.0  ;;  %v12335_v63 = vmax.f32 %v12079_v50, 0.0  ;;  %v15040_v42 = vld [vmem:[#allocation3 + $0x108] sm:$0xff] }
 0x32e   : > { %10424 = vmatmul.mubr.bf16.gmra.mrb[244].mxu1 %v13176_v44  ;;  %v20283_v44 = vld [vmem:[#allocation3 + $0x60] sm:$0xff]  ;;  %v5419_v17 = vrot.slane %v5417_v31, 5  ;;  %v5449_v58 = vshll.u32 %v15040_v42, 16 }
 0x32f   : > { %10433 = vmatprep.mubr.bf16.mxu1 %v13179_v60  ;;  %11339 = vmatmul.mubr.bf16.vlgmr.msra.gmra.mrb[32].mxu0 %v13326_v25  ;;  %v13331_v5 = vcombine.high %v20283_v44, %v20261_v48  ;;  %v5391_v60 = vrot.slane %v5390_v19, 4  ;;  %v20298_v25 = vld [vmem:[#allocation3 + $0xf0] sm:$0xff]  ;;  %v13330_v53 = vcombine.low %v20283_v44, %v20261_v48  ;;  %v13180_v19 = vcombine.low %v20271_v2, %v20254_v3 }
 0x330   : > { %11500 = vmatpush1.bf16.msra.mxu0 %v14741_v23  ;;  %11348 = vmatprep.mubr.bf16.mxu0 %v13329_v38  ;;  %v12320_v23 = vmax.f32 %v12064_v43, 0.0  ;;  %v5422_v38 = vshrl.u32 %v20298_v25, 16  ;;  %v5425_v59 = vshll.u32 %v20298_v25, 16  ;;  %v5437_v43 = vrot.slane %v5435_v22, 4  ;;  %12584 = vst [vmem:[%s18197_s13 + $0x488] sm:$0xff] %v12328_v34  ;;  %12591 = vst [vmem:[%s18197_s13 + $0x4c0] sm:$0xff] %v12335_v63 }
 0x331   : > { %11501 = vmatprep.subr.bf16.mxu0 %v14748_v4  ;;  %10555 = vmatpush1.bf16.msra.mxu1 %v14811_v20  ;;  %v5395_v4 = vrot.slane %v5393_v54, 5  ;;  %v20302_v20 = vpop.f32.mrb[207].mxu1  ;;  %v20352_v54 = vrot.slane %v5431_v30, 5  ;;  %v13333_v2 = vcombine.high %v20350_v26, %v20332_v56  ;;  %v5446_v30 = vshrl.u32 %v15040_v42, 16  ;;  %v20391_v22 = vld [vmem:[#allocation3 + $0x98] sm:$0xff] }
 0x332   : > { %10556 = vmatprep.subr.bf16.mxu1 %v14816_v37  ;;  %12576 = vst [vmem:[%s18197_s13 + $0x448] sm:$0xff] %v12320_v23  ;;  %v5403_v37 = vrot.slane %v5401_v52, 5  ;;  %v14786_v52 = vld [vmem:[%s21548_s3 + $0x754] ss:$8 sps:$4 sm:$0xff]   ;;  %v20374_v25 = vpop.f32.mrb[208].mxu1  ;;  %v12111_v42 = vadd.f32 %v21936_v0, %v20296_v12 }
 0x333   : > { %v20323_v29 = vsel %vm15624_vm15, %v5391_v60, %v5395_v4  ;;  %v5175_v23 = vld [vmem:[#allocation3 + $0x100] sm:$0x11]  ;;  %v12088_v60 = vadd.f32 %v21937_v1, %v20176_v10  ;;  %v12096_v4 = vadd.f32 %v21937_v1, %v20184_v46  ;;  %v20389_v6 = vpop.f32.mrb[209].mxu1 }
 0x334   : > { %11502 = vmatpush1.bf16.msra.mxu0 %v14746_v49  ;;  %v14775_v49 = vld [vmem:[%s21548_s3 + $0x744] ss:$8 sps:$4 sm:$0xff]   ;;  %v5404_v32 = vor.u32 %v5403_v37, %v5400_v39  ;;  %v14836_v10 = vld [vmem:[%s21548_s3 + $0x2f0] ss:$8 sps:$4 sm:$0xff]  }
 0x335   : > { %11503 = vmatprep.subr.bf16.mxu0 %v14753_v51  ;;  %10557 = vmatpush1.bf16.msra.mxu1 %v14814_v16  ;;  %v12327_v51 = vmax.f32 %v12071_v57, 0.0  ;;  %v12080_v16 = vadd.f32 %v21937_v1, %v20138_v7  ;;  %v14773_v7 = vld [vmem:[%s21548_s3 + $0x740] ss:$8 sps:$4 sm:$0xff]  }
 0x336   : > { %10434 = vmatmul.mubr.bf16.gmra.mrb[248].mxu1 %v13178_v14  ;;  %10558 = vmatprep.subr.bf16.mxu1 %v14824_v28  ;;  %v20339_v28 = vsel %vm15624_vm15, %v5381_v33, %v20227_v11  ;;  %v5415_v11 = vrot.slane %v5414_v55, 4  ;;  %v14833_v14 = vld [vmem:[%s21548_s3 + $0x2e0] ss:$8 sps:$4 sm:$0xff]   ;;  %v14797_v33 = vld [vmem:[%s21548_s3 + $0x764] ss:$8 sps:$4 sm:$0xff]  }
 0x337   : > { %10443 = vmatprep.mubr.bf16.mxu1 %v13181_v15  ;;  %11349 = vmatmul.mubr.bf16.gmra.mrb[36].mxu0 %v13328_v61  ;;  %12583 = vst [vmem:[%s18197_s13 + $0x480] sm:$0xff] %v12327_v51  ;;  %v12336_v3 = vmax.f32 %v12080_v16, 0.0  ;;  %v13183_v48 = vcombine.high %v20339_v28, %v20323_v29  ;;  %v5424_v15 = vrot.slane %v5422_v38, 4  ;;  %v5427_v61 = vrot.slane %v5425_v59, 5  ;;  %v15039_v39 = vld [vmem:[#allocation3 + $0x110] sm:$0xff] }
 0x338   : > { %11358 = vmatprep.mubr.bf16.mxu0 %v13331_v5  ;;  %11504 = vmatpush1.bf16.msra.mxu0 %v14751_v18  ;;  %v14838_v18 = vld [vmem:[%s21548_s3 + $0x2f4] ss:$8 sps:$4 sm:$0xff]   ;;  %v14784_v5 = vld [vmem:[%s21548_s3 + $0x750] ss:$8 sps:$4 sm:$0xff]   ;;  %v20378_v38 = vsel %vm15624_vm15, %v5415_v11, %v5419_v17  ;;  %v5455_v37 = vshll.u32 %v15039_v39, 16  ;;  %v5459_v55 = vshrl.u32 %v15039_v39, 16  ;;  %v13182_v46 = vcombine.low %v20339_v28, %v20323_v29 }
 0x339   : > { %11505 = vmatprep.subr.bf16.mxu0 %v14764_v41  ;;  %10559 = vmatpush1.bf16.msra.mxu1 %v14822_v27  ;;  %12592 = vst [vmem:[%s18197_s13 + $0x4c8] sm:$0xff] %v12336_v3  ;;  %v12087_v41 = vadd.f32 %v21936_v0, %v20166_v62  ;;  %v5405_v27 = vrot.slane %v5404_v32, 4  ;;  %v5438_v62 = vor.u32 %v5437_v43, %v20352_v54  ;;  %v14795_v59 = vld [vmem:[%s21548_s3 + $0x760] ss:$8 sps:$4 sm:$0xff]   ;;  %v5451_v3 = vrot.slane %v5449_v58, 5 }
 0x33a   : > { %10560 = vmatprep.subr.bf16.mxu1 %v14827_v24  ;;  %v12095_v24 = vadd.f32 %v21936_v0, %v20182_v9  ;;  %v13332_v16 = vcombine.low %v20350_v26, %v20332_v56  ;;  %v20414_v34 = vrot.slane %v5455_v37, 5  ;;  %v5461_v63 = vrot.slane %v5459_v55, 4  ;;  %v5176_v43 = vld [vmem:[#allocation3 + $0x118] sm:$0x11]  ;;  %v14819_v17 = vld [vmem:[%s21548_s3 + $0x784] ss:$8 sps:$4 sm:$0xff]  }
 0x33b   : > { %v12343_v9 = vmax.f32 %v12087_v41, 0.0  ;;  %v5410_v50 = vsel %vm15624_vm15, %v5405_v27, %v20276_v13  ;;  %v5439_v29 = vrot.slane %v5438_v62, 4  ;;  %v14808_v13 = vld [vmem:[%s21548_s3 + $0x774] ss:$8 sps:$4 sm:$0xff]   ;;  %v12104_v55 = vadd.f32 %v21937_v1, %v20250_v21 }
 0x33c   : > { %11506 = vmatpush1.bf16.msra.mxu0 %v14762_v40  ;;  %v12344_v40 = vmax.f32 %v12088_v60, 0.0  ;;  %v12351_v57 = vmax.f32 %v12095_v24, 0.0  ;;  %v13185_v51 = vcombine.high %v5410_v50, %v20378_v38  ;;  %v5462_v41 = vor.u32 %v5461_v63, %v20414_v34  ;;  %v20439_v60 = vld [vmem:[#allocation3 + $0xb0] sm:$0xff] }
 0x33d   : > { %11507 = vmatprep.subr.bf16.mxu0 %v14775_v49  ;;  %10561 = vmatpush1.bf16.msra.mxu1 %v14825_v45  ;;  %v5428_v49 = vor.u32 %v5427_v61, %v5424_v15  ;;  %v5441_v45 = vshll.u32 %v5175_v23, 16  ;;  %12599 = vst [vmem:[%s18197_s13 + $0x500] sm:$0xff] %v12343_v9  ;;  %v15042_v15 = vld [vmem:[#allocation3 + $0x120] sm:$0xff]  ;;  %v12103_v24 = vadd.f32 %v21936_v0, %v20242_v36  ;;  %v5465_v9 = vshll.u32 %v5176_v43, 16  ;;  %v15044_v43 = vld [vmem:[#allocation3 + $0x138] sm:$0xff] }
 0x33e   : > { %10444 = vmatmul.mubr.bf16.gmra.mrb[252].mxu1 %v13180_v19  ;;  %10562 = vmatprep.subr.bf16.mxu1 %v14835_v35  ;;  %12600 = vst [vmem:[%s18197_s13 + $0x508] sm:$0xff] %v12344_v40  ;;  %12607 = vst [vmem:[%s18197_s13 + $0x540] sm:$0xff] %v12351_v57  ;;  %v12352_v35 = vmax.f32 %v12096_v4, 0.0  ;;  %v20417_v19 = vpop.f32.mrb[210].mxu1  ;;  %v5470_v61 = vshrl.u32 %v15042_v15, 16  ;;  %v5473_v27 = vshll.u32 %v15042_v15, 16  ;;  %v13184_v62 = vcombine.low %v5410_v50, %v20378_v38 }
 0x33f   : > { %10453 = vmatprep.mubr.bf16.mxu1 %v13183_v48  ;;  %11359 = vmatmul.mubr.bf16.gmra.mrb[40].mxu0 %v13330_v53  ;;  %v20407_v53 = vld [vmem:[#allocation3 + $0x90] sm:$0xff]  ;;  %v5429_v28 = vrot.slane %v5428_v49, 4  ;;  %v5443_v32 = vrot.slane %v5441_v45, 5  ;;  %v14806_v48 = vld [vmem:[%s21548_s3 + $0x770] ss:$8 sps:$4 sm:$0xff]   ;;  %v20449_v4 = vld [vmem:[#allocation3 + $0xa8] sm:$0xff] }
 0x340   : > { %11368 = vmatprep.mubr.bf16.mxu0 %v13333_v2  ;;  %11508 = vmatpush1.bf16.msra.mxu0 %v14773_v7  ;;  %v13335_v31 = vcombine.high %v20407_v53, %v20391_v22  ;;  %12608 = vst [vmem:[%s18197_s13 + $0x548] sm:$0xff] %v12352_v35  ;;  %v20419_v7 = vpop.f32.mrb[211].mxu1  ;;  %v14830_v36 = vld [vmem:[%s21548_s3 + $0x794] ss:$8 sps:$4 sm:$0xff]   ;;  %v12359_v38 = vmax.f32 %v12103_v24, 0.0  ;;  %v13337_v40 = vcombine.high %v20449_v4, %v20439_v60  ;;  %v5463_v57 = vrot.slane %v5462_v41, 4 }
 0x341   : > { %11509 = vmatprep.subr.bf16.mxu0 %v14786_v52  ;;  %10563 = vmatpush1.bf16.msra.mxu1 %v14833_v14  ;;  %v5448_v52 = vrot.slane %v5446_v30, 4  ;;  %v20426_v11 = vsel %vm15624_vm15, %v5439_v29, %v5443_v32  ;;  %v15041_v14 = vld [vmem:[#allocation3 + $0x128] sm:$0xff]  ;;  %v20435_v23 = vsel %vm15624_vm15, %v5429_v28, %v20352_v54  ;;  %v5177_v30 = vld [vmem:[#allocation3 + $0x130] sm:$0x11]  ;;  %v5472_v49 = vrot.slane %v5470_v61, 4  ;;  %v20466_v35 = vpop.f32.mrb[212].mxu1 }
 0x342   : > { %10564 = vmatprep.subr.bf16.mxu1 %v14838_v18  ;;  %v5479_v2 = vshll.u32 %v15041_v14, 16  ;;  %v5483_v18 = vshrl.u32 %v15041_v14, 16  ;;  %v14817_v54 = vld [vmem:[%s21548_s3 + $0x780] ss:$8 sps:$4 sm:$0xff]   ;;  %v5475_v45 = vrot.slane %v5473_v27, 5  ;;  %12615 = vst [vmem:[%s18197_s13 + $0x580] sm:$0xff] %v12359_v38  ;;  %v13336_v61 = vcombine.low %v20449_v4, %v20439_v60 }
 0x343   : > { %v12360_v58 = vmax.f32 %v12104_v55, 0.0  ;;  %v5467_v21 = vrot.slane %v5465_v9, 5  ;;  %v14828_v50 = vld [vmem:[%s21548_s3 + $0x790] ss:$8 sps:$4 sm:$0xff]   ;;  %v20475_v29 = vpop.f32.mrb[213].mxu1  ;;  %v20482_v32 = vld [vmem:[#allocation3 + $0xc8] sm:$0xff] }
 0x344   : > { %11510 = vmatpush1.bf16.msra.mxu0 %v14784_v5  ;;  %v13334_v5 = vcombine.low %v20407_v53, %v20391_v22  ;;  %v20451_v39 = vrot.slane %v5479_v2, 5  ;;  %v5485_v37 = vrot.slane %v5483_v18, 4  ;;  %v5494_v14 = vshrl.u32 %v15044_v43, 16  ;;  %v20495_v41 = vld [vmem:[#allocation3 + $0xc0] sm:$0xff]  ;;  %v20505_v24 = vpop.f32.mrb[214].mxu1 }
 0x345   : > { %11511 = vmatprep.subr.bf16.mxu0 %v14797_v33  ;;  %10565 = vmatpush1.bf16.msra.mxu1 %v14836_v10  ;;  %v13187_v33 = vcombine.high %v20435_v23, %v20426_v11  ;;  %v5452_v10 = vor.u32 %v5451_v3, %v5448_v52  ;;  %12616 = vst [vmem:[%s18197_s13 + $0x588] sm:$0xff] %v12360_v58  ;;  %v5489_v3 = vshll.u32 %v5177_v30, 16  ;;  %v5497_v2 = vshll.u32 %v15044_v43, 16  ;;  %v5178_v38 = vld [vmem:[#allocation3 + $0x148] sm:$0x11]  ;;  %v15046_v58 = vld [vmem:[#allocation3 + $0x150] sm:$0xff] }
 0x346   : > { %10454 = vmatmul.mubr.bf16.gmra.mrb[0].mxu1 %v13182_v46  ;;  %v5486_v12 = vor.u32 %v5485_v37, %v20451_v39  ;;  %v5476_v52 = vor.u32 %v5475_v45, %v5472_v49  ;;  %v5496_v9 = vrot.slane %v5494_v14, 4  ;;  %v14844_v37 = vld [vmem:[%s21548_s3 + $0x7b0] ss:$8 sps:$4 sm:$0xff]   ;;  %v14851_v55 = vld [vmem:[%s21548_s3 + $0x7c4] ss:$8 sps:$4 sm:$0xff]   ;;  %v12120_v45 = vadd.f32 %v21937_v1, %v20389_v6 }
 0x347   : > { %10463 = vmatprep.mubr.bf16.mxu1 %v13185_v51  ;;  %11369 = vmatmul.mubr.bf16.gmra.mrb[44].mxu0 %v13332_v16  ;;  %v5453_v46 = vrot.slane %v5452_v10, 4  ;;  %v14841_v51 = vld [vmem:[%s21548_s3 + $0x7a4] ss:$8 sps:$4 sm:$0xff]   ;;  %v12112_v16 = vadd.f32 %v21937_v1, %v20302_v20  ;;  %v13186_v20 = vcombine.low %v20435_v23, %v20426_v11  ;;  %v14846_v11 = vld [vmem:[%s21548_s3 + $0x7b4] ss:$8 sps:$4 sm:$0xff]   ;;  %v20507_v10 = vpop.f32.mrb[215].mxu1 }
 0x348   : > { %11378 = vmatprep.mubr.bf16.mxu0 %v13335_v31  ;;  %11512 = vmatpush1.bf16.msra.mxu0 %v14795_v59  ;;  %v12367_v59 = vmax.f32 %v12111_v42, 0.0  ;;  %v15043_v31 = vld [vmem:[#allocation3 + $0x140] sm:$0xff]  ;;  %v5487_v27 = vrot.slane %v5486_v12, 4  ;;  %v15045_v42 = vld [vmem:[#allocation3 + $0x158] sm:$0xff]  ;;  %v14849_v6 = vld [vmem:[%s21548_s3 + $0x7c0] ss:$8 sps:$4 sm:$0xff]  }
 0x349   : > { %11513 = vmatprep.subr.bf16.mxu0 %v14808_v13  ;;  %v20479_v13 = vsel %vm15624_vm15, %v5463_v57, %v5467_v21  ;;  %v5503_v63 = vshll.u32 %v15043_v31, 16  ;;  %v5507_v28 = vshrl.u32 %v15043_v31, 16  ;;  %v5458_v18 = vsel %vm15624_vm15, %v5453_v46, %v20414_v34  ;;  %v20528_v12 = vld [vmem:[#allocation3 + $0xe0] sm:$0xff] }
 0x34a   : > { %12623 = vst [vmem:[%s18197_s13 + $0x5c0] sm:$0xff] %v12367_v59  ;;  %v13189_v15 = vcombine.high %v5458_v18, %v20479_v13  ;;  %v13339_v34 = vcombine.high %v20495_v41, %v20482_v32  ;;  %v5527_v30 = vshll.u32 %v15045_v42, 16  ;;  %v5531_v49 = vshrl.u32 %v15045_v42, 16 }
 0x34b   : > { %v20503_v23 = vrot.slane %v5503_v63, 5  ;;  %v5518_v46 = vshrl.u32 %v15046_v58, 16  ;;  %v5521_v21 = vshll.u32 %v15046_v58, 16  ;;  %v12376_v31 = vmax.f32 %v12120_v45, 0.0  ;;  %v14859_v58 = vld [vmem:[%s21548_s3 + $0x7e0] ss:$8 sps:$4 sm:$0xff]  }
 0x34c   : > { %11514 = vmatpush1.bf16.msra.mxu0 %v14806_v48  ;;  %v12368_v48 = vmax.f32 %v12112_v16, 0.0  ;;  %v20545_v43 = vrot.slane %v5527_v30, 5  ;;  %v5533_v14 = vrot.slane %v5531_v49, 4 }
 0x34d   : > { %11515 = vmatprep.subr.bf16.mxu0 %v14819_v17  ;;  %v14839_v17 = vld [vmem:[%s21548_s3 + $0x7a0] ss:$8 sps:$4 sm:$0xff]   ;;  %12632 = vst [vmem:[%s18197_s13 + $0x608] sm:$0xff] %v12376_v31  ;;  %v12135_v31 = vadd.f32 %v21936_v0, %v20466_v35  ;;  %v14868_v35 = vld [vmem:[%s21548_s3 + $0x804] ss:$8 sps:$4 sm:$0xff]  }
 0x34e   : > { %10464 = vmatmul.mubr.bf16.gmra.mrb[4].mxu1 %v13184_v62  ;;  %12624 = vst [vmem:[%s18197_s13 + $0x5c8] sm:$0xff] %v12368_v48  ;;  %v5477_v62 = vrot.slane %v5476_v52, 4  ;;  %v12127_v52 = vadd.f32 %v21936_v0, %v20417_v19  ;;  %v12128_v19 = vadd.f32 %v21937_v1, %v20419_v7 }
 0x34f   : > { %10473 = vmatprep.mubr.bf16.mxu1 %v13187_v33  ;;  %11379 = vmatmul.mubr.bf16.gmra.mrb[48].mxu0 %v13334_v5  ;;  %v5509_v5 = vrot.slane %v5507_v28, 4  ;;  %v5491_v33 = vrot.slane %v5489_v3, 5  ;;  %v20536_v28 = vld [vmem:[#allocation3 + $0xd8] sm:$0xff] }
 0x350   : > { %11388 = vmatprep.mubr.bf16.mxu0 %v13337_v40  ;;  %11516 = vmatpush1.bf16.msra.mxu0 %v14817_v54  ;;  %v5499_v54 = vrot.slane %v5497_v2, 5  ;;  %v12119_v40 = vadd.f32 %v21936_v0, %v20374_v25  ;;  %v5482_v59 = vsel %vm15624_vm15, %v5477_v62, %v20451_v39  ;;  %v14856_v39 = vld [vmem:[%s21548_s3 + $0x7d4] ss:$8 sps:$4 sm:$0xff]   ;;  %v13341_v3 = vcombine.high %v20536_v28, %v20528_v12 }
 0x351   : > { %11517 = vmatprep.subr.bf16.mxu0 %v14830_v36  ;;  %v20514_v36 = vsel %vm15624_vm15, %v5487_v27, %v5491_v33  ;;  %v5510_v57 = vor.u32 %v5509_v5, %v20503_v23  ;;  %v5179_v2 = vld [vmem:[#allocation3 + $0x160] sm:$0x11]  ;;  %v5523_v27 = vrot.slane %v5521_v21, 5  ;;  %v12384_v5 = vmax.f32 %v12128_v19, 0.0 }
 0x352   : > { %v5500_v25 = vor.u32 %v5499_v54, %v5496_v9  ;;  %v12375_v16 = vmax.f32 %v12119_v40, 0.0  ;;  %v13191_v63 = vcombine.high %v5482_v59, %v20514_v36  ;;  %v5534_v33 = vor.u32 %v5533_v14, %v20545_v43  ;;  %v15047_v9 = vld [vmem:[#allocation3 + $0x170] sm:$0xff]  ;;  %v20565_v40 = vld [vmem:[#allocation3 + $0xf8] sm:$0xff] }
 0x353   : > { %v5511_v48 = vrot.slane %v5510_v57, 4  ;;  %v5551_v54 = vshll.u32 %v15047_v9, 16  ;;  %v5537_v57 = vshll.u32 %v5179_v2, 16  ;;  %12640 = vst [vmem:[%s18197_s13 + $0x648] sm:$0xff] %v12384_v5  ;;  %v13190_v30 = vcombine.low %v5482_v59, %v20514_v36  ;;  %v14865_v36 = vld [vmem:[%s21548_s3 + $0x7f4] ss:$8 sps:$4 sm:$0xff]  }
 0x354   : > { %11518 = vmatpush1.bf16.msra.mxu0 %v14828_v50  ;;  %v13188_v50 = vcombine.low %v5458_v18, %v20479_v13  ;;  %v13338_v13 = vcombine.low %v20495_v41, %v20482_v32  ;;  %12631 = vst [vmem:[%s18197_s13 + $0x600] sm:$0xff] %v12375_v16  ;;  %v12383_v18 = vmax.f32 %v12127_v52, 0.0  ;;  %v13340_v21 = vcombine.low %v20536_v28, %v20528_v12  ;;  %v5180_v14 = vld [vmem:[#allocation3 + $0x178] sm:$0x11] }
 0x355   : > { %11519 = vmatprep.subr.bf16.mxu0 %v14841_v51  ;;  %v5513_v51 = vshll.u32 %v5178_v38, 16  ;;  %v15048_v38 = vld [vmem:[#allocation3 + $0x168] sm:$0xff]  ;;  %v5535_v59 = vrot.slane %v5534_v33, 4  ;;  %v5539_v16 = vrot.slane %v5537_v57, 5  ;;  %v20618_v57 = vld [vmem:[#allocation3] sm:$0xff] }
 0x356   : > { %10474 = vmatmul.mubr.bf16.gmra.mrb[8].mxu1 %v13186_v20  ;;  %v14854_v20 = vld [vmem:[%s21548_s3 + $0x7d0] ss:$8 sps:$4 sm:$0xff]   ;;  %12639 = vst [vmem:[%s18197_s13 + $0x640] sm:$0xff] %v12383_v18  ;;  %v5545_v42 = vshll.u32 %v15048_v38, 16  ;;  %v12391_v18 = vmax.f32 %v12135_v31, 0.0 }
 0x357   : > { %10483 = vmatprep.mubr.bf16.mxu1 %v13189_v15  ;;  %11389 = vmatmul.mubr.bf16.gmra.mrb[52].mxu0 %v13336_v61  ;;  %v5515_v15 = vrot.slane %v5513_v51, 5  ;;  %v5520_v61 = vrot.slane %v5518_v46, 4  ;;  %v5540_v2 = vsel %vm15624_vm15, %v5535_v59, %v5539_v16  ;;  %v15050_v59 = vld [vmem:[#allocation3 + $0x10] sm:$0x11] }
 0x358   : > { %11398 = vmatprep.mubr.bf16.mxu0 %v13339_v34  ;;  %11520 = vmatpush1.bf16.msra.mxu0 %v14839_v17  ;;  %v5501_v17 = vrot.slane %v5500_v25, 4  ;;  %v14861_v34 = vld [vmem:[%s21548_s3 + $0x7e4] ss:$8 sps:$4 sm:$0xff]   ;;  %v5553_v25 = vrot.slane %v5551_v54, 5  ;;  %v5547_v52 = vrot.slane %v5545_v42, 5  ;;  %12647 = vst [vmem:[%s18197_s13 + $0x680] sm:$0xff] %v12391_v18 }
 0x359   : > { %11521 = vmatprep.subr.bf16.mxu0 %v14846_v11  ;;  %v20554_v11 = vpop.f32.mrb[216].mxu1  ;;  %v5516_v7 = vsel %vm15624_vm15, %v5511_v48, %v5515_v15  ;;  %v5524_v45 = vor.u32 %v5523_v27, %v5520_v61  ;;  %v12136_v48 = vadd.f32 %v21937_v1, %v20475_v29  ;;  %v12143_v15 = vadd.f32 %v21936_v0, %v20505_v24  ;;  %v15051_v18 = vld [vmem:[#allocation3 + $0x20] sm:$0xff] }
 0x35a   : > { %v20560_v62 = vpop.f32.mrb[217].mxu1  ;;  %v5506_v49 = vsel %vm15624_vm15, %v5501_v17, %v20503_v23  ;;  %v20600_v17 = vld [vmem:[#allocation3 + $0x110] sm:$0xff]  ;;  %v12144_v24 = vadd.f32 %v21937_v1, %v20507_v10  ;;  %v5631_v42 = vrot.slane %v20618_v57, 5 }
 0x35b   : > { %v13193_v46 = vcombine.high %v5506_v49, %v5516_v7  ;;  %v12392_v19 = vmax.f32 %v12136_v48, 0.0  ;;  %v13192_v61 = vcombine.low %v5506_v49, %v5516_v7  ;;  %v12399_v54 = vmax.f32 %v12143_v15, 0.0  ;;  %v5565_v49 = vld [vmem:[#allocation3] sm:$0xee] }
 0x35c   : > { %11522 = vmatpush1.bf16.msra.mxu0 %v14844_v37  ;;  %v5555_v37 = vshrl.u32 %v15047_v9, 16  ;;  %v20611_v9 = vld [vmem:[#allocation3 + $0x108] sm:$0xff] }
 0x35d   : > { %11523 = vmatprep.subr.bf16.mxu0 %v14851_v55  ;;  %v5542_v55 = vshrl.u32 %v15048_v38, 16  ;;  %12648 = vst [vmem:[%s18197_s13 + $0x688] sm:$0xff] %v12392_v19  ;;  %12655 = vst [vmem:[%s18197_s13 + $0x6c0] sm:$0xff] %v12399_v54  ;;  %v13344_v31 = vcombine.low %v20611_v9, %v20600_v17  ;;  %v5638_v19 = vrot.slane %v15051_v18, 5 }
 0x35e   : > { %10484 = vmatmul.mubr.bf16.gmra.mrb[12].mxu1 %v13188_v50  ;;  %v20577_v50 = vld [vmem:[#allocation3 + $0xf0] sm:$0xff]  ;;  %v5557_v51 = vrot.slane %v5555_v37, 4  ;;  %v12400_v37 = vmax.f32 %v12144_v24, 0.0  ;;  %v5566_v24 = vld [vmem:[#allocation3 + $0x18] sm:$0xee] }
 0x35f   : > { %10493 = vmatprep.mubr.bf16.mxu1 %v13191_v63  ;;  %11399 = vmatmul.mubr.bf16.gmra.mrb[56].mxu0 %v13338_v13  ;;  %v13343_v23 = vcombine.high %v20577_v50, %v20565_v40  ;;  %v5525_v13 = vrot.slane %v5524_v45, 4  ;;  %v13342_v33 = vcombine.low %v20577_v50, %v20565_v40  ;;  %v5640_v54 = vrot.slane %v5638_v19, 4 }
 0x360   : > { %11408 = vmatprep.mubr.bf16.mxu0 %v13341_v3  ;;  %11524 = vmatpush1.bf16.msra.mxu0 %v14849_v6  ;;  %v20584_v6 = vpop.f32.mrb[218].mxu1  ;;  %v14863_v3 = vld [vmem:[%s21548_s3 + $0x7f0] ss:$8 sps:$4 sm:$0xff]   ;;  %12656 = vst [vmem:[%s18197_s13 + $0x6c8] sm:$0xff] %v12400_v37  ;;  %v13087_v37 = vrot.slane %v5566_v24, 9 }
 0x361   : > { %11525 = vmatprep.subr.bf16.mxu0 %v14856_v39  ;;  %v20588_v63 = vpop.f32.mrb[219].mxu1  ;;  %v5544_v39 = vrot.slane %v5542_v55, 4  ;;  %v5530_v29 = vsel %vm15624_vm15, %v5525_v13, %v20545_v43  ;;  %v13345_v43 = vcombine.high %v20611_v9, %v20600_v17  ;;  %v20630_v13 = vld [vmem:[#allocation3 + $0x120] sm:$0xff] }
 0x362   : > { %v13195_v5 = vcombine.high %v5530_v29, %v5540_v2 }
 0x363   : > { %v5548_v27 = vor.u32 %v5547_v52, %v5544_v39  ;;  %v12151_v39 = vadd.f32 %v21936_v0, %v20554_v11 }
 0x364   : > { %11526 = vmatpush1.bf16.msra.mxu0 %v14854_v20  ;;  %v5558_v20 = vor.u32 %v5557_v51, %v5553_v25  ;;  %v5634_v51 = vrot.slane %v15050_v59, 5  ;;  %v20668_v59 = vld [vmem:[#allocation3 + $0x150] sm:$0xff] }
 0x365   : > { %11527 = vmatprep.subr.bf16.mxu0 %v14861_v34  ;;  %v5561_v34 = vshll.u32 %v5180_v14, 16  ;;  %v5549_v38 = vrot.slane %v5548_v27, 4 }
 0x366   : > { %10494 = vmatmul.mubr.bf16.gmra.mrb[16].mxu1 %v13190_v30  ;;  %v5559_v7 = vrot.slane %v5558_v20, 4  ;;  %v8411_v30 = vpop.f32.mrb[220].mxu1  ;;  %v12159_v20 = vadd.f32 %v21936_v0, %v20584_v6 }
 0x367   : > { %10503 = vmatprep.mubr.bf16.mxu1 %v13193_v46  ;;  %11409 = vmatmul.mubr.bf16.gmra.mrb[60].mxu0 %v13340_v21  ;;  %v5563_v55 = vrot.slane %v5561_v34, 5  ;;  %v8413_v10 = vpop.f32.mrb[221].mxu1  ;;  %v20624_v46 = vld [vmem:[#allocation3 + $0x128] sm:$0xff]  ;;  %v5554_v21 = vsel %vm15624_vm15, %v5549_v38, %v5553_v25  ;;  %v12152_v25 = vadd.f32 %v21937_v1, %v20560_v62  ;;  %v20646_v62 = vld [vmem:[#allocation3 + $0x140] sm:$0xff] }
 0x368   : > { %11418 = vmatprep.mubr.bf16.mxu0 %v13343_v23  ;;  %11528 = vmatpush1.bf16.msra.mxu0 %v14859_v58  ;;  %v13194_v58 = vcombine.low %v5530_v29, %v5540_v2  ;;  %v5633_v23 = vrot.slane %v5631_v42, 4  ;;  %v13347_v52 = vcombine.high %v20630_v13, %v20624_v46  ;;  %v12160_v29 = vadd.f32 %v21937_v1, %v20588_v63 }
 0x369   : > { %11529 = vmatprep.subr.bf16.mxu0 %v14865_v36  ;;  %v5564_v45 = vsel %vm15624_vm15, %v5559_v7, %v5563_v55  ;;  %v13086_v36 = vrot.slane %v5565_v49, 9  ;;  %v12408_v2 = vmax.f32 %v12152_v25, 0.0  ;;  %v13346_v34 = vcombine.low %v20630_v13, %v20624_v46  ;;  %v15053_v55 = vld [vmem:[#allocation3 + $0x38] sm:$0xff] }
 0x36a   : > { %v13197_v16 = vcombine.high %v5554_v21, %v5564_v45  ;;  %v5635_v11 = vsel %vm15573_vm12, %v5633_v23, %v5634_v51  ;;  %v13196_v27 = vcombine.low %v5554_v21, %v5564_v45  ;;  %v12416_v6 = vmax.f32 %v12160_v29, 0.0  ;;  %v20660_v49 = vld [vmem:[#allocation3 + $0x158] sm:$0xff] }
 0x36b   : > { %v5632_v14 = vsel %vm15573_vm12, %v13086_v36, %v5631_v42  ;;  %12664 = vst [vmem:[%s18197_s13 + $0x708] sm:$0xff] %v12408_v2  ;;  %v5645_v42 = vrot.slane %v15053_v55, 5  ;;  %v12167_v45 = vadd.f32 %v21936_v0, %v8411_v30  ;;  %v12168_v21 = vadd.f32 %v21937_v1, %v8413_v10  ;;  %v15054_v10 = vld [vmem:[#allocation3 + $0x40] sm:$0x11]  ;;  %v15055_v2 = vld [vmem:[#allocation3 + $0x50] sm:$0xff] }
 0x36c   : > { %11530 = vmatpush1.bf16.msra.mxu0 %v14863_v3  ;;  %v8415_v3 = vpop.f32.mrb[222].mxu1  ;;  %v13199_v15 = vcombine.high %v5632_v14, %v5635_v11  ;;  %12672 = vst [vmem:[%s18197_s13 + $0x748] sm:$0xff] %v12416_v6  ;;  %v13198_v7 = vcombine.low %v5632_v14, %v5635_v11  ;;  %v13351_v51 = vcombine.high %v20668_v59, %v20660_v49  ;;  %v15056_v6 = vld [vmem:[#allocation3 + $0x58] sm:$0x11] }
 0x36d   : > { %11692 = vmatprep.subr.bf16.mxu0 %v14868_v35  ;;  %v8417_v48 = vpop.f32.mrb[223].mxu1  ;;  %v12407_v35 = vmax.f32 %v12151_v39, 0.0  ;;  %v12424_v30 = vmax.f32 %v12168_v21, 0.0  ;;  %v5567_v39 = vld [vmem:[#allocation3 + $0x30] sm:$0xee]  ;;  %v12175_v25 = vadd.f32 %v21936_v0, %v8415_v3  ;;  %v13350_v0 = vcombine.low %v20668_v59, %v20660_v49 }
 0x36e   : > { %10504 = vmatmul.mubr.bf16.gmra.mrb[20].mxu1 %v13192_v61  ;;  %v12415_v61 = vmax.f32 %v12159_v20, 0.0  ;;  %v12176_v14 = vadd.f32 %v21937_v1, %v8417_v48  ;;  %v13088_v11 = vrot.slane %v5567_v39, 9  ;;  %v5652_v20 = vrot.slane %v15055_v2, 5  ;;  %v20685_v1 = vld [vmem:[#allocation3 + $0x168] sm:$0xff]  ;;  %v5569_v39 = vld [vmem:[#allocation3 + $0x60] sm:$0xee] }
 0x36f   : > { %10513 = vmatprep.mubr.bf16.mxu1 %v13195_v5  ;;  %11419 = vmatmul.mubr.bf16.gmra.mrb[64].mxu0 %v13342_v33  ;;  %12663 = vst [vmem:[%s18197_s13 + $0x700] sm:$0xff] %v12407_v35  ;;  %v20652_v5 = vld [vmem:[#allocation3 + $0x138] sm:$0xff]  ;;  %12680 = vst [vmem:[%s18197_s13 + $0x788] sm:$0xff] %v12424_v30  ;;  %v12431_v18 = vmax.f32 %v12175_v25, 0.0  ;;  %v15060_v25 = vld [vmem:[#allocation3 + $0x70] sm:$0x11] }
 0x370   : > { %11428 = vmatprep.mubr.bf16.mxu0 %v13345_v43  ;;  %12671 = vst [vmem:[%s18197_s13 + $0x740] sm:$0xff] %v12415_v61  ;;  %v13349_v33 = vcombine.high %v20652_v5, %v20646_v62  ;;  %v15052_v43 = vld [vmem:[#allocation3 + $0x28] sm:$0x11]  ;;  %v13348_v23 = vcombine.low %v20652_v5, %v20646_v62  ;;  %v5646_v29 = vsel %vm15573_vm12, %v13088_v11, %v5645_v42  ;;  %v5654_v48 = vrot.slane %v5652_v20, 4 }
 0x371   : > { %v5641_v63 = vrot.slane %v15052_v43, 5  ;;  %12687 = vst [vmem:[%s18197_s13 + $0x7c0] sm:$0xff] %v12431_v18  ;;  %v15057_v43 = vld [vmem:[#allocation3 + $0x68] sm:$0xff]  ;;  %v13090_v2 = vrot.slane %v5569_v39, 9  ;;  %v15061_v18 = vld [vmem:[#allocation3 + $0x80] sm:$0xff] }
 0x373   : > { %v5642_v38 = vsel %vm15573_vm12, %v5640_v54, %v5641_v63  ;;  %v5659_v63 = vrot.slane %v15057_v43, 5  ;;  %v13357_v43 = vcombine.high %v20618_v57, %v20618_v57 }
 0x375   : > { %v5661_v30 = vrot.slane %v5659_v63, 4 }
 0x376   : > { %10514 = vmatmul.mubr.bf16.gmra.mrb[24].mxu1 %v13194_v58  ;;  %v5639_v58 = vsel %vm15573_vm12, %v13087_v37, %v5638_v19  ;;  %v20678_v19 = vld [vmem:[#allocation3 + $0x170] sm:$0xff]  ;;  %v15058_v37 = vld [vmem:[#allocation3 + $0x38] sm:$0xff] }
 0x377   : > { %10523 = vmatprep.mubr.bf16.mxu1 %v13197_v16  ;;  %11429 = vmatmul.mubr.bf16.gmra.mrb[68].mxu0 %v13344_v31  ;;  %v13201_v36 = vcombine.high %v5639_v58, %v5642_v38  ;;  %v5647_v16 = vrot.slane %v5645_v42, 4  ;;  %v12423_v31 = vmax.f32 %v12167_v45, 0.0  ;;  %v13200_v61 = vcombine.low %v5639_v58, %v5642_v38  ;;  %v15059_v58 = vld [vmem:[#allocation3 + $0x30] sm:$0xff] }
 0x378   : > { %11438 = vmatprep.mubr.bf16.mxu0 %v13347_v52  ;;  %v5648_v52 = vrot.slane %v15054_v10, 5  ;;  %v13353_v3 = vcombine.high %v20685_v1, %v20678_v19  ;;  %v6408_v38 = vshll.u32 %v15058_v37, 16  ;;  %v6412_v55 = vshrl.u32 %v15058_v37, 16 }
 0x379   : > { %12679 = vst [vmem:[%s18197_s13 + $0x780] sm:$0xff] %v12423_v31  ;;  %v6399_v21 = vshrl.u32 %v15059_v58, 16 }
 0x37a   : > { %v5649_v35 = vsel %vm15573_vm12, %v5647_v16, %v5648_v52  ;;  %v20698_v16 = vld [vmem:[#allocation3 + $0x180] sm:$0xff]  ;;  %v6410_v10 = vrot.slane %v6408_v38, 5  ;;  %v6414_v52 = vrot.slane %v6412_v55, 4 }
 0x37b   : > { %v13202_v42 = vcombine.low %v5646_v29, %v5649_v35  ;;  %v6401_v11 = vrot.slane %v6399_v21, 4  ;;  %v5570_v21 = vld [vmem:[#allocation3 + $0x78] sm:$0xee] }
 0x37e   : > { %10524 = vmatmul.mubr.bf16.gmra.mrb[28].mxu1 %v13196_v27  ;;  %v13203_v27 = vcombine.high %v5646_v29, %v5649_v35  ;;  %v15062_v29 = vld [vmem:[#allocation3 + $0x48] sm:$0xff] }
 0x37f   : > { %11439 = vmatmul.mubr.bf16.gmra.mrb[72].mxu0 %v13346_v34  ;;  %10566 = vmatprep.mubr.bf16.mxu1 %v13199_v15  ;;  %v12432_v15 = vmax.f32 %v12176_v14, 0.0  ;;  %v5568_v34 = vld [vmem:[#allocation3 + $0x48] sm:$0xee]  ;;  %v5662_v14 = vrot.slane %v15060_v25, 5 }
 0x380   : > { %11448 = vmatprep.mubr.bf16.mxu0 %v13349_v33  ;;  %v5655_v33 = vrot.slane %v15056_v6, 5  ;;  %v13089_v54 = vrot.slane %v5568_v34, 9  ;;  %v6426_v6 = vshll.u32 %v15062_v29, 16 }
 0x381   : > { %12688 = vst [vmem:[%s18197_s13 + $0x7c8] sm:$0xff] %v12432_v15  ;;  %v5666_v15 = vrot.slane %v15061_v18, 5  ;;  %v20715_v18 = vld [vmem:[#allocation3 + $0x58] sm:$0x11] }
 0x382   : > { %v5656_v24 = vsel %vm15573_vm12, %v5654_v48, %v5655_v33  ;;  %v5653_v45 = vsel %vm15573_vm12, %v13089_v54, %v5652_v20  ;;  %v5663_v20 = vsel %vm15573_vm12, %v5661_v30, %v5662_v14  ;;  %v5660_v54 = vsel %vm15573_vm12, %v13090_v2, %v5659_v63  ;;  %v15065_v63 = vld [vmem:[#allocation3 + $0x98] sm:$0xff] }
 0x383   : > { %v13204_v33 = vcombine.low %v5653_v45, %v5656_v24  ;;  %v13207_v37 = vcombine.high %v5660_v54, %v5663_v20  ;;  %v6428_v25 = vrot.slane %v6426_v6, 5  ;;  %v6447_v14 = vshrl.u32 %v20283_v44, 16 }
 0x384   : > { %v13356_v2 = vcombine.low %v20618_v57, %v20618_v57 }
 0x386   : > { %10567 = vmatmul.mubr.bf16.vlgmr.msra.gmra.mrb[224].mxu1 %v13198_v7  ;;  %v20692_v7 = vld [vmem:[#allocation3 + $0x188] sm:$0xff] }
 0x387   : > { %10576 = vmatprep.mubr.bf16.mxu1 %v13201_v36  ;;  %11449 = vmatmul.mubr.bf16.gmra.mrb[76].mxu0 %v13348_v23  ;;  %v6402_v36 = vshll.u32 %v15059_v58, 16  ;;  %v13205_v23 = vcombine.high %v5653_v45, %v5656_v24  ;;  %v13355_v31 = vcombine.high %v20698_v16, %v20692_v7  ;;  %v13354_v38 = vcombine.low %v20698_v16, %v20692_v7  ;;  %v15064_v45 = vld [vmem:[#allocation3 + $0x88] sm:$0x11] }
 0x388   : > { %11458 = vmatprep.mubr.bf16.mxu0 %v13351_v51  ;;  %v13352_v51 = vcombine.low %v20685_v1, %v20678_v19  ;;  %v5668_v58 = vrot.slane %v5666_v15, 4 }
 0x389   : > { %v6404_v35 = vrot.slane %v6402_v36, 5 }
 0x38b   : > { %v6405_v55 = vor.u32 %v6404_v35, %v6401_v11  ;;  %v13091_v11 = vrot.slane %v5570_v21, 9 }
 0x38d   : > { %v6406_v30 = vrot.slane %v6405_v55, 4  ;;  %v5667_v6 = vsel %vm15573_vm12, %v13091_v11, %v5666_v15  ;;  %v6442_v55 = vshll.u32 %v20715_v18, 16 }
 0x38e   : > { %10577 = vmatmul.mubr.bf16.gmra.mrb[228].mxu1 %v13200_v61  ;;  %v6382_v61 = vld [vmem:[#allocation3 + $0x40] sm:$0x11] }
 0x38f   : > { %10586 = vmatprep.mubr.bf16.mxu1 %v13203_v27  ;;  %11459 = vmatmul.mubr.bf16.gmra.mrb[80].mxu0 %v13350_v0  ;;  %v6423_v27 = vshrl.u32 %v15062_v29, 16  ;;  %v6415_v0 = vor.u32 %v6414_v52, %v6410_v10 }
 0x390   : > { %11468 = vmatprep.mubr.bf16.mxu0 %v13353_v3  ;;  %v15063_v3 = vld [vmem:[#allocation3 + $0x50] sm:$0xff] }
 0x391   : > { %v6432_v48 = vshll.u32 %v15063_v3, 16  ;;  %v6436_v34 = vshrl.u32 %v15063_v3, 16  ;;  %v6416_v36 = vrot.slane %v6415_v0, 4  ;;  %v6425_v52 = vrot.slane %v6423_v27, 4  ;;  %v20719_v0 = vld [vmem:[#allocation3 + $0x68] sm:$0xff] }
 0x392   : > { %v6456_v27 = vshll.u32 %v20719_v0, 16  ;;  %v6460_v3 = vshrl.u32 %v20719_v0, 16 }
 0x393   : > { %v6438_v24 = vrot.slane %v6436_v34, 4  ;;  %v13206_v34 = vcombine.low %v5660_v54, %v5663_v20 }
 0x394   : > { %v20729_v20 = vrot.slane %v6456_v27, 5  ;;  %v6462_v54 = vrot.slane %v6460_v3, 4  ;;  %v6474_v27 = vshll.u32 %v20350_v26, 16 }
 0x396   : > { %10587 = vmatmul.mubr.bf16.gmra.mrb[232].mxu1 %v13202_v42  ;;  %v6418_v42 = vshll.u32 %v6382_v61, 16  ;;  %v6463_v11 = vor.u32 %v6462_v54, %v20729_v20 }
 0x397   : > { %10596 = vmatprep.mubr.bf16.mxu1 %v13205_v23  ;;  %11469 = vmatmul.mubr.bf16.gmra.mrb[84].mxu0 %v13352_v51  ;;  %v6434_v23 = vrot.slane %v6432_v48, 5  ;;  %v5669_v51 = vrot.slane %v15064_v45, 5  ;;  %v6450_v48 = vshll.u32 %v20283_v44, 16  ;;  %v6449_v45 = vrot.slane %v6447_v14, 4 }
 0x398   : > { %11478 = vmatprep.mubr.bf16.mxu0 %v13355_v31  ;;  %v5673_v31 = vrot.slane %v15065_v63, 5  ;;  %v6420_v39 = vrot.slane %v6418_v42, 5  ;;  %v6471_v14 = vshrl.u32 %v20350_v26, 16 }
 0x399   : > { %v5670_v35 = vsel %vm15573_vm12, %v5668_v58, %v5669_v51  ;;  %v6439_v29 = vor.u32 %v6438_v24, %v6434_v23  ;;  %v15067_v58 = vld [vmem:[#allocation3 + $0xa0] sm:$0x11]  ;;  %v6444_v24 = vrot.slane %v6442_v55, 5  ;;  %v6452_v51 = vrot.slane %v6450_v48, 5  ;;  %v14866_v48 = vld [vmem:[%s21548_s3 + $0x800] ss:$8 sps:$4 sm:$0xff]  }
 0x39a   : > { %v6421_v61 = vsel %vm15624_vm15, %v6416_v36, %v6420_v39  ;;  %v13209_v57 = vcombine.high %v5667_v6, %v5670_v35  ;;  %v5676_v21 = vrot.slane %v15067_v58, 5  ;;  %v13208_v3 = vcombine.low %v5667_v6, %v5670_v35  ;;  %v5572_v6 = vld [vmem:[#allocation3 + $0xa8] sm:$0xee] }
 0x39b   : > { %v6440_v44 = vrot.slane %v6439_v29, 4  ;;  %v6484_v29 = vshrl.u32 %v20332_v56, 16  ;;  %v15070_v58 = vld [vmem:[#allocation3 + $0xc8] sm:$0xff] }
 0x39e   : > { %10597 = vmatmul.mubr.bf16.gmra.mrb[236].mxu1 %v13204_v33  ;;  %v5675_v33 = vrot.slane %v5673_v31, 4 }
 0x39f   : > { %10606 = vmatprep.mubr.bf16.mxu1 %v13207_v37  ;;  %11479 = vmatmul.mubr.bf16.gmra.mrb[88].mxu0 %v13354_v38  ;;  %v5571_v37 = vld [vmem:[#allocation3 + $0x90] sm:$0xee]  ;;  %v6429_v38 = vor.u32 %v6428_v25, %v6425_v52  ;;  %v20737_v52 = vld [vmem:[#allocation3 + $0x70] sm:$0x11]  ;;  %v20741_v25 = vsel %vm15624_vm15, %v6440_v44, %v6444_v24  ;;  %v6476_v24 = vrot.slane %v6474_v27, 5 }
 0x3a0   : > { %11488 = vmatprep.mubr.bf16.mxu0 %v13357_v43  ;;  %v6411_v43 = vsel %vm15624_vm15, %v6406_v30, %v6410_v10  ;;  %v13092_v15 = vrot.slane %v5571_v37, 9  ;;  %v20733_v36 = vsel %vm15573_vm12, %v5675_v33, %v5676_v21  ;;  %v15068_v30 = vld [vmem:[#allocation3 + $0xb0] sm:$0xff]  ;;  %v6466_v37 = vshll.u32 %v20737_v52, 16 }
 0x3a1   : > { %v13359_v42 = vcombine.high %v6411_v43, %v6421_v61  ;;  %v6430_v10 = vrot.slane %v6429_v38, 4  ;;  %v5680_v39 = vrot.slane %v15068_v30, 5  ;;  %v6464_v38 = vrot.slane %v6463_v11, 4 }
 0x3a2   : > { %v5674_v63 = vsel %vm15573_vm12, %v13092_v15, %v5673_v31  ;;  %v5687_v21 = vrot.slane %v15070_v58, 5  ;;  %v6468_v54 = vrot.slane %v6466_v37, 5  ;;  %v14874_v15 = vld [vmem:[%s21548_s3 + $0x824] ss:$8 sps:$4 sm:$0xff]   ;;  %v13093_v30 = vrot.slane %v5572_v6, 9 }
 0x3a3   : > { %v13211_v31 = vcombine.high %v5674_v63, %v20733_v36  ;;  %v6435_v33 = vsel %vm15624_vm15, %v6430_v10, %v6434_v23  ;;  %v5682_v35 = vrot.slane %v5680_v39, 4  ;;  %v15069_v23 = vld [vmem:[#allocation3 + $0xb8] sm:$0x11]  ;;  %v6473_v10 = vrot.slane %v6471_v14, 4 }
 0x3a4   : > { %v13361_v26 = vcombine.high %v6435_v33, %v20741_v25  ;;  %v6508_v14 = vshrl.u32 %v20391_v22, 16  ;;  %v13210_v27 = vcombine.low %v5674_v63, %v20733_v36  ;;  %v14877_v63 = vld [vmem:[%s21548_s3 + $0x834] ss:$8 sps:$4 sm:$0xff]  }
 0x3a6   : > { %10607 = vmatmul.mubr.bf16.gmra.mrb[240].mxu1 %v13206_v34  ;;  %v13358_v34 = vcombine.low %v6411_v43, %v6421_v61  ;;  %v6486_v61 = vrot.slane %v6484_v29, 4  ;;  %v5683_v43 = vrot.slane %v15069_v23, 5  ;;  %v6469_v29 = vsel %vm15624_vm15, %v6464_v38, %v6468_v54  ;;  %v14875_v23 = vld [vmem:[%s21548_s3 + $0x830] ss:$8 sps:$4 sm:$0xff]   ;;  %v14880_v54 = vld [vmem:[%s21548_s3 + $0x844] ss:$8 sps:$4 sm:$0xff]  }
 0x3a7   : > { %10616 = vmatprep.mubr.bf16.mxu1 %v13209_v57  ;;  %11489 = vmatmul.mubr.bf16.gmra.mrb[92].mxu0 %v13356_v2  ;;  %v6480_v2 = vshll.u32 %v20332_v56, 16  ;;  %v14871_v57 = vld [vmem:[%s21548_s3 + $0x814] ss:$8 sps:$4 sm:$0xff]   ;;  %v6453_v56 = vor.u32 %v6452_v51, %v6449_v45  ;;  %v6495_v45 = vshrl.u32 %v20407_v53, 16  ;;  %v6498_v51 = vshll.u32 %v20407_v53, 16 }
 0x3a8   : > { %11531 = vmatprep.mubr.bf16.mxu0 %v13359_v42  ;;  %v14869_v42 = vld [vmem:[%s21548_s3 + $0x810] ss:$8 sps:$4 sm:$0xff]   ;;  %v5684_v11 = vsel %vm15573_vm12, %v5682_v35, %v5683_v43  ;;  %v5681_v53 = vsel %vm15573_vm12, %v13093_v30, %v5680_v39  ;;  %v6510_v38 = vrot.slane %v6508_v14, 4  ;;  %v6519_v14 = vshrl.u32 %v20449_v4, 16 }
 0x3a9   : > { %v20759_v55 = vrot.slane %v6480_v2, 5  ;;  %v6454_v44 = vrot.slane %v6453_v56, 4  ;;  %v20771_v2 = vld [vmem:[#allocation3 + $0x88] sm:$0x11]  ;;  %v13213_v56 = vcombine.high %v5681_v53, %v5684_v11  ;;  %v6497_v58 = vrot.slane %v6495_v45, 4 }
 0x3aa   : > { %v6490_v36 = vshll.u32 %v20771_v2, 16  ;;  %v20808_v30 = vld [vmem:[#allocation3 + $0xa0] sm:$0x11]  ;;  %v6528_v45 = vshll.u32 %v20439_v60, 16 }
 0x3ab   : > { %v6459_v37 = vsel %vm15624_vm15, %v6454_v44, %v20729_v20  ;;  %v6500_v44 = vrot.slane %v6498_v51, 5  ;;  %v6532_v51 = vshrl.u32 %v20439_v60, 16  ;;  %v6514_v60 = vshll.u32 %v20808_v30, 16 }
 0x3ac   : > { %v13363_v39 = vcombine.high %v6459_v37, %v6469_v29 }
 0x3ae   : > { %10617 = vmatmul.mubr.bf16.gmra.mrb[244].mxu1 %v13208_v3  ;;  %v6487_v3 = vor.u32 %v6486_v61, %v20759_v55 }
 0x3af   : > { %10626 = vmatprep.mubr.bf16.mxu1 %v13211_v31  ;;  %11532 = vmatmul.mubr.bf16.vlgmr.msra.gmra.mrb[32].mxu0 %v13358_v34  ;;  %v6504_v31 = vshll.u32 %v20391_v22, 16  ;;  %v5689_v34 = vrot.slane %v5687_v21, 4  ;;  %v6477_v22 = vor.u32 %v6476_v24, %v6473_v10  ;;  %v15072_v10 = vld [vmem:[#allocation3 + $0xe0] sm:$0xff] }
 0x3b0   : > { %11693 = vmatpush1.bf16.msra.mxu0 %v14866_v48  ;;  %11541 = vmatprep.mubr.bf16.mxu0 %v13361_v26  ;;  %v13360_v48 = vcombine.low %v6435_v33, %v20741_v25  ;;  %v5573_v26 = vld [vmem:[#allocation3 + $0xc0] sm:$0xee]  ;;  %v15071_v25 = vld [vmem:[#allocation3 + $0xd0] sm:$0x11]  ;;  %v6488_v35 = vrot.slane %v6487_v3, 4  ;;  %v5694_v24 = vrot.slane %v15072_v10, 5 }
 0x3b1   : > { %11694 = vmatprep.subr.bf16.mxu0 %v14871_v57  ;;  %v14872_v57 = vld [vmem:[%s21548_s3 + $0x820] ss:$8 sps:$4 sm:$0xff]   ;;  %v5690_v33 = vrot.slane %v15071_v25, 5  ;;  %v20792_v6 = vrot.slane %v6504_v31, 5  ;;  %v13094_v20 = vrot.slane %v5573_v26, 9  ;;  %v6478_v43 = vrot.slane %v6477_v22, 4 }
 0x3b2   : > { %v6501_v26 = vor.u32 %v6500_v44, %v6497_v58  ;;  %v5574_v22 = vld [vmem:[#allocation3 + $0xd8] sm:$0xee]  ;;  %v6546_v58 = vshll.u32 %v20495_v41, 16  ;;  %v20844_v10 = vld [vmem:[#allocation3 + $0xb8] sm:$0x11] }
 0x3b3   : > { %v20796_v61 = vsel %vm15573_vm12, %v5689_v34, %v5690_v33  ;;  %v6511_v31 = vor.u32 %v6510_v38, %v20792_v6  ;;  %v14878_v34 = vld [vmem:[%s21548_s3 + $0x840] ss:$8 sps:$4 sm:$0xff]   ;;  %v14881_v33 = vld [vmem:[%s21548_s3 + $0x850] ss:$8 sps:$4 sm:$0xff]   ;;  %v6516_v38 = vrot.slane %v6514_v60, 5  ;;  %v13095_v44 = vrot.slane %v5574_v22, 9 }
 0x3b4   : > { %11695 = vmatpush1.bf16.msra.mxu0 %v14869_v42  ;;  %v6492_v42 = vrot.slane %v6490_v36, 5  ;;  %v6534_v36 = vrot.slane %v6532_v51, 4  ;;  %v6552_v51 = vshll.u32 %v20482_v32, 16 }
 0x3b5   : > { %11696 = vmatprep.subr.bf16.mxu0 %v14874_v15  ;;  %v20806_v15 = vsel %vm15573_vm12, %v13094_v20, %v5687_v21  ;;  %v13212_v21 = vcombine.low %v5681_v53, %v5684_v11  ;;  %v5696_v53 = vrot.slane %v5694_v24, 4  ;;  %v6521_v20 = vrot.slane %v6519_v14, 4 }
 0x3b6   : > { %10627 = vmatmul.mubr.bf16.gmra.mrb[248].mxu1 %v13210_v27  ;;  %v20812_v3 = vsel %vm15624_vm15, %v6488_v35, %v6492_v42  ;;  %v6522_v27 = vshll.u32 %v20449_v4, 16  ;;  %v14883_v4 = vld [vmem:[%s21548_s3 + $0x854] ss:$8 sps:$4 sm:$0xff]   ;;  %v6502_v35 = vrot.slane %v6501_v26, 4  ;;  %v6543_v42 = vshrl.u32 %v20495_v41, 16 }
 0x3b7   : > { %10636 = vmatprep.mubr.bf16.mxu1 %v13213_v56  ;;  %11542 = vmatmul.mubr.bf16.gmra.mrb[36].mxu0 %v13360_v48  ;;  %v13215_v48 = vcombine.high %v20806_v15, %v20796_v61  ;;  %v6483_v56 = vsel %vm15624_vm15, %v6478_v43, %v20759_v55  ;;  %v15073_v55 = vld [vmem:[#allocation3 + $0xe8] sm:$0x11]  ;;  %v6556_v14 = vshrl.u32 %v20482_v32, 16  ;;  %v5695_v41 = vsel %vm15573_vm12, %v13095_v44, %v5694_v24  ;;  %v5575_v32 = vld [vmem:[#allocation3 + $0xf0] sm:$0xee] }
 0x3b8   : > { %11551 = vmatprep.mubr.bf16.mxu0 %v13363_v39  ;;  %11697 = vmatpush1.bf16.msra.mxu0 %v14872_v57  ;;  %v13362_v57 = vcombine.low %v6459_v37, %v6469_v29  ;;  %v13365_v11 = vcombine.high %v6483_v56, %v20812_v3  ;;  %v6512_v29 = vrot.slane %v6511_v31, 4  ;;  %v20832_v37 = vrot.slane %v6528_v45, 5  ;;  %v15074_v39 = vld [vmem:[#allocation3 + $0xf8] sm:$0xff]  ;;  %v14886_v43 = vld [vmem:[%s21548_s3 + $0x864] ss:$8 sps:$4 sm:$0xff]  }
 0x3b9   : > { %11698 = vmatprep.subr.bf16.mxu0 %v14877_v63  ;;  %v5697_v63 = vrot.slane %v15073_v55, 5  ;;  %v5701_v25 = vrot.slane %v15074_v39, 5  ;;  %v6507_v26 = vsel %vm15624_vm15, %v6502_v35, %v20792_v6  ;;  %v13096_v6 = vrot.slane %v5575_v32, 9 }
 0x3ba   : > { %v6517_v31 = vsel %vm15624_vm15, %v6512_v29, %v6516_v38  ;;  %v6535_v45 = vor.u32 %v6534_v36, %v20832_v37  ;;  %v14887_v29 = vld [vmem:[%s21548_s3 + $0x870] ss:$8 sps:$4 sm:$0xff]   ;;  %v6548_v39 = vrot.slane %v6546_v58, 5  ;;  %v15076_v38 = vld [vmem:[#allocation3 + $0x110] sm:$0xff]  ;;  %v6576_v58 = vshll.u32 %v20528_v12, 16 }
 0x3bb   : > { %v13367_v24 = vcombine.high %v6507_v26, %v6517_v31  ;;  %v20880_v35 = vsel %vm15573_vm12, %v13096_v6, %v5701_v25  ;;  %v6580_v44 = vshrl.u32 %v20528_v12, 16  ;;  %v14898_v6 = vld [vmem:[%s21548_s3 + $0x8a4] ss:$8 sps:$4 sm:$0xff]  }
 0x3bc   : > { %11699 = vmatpush1.bf16.msra.mxu0 %v14875_v23  ;;  %v6524_v23 = vrot.slane %v6522_v27, 5  ;;  %v13214_v27 = vcombine.low %v20806_v15, %v20796_v61  ;;  %v6538_v61 = vshll.u32 %v20844_v10, 16  ;;  %v14889_v15 = vld [vmem:[%s21548_s3 + $0x874] ss:$8 sps:$4 sm:$0xff]  }
 0x3bd   : > { %11700 = vmatprep.subr.bf16.mxu0 %v14880_v54  ;;  %v5698_v54 = vsel %vm15573_vm12, %v5696_v53, %v5697_v63  ;;  %v6558_v53 = vrot.slane %v6556_v14, 4  ;;  %v6545_v63 = vrot.slane %v6543_v42, 4  ;;  %v6582_v32 = vrot.slane %v6580_v44, 4 }
 0x3be   : > { %10637 = vmatmul.mubr.bf16.gmra.mrb[252].mxu1 %v13212_v21  ;;  %v13364_v21 = vcombine.low %v6483_v56, %v20812_v3  ;;  %v6525_v60 = vor.u32 %v6524_v23, %v6521_v20  ;;  %v15075_v3 = vld [vmem:[#allocation3 + $0x100] sm:$0x11]  ;;  %v6540_v55 = vrot.slane %v6538_v61, 5  ;;  %v5708_v20 = vrot.slane %v15076_v38, 5  ;;  %v20882_v23 = vld [vmem:[#allocation3 + $0xd0] sm:$0x11] }
 0x3bf   : > { %10646 = vmatprep.mubr.bf16.mxu1 %v13215_v48  ;;  %11552 = vmatmul.mubr.bf16.gmra.mrb[40].mxu0 %v13362_v57  ;;  %v5703_v48 = vrot.slane %v5701_v25, 4  ;;  %v13217_v57 = vcombine.high %v5695_v41, %v5698_v54  ;;  %v5704_v56 = vrot.slane %v15075_v3, 5  ;;  %v13216_v25 = vcombine.low %v5695_v41, %v5698_v54  ;;  %v15078_v61 = vld [vmem:[#allocation3 + $0x128] sm:$0xff] }
 0x3c0   : > { %11561 = vmatprep.mubr.bf16.mxu0 %v13365_v11  ;;  %11701 = vmatpush1.bf16.msra.mxu0 %v14878_v34  ;;  %v14884_v34 = vld [vmem:[%s21548_s3 + $0x860] ss:$8 sps:$4 sm:$0xff]   ;;  %v20866_v11 = vrot.slane %v6552_v51, 5  ;;  %v6526_v36 = vrot.slane %v6525_v60, 4  ;;  %v6570_v51 = vshll.u32 %v20536_v28, 16  ;;  %v6562_v12 = vshll.u32 %v20882_v23, 16 }
 0x3c1   : > { %11702 = vmatprep.subr.bf16.mxu0 %v14883_v4  ;;  %v6536_v4 = vrot.slane %v6535_v45, 4  ;;  %v20870_v22 = vsel %vm15573_vm12, %v5703_v48, %v5704_v56  ;;  %v6567_v45 = vshrl.u32 %v20536_v28, 16  ;;  %v14895_v28 = vld [vmem:[%s21548_s3 + $0x894] ss:$8 sps:$4 sm:$0xff]   ;;  %v5710_v41 = vrot.slane %v5708_v20, 4 }
 0x3c2   : > { %v6559_v42 = vor.u32 %v6558_v53, %v20866_v11  ;;  %v13219_v14 = vcombine.high %v20880_v35, %v20870_v22  ;;  %v6531_v48 = vsel %vm15624_vm15, %v6526_v36, %v20832_v37  ;;  %v15077_v37 = vld [vmem:[#allocation3 + $0x118] sm:$0x11]  ;;  %v6564_v56 = vrot.slane %v6562_v12, 5 }
 0x3c3   : > { %v5711_v60 = vrot.slane %v15077_v37, 5  ;;  %v6572_v53 = vrot.slane %v6570_v51, 5  ;;  %v6594_v36 = vshll.u32 %v20577_v50, 16  ;;  %v13218_v44 = vcombine.low %v20880_v35, %v20870_v22  ;;  %v14901_v35 = vld [vmem:[%s21548_s3 + $0x8b4] ss:$8 sps:$4 sm:$0xff]  }
 0x3c4   : > { %11703 = vmatpush1.bf16.msra.mxu0 %v14881_v33  ;;  %v14892_v33 = vld [vmem:[%s21548_s3 + $0x884] ss:$8 sps:$4 sm:$0xff]  }
 0x3c5   : > { %11704 = vmatprep.subr.bf16.mxu0 %v14886_v43  ;;  %v20886_v43 = vsel %vm15624_vm15, %v6536_v4, %v6540_v55  ;;  %v6569_v4 = vrot.slane %v6567_v45, 4  ;;  %v6596_v37 = vrot.slane %v6594_v36, 5  ;;  %v6615_v36 = vshrl.u32 %v20611_v9, 16 }
 0x3c6   : > { %10647 = vmatmul.mubr.bf16.gmra.mrb[0].mxu1 %v13214_v27  ;;  %v14890_v27 = vld [vmem:[%s21548_s3 + $0x880] ss:$8 sps:$4 sm:$0xff]   ;;  %v13369_v54 = vcombine.high %v6531_v48, %v20886_v43  ;;  %v13368_v45 = vcombine.low %v6531_v48, %v20886_v43 }
 0x3c7   : > { %10656 = vmatprep.mubr.bf16.mxu1 %v13217_v57  ;;  %11562 = vmatmul.mubr.bf16.gmra.mrb[44].mxu0 %v13364_v21  ;;  %v13366_v21 = vcombine.low %v6507_v26, %v6517_v31  ;;  %v5576_v57 = vld [vmem:[#allocation3 + $0x108] sm:$0xee]  ;;  %v6560_v31 = vrot.slane %v6559_v42, 4  ;;  %v20906_v26 = vrot.slane %v6576_v58, 5  ;;  %v6600_v42 = vshll.u32 %v20565_v40, 16 }
 0x3c8   : > { %11571 = vmatprep.mubr.bf16.mxu0 %v13367_v24  ;;  %11705 = vmatpush1.bf16.msra.mxu0 %v14884_v34  ;;  %v6549_v34 = vor.u32 %v6548_v39, %v6545_v63  ;;  %v14893_v24 = vld [vmem:[%s21548_s3 + $0x890] ss:$8 sps:$4 sm:$0xff]   ;;  %v13097_v55 = vrot.slane %v5576_v57, 9  ;;  %v5712_v63 = vsel %vm15573_vm12, %v5710_v41, %v5711_v60  ;;  %v20918_v39 = vld [vmem:[#allocation3 + $0xe8] sm:$0x11]  ;;  %v6604_v58 = vshrl.u32 %v20565_v40, 16 }
 0x3c9   : > { %11706 = vmatprep.subr.bf16.mxu0 %v14889_v15  ;;  %v5715_v15 = vrot.slane %v15078_v61, 5  ;;  %v6583_v38 = vor.u32 %v6582_v32, %v20906_v26  ;;  %v5577_v40 = vld [vmem:[#allocation3 + $0x120] sm:$0xee]  ;;  %v6586_v22 = vshll.u32 %v20918_v39, 16  ;;  %v15079_v43 = vld [vmem:[#allocation3 + $0x130] sm:$0x11] }
 0x3ca   : > { %v6550_v3 = vrot.slane %v6549_v34, 4  ;;  %v5718_v48 = vrot.slane %v15079_v43, 5  ;;  %v20940_v12 = vrot.slane %v6600_v42, 5  ;;  %v14899_v41 = vld [vmem:[%s21548_s3 + $0x8b0] ss:$8 sps:$4 sm:$0xff]   ;;  %v6617_v43 = vrot.slane %v6615_v36, 4 }
 0x3cb   : > { %v5717_v51 = vrot.slane %v5715_v15, 4  ;;  %v6584_v34 = vrot.slane %v6583_v38, 4  ;;  %v14904_v60 = vld [vmem:[%s21548_s3 + $0x8c4] ss:$8 sps:$4 sm:$0xff]   ;;  %v14902_v42 = vld [vmem:[%s21548_s3 + $0x8c0] ss:$8 sps:$4 sm:$0xff]  }
 0x3cc   : > { %11707 = vmatpush1.bf16.msra.mxu0 %v14887_v29  ;;  %v6591_v29 = vshrl.u32 %v20577_v50, 16  ;;  %v5709_v50 = vsel %vm15573_vm12, %v13097_v55, %v5708_v20  ;;  %v6618_v55 = vshll.u32 %v20611_v9, 16  ;;  %v14907_v9 = vld [vmem:[%s21548_s3 + $0x8d4] ss:$8 sps:$4 sm:$0xff]   ;;  %v14908_v36 = vld [vmem:[%s21548_s3 + $0x8e0] ss:$8 sps:$4 sm:$0xff]  }
 0x3cd   : > { %11708 = vmatprep.subr.bf16.mxu0 %v14892_v33  ;;  %v6565_v33 = vsel %vm15624_vm15, %v6560_v31, %v6564_v56  ;;  %v6588_v31 = vrot.slane %v6586_v22, 5  ;;  %v20956_v56 = vld [vmem:[#allocation3 + $0x100] sm:$0x11] }
 0x3ce   : > { %10657 = vmatmul.mubr.bf16.gmra.mrb[4].mxu1 %v13216_v25  ;;  %v14896_v25 = vld [vmem:[%s21548_s3 + $0x8a0] ss:$8 sps:$4 sm:$0xff]   ;;  %v6593_v32 = vrot.slane %v6591_v29, 4  ;;  %v6628_v29 = vshrl.u32 %v20600_v17, 16  ;;  %v14905_v22 = vld [vmem:[%s21548_s3 + $0x8d0] ss:$8 sps:$4 sm:$0xff]  }
 0x3cf   : > { %10666 = vmatprep.mubr.bf16.mxu1 %v13219_v14  ;;  %11572 = vmatmul.mubr.bf16.gmra.mrb[48].mxu0 %v13366_v21  ;;  %v13221_v14 = vcombine.high %v5709_v50, %v5712_v63  ;;  %v6573_v21 = vor.u32 %v6572_v53, %v6569_v4  ;;  %v20960_v4 = vsel %vm15624_vm15, %v6584_v34, %v6588_v31  ;;  %v14910_v34 = vld [vmem:[%s21548_s3 + $0x8e4] ss:$8 sps:$4 sm:$0xff]   ;;  %v20992_v31 = vld [vmem:[#allocation3 + $0x118] sm:$0x11] }
 0x3d0   : > { %11581 = vmatprep.mubr.bf16.mxu0 %v13369_v54  ;;  %11709 = vmatpush1.bf16.msra.mxu0 %v14890_v27  ;;  %v6555_v27 = vsel %vm15624_vm15, %v6550_v3, %v20866_v11  ;;  %v13098_v11 = vrot.slane %v5577_v40, 9  ;;  %v20944_v54 = vsel %vm15573_vm12, %v5717_v51, %v5718_v48  ;;  %v5578_v51 = vld [vmem:[#allocation3 + $0x138] sm:$0xee]  ;;  %v6620_v48 = vrot.slane %v6618_v55, 5 }
 0x3d1   : > { %11710 = vmatprep.subr.bf16.mxu0 %v14895_v28  ;;  %v13371_v20 = vcombine.high %v6555_v27, %v6565_v33  ;;  %v6606_v28 = vrot.slane %v6604_v58, 4  ;;  %v6574_v57 = vrot.slane %v6573_v21, 4  ;;  %v13370_v58 = vcombine.low %v6555_v27, %v6565_v33  ;;  %v15082_v40 = vld [vmem:[#allocation3 + $0x158] sm:$0xff] }
 0x3d2   : > { %v20954_v61 = vsel %vm15573_vm12, %v13098_v11, %v5715_v15  ;;  %v13220_v15 = vcombine.low %v5709_v50, %v5712_v63  ;;  %v5729_v21 = vrot.slane %v15082_v40, 5  ;;  %v6642_v11 = vshll.u32 %v20630_v13, 16  ;;  %v21021_v40 = vld [vmem:[#allocation3 + $0x130] sm:$0x11] }
 0x3d3   : > { %v6607_v53 = vor.u32 %v6606_v28, %v20940_v12  ;;  %v13223_v38 = vcombine.high %v20954_v61, %v20944_v54  ;;  %v6639_v28 = vshrl.u32 %v20630_v13, 16 }
 0x3d4   : > { %11711 = vmatpush1.bf16.msra.mxu0 %v14893_v24  ;;  %v15080_v24 = vld [vmem:[#allocation3 + $0x140] sm:$0xff] }
 0x3d5   : > { %11712 = vmatprep.subr.bf16.mxu0 %v14898_v6  ;;  %v5722_v3 = vrot.slane %v15080_v24, 5  ;;  %v6624_v6 = vshll.u32 %v20600_v17, 16  ;;  %v6610_v17 = vshll.u32 %v20956_v56, 16  ;;  %v6608_v33 = vrot.slane %v6607_v53, 4 }
 0x3d6   : > { %10667 = vmatmul.mubr.bf16.gmra.mrb[8].mxu1 %v13218_v44  ;;  %v6579_v44 = vsel %vm15624_vm15, %v6574_v57, %v20906_v26  ;;  %v15081_v26 = vld [vmem:[#allocation3 + $0x148] sm:$0x11]  ;;  %v6652_v24 = vshrl.u32 %v20624_v46, 16  ;;  %v13222_v53 = vcombine.low %v20954_v61, %v20944_v54  ;;  %v6634_v54 = vshll.u32 %v20992_v31, 16  ;;  %v14913_v61 = vld [vmem:[%s21548_s3 + $0x8f4] ss:$8 sps:$4 sm:$0xff]  }
 0x3d7   : > { %10676 = vmatprep.mubr.bf16.mxu1 %v13221_v14  ;;  %11582 = vmatmul.mubr.bf16.gmra.mrb[52].mxu0 %v13368_v45  ;;  %v6597_v45 = vor.u32 %v6596_v37, %v6593_v32  ;;  %v13373_v63 = vcombine.high %v6579_v44, %v20960_v4  ;;  %v5724_v50 = vrot.slane %v5722_v3, 4  ;;  %v6630_v14 = vrot.slane %v6628_v29, 4 }
 0x3d8   : > { %11591 = vmatprep.mubr.bf16.mxu0 %v13371_v20  ;;  %11713 = vmatpush1.bf16.msra.mxu0 %v14896_v25  ;;  %v20980_v25 = vrot.slane %v6624_v6, 5  ;;  %v5725_v27 = vrot.slane %v15081_v26, 5  ;;  %v6612_v20 = vrot.slane %v6610_v17, 5  ;;  %v13372_v6 = vcombine.low %v6579_v44, %v20960_v4  ;;  %v15083_v4 = vld [vmem:[#allocation3 + $0x160] sm:$0x11]  ;;  %v15084_v26 = vld [vmem:[#allocation3 + $0x170] sm:$0xff] }
 0x3d9   : > { %11714 = vmatprep.subr.bf16.mxu0 %v14901_v35  ;;  %v6598_v35 = vrot.slane %v6597_v45, 4  ;;  %v5731_v29 = vrot.slane %v5729_v21, 4  ;;  %v6654_v45 = vrot.slane %v6652_v24, 4 }
 0x3da   : > { %v5726_v57 = vsel %vm15573_vm12, %v5724_v50, %v5725_v27  ;;  %v6613_v32 = vsel %vm15624_vm15, %v6608_v33, %v6612_v20  ;;  %v6631_v37 = vor.u32 %v6630_v14, %v20980_v25  ;;  %v6636_v50 = vrot.slane %v6634_v54, 5  ;;  %v21036_v54 = vld [vmem:[#allocation3 + $0x148] sm:$0x11] }
 0x3db   : > { %v6644_v33 = vrot.slane %v6642_v11, 5  ;;  %v5736_v27 = vrot.slane %v15084_v26, 5  ;;  %v6672_v20 = vshll.u32 %v20646_v62, 16 }
 0x3dc   : > { %11715 = vmatpush1.bf16.msra.mxu0 %v14899_v41  ;;  %v13099_v41 = vrot.slane %v5578_v51, 9  ;;  %v6641_v51 = vrot.slane %v6639_v28, 4 }
 0x3dd   : > { %11716 = vmatprep.subr.bf16.mxu0 %v14904_v60  ;;  %v6648_v60 = vshll.u32 %v20624_v46, 16  ;;  %v5579_v46 = vld [vmem:[#allocation3 + $0x150] sm:$0xee] }
 0x3de   : > { %10677 = vmatmul.mubr.bf16.gmra.mrb[12].mxu1 %v13220_v15  ;;  %v5723_v13 = vsel %vm15573_vm12, %v13099_v41, %v5722_v3  ;;  %v6603_v15 = vsel %vm15624_vm15, %v6598_v35, %v20940_v12  ;;  %v13100_v12 = vrot.slane %v5579_v46, 9 }
 0x3df   : > { %10686 = vmatprep.mubr.bf16.mxu1 %v13223_v38  ;;  %11592 = vmatmul.mubr.bf16.gmra.mrb[56].mxu0 %v13370_v58  ;;  %v13225_v55 = vcombine.high %v5723_v13, %v5726_v57  ;;  %v6621_v38 = vor.u32 %v6620_v48, %v6617_v43  ;;  %v13375_v3 = vcombine.high %v6603_v15, %v6613_v32  ;;  %v6632_v58 = vrot.slane %v6631_v37, 4 }
 0x3e0   : > { %11601 = vmatprep.mubr.bf16.mxu0 %v13373_v63  ;;  %11717 = vmatpush1.bf16.msra.mxu0 %v14902_v42  ;;  %v5732_v42 = vrot.slane %v15083_v4, 5  ;;  %v6650_v44 = vrot.slane %v6648_v60, 5  ;;  %v5730_v14 = vsel %vm15573_vm12, %v13100_v12, %v5729_v21  ;;  %v6676_v43 = vshrl.u32 %v20646_v62, 16  ;;  %v5580_v62 = vld [vmem:[#allocation3 + $0x168] sm:$0xee] }
 0x3e1   : > { %11718 = vmatprep.subr.bf16.mxu0 %v14907_v9  ;;  %v14911_v9 = vld [vmem:[%s21548_s3 + $0x8f0] ss:$8 sps:$4 sm:$0xff]   ;;  %v6622_v63 = vrot.slane %v6621_v38, 4  ;;  %v6663_v48 = vshrl.u32 %v20652_v5, 16  ;;  %v13224_v28 = vcombine.low %v5723_v13, %v5726_v57  ;;  %v13374_v21 = vcombine.low %v6603_v15, %v6613_v32 }
 0x3e2   : > { %v5733_v17 = vsel %vm15573_vm12, %v5731_v29, %v5732_v42  ;;  %v6655_v35 = vor.u32 %v6654_v45, %v6650_v44  ;;  %v6645_v37 = vor.u32 %v6644_v33, %v6641_v51  ;;  %v6658_v60 = vshll.u32 %v21021_v40, 16  ;;  %v15085_v57 = vld [vmem:[#allocation3 + $0x178] sm:$0x11] }
 0x3e3   : > { %v13227_v11 = vcombine.high %v5730_v14, %v5733_v17  ;;  %v6627_v41 = vsel %vm15624_vm15, %v6622_v63, %v20980_v25  ;;  %v6674_v29 = vrot.slane %v6672_v20, 5  ;;  %v5739_v13 = vrot.slane %v15085_v57, 5 }
 0x3e4   : > { %11719 = vmatpush1.bf16.msra.mxu0 %v14905_v22  ;;  %v6637_v22 = vsel %vm15624_vm15, %v6632_v58, %v6636_v50  ;;  %v6646_v32 = vrot.slane %v6645_v37, 4  ;;  %v6687_v25 = vshrl.u32 %v20668_v59, 16  ;;  %v13101_v46 = vrot.slane %v5580_v62, 9 }
 0x3e5   : > { %11720 = vmatprep.subr.bf16.mxu0 %v14910_v34  ;;  %v6666_v34 = vshll.u32 %v20652_v5, 16  ;;  %v13377_v24 = vcombine.high %v6627_v41, %v6637_v22  ;;  %v6678_v5 = vrot.slane %v6676_v43, 4  ;;  %v6696_v4 = vshll.u32 %v20660_v49, 16 }
 0x3e6   : > { %10687 = vmatmul.mubr.bf16.gmra.mrb[16].mxu1 %v13222_v53  ;;  %v5738_v53 = vrot.slane %v5736_v27, 4  ;;  %v6700_v42 = vshrl.u32 %v20660_v49, 16  ;;  %v6690_v58 = vshll.u32 %v20668_v59, 16  ;;  %v13226_v45 = vcombine.low %v5730_v14, %v5733_v17 }
 0x3e7   : > { %10696 = vmatprep.mubr.bf16.mxu1 %v13225_v55  ;;  %11602 = vmatmul.mubr.bf16.gmra.mrb[60].mxu0 %v13372_v6  ;;  %v6656_v6 = vrot.slane %v6655_v35, 4  ;;  %v6665_v55 = vrot.slane %v6663_v48, 4  ;;  %v6668_v15 = vrot.slane %v6666_v34, 5  ;;  %v5737_v12 = vsel %vm15573_vm12, %v13101_v46, %v5736_v27 }
 0x3e8   : > { %11611 = vmatprep.mubr.bf16.mxu0 %v13375_v3  ;;  %11721 = vmatpush1.bf16.msra.mxu0 %v14908_v36  ;;  %v6660_v36 = vrot.slane %v6658_v60, 5  ;;  %v5740_v38 = vsel %vm15573_vm12, %v5738_v53, %v5739_v13  ;;  %v6679_v3 = vor.u32 %v6678_v5, %v6674_v29  ;;  %v6651_v50 = vsel %vm15624_vm15, %v6646_v32, %v6650_v44 }
 0x3e9   : > { %11722 = vmatprep.subr.bf16.mxu0 %v14913_v61  ;;  %v13229_v63 = vcombine.high %v5737_v12, %v5740_v38  ;;  %v6669_v51 = vor.u32 %v6668_v15, %v6665_v55  ;;  %v6682_v33 = vshll.u32 %v21036_v54, 16  ;;  %v6698_v49 = vrot.slane %v6696_v4, 5 }
 0x3ea   : > { %v6661_v61 = vsel %vm15624_vm15, %v6656_v6, %v6660_v36  ;;  %v6680_v35 = vrot.slane %v6679_v3, 4  ;;  %v6702_v20 = vrot.slane %v6700_v42, 4  ;;  %v6689_v14 = vrot.slane %v6687_v25, 4 }
 0x3eb   : > { %v13379_v26 = vcombine.high %v6651_v50, %v6661_v61  ;;  %v6670_v59 = vrot.slane %v6669_v51, 4  ;;  %v6684_v17 = vrot.slane %v6682_v33, 5  ;;  %v6692_v27 = vrot.slane %v6690_v58, 5 }
 0x3ec   : > { %11723 = vmatpush1.bf16.msra.mxu0 %v14911_v9  ;;  %v13376_v9 = vcombine.low %v6627_v41, %v6637_v22  ;;  %v21048_v22 = vld [vmem:[#allocation3 + $0x160] sm:$0x11]  ;;  %v6703_v43 = vor.u32 %v6702_v20, %v6698_v49  ;;  %v6720_v48 = vshll.u32 %v20678_v19, 16  ;;  %v6724_v34 = vshrl.u32 %v20678_v19, 16 }
 0x3ed   : > { %v6685_v44 = vsel %vm15624_vm15, %v6680_v35, %v6684_v17  ;;  %v13378_v41 = vcombine.low %v6651_v50, %v6661_v61  ;;  %v6675_v37 = vsel %vm15624_vm15, %v6670_v59, %v6674_v29  ;;  %v6693_v60 = vor.u32 %v6692_v27, %v6689_v14 }
 0x3ee   : > { %10697 = vmatmul.mubr.bf16.gmra.mrb[20].mxu1 %v13224_v28  ;;  %v6711_v28 = vshrl.u32 %v20685_v1, 16  ;;  %v13381_v53 = vcombine.high %v6675_v37, %v6685_v44  ;;  %v6704_v62 = vrot.slane %v6703_v43, 4  ;;  %v6722_v6 = vrot.slane %v6720_v48, 5  ;;  %v21081_v48 = vld [vmem:[#allocation3 + $0x1a8] sm:$0x11] }
 0x3ef   : > { %10706 = vmatprep.mubr.bf16.mxu1 %v13227_v11  ;;  %11612 = vmatmul.mubr.bf16.gmra.mrb[64].mxu0 %v13374_v21  ;;  %v6714_v11 = vshll.u32 %v20685_v1, 16  ;;  %v13228_v21 = vcombine.low %v5737_v12, %v5740_v38  ;;  %v6726_v5 = vrot.slane %v6724_v34, 4  ;;  %v6694_v13 = vrot.slane %v6693_v60, 4  ;;  %v21059_v1 = vld [vmem:[#allocation3 + $0x178] sm:$0x11] }
 0x3f0   : > { %11621 = vmatprep.mubr.bf16.mxu0 %v13377_v24  ;;  %v6706_v24 = vshll.u32 %v21048_v22, 16  ;;  %v6713_v19 = vrot.slane %v6711_v28, 4  ;;  %v6744_v55 = vshll.u32 %v20692_v7, 16  ;;  %v6748_v15 = vshrl.u32 %v20692_v7, 16 }
 0x3f1   : > { %v6716_v57 = vrot.slane %v6714_v11, 5  ;;  %v6727_v29 = vor.u32 %v6726_v5, %v6722_v6  ;;  %v6735_v25 = vshrl.u32 %v20698_v16, 16  ;;  %v6738_v46 = vshll.u32 %v20698_v16, 16 }
 0x3f2   : > { %v6708_v32 = vrot.slane %v6706_v24, 5  ;;  %v13380_v61 = vcombine.low %v6675_v37, %v6685_v44  ;;  %v6699_v3 = vsel %vm15624_vm15, %v6694_v13, %v6698_v49  ;;  %v6730_v4 = vshll.u32 %v21059_v1, 16 }
 0x3f3   : > { %v6717_v38 = vor.u32 %v6716_v57, %v6713_v19  ;;  %v6728_v58 = vrot.slane %v6727_v29, 4  ;;  %v6750_v12 = vrot.slane %v6748_v15, 4  ;;  %v6737_v50 = vrot.slane %v6735_v25, 4  ;;  %v15087_v57 = vld [vmem:[#allocation3 + $0x38] sm:$0xff]  ;;  %v15088_v15 = vld [vmem:[#allocation3 + $0x40] sm:$0x11] }
 0x3f4   : > { %v6709_v36 = vsel %vm15624_vm15, %v6704_v62, %v6708_v32  ;;  %v6740_v16 = vrot.slane %v6738_v46, 5  ;;  %v6732_v33 = vrot.slane %v6730_v4, 5  ;;  %v6848_v13 = vrot.slane %v15087_v57, 5 }
 0x3f5   : > { %v13383_v42 = vcombine.high %v6699_v3, %v6709_v36  ;;  %v13382_v20 = vcombine.low %v6699_v3, %v6709_v36  ;;  %v6851_v25 = vrot.slane %v15088_v15, 5  ;;  %v15089_v3 = vld [vmem:[#allocation3 + $0x50] sm:$0xff]  ;;  %v6886_v15 = vrot.slane %v20844_v10, 5 }
 0x3f6   : > { %10707 = vmatmul.mubr.bf16.gmra.mrb[24].mxu1 %v13226_v45  ;;  %v6746_v45 = vrot.slane %v6744_v55, 5  ;;  %v6733_v35 = vsel %vm15624_vm15, %v6728_v58, %v6732_v33  ;;  %v6741_v17 = vor.u32 %v6740_v16, %v6737_v50  ;;  %v6850_v29 = vrot.slane %v6848_v13, 4  ;;  %v6782_v55 = vld [vmem:[#allocation3 + $0x30] sm:$0xee] }
 0x3f7   : > { %10716 = vmatprep.mubr.bf16.mxu1 %v13229_v63  ;;  %11622 = vmatmul.mubr.bf16.gmra.mrb[68].mxu0 %v13376_v9  ;;  %v21070_v9 = vld [vmem:[#allocation3] sm:$0xff]  ;;  %v6718_v63 = vrot.slane %v6717_v38, 4  ;;  %v13118_v38 = vrot.slane %v6782_v55, 9  ;;  %v6855_v4 = vrot.slane %v15089_v3, 5  ;;  %v6862_v50 = vrot.slane %v20719_v0, 5 }
 0x3f8   : > { %11631 = vmatprep.mubr.bf16.mxu0 %v13379_v26  ;;  %v6759_v7 = vshrl.u32 %v21070_v9, 16  ;;  %v6762_v51 = vshll.u32 %v21070_v9, 16  ;;  %v21074_v26 = vld [vmem:[#allocation3 + $0x190] sm:$0x11]  ;;  %v6751_v49 = vor.u32 %v6750_v12, %v6746_v45  ;;  %v6742_v28 = vrot.slane %v6741_v17, 4  ;;  %v15090_v17 = vld [vmem:[#allocation3 + $0x80] sm:$0xff] }
 0x3f9   : > { %v6723_v59 = vsel %vm15624_vm15, %v6718_v63, %v6722_v6  ;;  %v6754_v14 = vshll.u32 %v21074_v26, 16  ;;  %v6849_v47 = vsel %vm15573_vm12, %v13118_v38, %v6848_v13  ;;  %v6857_v58 = vrot.slane %v6855_v4, 4  ;;  %v6787_v55 = vld [vmem:[#allocation3 + $0xa8] sm:$0xee] }
 0x3fa   : > { %v6761_v27 = vrot.slane %v6759_v7, 4  ;;  %v6764_v44 = vrot.slane %v6762_v51, 5  ;;  %v13385_v43 = vcombine.high %v6723_v59, %v6733_v35  ;;  %v6752_v34 = vrot.slane %v6751_v49, 4  ;;  %v6784_v49 = vld [vmem:[#allocation3 + $0x60] sm:$0xee] }
 0x3fb   : > { %v6756_v11 = vrot.slane %v6754_v14, 5  ;;  %v6747_v60 = vsel %vm15624_vm15, %v6742_v28, %v6746_v45  ;;  %v13384_v24 = vcombine.low %v6723_v59, %v6733_v35  ;;  %v6783_v45 = vld [vmem:[#allocation3 + $0x48] sm:$0xee]  ;;  %v6858_v12 = vrot.slane %v20715_v18, 5 }
 0x3fc   : > { %v13119_v7 = vrot.slane %v6783_v45, 9  ;;  %v6864_v35 = vrot.slane %v6862_v50, 4  ;;  %v13120_v59 = vrot.slane %v6784_v49, 9  ;;  %v6869_v14 = vrot.slane %v15090_v17, 5  ;;  %v15095_v17 = vld [vmem:[#allocation3 + $0xf8] sm:$0xff] }
 0x3fd   : > { %v6757_v37 = vsel %vm15624_vm15, %v6752_v34, %v6756_v11  ;;  %v6859_v63 = vsel %vm15573_vm12, %v6857_v58, %v6858_v12  ;;  %v6785_v34 = vld [vmem:[#allocation3 + $0x78] sm:$0xee]  ;;  %v6872_v28 = vrot.slane %v20771_v2, 5  ;;  %v6893_v58 = vrot.slane %v20882_v23, 5  ;;  %v15094_v12 = vld [vmem:[#allocation3 + $0xe0] sm:$0xff] }
 0x3fe   : > { %10717 = vmatmul.mubr.bf16.gmra.mrb[28].mxu1 %v13228_v21  ;;  %v6765_v21 = vor.u32 %v6764_v44, %v6761_v27  ;;  %v13387_v6 = vcombine.high %v6747_v60, %v6757_v37  ;;  %v13386_v36 = vcombine.low %v6747_v60, %v6757_v37  ;;  %v6856_v51 = vsel %vm15573_vm12, %v13119_v7, %v6855_v4 }
 0x3ff   : > { %11632 = vmatmul.mubr.bf16.gmra.mrb[72].mxu0 %v13378_v41  ;;  %v6778_v41 = vshll.u32 %v21081_v48, 16  ;;  %v13393_v33 = vcombine.high %v6856_v51, %v6859_v63  ;;  %v13392_v27 = vcombine.low %v6856_v51, %v6859_v63  ;;  %v6863_v0 = vsel %vm15573_vm12, %v13120_v59, %v6862_v50 }
 0x400   : > { %11641 = vmatprep.mubr.bf16.mxu0 %v13381_v53  ;;  %v6766_v53 = vrot.slane %v6765_v21, 4  ;;  %v13121_v11 = vrot.slane %v6785_v34, 9  ;;  %v15091_v21 = vld [vmem:[#allocation3 + $0x98] sm:$0xff]  ;;  %v6897_v7 = vrot.slane %v15094_v12, 5  ;;  %v6900_v49 = vrot.slane %v20918_v39, 5 }
 0x401   : > { %v6780_v62 = vrot.slane %v6778_v41, 5  ;;  %v6876_v41 = vrot.slane %v15091_v21, 5  ;;  %v6790_v39 = vld [vmem:[#allocation3 + $0xf0] sm:$0xee] }
 0x402   : > { %v6771_v5 = vsel %vm15624_vm15, %v6766_v53, %v6764_v44  ;;  %v6870_v60 = vsel %vm15573_vm12, %v13121_v11, %v6869_v14  ;;  %v6899_v51 = vrot.slane %v6897_v7, 4  ;;  %v6907_v11 = vrot.slane %v20956_v56, 5  ;;  %v6791_v56 = vld [vmem:[#allocation3 + $0x108] sm:$0xee] }
 0x403   : > { %v6781_v19 = vsel %vm15624_vm15, %v6766_v53, %v6780_v62  ;;  %v6878_v53 = vrot.slane %v6876_v41, 4  ;;  %v6786_v62 = vld [vmem:[#allocation3 + $0x90] sm:$0xee] }
 0x404   : > { %v13389_v32 = vcombine.high %v6771_v5, %v6781_v19  ;;  %v13388_v46 = vcombine.low %v6771_v5, %v6781_v19  ;;  %v13122_v5 = vrot.slane %v6786_v62, 9  ;;  %v15092_v19 = vld [vmem:[#allocation3 + $0xb0] sm:$0xff] }
 0x405   : > { %v6883_v57 = vrot.slane %v15092_v19, 5 }
 0x407   : > { %11642 = vmatmul.mubr.bf16.gmra.mrb[76].mxu0 %v13380_v61  ;;  %v6852_v61 = vsel %vm15573_vm12, %v6850_v29, %v6851_v25  ;;  %v6885_v29 = vrot.slane %v6883_v57, 4  ;;  %v13123_v25 = vrot.slane %v6787_v55, 9  ;;  %v15097_v55 = vld [vmem:[#allocation3 + $0x128] sm:$0xff] }
 0x408   : > { %11651 = vmatprep.mubr.bf16.mxu0 %v13383_v42  ;;  %v13391_v42 = vcombine.high %v6849_v47, %v6852_v61  ;;  %v13390_v16 = vcombine.low %v6849_v47, %v6852_v61 }
 0x409   : > { %v6884_v3 = vsel %vm15573_vm12, %v13123_v25, %v6883_v57  ;;  %v6914_v57 = vrot.slane %v20992_v31, 5  ;;  %v6792_v31 = vld [vmem:[#allocation3 + $0x120] sm:$0xee] }
 0x40f   : > { %11652 = vmatmul.mubr.bf16.gmra.mrb[80].mxu0 %v13382_v20  ;;  %v6865_v20 = vrot.slane %v20737_v52, 5 }
 0x410   : > { %11661 = vmatprep.mubr.bf16.mxu0 %v13385_v43  ;;  %v6871_v43 = vrot.slane %v6869_v14, 4  ;;  %v6904_v14 = vrot.slane %v15095_v17, 5 }
 0x411   : > { %v6866_v18 = vsel %vm15573_vm12, %v6864_v35, %v6865_v20 }
 0x412   : > { %v13395_v44 = vcombine.high %v6863_v0, %v6866_v18  ;;  %v6873_v52 = vsel %vm15573_vm12, %v6871_v43, %v6872_v28  ;;  %v13394_v37 = vcombine.low %v6863_v0, %v6866_v18  ;;  %v6901_v18 = vsel %vm15573_vm12, %v6899_v51, %v6900_v49 }
 0x413   : > { %v13396_v13 = vcombine.low %v6870_v60, %v6873_v52  ;;  %v6906_v34 = vrot.slane %v6904_v14, 4  ;;  %v6928_v49 = vrot.slane %v21036_v54, 5  ;;  %v6794_v54 = vld [vmem:[#allocation3 + $0x150] sm:$0xee] }
 0x417   : > { %11662 = vmatmul.mubr.bf16.gmra.mrb[84].mxu0 %v13384_v24  ;;  %v13397_v24 = vcombine.high %v6870_v60, %v6873_v52  ;;  %v15096_v60 = vld [vmem:[#allocation3 + $0x110] sm:$0xff] }
 0x418   : > { %11671 = vmatprep.mubr.bf16.mxu0 %v13387_v6  ;;  %v6879_v6 = vrot.slane %v20808_v30, 5  ;;  %v6887_v30 = vsel %vm15573_vm12, %v6885_v29, %v6886_v15  ;;  %v6918_v15 = vrot.slane %v15097_v55, 5 }
 0x419   : > { %v13401_v4 = vcombine.high %v6884_v3, %v6887_v30  ;;  %v13400_v63 = vcombine.low %v6884_v3, %v6887_v30 }
 0x41a   : > { %v6880_v2 = vsel %vm15573_vm12, %v6878_v53, %v6879_v6 }
 0x41f   : > { %11672 = vmatmul.mubr.bf16.gmra.mrb[88].mxu0 %v13386_v36 }
 0x420   : > { %11681 = vmatprep.mubr.bf16.mxu0 %v13389_v32  ;;  %v6877_v32 = vsel %vm15573_vm12, %v13122_v5, %v6876_v41  ;;  %v13126_v41 = vrot.slane %v6790_v39, 9 }
 0x421   : > { %v13399_v36 = vcombine.high %v6877_v32, %v6880_v2  ;;  %v13398_v61 = vcombine.low %v6877_v32, %v6880_v2 }
 0x422   : > { %v6905_v6 = vsel %vm15573_vm12, %v13126_v41, %v6904_v14 }
 0x427   : > { %11682 = vmatmul.mubr.bf16.gmra.mrb[92].mxu0 %v13388_v46  ;;  %v15093_v46 = vld [vmem:[#allocation3 + $0xc8] sm:$0xff] }
 0x428   : > { %11724 = vmatprep.mubr.bf16.mxu0 %v13391_v42  ;;  %v6890_v38 = vrot.slane %v15093_v46, 5  ;;  %v6788_v42 = vld [vmem:[#allocation3 + $0xc0] sm:$0xee] }
 0x429   : > { %v13124_v45 = vrot.slane %v6788_v42, 9 }
 0x42a   : > { %v6892_v47 = vrot.slane %v6890_v38, 4 }
 0x42b   : > { %v6891_v50 = vsel %vm15573_vm12, %v13124_v45, %v6890_v38 }
 0x42c   : > { %v6894_v10 = vsel %vm15573_vm12, %v6892_v47, %v6893_v58  ;;  %v13128_v58 = vrot.slane %v6792_v31, 9 }
 0x42d   : > { %v13402_v0 = vcombine.low %v6891_v50, %v6894_v10 }
 0x42f   : > { %11725 = vmatmul.mubr.bf16.vlgmr.msra.gmra.mrb[32].mxu0 %v13390_v16  ;;  %v13403_v16 = vcombine.high %v6891_v50, %v6894_v10  ;;  %v15098_v10 = vld [vmem:[#allocation3 + $0x140] sm:$0xff]  ;;  %v6919_v50 = vsel %vm15573_vm12, %v13128_v58, %v6918_v15  ;;  %v15101_v58 = vld [vmem:[#allocation3 + $0x188] sm:$0xff] }
 0x430   : > { %11734 = vmatprep.mubr.bf16.mxu0 %v13393_v33  ;;  %v6789_v33 = vld [vmem:[#allocation3 + $0xd8] sm:$0xee]  ;;  %v6925_v12 = vrot.slane %v15098_v10, 5 }
 0x431   : > { %v13125_v59 = vrot.slane %v6789_v33, 9 }
 0x432   : > { %v6927_v51 = vrot.slane %v6925_v12, 4 }
 0x434   : > { %v6929_v14 = vsel %vm15573_vm12, %v6927_v51, %v6928_v49  ;;  %v6953_v49 = vrot.slane %v21070_v9, 5 }
 0x437   : > { %11735 = vmatmul.mubr.bf16.gmra.mrb[36].mxu0 %v13392_v27 }
 0x438   : > { %11744 = vmatprep.mubr.bf16.mxu0 %v13395_v44  ;;  %v6898_v44 = vsel %vm15573_vm12, %v13125_v59, %v6897_v7 }
 0x439   : > { %v13405_v43 = vcombine.high %v6898_v44, %v6901_v18  ;;  %v13404_v62 = vcombine.low %v6898_v44, %v6901_v18 }
 0x43f   : > { %11745 = vmatmul.mubr.bf16.gmra.mrb[40].mxu0 %v13394_v37  ;;  %v6908_v37 = vsel %vm15573_vm12, %v6906_v34, %v6907_v11 }
 0x440   : > { %11754 = vmatprep.mubr.bf16.mxu0 %v13397_v24  ;;  %v6911_v24 = vrot.slane %v15096_v60, 5  ;;  %v13407_v5 = vcombine.high %v6905_v6, %v6908_v37  ;;  %v13406_v30 = vcombine.low %v6905_v6, %v6908_v37  ;;  %v6935_v60 = vrot.slane %v21048_v22, 5  ;;  %v6795_v22 = vld [vmem:[#allocation3 + $0x168] sm:$0xee] }
 0x441   : > { %v13130_v6 = vrot.slane %v6794_v54, 9  ;;  %v13131_v31 = vrot.slane %v6795_v22, 9 }
 0x442   : > { %v6913_v2 = vrot.slane %v6911_v24, 4 }
 0x444   : > { %v6915_v29 = vsel %vm15573_vm12, %v6913_v2, %v6914_v57  ;;  %v15100_v2 = vld [vmem:[#allocation3 + $0x170] sm:$0xff] }
 0x447   : > { %11755 = vmatmul.mubr.bf16.gmra.mrb[44].mxu0 %v13396_v13 }
 0x448   : > { %11764 = vmatprep.mubr.bf16.mxu0 %v13399_v36  ;;  %v13127_v36 = vrot.slane %v6791_v56, 9  ;;  %v6939_v56 = vrot.slane %v15100_v2, 5 }
 0x44a   : > { %v6912_v46 = vsel %vm15573_vm12, %v13127_v36, %v6911_v24 }
 0x44b   : > { %v13409_v38 = vcombine.high %v6912_v46, %v6915_v29 }
 0x44f   : > { %11765 = vmatmul.mubr.bf16.gmra.mrb[48].mxu0 %v13398_v61  ;;  %v6920_v61 = vrot.slane %v6918_v15, 4  ;;  %v6941_v15 = vrot.slane %v6939_v56, 4 }
 0x450   : > { %11774 = vmatprep.mubr.bf16.mxu0 %v13401_v4  ;;  %v6921_v4 = vrot.slane %v21021_v40, 5  ;;  %v6793_v40 = vld [vmem:[#allocation3 + $0x138] sm:$0xee] }
 0x451   : > { %v13129_v17 = vrot.slane %v6793_v40, 9  ;;  %v6949_v40 = vrot.slane %v21074_v26, 5  ;;  %v6956_v26 = vrot.slane %v21081_v48, 5 }
 0x452   : > { %v6922_v45 = vsel %vm15573_vm12, %v6920_v61, %v6921_v4 }
 0x453   : > { %v13410_v34 = vcombine.low %v6919_v50, %v6922_v45  ;;  %v6926_v39 = vsel %vm15573_vm12, %v13129_v17, %v6925_v12 }
 0x454   : > { %v13413_v11 = vcombine.high %v6926_v39, %v6929_v14  ;;  %v13412_v36 = vcombine.low %v6926_v39, %v6929_v14 }
 0x457   : > { %11775 = vmatmul.mubr.bf16.gmra.mrb[52].mxu0 %v13400_v63  ;;  %v13408_v63 = vcombine.low %v6912_v46, %v6915_v29  ;;  %v6942_v46 = vrot.slane %v21059_v1, 5 }
 0x458   : > { %11784 = vmatprep.mubr.bf16.mxu0 %v13403_v16  ;;  %v13411_v16 = vcombine.high %v6919_v50, %v6922_v45  ;;  %v6946_v45 = vrot.slane %v15101_v58, 5 }
 0x459   : > { %v21127_v35 = vpop.f32.mrb[224].mxu1  ;;  %v6943_v4 = vsel %vm15573_vm12, %v6941_v15, %v6942_v46 }
 0x45a   : > { %v21130_v23 = vpop.f32.mrb[225].mxu1  ;;  %v6948_v1 = vrot.slane %v6946_v45, 4 }
 0x45b   : > { %v21132_v20 = vpop.f32.mrb[226].mxu1 }
 0x45c   : > { %v21136_v27 = vpop.f32.mrb[227].mxu1 }
 0x45f   : > { %11785 = vmatmul.mubr.bf16.gmra.mrb[56].mxu0 %v13402_v0  ;;  %v15099_v0 = vld [vmem:[#allocation3 + $0x158] sm:$0xff] }
 0x460   : > { %11794 = vmatprep.mubr.bf16.mxu0 %v13405_v43  ;;  %v6932_v44 = vrot.slane %v15099_v0, 5  ;;  %v6797_v0 = vld [vmem:[#allocation3 + $0x198] sm:$0xee] }
 0x461   : > { %v21140_v28 = vpop.f32.mrb[228].mxu1  ;;  %v13133_v54 = vrot.slane %v6797_v0, 9 }
 0x462   : > { %v21143_v52 = vpop.f32.mrb[229].mxu1  ;;  %v6934_v41 = vrot.slane %v6932_v44, 4  ;;  %v6933_v29 = vsel %vm15573_vm12, %v13130_v6, %v6932_v44 }
 0x463   : > { %v21145_v21 = vpop.f32.mrb[230].mxu1 }
 0x464   : > { %v21149_v53 = vpop.f32.mrb[231].mxu1 }
 0x467   : > { %11795 = vmatmul.mubr.bf16.gmra.mrb[60].mxu0 %v13404_v62 }
 0x468   : > { %11804 = vmatprep.mubr.bf16.mxu0 %v13407_v5  ;;  %v6936_v5 = vsel %vm15573_vm12, %v6934_v41, %v6935_v60  ;;  %v6955_v60 = vrot.slane %v6953_v49, 4 }
 0x469   : > { %v21153_v19 = vpop.f32.mrb[232].mxu1  ;;  %v13415_v55 = vcombine.high %v6933_v29, %v6936_v5  ;;  %v13414_v12 = vcombine.low %v6933_v29, %v6936_v5  ;;  %v6954_v5 = vsel %vm15573_vm12, %v13133_v54, %v6953_v49 }
 0x46a   : > { %v21156_v13 = vpop.f32.mrb[233].mxu1  ;;  %v6957_v2 = vsel %vm15573_vm12, %v6955_v60, %v6956_v26 }
 0x46b   : > { %v21158_v32 = vpop.f32.mrb[234].mxu1 }
 0x46c   : > { %v21162_v25 = vpop.f32.mrb[235].mxu1 }
 0x46f   : > { %11805 = vmatmul.mubr.bf16.gmra.mrb[64].mxu0 %v13406_v30 }
 0x470   : > { %11814 = vmatprep.mubr.bf16.mxu0 %v13409_v38 }
 0x471   : > { %v21166_v3 = vpop.f32.mrb[236].mxu1 }
 0x472   : > { %v21169_v47 = vpop.f32.mrb[237].mxu1 }
 0x473   : > { %v21171_v42 = vpop.f32.mrb[238].mxu1 }
 0x474   : > { %v21175_v7 = vpop.f32.mrb[239].mxu1 }
 0x477   : > { %11815 = vmatmul.mubr.bf16.gmra.mrb[68].mxu0 %v13408_v63  ;;  %v6940_v63 = vsel %vm15573_vm12, %v13131_v31, %v6939_v56  ;;  %v13420_v31 = vcombine.low %v6954_v5, %v6957_v2 }
 0x478   : > { %11824 = vmatprep.mubr.bf16.mxu0 %v13411_v16  ;;  %v13417_v50 = vcombine.high %v6940_v63, %v6943_v4  ;;  %v6796_v16 = vld [vmem:[#allocation3 + $0x180] sm:$0xee]  ;;  %v13416_v41 = vcombine.low %v6940_v63, %v6943_v4 }
 0x479   : > { %v21179_v33 = vpop.f32.mrb[240].mxu1  ;;  %v13132_v14 = vrot.slane %v6796_v16, 9 }
 0x47a   : > { %v21182_v59 = vpop.f32.mrb[241].mxu1 }
 0x47b   : > { %v21184_v18 = vpop.f32.mrb[242].mxu1 }
 0x47c   : > { %v21188_v43 = vpop.f32.mrb[243].mxu1 }
 0x47f   : > { %11825 = vmatmul.mubr.bf16.gmra.mrb[72].mxu0 %v13410_v34  ;;  %v6950_v34 = vsel %vm15573_vm12, %v6948_v1, %v6949_v40 }
 0x480   : > { %11834 = vmatprep.mubr.bf16.mxu0 %v13413_v11  ;;  %v6947_v11 = vsel %vm15573_vm12, %v13132_v14, %v6946_v45 }
 0x481   : > { %v21192_v37 = vpop.f32.mrb[244].mxu1  ;;  %v13419_v9 = vcombine.high %v6947_v11, %v6950_v34  ;;  %v13418_v15 = vcombine.low %v6947_v11, %v6950_v34 }
 0x482   : > { %v21195_v24 = vpop.f32.mrb[245].mxu1 }
 0x483   : > { %v21197_v62 = vpop.f32.mrb[246].mxu1 }
 0x484   : > { %v21201_v57 = vpop.f32.mrb[247].mxu1 }
 0x487   : > { %11835 = vmatmul.mubr.bf16.gmra.mrb[76].mxu0 %v13412_v36 }
 0x488   : > { %11844 = vmatprep.mubr.bf16.mxu0 %v13415_v55  ;;  %v13421_v55 = vcombine.high %v6954_v5, %v6957_v2 }
 0x489   : > { %v21205_v30 = vpop.f32.mrb[248].mxu1 }
 0x48a   : > { %v21208_v38 = vpop.f32.mrb[249].mxu1 }
 0x48b   : > { %v21210_v61 = vpop.f32.mrb[250].mxu1 }
 0x48c   : > { %v21214_v10 = vpop.f32.mrb[251].mxu1 }
 0x48f   : > { %11845 = vmatmul.mubr.bf16.gmra.mrb[80].mxu0 %v13414_v12 }
 0x490   : > { %11854 = vmatprep.mubr.bf16.mxu0 %v13417_v50 }
 0x491   : > { %v21218_v51 = vpop.f32.mrb[252].mxu1 }
 0x492   : > { %v21222_v17 = vpop.f32.mrb[253].mxu1 }
 0x493   : > { %v21224_v44 = vpop.f32.mrb[254].mxu1 }
 0x494   : > { %v21228_v39 = vpop.f32.mrb[255].mxu1 }
 0x497   : > { %11855 = vmatmul.mubr.bf16.gmra.mrb[84].mxu0 %v13416_v41 }
 0x498   : > { %11864 = vmatprep.mubr.bf16.mxu0 %v13419_v9 }
 0x499   : > { %v21233_v6 = vpop.f32.mrb[0].mxu1 }
 0x49a   : > { %v21239_v56 = vpop.f32.mrb[1].mxu1 }
 0x49b   : > { %v21241_v36 = vpop.f32.mrb[2].mxu1 }
 0x49c   : > { %v21243_v29 = vpop.f32.mrb[3].mxu1 }
 0x49f   : > { %11865 = vmatmul.mubr.bf16.gmra.mrb[88].mxu0 %v13418_v15 }
 0x4a0   : > { %11874 = vmatprep.mubr.bf16.mxu0 %v13421_v55 }
 0x4a1   : > { %v21245_v48 = vpop.f32.mrb[4].mxu1 }
 0x4a2   : > { %v21247_v22 = vpop.f32.mrb[5].mxu1 }
 0x4a3   : > { %v21249_v46 = vpop.f32.mrb[6].mxu1 }
 0x4a4   : > { %v21251_v4 = vpop.f32.mrb[7].mxu1 }
 0x4a7   : > { %11875 = vmatmul.mubr.bf16.gmra.mrb[92].mxu0 %v13420_v31 }
 0x4a9   : > { %v21253_v8 = vpop.f32.mrb[8].mxu1 }
 0x4aa   : > { %v21255_v58 = vpop.f32.mrb[9].mxu1 }
 0x4ab   : > { %v21257_v45 = vpop.f32.mrb[10].mxu1 }
 0x4ac   : > { %v21259_v12 = vpop.f32.mrb[11].mxu1 }
 0x4b1   : > { %v21261_v63 = vpop.f32.mrb[12].mxu1 }
 0x4b2   : > { %v21263_v50 = vpop.f32.mrb[13].mxu1 }
 0x4b3   : > { %v21265_v16 = vpop.f32.mrb[14].mxu1 }
 0x4b4   : > { %v21267_v1 = vpop.f32.mrb[15].mxu1 }
 0x4b9   : > { %v21269_v40 = vpop.f32.mrb[16].mxu1 }
 0x4ba   : > { %v21271_v49 = vpop.f32.mrb[17].mxu1 }
 0x4bb   : > { %21938 = vst [vmem:[#allocation53_spill] sm:$0xff] %v21271_v49  ;;  %v21273_v14 = vpop.f32.mrb[18].mxu1 }
 0x4bc   : > { %21939 = vst [vmem:[#allocation13_spill] sm:$0xff] %v21273_v14  ;;  %v21275_v0 = vpop.f32.mrb[19].mxu1 }
 0x4bd   : > { %21940 = vst [vmem:[#allocation36_spill] sm:$0xff] %v21275_v0 }
 0x4c1   : > { %v21277_v34 = vpop.f32.mrb[20].mxu1 }
 0x4c2   : > { %21941 = vst [vmem:[#allocation54_spill] sm:$0xff] %v21277_v34  ;;  %v21279_v11 = vpop.f32.mrb[21].mxu1  ;;  %v21954_v34 = vld [vmem:[#allocation11_spill] sm:$0xff] }
 0x4c3   : > { %21942 = vst [vmem:[#allocation55_spill] sm:$0xff] %v21279_v11  ;;  %v21281_v41 = vpop.f32.mrb[22].mxu1  ;;  %v21953_v11 = vld [vmem:[#allocation10_spill] sm:$0xff] }
 0x4c4   : > { %21943 = vst [vmem:[#allocation35_spill] sm:$0xff] %v21281_v41  ;;  %v21283_v54 = vpop.f32.mrb[23].mxu1 }
 0x4c5   : > { %21944 = vst [vmem:[#allocation30_spill] sm:$0xff] %v21283_v54 }
 0x4c9   : > { %v21285_v60 = vpop.f32.mrb[24].mxu1 }
 0x4ca   : > { %21945 = vst [vmem:[#allocation25_spill] sm:$0xff] %v21285_v60  ;;  %v21287_v26 = vpop.f32.mrb[25].mxu1 }
 0x4cb   : > { %21946 = vst [vmem:[#allocation56_spill] sm:$0xff] %v21287_v26  ;;  %v21289_v9 = vpop.f32.mrb[26].mxu1 }
 0x4cc   : > { %21947 = vst [vmem:[#allocation57_spill] sm:$0xff] %v21289_v9  ;;  %v21291_v5 = vpop.f32.mrb[27].mxu1 }
 0x4cd   : > { %21948 = vst [vmem:[#allocation38_spill] sm:$0xff] %v21291_v5 }
 0x4d1   : > { %v21293_v2 = vpop.f32.mrb[28].mxu1 }
 0x4d2   : > { %21949 = vst [vmem:[#allocation58_spill] sm:$0xff] %v21293_v2  ;;  %v21295_v55 = vpop.f32.mrb[29].mxu1 }
 0x4d3   : > { %21950 = vst [vmem:[#allocation37_spill] sm:$0xff] %v21295_v55  ;;  %v21297_v15 = vpop.f32.mrb[30].mxu1 }
 0x4d4   : > { %21951 = vst [vmem:[#allocation59_spill] sm:$0xff] %v21297_v15  ;;  %v21299_v31 = vpop.f32.mrb[31].mxu1 }
 0x4d5   : > { %21952 = vst [vmem:[#allocation7_spill] sm:$0xff] %v21299_v31 }
 0x502   : > { %v11726_v41 = vpop.f32.mrb[32].mxu0 }
 0x503   : > { %v13806_v54 = vadd.f32 %v11726_v41, %v21127_v35  ;;  %v11728_v60 = vpop.f32.mrb[33].mxu0 }
 0x504   : > { %v13807_v26 = vadd.f32 %v11728_v60, %v21130_v23  ;;  %v11730_v9 = vpop.f32.mrb[34].mxu0 }
 0x505   : > { %v11929_v5 = vadd.f32 %v13806_v54, %v21953_v11  ;;  %v13808_v2 = vadd.f32 %v11730_v9, %v21132_v20  ;;  %v11732_v55 = vpop.f32.mrb[35].mxu0 }
 0x506   : > { %v11930_v15 = vadd.f32 %v13807_v26, %v21954_v34  ;;  %v13809_v0 = vadd.f32 %v11732_v55, %v21136_v27 }
 0x507   : > { %v12185_v31 = vmax.f32 %v11929_v5, 0.0  ;;  %v11937_v14 = vadd.f32 %v13808_v2, %v21953_v11 }
 0x508   : > { %v12186_v49 = vmax.f32 %v11930_v15, 0.0  ;;  %v11938_v35 = vadd.f32 %v13809_v0, %v21954_v34 }
 0x509   : > { %12441 = vst [vmem:[%s18197_s13 + $0x10] sm:$0xff] %v12185_v31  ;;  %v12193_v23 = vmax.f32 %v11937_v14, 0.0 }
 0x50a   : > { %12442 = vst [vmem:[%s18197_s13 + $0x18] sm:$0xff] %v12186_v49  ;;  %v12194_v41 = vmax.f32 %v11938_v35, 0.0  ;;  %v11736_v60 = vpop.f32.mrb[36].mxu0 }
 0x50b   : > { %12449 = vst [vmem:[%s18197_s13 + $0x50] sm:$0xff] %v12193_v23  ;;  %v13810_v20 = vadd.f32 %v11736_v60, %v21140_v28  ;;  %v11738_v54 = vpop.f32.mrb[37].mxu0 }
 0x50c   : > { %12450 = vst [vmem:[%s18197_s13 + $0x58] sm:$0xff] %v12194_v41  ;;  %v13811_v27 = vadd.f32 %v11738_v54, %v21143_v52  ;;  %v11740_v26 = vpop.f32.mrb[38].mxu0 }
 0x50d   : > { %v11945_v9 = vadd.f32 %v13810_v20, %v21953_v11  ;;  %v13812_v0 = vadd.f32 %v11740_v26, %v21145_v21  ;;  %v11742_v14 = vpop.f32.mrb[39].mxu0 }
 0x50e   : > { %v11946_v49 = vadd.f32 %v13811_v27, %v21954_v34  ;;  %v13813_v5 = vadd.f32 %v11742_v14, %v21149_v53 }
 0x50f   : > { %v12201_v2 = vmax.f32 %v11945_v9, 0.0  ;;  %v11953_v28 = vadd.f32 %v13812_v0, %v21953_v11 }
 0x510   : > { %v12202_v55 = vmax.f32 %v11946_v49, 0.0  ;;  %v11954_v15 = vadd.f32 %v13813_v5, %v21954_v34 }
 0x511   : > { %12457 = vst [vmem:[%s18197_s13 + $0x90] sm:$0xff] %v12201_v2  ;;  %v12209_v52 = vmax.f32 %v11953_v28, 0.0 }
 0x512   : > { %12458 = vst [vmem:[%s18197_s13 + $0x98] sm:$0xff] %v12202_v55  ;;  %v12210_v31 = vmax.f32 %v11954_v15, 0.0  ;;  %v11746_v35 = vpop.f32.mrb[40].mxu0 }
 0x513   : > { %12465 = vst [vmem:[%s18197_s13 + $0xd0] sm:$0xff] %v12209_v52  ;;  %v13814_v21 = vadd.f32 %v11746_v35, %v21153_v19  ;;  %v11748_v23 = vpop.f32.mrb[41].mxu0 }
 0x514   : > { %12466 = vst [vmem:[%s18197_s13 + $0xd8] sm:$0xff] %v12210_v31  ;;  %v13815_v53 = vadd.f32 %v11748_v23, %v21156_v13  ;;  %v11750_v41 = vpop.f32.mrb[42].mxu0 }
 0x515   : > { %v11961_v60 = vadd.f32 %v13814_v21, %v21953_v11  ;;  %v13816_v20 = vadd.f32 %v11750_v41, %v21158_v32  ;;  %v11752_v54 = vpop.f32.mrb[43].mxu0 }
 0x516   : > { %v11962_v27 = vadd.f32 %v13815_v53, %v21954_v34  ;;  %v13817_v26 = vadd.f32 %v11752_v54, %v21162_v25 }
 0x517   : > { %v12217_v9 = vmax.f32 %v11961_v60, 0.0  ;;  %v11969_v19 = vadd.f32 %v13816_v20, %v21953_v11 }
 0x518   : > { %v12218_v0 = vmax.f32 %v11962_v27, 0.0  ;;  %v11970_v14 = vadd.f32 %v13817_v26, %v21954_v34 }
 0x519   : > { %12473 = vst [vmem:[%s18197_s13 + $0x110] sm:$0xff] %v12217_v9  ;;  %v12225_v13 = vmax.f32 %v11969_v19, 0.0 }
 0x51a   : > { %12474 = vst [vmem:[%s18197_s13 + $0x118] sm:$0xff] %v12218_v0  ;;  %v12226_v49 = vmax.f32 %v11970_v14, 0.0  ;;  %v11756_v5 = vpop.f32.mrb[44].mxu0 }
 0x51b   : > { %12481 = vst [vmem:[%s18197_s13 + $0x150] sm:$0xff] %v12225_v13  ;;  %v13818_v32 = vadd.f32 %v11756_v5, %v21166_v3  ;;  %v11758_v2 = vpop.f32.mrb[45].mxu0 }
 0x51c   : > { %12482 = vst [vmem:[%s18197_s13 + $0x158] sm:$0xff] %v12226_v49  ;;  %v13819_v25 = vadd.f32 %v11758_v2, %v21169_v47  ;;  %v11760_v28 = vpop.f32.mrb[46].mxu0 }
 0x51d   : > { %v11977_v55 = vadd.f32 %v13818_v32, %v21953_v11  ;;  %v13820_v15 = vadd.f32 %v11760_v28, %v21171_v42  ;;  %v11762_v52 = vpop.f32.mrb[47].mxu0 }
 0x51e   : > { %v11978_v31 = vadd.f32 %v13819_v25, %v21954_v34  ;;  %v13821_v35 = vadd.f32 %v11762_v52, %v21175_v7 }
 0x51f   : > { %v12233_v21 = vmax.f32 %v11977_v55, 0.0  ;;  %v11985_v3 = vadd.f32 %v13820_v15, %v21953_v11 }
 0x520   : > { %v12234_v23 = vmax.f32 %v11978_v31, 0.0  ;;  %v11986_v53 = vadd.f32 %v13821_v35, %v21954_v34 }
 0x521   : > { %12489 = vst [vmem:[%s18197_s13 + $0x190] sm:$0xff] %v12233_v21  ;;  %v12241_v47 = vmax.f32 %v11985_v3, 0.0 }
 0x522   : > { %12490 = vst [vmem:[%s18197_s13 + $0x198] sm:$0xff] %v12234_v23  ;;  %v12242_v41 = vmax.f32 %v11986_v53, 0.0  ;;  %v11766_v60 = vpop.f32.mrb[48].mxu0 }
 0x523   : > { %12497 = vst [vmem:[%s18197_s13 + $0x1d0] sm:$0xff] %v12241_v47  ;;  %v13822_v42 = vadd.f32 %v11766_v60, %v21179_v33  ;;  %v11768_v20 = vpop.f32.mrb[49].mxu0 }
 0x524   : > { %12498 = vst [vmem:[%s18197_s13 + $0x1d8] sm:$0xff] %v12242_v41  ;;  %v13823_v7 = vadd.f32 %v11768_v20, %v21182_v59  ;;  %v11770_v54 = vpop.f32.mrb[50].mxu0 }
 0x525   : > { %v11993_v27 = vadd.f32 %v13822_v42, %v21953_v11  ;;  %v13824_v26 = vadd.f32 %v11770_v54, %v21184_v18  ;;  %v11772_v9 = vpop.f32.mrb[51].mxu0 }
 0x526   : > { %v11994_v19 = vadd.f32 %v13823_v7, %v21954_v34  ;;  %v13825_v0 = vadd.f32 %v11772_v9, %v21188_v43 }
 0x527   : > { %v12249_v14 = vmax.f32 %v11993_v27, 0.0  ;;  %v12001_v33 = vadd.f32 %v13824_v26, %v21953_v11 }
 0x528   : > { %v12250_v13 = vmax.f32 %v11994_v19, 0.0  ;;  %v12002_v49 = vadd.f32 %v13825_v0, %v21954_v34 }
 0x529   : > { %12505 = vst [vmem:[%s18197_s13 + $0x210] sm:$0xff] %v12249_v14  ;;  %v12257_v59 = vmax.f32 %v12001_v33, 0.0 }
 0x52a   : > { %12506 = vst [vmem:[%s18197_s13 + $0x218] sm:$0xff] %v12250_v13  ;;  %v12258_v5 = vmax.f32 %v12002_v49, 0.0  ;;  %v11776_v32 = vpop.f32.mrb[52].mxu0 }
 0x52b   : > { %12513 = vst [vmem:[%s18197_s13 + $0x250] sm:$0xff] %v12257_v59  ;;  %v13826_v18 = vadd.f32 %v11776_v32, %v21192_v37  ;;  %v11778_v2 = vpop.f32.mrb[53].mxu0 }
 0x52c   : > { %12514 = vst [vmem:[%s18197_s13 + $0x258] sm:$0xff] %v12258_v5  ;;  %v13827_v43 = vadd.f32 %v11778_v2, %v21195_v24  ;;  %v11780_v25 = vpop.f32.mrb[54].mxu0 }
 0x52d   : > { %v12009_v28 = vadd.f32 %v13826_v18, %v21953_v11  ;;  %v13828_v55 = vadd.f32 %v11780_v25, %v21197_v62  ;;  %v11782_v15 = vpop.f32.mrb[55].mxu0 }
 0x52e   : > { %v12010_v52 = vadd.f32 %v13827_v43, %v21954_v34  ;;  %v13829_v31 = vadd.f32 %v11782_v15, %v21201_v57 }
 0x52f   : > { %v12265_v35 = vmax.f32 %v12009_v28, 0.0  ;;  %v12017_v37 = vadd.f32 %v13828_v55, %v21953_v11 }
 0x530   : > { %v12266_v21 = vmax.f32 %v12010_v52, 0.0  ;;  %v12018_v3 = vadd.f32 %v13829_v31, %v21954_v34 }
 0x531   : > { %12521 = vst [vmem:[%s18197_s13 + $0x290] sm:$0xff] %v12265_v35  ;;  %v12273_v24 = vmax.f32 %v12017_v37, 0.0 }
 0x532   : > { %12522 = vst [vmem:[%s18197_s13 + $0x298] sm:$0xff] %v12266_v21  ;;  %v12274_v23 = vmax.f32 %v12018_v3, 0.0  ;;  %v11786_v53 = vpop.f32.mrb[56].mxu0 }
 0x533   : > { %12529 = vst [vmem:[%s18197_s13 + $0x2d0] sm:$0xff] %v12273_v24  ;;  %v13830_v62 = vadd.f32 %v11786_v53, %v21205_v30  ;;  %v11788_v47 = vpop.f32.mrb[57].mxu0 }
 0x534   : > { %12530 = vst [vmem:[%s18197_s13 + $0x2d8] sm:$0xff] %v12274_v23  ;;  %v13831_v57 = vadd.f32 %v11788_v47, %v21208_v38  ;;  %v11790_v41 = vpop.f32.mrb[58].mxu0 }
 0x535   : > { %v12025_v60 = vadd.f32 %v13830_v62, %v21953_v11  ;;  %v13832_v42 = vadd.f32 %v11790_v41, %v21210_v61  ;;  %v11792_v20 = vpop.f32.mrb[59].mxu0 }
 0x536   : > { %v12026_v7 = vadd.f32 %v13831_v57, %v21954_v34  ;;  %v13833_v54 = vadd.f32 %v11792_v20, %v21214_v10 }
 0x537   : > { %v12281_v27 = vmax.f32 %v12025_v60, 0.0  ;;  %v12033_v30 = vadd.f32 %v13832_v42, %v21953_v11 }
 0x538   : > { %v12282_v26 = vmax.f32 %v12026_v7, 0.0  ;;  %v12034_v9 = vadd.f32 %v13833_v54, %v21954_v34 }
 0x539   : > { %12537 = vst [vmem:[%s18197_s13 + $0x310] sm:$0xff] %v12281_v27  ;;  %v12289_v38 = vmax.f32 %v12033_v30, 0.0 }
 0x53a   : > { %12538 = vst [vmem:[%s18197_s13 + $0x318] sm:$0xff] %v12282_v26  ;;  %v12290_v19 = vmax.f32 %v12034_v9, 0.0  ;;  %v11796_v0 = vpop.f32.mrb[60].mxu0 }
 0x53b   : > { %12545 = vst [vmem:[%s18197_s13 + $0x350] sm:$0xff] %v12289_v38  ;;  %v13834_v61 = vadd.f32 %v11796_v0, %v21218_v51  ;;  %v11798_v14 = vpop.f32.mrb[61].mxu0 }
 0x53c   : > { %12546 = vst [vmem:[%s18197_s13 + $0x358] sm:$0xff] %v12290_v19  ;;  %v13835_v10 = vadd.f32 %v11798_v14, %v21222_v17  ;;  %v11800_v33 = vpop.f32.mrb[62].mxu0 }
 0x53d   : > { %v12041_v13 = vadd.f32 %v13834_v61, %v21953_v11  ;;  %v13836_v49 = vadd.f32 %v11800_v33, %v21224_v44  ;;  %v11802_v59 = vpop.f32.mrb[63].mxu0 }
 0x53e   : > { %v12042_v5 = vadd.f32 %v13835_v10, %v21954_v34  ;;  %v13837_v32 = vadd.f32 %v11802_v59, %v21228_v39 }
 0x53f   : > { %v12297_v18 = vmax.f32 %v12041_v13, 0.0  ;;  %v12049_v51 = vadd.f32 %v13836_v49, %v21953_v11 }
 0x540   : > { %v12298_v2 = vmax.f32 %v12042_v5, 0.0  ;;  %v12050_v43 = vadd.f32 %v13837_v32, %v21954_v34 }
 0x541   : > { %12553 = vst [vmem:[%s18197_s13 + $0x390] sm:$0xff] %v12297_v18  ;;  %v12305_v17 = vmax.f32 %v12049_v51, 0.0 }
 0x542   : > { %12554 = vst [vmem:[%s18197_s13 + $0x398] sm:$0xff] %v12298_v2  ;;  %v12306_v25 = vmax.f32 %v12050_v43, 0.0  ;;  %v11806_v28 = vpop.f32.mrb[64].mxu0 }
 0x543   : > { %12561 = vst [vmem:[%s18197_s13 + $0x3d0] sm:$0xff] %v12305_v17  ;;  %v13838_v44 = vadd.f32 %v11806_v28, %v21233_v6  ;;  %v11808_v55 = vpop.f32.mrb[65].mxu0 }
 0x544   : > { %12562 = vst [vmem:[%s18197_s13 + $0x3d8] sm:$0xff] %v12306_v25  ;;  %v13839_v39 = vadd.f32 %v11808_v55, %v21239_v56  ;;  %v11810_v15 = vpop.f32.mrb[66].mxu0 }
 0x545   : > { %v12057_v52 = vadd.f32 %v13838_v44, %v21953_v11  ;;  %v13840_v31 = vadd.f32 %v11810_v15, %v21241_v36  ;;  %v11812_v35 = vpop.f32.mrb[67].mxu0 }
 0x546   : > { %v12058_v37 = vadd.f32 %v13839_v39, %v21954_v34  ;;  %v13841_v21 = vadd.f32 %v11812_v35, %v21243_v29  ;;  %v21955_v35 = vld [vmem:[#allocation53_spill] sm:$0xff] }
 0x547   : > { %v12313_v3 = vmax.f32 %v12057_v52, 0.0  ;;  %v12065_v6 = vadd.f32 %v13840_v31, %v21953_v11 }
 0x548   : > { %v12314_v24 = vmax.f32 %v12058_v37, 0.0  ;;  %v12066_v23 = vadd.f32 %v13841_v21, %v21954_v34 }
 0x549   : > { %12569 = vst [vmem:[%s18197_s13 + $0x410] sm:$0xff] %v12313_v3  ;;  %v12321_v56 = vmax.f32 %v12065_v6, 0.0  ;;  %v21956_v3 = vld [vmem:[#allocation13_spill] sm:$0xff] }
 0x54a   : > { %12570 = vst [vmem:[%s18197_s13 + $0x418] sm:$0xff] %v12314_v24  ;;  %v12322_v53 = vmax.f32 %v12066_v23, 0.0  ;;  %v11816_v62 = vpop.f32.mrb[68].mxu0 }
 0x54b   : > { %12577 = vst [vmem:[%s18197_s13 + $0x450] sm:$0xff] %v12321_v56  ;;  %v13842_v36 = vadd.f32 %v11816_v62, %v21245_v48  ;;  %v11818_v47 = vpop.f32.mrb[69].mxu0  ;;  %v21957_v56 = vld [vmem:[#allocation36_spill] sm:$0xff] }
 0x54c   : > { %12578 = vst [vmem:[%s18197_s13 + $0x458] sm:$0xff] %v12322_v53  ;;  %v13843_v29 = vadd.f32 %v11818_v47, %v21247_v22  ;;  %v11820_v57 = vpop.f32.mrb[70].mxu0 }
 0x54d   : > { %v12073_v41 = vadd.f32 %v13842_v36, %v21953_v11  ;;  %v13844_v60 = vadd.f32 %v11820_v57, %v21249_v46  ;;  %v11822_v42 = vpop.f32.mrb[71].mxu0 }
 0x54e   : > { %v12074_v20 = vadd.f32 %v13843_v29, %v21954_v34  ;;  %v13845_v7 = vadd.f32 %v11822_v42, %v21251_v4 }
 0x54f   : > { %v12329_v54 = vmax.f32 %v12073_v41, 0.0  ;;  %v12081_v48 = vadd.f32 %v13844_v60, %v21953_v11  ;;  %v21958_v60 = vld [vmem:[#allocation54_spill] sm:$0xff] }
 0x550   : > { %v12330_v27 = vmax.f32 %v12074_v20, 0.0  ;;  %v12082_v30 = vadd.f32 %v13845_v7, %v21954_v34  ;;  %v21959_v7 = vld [vmem:[#allocation55_spill] sm:$0xff] }
 0x551   : > { %12585 = vst [vmem:[%s18197_s13 + $0x490] sm:$0xff] %v12329_v54  ;;  %v12337_v22 = vmax.f32 %v12081_v48, 0.0 }
 0x552   : > { %12586 = vst [vmem:[%s18197_s13 + $0x498] sm:$0xff] %v12330_v27  ;;  %v12338_v26 = vmax.f32 %v12082_v30, 0.0  ;;  %v11826_v9 = vpop.f32.mrb[72].mxu0  ;;  %v21960_v30 = vld [vmem:[#allocation35_spill] sm:$0xff] }
 0x553   : > { %12593 = vst [vmem:[%s18197_s13 + $0x4d0] sm:$0xff] %v12337_v22  ;;  %v13846_v46 = vadd.f32 %v11826_v9, %v21253_v8  ;;  %v11828_v38 = vpop.f32.mrb[73].mxu0 }
 0x554   : > { %12594 = vst [vmem:[%s18197_s13 + $0x4d8] sm:$0xff] %v12338_v26  ;;  %v13847_v4 = vadd.f32 %v11828_v38, %v21255_v58  ;;  %v11830_v19 = vpop.f32.mrb[74].mxu0 }
 0x555   : > { %v12089_v0 = vadd.f32 %v13846_v46, %v21953_v11  ;;  %v13848_v61 = vadd.f32 %v11830_v19, %v21257_v45  ;;  %v11832_v14 = vpop.f32.mrb[75].mxu0  ;;  %v21961_v46 = vld [vmem:[#allocation30_spill] sm:$0xff] }
 0x556   : > { %v12090_v10 = vadd.f32 %v13847_v4, %v21954_v34  ;;  %v13849_v33 = vadd.f32 %v11832_v14, %v21259_v12 }
 0x557   : > { %v12345_v13 = vmax.f32 %v12089_v0, 0.0  ;;  %v12097_v8 = vadd.f32 %v13848_v61, %v21953_v11 }
 0x558   : > { %v12346_v49 = vmax.f32 %v12090_v10, 0.0  ;;  %v12098_v59 = vadd.f32 %v13849_v33, %v21954_v34 }
 0x559   : > { %12601 = vst [vmem:[%s18197_s13 + $0x510] sm:$0xff] %v12345_v13  ;;  %v12353_v58 = vmax.f32 %v12097_v8, 0.0  ;;  %v21962_v13 = vld [vmem:[#allocation25_spill] sm:$0xff] }
 0x55a   : > { %12602 = vst [vmem:[%s18197_s13 + $0x518] sm:$0xff] %v12346_v49  ;;  %v12354_v5 = vmax.f32 %v12098_v59, 0.0  ;;  %v11836_v32 = vpop.f32.mrb[76].mxu0  ;;  %v21963_v59 = vld [vmem:[#allocation56_spill] sm:$0xff] }
 0x55b   : > { %12609 = vst [vmem:[%s18197_s13 + $0x550] sm:$0xff] %v12353_v58  ;;  %v13850_v45 = vadd.f32 %v11836_v32, %v21261_v63  ;;  %v11838_v18 = vpop.f32.mrb[77].mxu0 }
 0x55c   : > { %12610 = vst [vmem:[%s18197_s13 + $0x558] sm:$0xff] %v12354_v5  ;;  %v13851_v12 = vadd.f32 %v11838_v18, %v21263_v50  ;;  %v11840_v51 = vpop.f32.mrb[78].mxu0 }
 0x55d   : > { %v12105_v2 = vadd.f32 %v13850_v45, %v21953_v11  ;;  %v13852_v43 = vadd.f32 %v11840_v51, %v21265_v16  ;;  %v11842_v17 = vpop.f32.mrb[79].mxu0  ;;  %v21964_v45 = vld [vmem:[#allocation57_spill] sm:$0xff] }
 0x55e   : > { %v12106_v25 = vadd.f32 %v13851_v12, %v21954_v34  ;;  %v13853_v28 = vadd.f32 %v11842_v17, %v21267_v1 }
 0x55f   : > { %v12361_v44 = vmax.f32 %v12105_v2, 0.0  ;;  %v12113_v63 = vadd.f32 %v13852_v43, %v21953_v11  ;;  %v21965_v2 = vld [vmem:[#allocation38_spill] sm:$0xff] }
 0x560   : > { %v12362_v55 = vmax.f32 %v12106_v25, 0.0  ;;  %v12114_v39 = vadd.f32 %v13853_v28, %v21954_v34 }
 0x561   : > { %12617 = vst [vmem:[%s18197_s13 + $0x590] sm:$0xff] %v12361_v44  ;;  %v12369_v50 = vmax.f32 %v12113_v63, 0.0 }
 0x562   : > { %12618 = vst [vmem:[%s18197_s13 + $0x598] sm:$0xff] %v12362_v55  ;;  %v12370_v15 = vmax.f32 %v12114_v39, 0.0  ;;  %v11846_v52 = vpop.f32.mrb[80].mxu0 }
 0x563   : > { %12625 = vst [vmem:[%s18197_s13 + $0x5d0] sm:$0xff] %v12369_v50  ;;  %v13854_v16 = vadd.f32 %v11846_v52, %v21269_v40  ;;  %v11848_v31 = vpop.f32.mrb[81].mxu0  ;;  %v21966_v50 = vld [vmem:[#allocation58_spill] sm:$0xff] }
 0x564   : > { %12626 = vst [vmem:[%s18197_s13 + $0x5d8] sm:$0xff] %v12370_v15  ;;  %v13855_v1 = vadd.f32 %v11848_v31, %v21955_v35  ;;  %v11850_v37 = vpop.f32.mrb[82].mxu0 }
 0x565   : > { %v12121_v21 = vadd.f32 %v13854_v16, %v21953_v11  ;;  %v13856_v6 = vadd.f32 %v11850_v37, %v21956_v3  ;;  %v11852_v24 = vpop.f32.mrb[83].mxu0  ;;  %v21967_v16 = vld [vmem:[#allocation37_spill] sm:$0xff]  ;;  %v21968_v37 = vld [vmem:[#allocation59_spill] sm:$0xff] }
 0x566   : > { %v12122_v23 = vadd.f32 %v13855_v1, %v21954_v34  ;;  %v13857_v53 = vadd.f32 %v11852_v24, %v21957_v56  ;;  %v21969_v24 = vld [vmem:[#allocation7_spill] sm:$0xff] }
 0x567   : > { %v12377_v62 = vmax.f32 %v12121_v21, 0.0  ;;  %v12129_v40 = vadd.f32 %v13856_v6, %v21953_v11 }
 0x568   : > { %v12378_v36 = vmax.f32 %v12122_v23, 0.0  ;;  %v12130_v47 = vadd.f32 %v13857_v53, %v21954_v34 }
 0x569   : > { %12633 = vst [vmem:[%s18197_s13 + $0x610] sm:$0xff] %v12377_v62  ;;  %v12385_v29 = vmax.f32 %v12129_v40, 0.0 }
 0x56a   : > { %12634 = vst [vmem:[%s18197_s13 + $0x618] sm:$0xff] %v12378_v36  ;;  %v12386_v57 = vmax.f32 %v12130_v47, 0.0  ;;  %v11856_v41 = vpop.f32.mrb[84].mxu0 }
 0x56b   : > { %12641 = vst [vmem:[%s18197_s13 + $0x650] sm:$0xff] %v12385_v29  ;;  %v13858_v42 = vadd.f32 %v11856_v41, %v21958_v60  ;;  %v11858_v20 = vpop.f32.mrb[85].mxu0 }
 0x56c   : > { %12642 = vst [vmem:[%s18197_s13 + $0x658] sm:$0xff] %v12386_v57  ;;  %v13859_v54 = vadd.f32 %v11858_v20, %v21959_v7  ;;  %v11860_v48 = vpop.f32.mrb[86].mxu0 }
 0x56d   : > { %v12137_v27 = vadd.f32 %v13858_v42, %v21953_v11  ;;  %v13860_v22 = vadd.f32 %v11860_v48, %v21960_v30  ;;  %v11862_v26 = vpop.f32.mrb[87].mxu0 }
 0x56e   : > { %v12138_v9 = vadd.f32 %v13859_v54, %v21954_v34  ;;  %v13861_v38 = vadd.f32 %v11862_v26, %v21961_v46 }
 0x56f   : > { %v12393_v4 = vmax.f32 %v12137_v27, 0.0  ;;  %v12145_v19 = vadd.f32 %v13860_v22, %v21953_v11 }
 0x570   : > { %v12394_v0 = vmax.f32 %v12138_v9, 0.0  ;;  %v12146_v61 = vadd.f32 %v13861_v38, %v21954_v34 }
 0x571   : > { %12649 = vst [vmem:[%s18197_s13 + $0x690] sm:$0xff] %v12393_v4  ;;  %v12401_v14 = vmax.f32 %v12145_v19, 0.0 }
 0x572   : > { %12650 = vst [vmem:[%s18197_s13 + $0x698] sm:$0xff] %v12394_v0  ;;  %v12402_v10 = vmax.f32 %v12146_v61, 0.0  ;;  %v11866_v33 = vpop.f32.mrb[88].mxu0 }
 0x573   : > { %12657 = vst [vmem:[%s18197_s13 + $0x6d0] sm:$0xff] %v12401_v14  ;;  %v13862_v8 = vadd.f32 %v11866_v33, %v21962_v13  ;;  %v11868_v49 = vpop.f32.mrb[89].mxu0 }
 0x574   : > { %12658 = vst [vmem:[%s18197_s13 + $0x6d8] sm:$0xff] %v12402_v10  ;;  %v13863_v58 = vadd.f32 %v11868_v49, %v21963_v59  ;;  %v11870_v5 = vpop.f32.mrb[90].mxu0 }
 0x575   : > { %v12153_v32 = vadd.f32 %v13862_v8, %v21953_v11  ;;  %v13864_v18 = vadd.f32 %v11870_v5, %v21964_v45  ;;  %v11872_v12 = vpop.f32.mrb[91].mxu0 }
 0x576   : > { %v12154_v51 = vadd.f32 %v13863_v58, %v21954_v34  ;;  %v13865_v43 = vadd.f32 %v11872_v12, %v21965_v2 }
 0x577   : > { %v12409_v17 = vmax.f32 %v12153_v32, 0.0  ;;  %v12161_v25 = vadd.f32 %v13864_v18, %v21953_v11 }
 0x578   : > { %v12410_v28 = vmax.f32 %v12154_v51, 0.0  ;;  %v12162_v44 = vadd.f32 %v13865_v43, %v21954_v34 }
 0x579   : > { %12665 = vst [vmem:[%s18197_s13 + $0x710] sm:$0xff] %v12409_v17  ;;  %v12417_v63 = vmax.f32 %v12161_v25, 0.0 }
 0x57a   : > { %12666 = vst [vmem:[%s18197_s13 + $0x718] sm:$0xff] %v12410_v28  ;;  %v12418_v55 = vmax.f32 %v12162_v44, 0.0  ;;  %v11876_v39 = vpop.f32.mrb[92].mxu0 }
 0x57b   : > { %12673 = vst [vmem:[%s18197_s13 + $0x750] sm:$0xff] %v12417_v63  ;;  %v13866_v15 = vadd.f32 %v11876_v39, %v21966_v50  ;;  %v11878_v52 = vpop.f32.mrb[93].mxu0 }
 0x57c   : > { %12674 = vst [vmem:[%s18197_s13 + $0x758] sm:$0xff] %v12418_v55  ;;  %v13867_v31 = vadd.f32 %v11878_v52, %v21967_v16  ;;  %v11880_v35 = vpop.f32.mrb[94].mxu0 }
 0x57d   : > { %v12169_v1 = vadd.f32 %v13866_v15, %v21953_v11  ;;  %v13868_v21 = vadd.f32 %v11880_v35, %v21968_v37  ;;  %v11882_v3 = vpop.f32.mrb[95].mxu0 }
 0x57e   : > { %v12170_v6 = vadd.f32 %v13867_v31, %v21954_v34  ;;  %v13869_v23 = vadd.f32 %v11882_v3, %v21969_v24 }
 0x57f   : > { %v12425_v56 = vmax.f32 %v12169_v1, 0.0  ;;  %v12177_v53 = vadd.f32 %v13868_v21, %v21953_v11 }
 0x580   : > { %v12426_v62 = vmax.f32 %v12170_v6, 0.0  ;;  %v12178_v40 = vadd.f32 %v13869_v23, %v21954_v34 }
 0x581   : > { %12681 = vst [vmem:[%s18197_s13 + $0x790] sm:$0xff] %v12425_v56  ;;  %v12433_v36 = vmax.f32 %v12177_v53, 0.0 }
 0x582   : > { %12682 = vst [vmem:[%s18197_s13 + $0x798] sm:$0xff] %v12426_v62  ;;  %v12434_v47 = vmax.f32 %v12178_v40, 0.0 }
 0x583   : > { %12689 = vst [vmem:[%s18197_s13 + $0x7d0] sm:$0xff] %v12433_v36 }
 0x584   : > { %12690 = vst [vmem:[%s18197_s13 + $0x7d8] sm:$0xff] %v12434_v47 }
 0x585   : > { %15115 = shalt.err (!%p15112_p3)
}
 0x586   : > { %s15116_s20 = scalar_lea.hbm %s21495_s17, 32768  ;;  %s15120_s26 = scalar_lea.hbm %s21551_s6, 65536 }
 0x587   : > { %p15117_p4 = scmp.ne.s32.totalorder %s21495_s17, %s15116_s20  ;;  %p15121_p9 = scmp.lt.u32.totalorder %s21495_s17, %s21551_s6 }
 0x588   : > { %p15122_p10 = scmp.lt.u32.totalorder %s15120_s26, %s15116_s20  ;;  %p15124_p12 = scmp.lt.u32.totalorder %s15116_s20, %s21495_s17 }
 0x589   : > { %p15118_p7 = pnand %p15117_p4, %p15252_p5 }
 0x58a   : > { %p15123_p11 = por %p15122_p10, %p15121_p9 }
 0x58b   : > { %p15119_p8 = pneg %p15118_p7 }
 0x58c   : > { %p15125_p13 = por %p15124_p12, %p15123_p11 }
 0x58e   : > { %p15126_p0 = pnand %p15125_p13, %p15119_p8 }
 0x590   : > { %15129 = shalt.err (!%p15126_p0)
}
 0x591   : > { %s15177_s10 = smov 1024   ;;  %s15178_s9 = smov 64  }
 0x592   : > { %14318 = dma.vmem_to_hbm [thread:$0]  (%p15252_p5), %s21497_s28, 32768, %s21495_s17, %s21504_s25, %s15177_s10, %s15177_s10, %s15178_s9  }
 0x593 PF: > { %p14324_p1 = scmp.ge.s32.totalorder %s15164_s24, 2  ;;  %s12724_s16 = sand.u32 1, %s15152_s21  }
 0x594   : > { %s12725_s11 = scalar_lea.sflag [#allocation5], %s12724_s16 }
 0x595   : > { %p14321_p2 = pnand %p14324_p1, %p15256_p6 }
 0x597   : > { %15147 = dma.done.wait (!%p14321_p2), %s12725_s11, 32768  }
 0x598   : > { %15149 = vsyncadd (!%p14321_p2), %s12725_s11, 4294934528  ;;  %p16_p3 = scmp.ge.s32.totalorder %s15239_s27, 4   ;;  %s21970_s21 = smov %s15156_s22 }
 0x599   : > { %s21971_s22 = smov %s15160_s23  ;;  %s21972_s23 = smov %s15250_s30 }
 0x59a   : > { %s21973_s24 = smov %s15239_s27  ;;  %18 = sbr.rel (!%p16_p3) target bundleno = 3 (0x3), region = 83 }
 0x5a1   :  { %12730 = vsyncpa [#allocation5], 1 }
 0x5a2   :  { %12732 = vsyncpa [#allocation5 + $0x1], 1 }

</bundles_post_ra>
